<compile_context>
chip_gen: v6e
topology: v6e:2x2x1
jax: 0.10.0
libtpu: 0.0.40
codegen_flags: <defaults>
</compile_context>

<pallas_src>
import numpy as np
import jax
import jax.numpy as jnp
from jax.experimental import pallas as pl
from jax.experimental.pallas import tpu as pltpu


# name, Cin, Cout, K, (H, W) spatial size of this layer's input/output.
_LAYERS = (
    ("c1_1", 3, 16, 9, 16, 16),
    ("c1_2", 16, 32, 7, 8, 8),
    ("c1_3", 32, 16, 7, 4, 4),
    ("f1", 16, 8, 7, 4, 4),
    ("c2_1", 3, 24, 5, 16, 16),
    ("c2_2", 24, 48, 3, 8, 8),
    ("c2_3", 48, 24, 3, 4, 4),
    ("f2", 24, 12, 3, 4, 4),
    ("fuse", 20, 1, 1, 4, 4),
)

# flat (H, W, C) shapes of the six returned tensors (out, xcat, x1_1, x2_1, x1_2, x2_2)
_OUT_SHAPES = ((4, 4, 1), (4, 4, 40), (8, 8, 16), (8, 8, 24), (8, 8, 32), (8, 8, 48))


# ----------------------------------------------------------------------------
# Fused forward kernel (one batch element per grid step)
# ----------------------------------------------------------------------------
def _bunet_kernel(x_ref, *refs):
    # refs = 27 param refs (w, scale, bias per layer) + 6 output refs + 2 scratch
    params = {}
    idx = 0
    for (name, *_unused) in _LAYERS:
        params[name] = (refs[idx], refs[idx + 1], refs[idx + 2])
        idx += 3
    out_ref, xcat_ref, x11_ref, x21_ref, x12_ref, x22_ref = refs[idx:idx + 6]
    pad_sc = refs[idx + 6]    # (24, 384) f32 scratch: padding + pool row buffer
    pool_sc = refs[idx + 7]   # (8, 192)  f32 scratch: pooled / concat assembly

    def conv_unit(xin, name, H, W, Cin, Cout, K):
        """Conv(K, same) + folded BN + ReLU on a (H, W*Cin) activation."""
        w_ref, s_ref, b_ref = params[name]
        pad = (K - 1) // 2
        if pad > 0:
            Hp = H + 2 * pad
            Wp = W + 2 * pad
            pad_sc[0:Hp, 0:Wp * Cin] = jnp.zeros((Hp, Wp * Cin), jnp.float32)
            pad_sc[pad:pad + H, pad * Cin:pad * Cin + W * Cin] = xin
            xp = pad_sc[0:Hp, 0:Wp * Cin]
        else:
            xp = xin
        acc = jnp.zeros((H, W * Cout), jnp.float32)
        for ky in range(K):  # kx taps + Cin are folded into the contraction dim
            lhs = xp[ky:ky + H, :].astype(jnp.bfloat16)
            acc = acc + jnp.dot(lhs, w_ref[ky],
                                preferred_element_type=jnp.float32)
        y = acc * s_ref[...] + b_ref[...]
        return jnp.maximum(y, 0.0)

    def maxpool2x2(y, H, W, C):
        """MaxPool2d(2) on a (H, W*C) activation -> (H//2, (W//2)*C)."""
        Ho, Wo = H // 2, W // 2
        for io in range(Ho):  # vertical pairs
            pad_sc[io:io + 1, 0:W * C] = jnp.maximum(
                y[2 * io:2 * io + 1, :], y[2 * io + 1:2 * io + 2, :])
        v = pad_sc[0:Ho, 0:W * C]
        for jo in range(Wo):  # horizontal pairs (per channel block)
            pool_sc[0:Ho, jo * C:(jo + 1) * C] = jnp.maximum(
                v[:, (2 * jo) * C:(2 * jo + 1) * C],
                v[:, (2 * jo + 1) * C:(2 * jo + 2) * C])
        return pool_sc[0:Ho, 0:Wo * C]

    x = x_ref[0]  # (16, 48) = (H, W*3)

    # ------------------------------ branch 1 ------------------------------
    y = conv_unit(x, "c1_1", 16, 16, 3, 16, 9)          # (16, 256)
    x1_1 = maxpool2x2(y, 16, 16, 16)                    # (8, 128)
    x11_ref[0] = x1_1
    x1_2 = conv_unit(x1_1, "c1_2", 8, 8, 16, 32, 7)     # (8, 256)
    x12_ref[0] = x1_2
    p1 = maxpool2x2(x1_2, 8, 8, 32)                     # (4, 128)
    x1_3 = conv_unit(p1, "c1_3", 4, 4, 32, 16, 7)       # (4, 64)
    final1 = conv_unit(x1_3, "f1", 4, 4, 16, 8, 7)      # (4, 32)

    # ------------------------------ branch 2 ------------------------------
    y = conv_unit(x, "c2_1", 16, 16, 3, 24, 5)          # (16, 384)
    x2_1 = maxpool2x2(y, 16, 16, 24)                    # (8, 192)
    x21_ref[0] = x2_1
    x2_2 = conv_unit(x2_1, "c2_2", 8, 8, 24, 48, 3)     # (8, 384)
    x22_ref[0] = x2_2
    p2 = maxpool2x2(x2_2, 8, 8, 48)                     # (4, 192)
    x2_3 = conv_unit(p2, "c2_3", 4, 4, 48, 24, 3)       # (4, 96)
    final2 = conv_unit(x2_3, "f2", 4, 4, 24, 12, 3)     # (4, 48)

    # xcat = channel-concat(x1_3, x2_3): assemble interleaved (w, c) lanes.
    for j in range(4):
        pad_sc[0:4, j * 40:j * 40 + 16] = x1_3[:, j * 16:(j + 1) * 16]
        pad_sc[0:4, j * 40 + 16:(j + 1) * 40] = x2_3[:, j * 24:(j + 1) * 24]
    xcat_ref[0] = pad_sc[0:4, 0:160]

    # fuse input = channel-concat(final1, final2) -> (4, 80), then 1x1 ConvUnit.
    for j in range(4):
        pool_sc[0:4, j * 20:j * 20 + 8] = final1[:, j * 8:(j + 1) * 8]
        pool_sc[0:4, j * 20 + 8:(j + 1) * 20] = final2[:, j * 12:(j + 1) * 12]
    fused = pool_sc[0:4, 0:80]
    out = conv_unit(fused, "fuse", 4, 4, 20, 1, 1)      # (4, 4)
    out_ref[0] = out


# ----------------------------------------------------------------------------
# Parameter construction / packing
# ----------------------------------------------------------------------------
def init_conv_unit(key, cin, cout, k, eps=1e-5):
    k1, k2 = jax.random.split(key)
    fan_in = cin * k * k
    w = jax.random.normal(k1, (k, k, cin, cout), jnp.float32) / np.sqrt(fan_in)
    conv_b = 0.01 * jax.random.normal(k2, (cout,), jnp.float32)
    idx = jnp.arange(cout, dtype=jnp.float32)
    gamma = 1.0 + 0.1 * jnp.cos(idx)
    beta = 0.05 * jnp.sin(idx)
    running_mean = 0.02 * idx / max(cout, 1)
    running_var = 1.0 + 0.1 * idx / max(cout, 1)
    scale = gamma / jnp.sqrt(running_var + eps)
    bias = beta + (conv_b - running_mean) * scale
    return dict(w=w, scale=scale, bias=bias)


def init_bunet_params(key):
    keys = jax.random.split(key, len(_LAYERS))
    return {name: init_conv_unit(k, cin, cout, ksz)
            for k, (name, cin, cout, ksz, _h, _w) in zip(keys, _LAYERS)}


def pack_bunet_params(params):
    """Build per-layer banded (Toeplitz) matmul weights (bf16) of shape
    (K, Wp*Cin, W*Cout) plus lane-tiled BN scale/bias (1, W*Cout) in f32,
    matching the kernel's (H, W*C) lane layout."""
    packed = []
    for name, cin, cout, k, _h, wdt in _LAYERS:
        p = params[name]
        w = np.asarray(p["w"], np.float32)              # (K, K, Cin, Cout) HWIO
        scale = np.asarray(p["scale"], np.float32)
        bias = np.asarray(p["bias"], np.float32)
        pad = (k - 1) // 2
        wp = wdt + 2 * pad
        t = np.zeros((k, wp * cin, wdt * cout), np.float32)
        for ky in range(k):
            for kx in range(k):
                for j in range(wdt):
                    t[ky, (j + kx) * cin:(j + kx + 1) * cin,
                      j * cout:(j + 1) * cout] = w[ky, kx]
        packed.append(jnp.asarray(t, jnp.bfloat16))
        packed.append(jnp.asarray(np.tile(scale, wdt)[None, :], jnp.float32))
        packed.append(jnp.asarray(np.tile(bias, wdt)[None, :], jnp.float32))
    return packed


# ----------------------------------------------------------------------------
# Forward wrapper: one fused pallas_call for the whole network
# ----------------------------------------------------------------------------
def bunet_forward(x_nhwc, packed):
    N, H, W, Cin = x_nhwc.shape
    assert (H, W, Cin) == (16, 16, 3), "kernel is specialised for 16x16x3 input"
    x_flat = x_nhwc.reshape(N, H, W * Cin)

    in_specs = [pl.BlockSpec((1, H, W * Cin), lambda n: (n, 0, 0))]
    for arr in packed:
        if arr.ndim == 3:
            in_specs.append(pl.BlockSpec(arr.shape, lambda n: (0, 0, 0)))
        else:
            in_specs.append(pl.BlockSpec(arr.shape, lambda n: (0, 0)))

    out_shape = tuple(jax.ShapeDtypeStruct((N, h, w * c), jnp.float32)
                      for (h, w, c) in _OUT_SHAPES)
    out_specs = tuple(pl.BlockSpec((1, h, w * c), lambda n: (n, 0, 0))
                      for (h, w, c) in _OUT_SHAPES)

    outs = pl.pallas_call(
        _bunet_kernel,
        out_shape=out_shape,
        grid=(N,),
        in_specs=in_specs,
        out_specs=out_specs,
        scratch_shapes=[
            pltpu.VMEM((24, 384), jnp.float32),   # padding + pool row buffer
            pltpu.VMEM((8, 192), jnp.float32),    # pooled / concat assembly
        ],
        compiler_params=pltpu.CompilerParams(
            dimension_semantics=("parallel",)),
    )(x_flat, *packed)

    # free row-major reshapes back to NHWC
    return tuple(o.reshape(o.shape[0], h, w, c)
                 for o, (h, w, c) in zip(outs, _OUT_SHAPES))


if __name__ == "__main__":
    key = jax.random.PRNGKey(0)
    kx, kp = jax.random.split(key)
    # NHWC input, equivalent to PyTorch NCHW (2, 3, 16, 16)
    x = jax.random.normal(kx, (2, 16, 16, 3), jnp.float32)
    params = init_bunet_params(kp)
    packed = pack_bunet_params(params)

    outs = bunet_forward(x, packed)
    outs = jax.block_until_ready(outs)

    out, xcat, x1_1, x2_1, x1_2, x2_2 = outs
    assert out.shape == (2, 4, 4, 1)
    assert xcat.shape == (2, 4, 4, 40)
    assert x1_1.shape == (2, 8, 8, 16)
    assert x2_1.shape == (2, 8, 8, 24)
    assert x1_2.shape == (2, 8, 8, 32)
    assert x2_2.shape == (2, 8, 8, 48)
    assert all(bool(jnp.all(jnp.isfinite(o))) for o in outs)
    print("KERNEL_OK")
</pallas_src>

<mosaic_0001>
module attributes {stable_mosaic.version = 11 : i64} {
  func.func @_bunet_kernel(%arg0: i32, %arg1: memref<1x16x48xf32, #tpu.memory_space<vmem>>, %arg2: memref<9x72x256xbf16, #tpu.memory_space<vmem>>, %arg3: memref<1x256xf32, #tpu.memory_space<vmem>>, %arg4: memref<1x256xf32, #tpu.memory_space<vmem>>, %arg5: memref<7x224x256xbf16, #tpu.memory_space<vmem>>, %arg6: memref<1x256xf32, #tpu.memory_space<vmem>>, %arg7: memref<1x256xf32, #tpu.memory_space<vmem>>, %arg8: memref<7x320x64xbf16, #tpu.memory_space<vmem>>, %arg9: memref<1x64xf32, #tpu.memory_space<vmem>>, %arg10: memref<1x64xf32, #tpu.memory_space<vmem>>, %arg11: memref<7x160x32xbf16, #tpu.memory_space<vmem>>, %arg12: memref<1x32xf32, #tpu.memory_space<vmem>>, %arg13: memref<1x32xf32, #tpu.memory_space<vmem>>, %arg14: memref<5x60x384xbf16, #tpu.memory_space<vmem>>, %arg15: memref<1x384xf32, #tpu.memory_space<vmem>>, %arg16: memref<1x384xf32, #tpu.memory_space<vmem>>, %arg17: memref<3x240x384xbf16, #tpu.memory_space<vmem>>, %arg18: memref<1x384xf32, #tpu.memory_space<vmem>>, %arg19: memref<1x384xf32, #tpu.memory_space<vmem>>, %arg20: memref<3x288x96xbf16, #tpu.memory_space<vmem>>, %arg21: memref<1x96xf32, #tpu.memory_space<vmem>>, %arg22: memref<1x96xf32, #tpu.memory_space<vmem>>, %arg23: memref<3x144x48xbf16, #tpu.memory_space<vmem>>, %arg24: memref<1x48xf32, #tpu.memory_space<vmem>>, %arg25: memref<1x48xf32, #tpu.memory_space<vmem>>, %arg26: memref<1x80x4xbf16, #tpu.memory_space<vmem>>, %arg27: memref<1x4xf32, #tpu.memory_space<vmem>>, %arg28: memref<1x4xf32, #tpu.memory_space<vmem>>, %arg29: memref<1x4x4xf32, #tpu.memory_space<vmem>>, %arg30: memref<1x4x160xf32, #tpu.memory_space<vmem>>, %arg31: memref<1x8x128xf32, #tpu.memory_space<vmem>>, %arg32: memref<1x8x192xf32, #tpu.memory_space<vmem>>, %arg33: memref<1x8x256xf32, #tpu.memory_space<vmem>>, %arg34: memref<1x8x384xf32, #tpu.memory_space<vmem>>, %arg35: memref<24x384xf32, #tpu.memory_space<vmem>>, %arg36: memref<8x192xf32, #tpu.memory_space<vmem>>) attributes {dimension_semantics = [#tpu.dimension_semantics<parallel>], iteration_bounds = array<i64: 2>, scalar_prefetch = 0 : i64, scratch_operands = 2 : i64, tpu.core_type = #tpu.core_type<tc>, window_params = [{transform_indices = @transform_0, window_bounds = array<i64: 1, 16, 48>}, {pipeline_mode = #tpu.pipeline_mode<synchronous>, transform_indices = @transform_1, window_bounds = array<i64: 9, 72, 256>}, {pipeline_mode = #tpu.pipeline_mode<synchronous>, transform_indices = @transform_2, window_bounds = array<i64: 1, 256>}, {pipeline_mode = #tpu.pipeline_mode<synchronous>, transform_indices = @transform_3, window_bounds = array<i64: 1, 256>}, {pipeline_mode = #tpu.pipeline_mode<synchronous>, transform_indices = @transform_4, window_bounds = array<i64: 7, 224, 256>}, {pipeline_mode = #tpu.pipeline_mode<synchronous>, transform_indices = @transform_5, window_bounds = array<i64: 1, 256>}, {pipeline_mode = #tpu.pipeline_mode<synchronous>, transform_indices = @transform_6, window_bounds = array<i64: 1, 256>}, {pipeline_mode = #tpu.pipeline_mode<synchronous>, transform_indices = @transform_7, window_bounds = array<i64: 7, 320, 64>}, {pipeline_mode = #tpu.pipeline_mode<synchronous>, transform_indices = @transform_8, window_bounds = array<i64: 1, 64>}, {pipeline_mode = #tpu.pipeline_mode<synchronous>, transform_indices = @transform_9, window_bounds = array<i64: 1, 64>}, {pipeline_mode = #tpu.pipeline_mode<synchronous>, transform_indices = @transform_10, window_bounds = array<i64: 7, 160, 32>}, {pipeline_mode = #tpu.pipeline_mode<synchronous>, transform_indices = @transform_11, window_bounds = array<i64: 1, 32>}, {pipeline_mode = #tpu.pipeline_mode<synchronous>, transform_indices = @transform_12, window_bounds = array<i64: 1, 32>}, {pipeline_mode = #tpu.pipeline_mode<synchronous>, transform_indices = @transform_13, window_bounds = array<i64: 5, 60, 384>}, {pipeline_mode = #tpu.pipeline_mode<synchronous>, transform_indices = @transform_14, window_bounds = array<i64: 1, 384>}, {pipeline_mode = #tpu.pipeline_mode<synchronous>, transform_indices = @transform_15, window_bounds = array<i64: 1, 384>}, {pipeline_mode = #tpu.pipeline_mode<synchronous>, transform_indices = @transform_16, window_bounds = array<i64: 3, 240, 384>}, {pipeline_mode = #tpu.pipeline_mode<synchronous>, transform_indices = @transform_17, window_bounds = array<i64: 1, 384>}, {pipeline_mode = #tpu.pipeline_mode<synchronous>, transform_indices = @transform_18, window_bounds = array<i64: 1, 384>}, {pipeline_mode = #tpu.pipeline_mode<synchronous>, transform_indices = @transform_19, window_bounds = array<i64: 3, 288, 96>}, {pipeline_mode = #tpu.pipeline_mode<synchronous>, transform_indices = @transform_20, window_bounds = array<i64: 1, 96>}, {pipeline_mode = #tpu.pipeline_mode<synchronous>, transform_indices = @transform_21, window_bounds = array<i64: 1, 96>}, {pipeline_mode = #tpu.pipeline_mode<synchronous>, transform_indices = @transform_22, window_bounds = array<i64: 3, 144, 48>}, {pipeline_mode = #tpu.pipeline_mode<synchronous>, transform_indices = @transform_23, window_bounds = array<i64: 1, 48>}, {pipeline_mode = #tpu.pipeline_mode<synchronous>, transform_indices = @transform_24, window_bounds = array<i64: 1, 48>}, {pipeline_mode = #tpu.pipeline_mode<synchronous>, transform_indices = @transform_25, window_bounds = array<i64: 1, 80, 4>}, {pipeline_mode = #tpu.pipeline_mode<synchronous>, transform_indices = @transform_26, window_bounds = array<i64: 1, 4>}, {pipeline_mode = #tpu.pipeline_mode<synchronous>, transform_indices = @transform_27, window_bounds = array<i64: 1, 4>}, {transform_indices = @transform_28, window_bounds = array<i64: 1, 4, 4>}, {transform_indices = @transform_29, window_bounds = array<i64: 1, 4, 160>}, {transform_indices = @transform_30, window_bounds = array<i64: 1, 8, 128>}, {transform_indices = @transform_31, window_bounds = array<i64: 1, 8, 192>}, {transform_indices = @transform_32, window_bounds = array<i64: 1, 8, 256>}, {transform_indices = @transform_33, window_bounds = array<i64: 1, 8, 384>}]} {
    %c0 = arith.constant 0 : index
    %c0_0 = arith.constant 0 : index
    %c0_1 = arith.constant 0 : index
    %0 = vector.load %arg1[%c0, %c0_0, %c0_1] : memref<1x16x48xf32, #tpu.memory_space<vmem>>, vector<1x16x48xf32>
    %1 = vector.shape_cast %0 : vector<1x16x48xf32> to vector<16x48xf32>
    %cst = arith.constant 0.000000e+00 : f32
    %2 = vector.broadcast %cst : f32 to vector<24x72xf32>
    %c0_2 = arith.constant 0 : index
    %c0_3 = arith.constant 0 : index
    %3 = vector.load %arg35[%c0_2, %c0_3] : memref<24x384xf32, #tpu.memory_space<vmem>>, vector<24x72xf32>
    tpu.vector_store %arg35[%c0_2, %c0_3], %2 {strides = array<i32>} : memref<24x384xf32, #tpu.memory_space<vmem>>, vector<24x72xf32>,
    %c4 = arith.constant 4 : index
    %c12 = arith.constant 12 : index
    %4 = vector.load %arg35[%c4, %c12] : memref<24x384xf32, #tpu.memory_space<vmem>>, vector<16x48xf32>
    tpu.vector_store %arg35[%c4, %c12], %1 {strides = array<i32>} : memref<24x384xf32, #tpu.memory_space<vmem>>, vector<16x48xf32>,
    %c0_4 = arith.constant 0 : index
    %c0_5 = arith.constant 0 : index
    %5 = vector.load %arg35[%c0_4, %c0_5] : memref<24x384xf32, #tpu.memory_space<vmem>>, vector<24x72xf32>
    %cst_6 = arith.constant 0.000000e+00 : f32
    %6 = vector.broadcast %cst_6 : f32 to vector<16x256xf32>
    %7 = vector.extract_strided_slice %5 {offsets = [0, 0], sizes = [16, 72], strides = [1, 1]} : vector<24x72xf32> to vector<16x72xf32>
    %8 = arith.truncf %7 : vector<16x72xf32> to vector<16x72xbf16>
    %c0_7 = arith.constant 0 : index
    %c0_8 = arith.constant 0 : index
    %c0_9 = arith.constant 0 : index
    %9 = vector.load %arg2[%c0_7, %c0_8, %c0_9] : memref<9x72x256xbf16, #tpu.memory_space<vmem>>, vector<1x72x256xbf16>
    %10 = vector.shape_cast %9 : vector<1x72x256xbf16> to vector<72x256xbf16>
    %cst_10 = arith.constant dense<0.000000e+00> : vector<16x256xf32>
    %11 = tpu.matmul %8, %10, %cst_10 {dimension_numbers = #tpu.dot_dimension_numbers<[1], [0], [0], [1], [0, 0, 1, 1], [], []>} : vector<16x72xbf16>, vector<72x256xbf16>, vector<16x256xf32> -> vector<16x256xf32>
    %12 = arith.addf %6, %11 : vector<16x256xf32>
    %13 = vector.extract_strided_slice %5 {offsets = [1, 0], sizes = [16, 72], strides = [1, 1]} : vector<24x72xf32> to vector<16x72xf32>
    %14 = arith.truncf %13 : vector<16x72xf32> to vector<16x72xbf16>
    %c1 = arith.constant 1 : index
    %c0_11 = arith.constant 0 : index
    %c0_12 = arith.constant 0 : index
    %15 = vector.load %arg2[%c1, %c0_11, %c0_12] : memref<9x72x256xbf16, #tpu.memory_space<vmem>>, vector<1x72x256xbf16>
    %16 = vector.shape_cast %15 : vector<1x72x256xbf16> to vector<72x256xbf16>
    %cst_13 = arith.constant dense<0.000000e+00> : vector<16x256xf32>
    %17 = tpu.matmul %14, %16, %cst_13 {dimension_numbers = #tpu.dot_dimension_numbers<[1], [0], [0], [1], [0, 0, 1, 1], [], []>} : vector<16x72xbf16>, vector<72x256xbf16>, vector<16x256xf32> -> vector<16x256xf32>
    %18 = arith.addf %12, %17 : vector<16x256xf32>
    %19 = vector.extract_strided_slice %5 {offsets = [2, 0], sizes = [16, 72], strides = [1, 1]} : vector<24x72xf32> to vector<16x72xf32>
    %20 = arith.truncf %19 : vector<16x72xf32> to vector<16x72xbf16>
    %c2 = arith.constant 2 : index
    %c0_14 = arith.constant 0 : index
    %c0_15 = arith.constant 0 : index
    %21 = vector.load %arg2[%c2, %c0_14, %c0_15] : memref<9x72x256xbf16, #tpu.memory_space<vmem>>, vector<1x72x256xbf16>
    %22 = vector.shape_cast %21 : vector<1x72x256xbf16> to vector<72x256xbf16>
    %cst_16 = arith.constant dense<0.000000e+00> : vector<16x256xf32>
    %23 = tpu.matmul %20, %22, %cst_16 {dimension_numbers = #tpu.dot_dimension_numbers<[1], [0], [0], [1], [0, 0, 1, 1], [], []>} : vector<16x72xbf16>, vector<72x256xbf16>, vector<16x256xf32> -> vector<16x256xf32>
    %24 = arith.addf %18, %23 : vector<16x256xf32>
    %25 = vector.extract_strided_slice %5 {offsets = [3, 0], sizes = [16, 72], strides = [1, 1]} : vector<24x72xf32> to vector<16x72xf32>
    %26 = arith.truncf %25 : vector<16x72xf32> to vector<16x72xbf16>
    %c3 = arith.constant 3 : index
    %c0_17 = arith.constant 0 : index
    %c0_18 = arith.constant 0 : index
    %27 = vector.load %arg2[%c3, %c0_17, %c0_18] : memref<9x72x256xbf16, #tpu.memory_space<vmem>>, vector<1x72x256xbf16>
    %28 = vector.shape_cast %27 : vector<1x72x256xbf16> to vector<72x256xbf16>
    %cst_19 = arith.constant dense<0.000000e+00> : vector<16x256xf32>
    %29 = tpu.matmul %26, %28, %cst_19 {dimension_numbers = #tpu.dot_dimension_numbers<[1], [0], [0], [1], [0, 0, 1, 1], [], []>} : vector<16x72xbf16>, vector<72x256xbf16>, vector<16x256xf32> -> vector<16x256xf32>
    %30 = arith.addf %24, %29 : vector<16x256xf32>
    %31 = vector.extract_strided_slice %5 {offsets = [4, 0], sizes = [16, 72], strides = [1, 1]} : vector<24x72xf32> to vector<16x72xf32>
    %32 = arith.truncf %31 : vector<16x72xf32> to vector<16x72xbf16>
    %c4_20 = arith.constant 4 : index
    %c0_21 = arith.constant 0 : index
    %c0_22 = arith.constant 0 : index
    %33 = vector.load %arg2[%c4_20, %c0_21, %c0_22] : memref<9x72x256xbf16, #tpu.memory_space<vmem>>, vector<1x72x256xbf16>
    %34 = vector.shape_cast %33 : vector<1x72x256xbf16> to vector<72x256xbf16>
    %cst_23 = arith.constant dense<0.000000e+00> : vector<16x256xf32>
    %35 = tpu.matmul %32, %34, %cst_23 {dimension_numbers = #tpu.dot_dimension_numbers<[1], [0], [0], [1], [0, 0, 1, 1], [], []>} : vector<16x72xbf16>, vector<72x256xbf16>, vector<16x256xf32> -> vector<16x256xf32>
    %36 = arith.addf %30, %35 : vector<16x256xf32>
    %37 = vector.extract_strided_slice %5 {offsets = [5, 0], sizes = [16, 72], strides = [1, 1]} : vector<24x72xf32> to vector<16x72xf32>
    %38 = arith.truncf %37 : vector<16x72xf32> to vector<16x72xbf16>
    %c5 = arith.constant 5 : index
    %c0_24 = arith.constant 0 : index
    %c0_25 = arith.constant 0 : index
    %39 = vector.load %arg2[%c5, %c0_24, %c0_25] : memref<9x72x256xbf16, #tpu.memory_space<vmem>>, vector<1x72x256xbf16>
    %40 = vector.shape_cast %39 : vector<1x72x256xbf16> to vector<72x256xbf16>
    %cst_26 = arith.constant dense<0.000000e+00> : vector<16x256xf32>
    %41 = tpu.matmul %38, %40, %cst_26 {dimension_numbers = #tpu.dot_dimension_numbers<[1], [0], [0], [1], [0, 0, 1, 1], [], []>} : vector<16x72xbf16>, vector<72x256xbf16>, vector<16x256xf32> -> vector<16x256xf32>
    %42 = arith.addf %36, %41 : vector<16x256xf32>
    %43 = vector.extract_strided_slice %5 {offsets = [6, 0], sizes = [16, 72], strides = [1, 1]} : vector<24x72xf32> to vector<16x72xf32>
    %44 = arith.truncf %43 : vector<16x72xf32> to vector<16x72xbf16>
    %c6 = arith.constant 6 : index
    %c0_27 = arith.constant 0 : index
    %c0_28 = arith.constant 0 : index
    %45 = vector.load %arg2[%c6, %c0_27, %c0_28] : memref<9x72x256xbf16, #tpu.memory_space<vmem>>, vector<1x72x256xbf16>
    %46 = vector.shape_cast %45 : vector<1x72x256xbf16> to vector<72x256xbf16>
    %cst_29 = arith.constant dense<0.000000e+00> : vector<16x256xf32>
    %47 = tpu.matmul %44, %46, %cst_29 {dimension_numbers = #tpu.dot_dimension_numbers<[1], [0], [0], [1], [0, 0, 1, 1], [], []>} : vector<16x72xbf16>, vector<72x256xbf16>, vector<16x256xf32> -> vector<16x256xf32>
    %48 = arith.addf %42, %47 : vector<16x256xf32>
    %49 = vector.extract_strided_slice %5 {offsets = [7, 0], sizes = [16, 72], strides = [1, 1]} : vector<24x72xf32> to vector<16x72xf32>
    %50 = arith.truncf %49 : vector<16x72xf32> to vector<16x72xbf16>
    %c7 = arith.constant 7 : index
    %c0_30 = arith.constant 0 : index
    %c0_31 = arith.constant 0 : index
    %51 = vector.load %arg2[%c7, %c0_30, %c0_31] : memref<9x72x256xbf16, #tpu.memory_space<vmem>>, vector<1x72x256xbf16>
    %52 = vector.shape_cast %51 : vector<1x72x256xbf16> to vector<72x256xbf16>
    %cst_32 = arith.constant dense<0.000000e+00> : vector<16x256xf32>
    %53 = tpu.matmul %50, %52, %cst_32 {dimension_numbers = #tpu.dot_dimension_numbers<[1], [0], [0], [1], [0, 0, 1, 1], [], []>} : vector<16x72xbf16>, vector<72x256xbf16>, vector<16x256xf32> -> vector<16x256xf32>
    %54 = arith.addf %48, %53 : vector<16x256xf32>
    %55 = vector.extract_strided_slice %5 {offsets = [8, 0], sizes = [16, 72], strides = [1, 1]} : vector<24x72xf32> to vector<16x72xf32>
    %56 = arith.truncf %55 : vector<16x72xf32> to vector<16x72xbf16>
    %c8 = arith.constant 8 : index
    %c0_33 = arith.constant 0 : index
    %c0_34 = arith.constant 0 : index
    %57 = vector.load %arg2[%c8, %c0_33, %c0_34] : memref<9x72x256xbf16, #tpu.memory_space<vmem>>, vector<1x72x256xbf16>
    %58 = vector.shape_cast %57 : vector<1x72x256xbf16> to vector<72x256xbf16>
    %cst_35 = arith.constant dense<0.000000e+00> : vector<16x256xf32>
    %59 = tpu.matmul %56, %58, %cst_35 {dimension_numbers = #tpu.dot_dimension_numbers<[1], [0], [0], [1], [0, 0, 1, 1], [], []>} : vector<16x72xbf16>, vector<72x256xbf16>, vector<16x256xf32> -> vector<16x256xf32>
    %60 = arith.addf %54, %59 : vector<16x256xf32>
    %c0_36 = arith.constant 0 : index
    %c0_37 = arith.constant 0 : index
    %61 = vector.load %arg3[%c0_36, %c0_37] : memref<1x256xf32, #tpu.memory_space<vmem>>, vector<1x256xf32>
    %62 = vector.broadcast %61 : vector<1x256xf32> to vector<16x256xf32>
    %63 = arith.mulf %60, %62 : vector<16x256xf32>
    %c0_38 = arith.constant 0 : index
    %c0_39 = arith.constant 0 : index
    %64 = vector.load %arg4[%c0_38, %c0_39] : memref<1x256xf32, #tpu.memory_space<vmem>>, vector<1x256xf32>
    %65 = vector.broadcast %64 : vector<1x256xf32> to vector<16x256xf32>
    %66 = arith.addf %63, %65 : vector<16x256xf32>
    %cst_40 = arith.constant 0.000000e+00 : f32
    %67 = vector.broadcast %cst_40 : f32 to vector<16x256xf32>
    %68 = arith.maximumf %66, %67 : vector<16x256xf32>
    %69 = vector.extract_strided_slice %68 {offsets = [0, 0], sizes = [1, 256], strides = [1, 1]} : vector<16x256xf32> to vector<1x256xf32>
    %70 = vector.extract_strided_slice %68 {offsets = [1, 0], sizes = [1, 256], strides = [1, 1]} : vector<16x256xf32> to vector<1x256xf32>
    %71 = arith.maximumf %69, %70 : vector<1x256xf32>
    %c0_41 = arith.constant 0 : index
    %c0_42 = arith.constant 0 : index
    %72 = vector.load %arg35[%c0_41, %c0_42] : memref<24x384xf32, #tpu.memory_space<vmem>>, vector<1x256xf32>
    tpu.vector_store %arg35[%c0_41, %c0_42], %71 {strides = array<i32>} : memref<24x384xf32, #tpu.memory_space<vmem>>, vector<1x256xf32>,
    %73 = vector.extract_strided_slice %68 {offsets = [2, 0], sizes = [1, 256], strides = [1, 1]} : vector<16x256xf32> to vector<1x256xf32>
    %74 = vector.extract_strided_slice %68 {offsets = [3, 0], sizes = [1, 256], strides = [1, 1]} : vector<16x256xf32> to vector<1x256xf32>
    %75 = arith.maximumf %73, %74 : vector<1x256xf32>
    %c1_43 = arith.constant 1 : index
    %c0_44 = arith.constant 0 : index
    %76 = vector.load %arg35[%c1_43, %c0_44] : memref<24x384xf32, #tpu.memory_space<vmem>>, vector<1x256xf32>
    tpu.vector_store %arg35[%c1_43, %c0_44], %75 {strides = array<i32>} : memref<24x384xf32, #tpu.memory_space<vmem>>, vector<1x256xf32>,
    %77 = vector.extract_strided_slice %68 {offsets = [4, 0], sizes = [1, 256], strides = [1, 1]} : vector<16x256xf32> to vector<1x256xf32>
    %78 = vector.extract_strided_slice %68 {offsets = [5, 0], sizes = [1, 256], strides = [1, 1]} : vector<16x256xf32> to vector<1x256xf32>
    %79 = arith.maximumf %77, %78 : vector<1x256xf32>
    %c2_45 = arith.constant 2 : index
    %c0_46 = arith.constant 0 : index
    %80 = vector.load %arg35[%c2_45, %c0_46] : memref<24x384xf32, #tpu.memory_space<vmem>>, vector<1x256xf32>
    tpu.vector_store %arg35[%c2_45, %c0_46], %79 {strides = array<i32>} : memref<24x384xf32, #tpu.memory_space<vmem>>, vector<1x256xf32>,
    %81 = vector.extract_strided_slice %68 {offsets = [6, 0], sizes = [1, 256], strides = [1, 1]} : vector<16x256xf32> to vector<1x256xf32>
    %82 = vector.extract_strided_slice %68 {offsets = [7, 0], sizes = [1, 256], strides = [1, 1]} : vector<16x256xf32> to vector<1x256xf32>
    %83 = arith.maximumf %81, %82 : vector<1x256xf32>
    %c3_47 = arith.constant 3 : index
    %c0_48 = arith.constant 0 : index
    %84 = vector.load %arg35[%c3_47, %c0_48] : memref<24x384xf32, #tpu.memory_space<vmem>>, vector<1x256xf32>
    tpu.vector_store %arg35[%c3_47, %c0_48], %83 {strides = array<i32>} : memref<24x384xf32, #tpu.memory_space<vmem>>, vector<1x256xf32>,
    %85 = vector.extract_strided_slice %68 {offsets = [8, 0], sizes = [1, 256], strides = [1, 1]} : vector<16x256xf32> to vector<1x256xf32>
    %86 = vector.extract_strided_slice %68 {offsets = [9, 0], sizes = [1, 256], strides = [1, 1]} : vector<16x256xf32> to vector<1x256xf32>
    %87 = arith.maximumf %85, %86 : vector<1x256xf32>
    %c4_49 = arith.constant 4 : index
    %c0_50 = arith.constant 0 : index
    %88 = vector.load %arg35[%c4_49, %c0_50] : memref<24x384xf32, #tpu.memory_space<vmem>>, vector<1x256xf32>
    tpu.vector_store %arg35[%c4_49, %c0_50], %87 {strides = array<i32>} : memref<24x384xf32, #tpu.memory_space<vmem>>, vector<1x256xf32>,
    %89 = vector.extract_strided_slice %68 {offsets = [10, 0], sizes = [1, 256], strides = [1, 1]} : vector<16x256xf32> to vector<1x256xf32>
    %90 = vector.extract_strided_slice %68 {offsets = [11, 0], sizes = [1, 256], strides = [1, 1]} : vector<16x256xf32> to vector<1x256xf32>
    %91 = arith.maximumf %89, %90 : vector<1x256xf32>
    %c5_51 = arith.constant 5 : index
    %c0_52 = arith.constant 0 : index
    %92 = vector.load %arg35[%c5_51, %c0_52] : memref<24x384xf32, #tpu.memory_space<vmem>>, vector<1x256xf32>
    tpu.vector_store %arg35[%c5_51, %c0_52], %91 {strides = array<i32>} : memref<24x384xf32, #tpu.memory_space<vmem>>, vector<1x256xf32>,
    %93 = vector.extract_strided_slice %68 {offsets = [12, 0], sizes = [1, 256], strides = [1, 1]} : vector<16x256xf32> to vector<1x256xf32>
    %94 = vector.extract_strided_slice %68 {offsets = [13, 0], sizes = [1, 256], strides = [1, 1]} : vector<16x256xf32> to vector<1x256xf32>
    %95 = arith.maximumf %93, %94 : vector<1x256xf32>
    %c6_53 = arith.constant 6 : index
    %c0_54 = arith.constant 0 : index
    %96 = vector.load %arg35[%c6_53, %c0_54] : memref<24x384xf32, #tpu.memory_space<vmem>>, vector<1x256xf32>
    tpu.vector_store %arg35[%c6_53, %c0_54], %95 {strides = array<i32>} : memref<24x384xf32, #tpu.memory_space<vmem>>, vector<1x256xf32>,
    %97 = vector.extract_strided_slice %68 {offsets = [14, 0], sizes = [1, 256], strides = [1, 1]} : vector<16x256xf32> to vector<1x256xf32>
    %98 = vector.extract_strided_slice %68 {offsets = [15, 0], sizes = [1, 256], strides = [1, 1]} : vector<16x256xf32> to vector<1x256xf32>
    %99 = arith.maximumf %97, %98 : vector<1x256xf32>
    %c7_55 = arith.constant 7 : index
    %c0_56 = arith.constant 0 : index
    %100 = vector.load %arg35[%c7_55, %c0_56] : memref<24x384xf32, #tpu.memory_space<vmem>>, vector<1x256xf32>
    tpu.vector_store %arg35[%c7_55, %c0_56], %99 {strides = array<i32>} : memref<24x384xf32, #tpu.memory_space<vmem>>, vector<1x256xf32>,
    %c0_57 = arith.constant 0 : index
    %c0_58 = arith.constant 0 : index
    %101 = vector.load %arg35[%c0_57, %c0_58] : memref<24x384xf32, #tpu.memory_space<vmem>>, vector<8x256xf32>
    %102 = vector.extract_strided_slice %101 {offsets = [0, 0], sizes = [8, 16], strides = [1, 1]} : vector<8x256xf32> to vector<8x16xf32>
    %103 = vector.extract_strided_slice %101 {offsets = [0, 16], sizes = [8, 16], strides = [1, 1]} : vector<8x256xf32> to vector<8x16xf32>
    %104 = arith.maximumf %102, %103 : vector<8x16xf32>
    %c0_59 = arith.constant 0 : index
    %c0_60 = arith.constant 0 : index
    %105 = vector.load %arg36[%c0_59, %c0_60] : memref<8x192xf32, #tpu.memory_space<vmem>>, vector<8x16xf32>
    tpu.vector_store %arg36[%c0_59, %c0_60], %104 {strides = array<i32>} : memref<8x192xf32, #tpu.memory_space<vmem>>, vector<8x16xf32>,
    %106 = vector.extract_strided_slice %101 {offsets = [0, 32], sizes = [8, 16], strides = [1, 1]} : vector<8x256xf32> to vector<8x16xf32>
    %107 = vector.extract_strided_slice %101 {offsets = [0, 48], sizes = [8, 16], strides = [1, 1]} : vector<8x256xf32> to vector<8x16xf32>
    %108 = arith.maximumf %106, %107 : vector<8x16xf32>
    %c0_61 = arith.constant 0 : index
    %c16 = arith.constant 16 : index
    %109 = vector.load %arg36[%c0_61, %c16] : memref<8x192xf32, #tpu.memory_space<vmem>>, vector<8x16xf32>
    tpu.vector_store %arg36[%c0_61, %c16], %108 {strides = array<i32>} : memref<8x192xf32, #tpu.memory_space<vmem>>, vector<8x16xf32>,
    %110 = vector.extract_strided_slice %101 {offsets = [0, 64], sizes = [8, 16], strides = [1, 1]} : vector<8x256xf32> to vector<8x16xf32>
    %111 = vector.extract_strided_slice %101 {offsets = [0, 80], sizes = [8, 16], strides = [1, 1]} : vector<8x256xf32> to vector<8x16xf32>
    %112 = arith.maximumf %110, %111 : vector<8x16xf32>
    %c0_62 = arith.constant 0 : index
    %c32 = arith.constant 32 : index
    %113 = vector.load %arg36[%c0_62, %c32] : memref<8x192xf32, #tpu.memory_space<vmem>>, vector<8x16xf32>
    tpu.vector_store %arg36[%c0_62, %c32], %112 {strides = array<i32>} : memref<8x192xf32, #tpu.memory_space<vmem>>, vector<8x16xf32>,
    %114 = vector.extract_strided_slice %101 {offsets = [0, 96], sizes = [8, 16], strides = [1, 1]} : vector<8x256xf32> to vector<8x16xf32>
    %115 = vector.extract_strided_slice %101 {offsets = [0, 112], sizes = [8, 16], strides = [1, 1]} : vector<8x256xf32> to vector<8x16xf32>
    %116 = arith.maximumf %114, %115 : vector<8x16xf32>
    %c0_63 = arith.constant 0 : index
    %c48 = arith.constant 48 : index
    %117 = vector.load %arg36[%c0_63, %c48] : memref<8x192xf32, #tpu.memory_space<vmem>>, vector<8x16xf32>
    tpu.vector_store %arg36[%c0_63, %c48], %116 {strides = array<i32>} : memref<8x192xf32, #tpu.memory_space<vmem>>, vector<8x16xf32>,
    %118 = vector.extract_strided_slice %101 {offsets = [0, 128], sizes = [8, 16], strides = [1, 1]} : vector<8x256xf32> to vector<8x16xf32>
    %119 = vector.extract_strided_slice %101 {offsets = [0, 144], sizes = [8, 16], strides = [1, 1]} : vector<8x256xf32> to vector<8x16xf32>
    %120 = arith.maximumf %118, %119 : vector<8x16xf32>
    %c0_64 = arith.constant 0 : index
    %c64 = arith.constant 64 : index
    %121 = vector.load %arg36[%c0_64, %c64] : memref<8x192xf32, #tpu.memory_space<vmem>>, vector<8x16xf32>
    tpu.vector_store %arg36[%c0_64, %c64], %120 {strides = array<i32>} : memref<8x192xf32, #tpu.memory_space<vmem>>, vector<8x16xf32>,
    %122 = vector.extract_strided_slice %101 {offsets = [0, 160], sizes = [8, 16], strides = [1, 1]} : vector<8x256xf32> to vector<8x16xf32>
    %123 = vector.extract_strided_slice %101 {offsets = [0, 176], sizes = [8, 16], strides = [1, 1]} : vector<8x256xf32> to vector<8x16xf32>
    %124 = arith.maximumf %122, %123 : vector<8x16xf32>
    %c0_65 = arith.constant 0 : index
    %c80 = arith.constant 80 : index
    %125 = vector.load %arg36[%c0_65, %c80] : memref<8x192xf32, #tpu.memory_space<vmem>>, vector<8x16xf32>
    tpu.vector_store %arg36[%c0_65, %c80], %124 {strides = array<i32>} : memref<8x192xf32, #tpu.memory_space<vmem>>, vector<8x16xf32>,
    %126 = vector.extract_strided_slice %101 {offsets = [0, 192], sizes = [8, 16], strides = [1, 1]} : vector<8x256xf32> to vector<8x16xf32>
    %127 = vector.extract_strided_slice %101 {offsets = [0, 208], sizes = [8, 16], strides = [1, 1]} : vector<8x256xf32> to vector<8x16xf32>
    %128 = arith.maximumf %126, %127 : vector<8x16xf32>
    %c0_66 = arith.constant 0 : index
    %c96 = arith.constant 96 : index
    %129 = vector.load %arg36[%c0_66, %c96] : memref<8x192xf32, #tpu.memory_space<vmem>>, vector<8x16xf32>
    tpu.vector_store %arg36[%c0_66, %c96], %128 {strides = array<i32>} : memref<8x192xf32, #tpu.memory_space<vmem>>, vector<8x16xf32>,
    %130 = vector.extract_strided_slice %101 {offsets = [0, 224], sizes = [8, 16], strides = [1, 1]} : vector<8x256xf32> to vector<8x16xf32>
    %131 = vector.extract_strided_slice %101 {offsets = [0, 240], sizes = [8, 16], strides = [1, 1]} : vector<8x256xf32> to vector<8x16xf32>
    %132 = arith.maximumf %130, %131 : vector<8x16xf32>
    %c0_67 = arith.constant 0 : index
    %c112 = arith.constant 112 : index
    %133 = vector.load %arg36[%c0_67, %c112] : memref<8x192xf32, #tpu.memory_space<vmem>>, vector<8x16xf32>
    tpu.vector_store %arg36[%c0_67, %c112], %132 {strides = array<i32>} : memref<8x192xf32, #tpu.memory_space<vmem>>, vector<8x16xf32>,
    %c0_68 = arith.constant 0 : index
    %c0_69 = arith.constant 0 : index
    %134 = vector.load %arg36[%c0_68, %c0_69] : memref<8x192xf32, #tpu.memory_space<vmem>>, vector<8x128xf32>
    %c0_70 = arith.constant 0 : index
    %c0_71 = arith.constant 0 : index
    %c0_72 = arith.constant 0 : index
    %135 = vector.load %arg31[%c0_70, %c0_71, %c0_72] : memref<1x8x128xf32, #tpu.memory_space<vmem>>, vector<1x8x128xf32>
    %136 = vector.shape_cast %135 : vector<1x8x128xf32> to vector<8x128xf32>
    %137 = vector.shape_cast %134 : vector<8x128xf32> to vector<1x8x128xf32>
    tpu.vector_store %arg31[%c0_70, %c0_71, %c0_72], %137 {strides = array<i32>} : memref<1x8x128xf32, #tpu.memory_space<vmem>>, vector<1x8x128xf32>,
    %cst_73 = arith.constant 0.000000e+00 : f32
    %138 = vector.broadcast %cst_73 : f32 to vector<14x224xf32>
    %c0_74 = arith.constant 0 : index
    %c0_75 = arith.constant 0 : index
    %139 = vector.load %arg35[%c0_74, %c0_75] : memref<24x384xf32, #tpu.memory_space<vmem>>, vector<14x224xf32>
    tpu.vector_store %arg35[%c0_74, %c0_75], %138 {strides = array<i32>} : memref<24x384xf32, #tpu.memory_space<vmem>>, vector<14x224xf32>,
    %c3_76 = arith.constant 3 : index
    %c48_77 = arith.constant 48 : index
    %140 = vector.load %arg35[%c3_76, %c48_77] : memref<24x384xf32, #tpu.memory_space<vmem>>, vector<8x128xf32>
    tpu.vector_store %arg35[%c3_76, %c48_77], %134 {strides = array<i32>} : memref<24x384xf32, #tpu.memory_space<vmem>>, vector<8x128xf32>,
    %c0_78 = arith.constant 0 : index
    %c0_79 = arith.constant 0 : index
    %141 = vector.load %arg35[%c0_78, %c0_79] : memref<24x384xf32, #tpu.memory_space<vmem>>, vector<14x224xf32>
    %cst_80 = arith.constant 0.000000e+00 : f32
    %142 = vector.broadcast %cst_80 : f32 to vector<8x256xf32>
    %143 = vector.extract_strided_slice %141 {offsets = [0, 0], sizes = [8, 224], strides = [1, 1]} : vector<14x224xf32> to vector<8x224xf32>
    %144 = arith.truncf %143 : vector<8x224xf32> to vector<8x224xbf16>
    %c0_81 = arith.constant 0 : index
    %c0_82 = arith.constant 0 : index
    %c0_83 = arith.constant 0 : index
    %145 = vector.load %arg5[%c0_81, %c0_82, %c0_83] : memref<7x224x256xbf16, #tpu.memory_space<vmem>>, vector<1x224x256xbf16>
    %146 = vector.shape_cast %145 : vector<1x224x256xbf16> to vector<224x256xbf16>
    %cst_84 = arith.constant dense<0.000000e+00> : vector<8x256xf32>
    %147 = tpu.matmul %144, %146, %cst_84 {dimension_numbers = #tpu.dot_dimension_numbers<[1], [0], [0], [1], [0, 0, 1, 1], [], []>} : vector<8x224xbf16>, vector<224x256xbf16>, vector<8x256xf32> -> vector<8x256xf32>
    %148 = arith.addf %142, %147 : vector<8x256xf32>
    %149 = vector.extract_strided_slice %141 {offsets = [1, 0], sizes = [8, 224], strides = [1, 1]} : vector<14x224xf32> to vector<8x224xf32>
    %150 = arith.truncf %149 : vector<8x224xf32> to vector<8x224xbf16>
    %c1_85 = arith.constant 1 : index
    %c0_86 = arith.constant 0 : index
    %c0_87 = arith.constant 0 : index
    %151 = vector.load %arg5[%c1_85, %c0_86, %c0_87] : memref<7x224x256xbf16, #tpu.memory_space<vmem>>, vector<1x224x256xbf16>
    %152 = vector.shape_cast %151 : vector<1x224x256xbf16> to vector<224x256xbf16>
    %cst_88 = arith.constant dense<0.000000e+00> : vector<8x256xf32>
    %153 = tpu.matmul %150, %152, %cst_88 {dimension_numbers = #tpu.dot_dimension_numbers<[1], [0], [0], [1], [0, 0, 1, 1], [], []>} : vector<8x224xbf16>, vector<224x256xbf16>, vector<8x256xf32> -> vector<8x256xf32>
    %154 = arith.addf %148, %153 : vector<8x256xf32>
    %155 = vector.extract_strided_slice %141 {offsets = [2, 0], sizes = [8, 224], strides = [1, 1]} : vector<14x224xf32> to vector<8x224xf32>
    %156 = arith.truncf %155 : vector<8x224xf32> to vector<8x224xbf16>
    %c2_89 = arith.constant 2 : index
    %c0_90 = arith.constant 0 : index
    %c0_91 = arith.constant 0 : index
    %157 = vector.load %arg5[%c2_89, %c0_90, %c0_91] : memref<7x224x256xbf16, #tpu.memory_space<vmem>>, vector<1x224x256xbf16>
    %158 = vector.shape_cast %157 : vector<1x224x256xbf16> to vector<224x256xbf16>
    %cst_92 = arith.constant dense<0.000000e+00> : vector<8x256xf32>
    %159 = tpu.matmul %156, %158, %cst_92 {dimension_numbers = #tpu.dot_dimension_numbers<[1], [0], [0], [1], [0, 0, 1, 1], [], []>} : vector<8x224xbf16>, vector<224x256xbf16>, vector<8x256xf32> -> vector<8x256xf32>
    %160 = arith.addf %154, %159 : vector<8x256xf32>
    %161 = vector.extract_strided_slice %141 {offsets = [3, 0], sizes = [8, 224], strides = [1, 1]} : vector<14x224xf32> to vector<8x224xf32>
    %162 = arith.truncf %161 : vector<8x224xf32> to vector<8x224xbf16>
    %c3_93 = arith.constant 3 : index
    %c0_94 = arith.constant 0 : index
    %c0_95 = arith.constant 0 : index
    %163 = vector.load %arg5[%c3_93, %c0_94, %c0_95] : memref<7x224x256xbf16, #tpu.memory_space<vmem>>, vector<1x224x256xbf16>
    %164 = vector.shape_cast %163 : vector<1x224x256xbf16> to vector<224x256xbf16>
    %cst_96 = arith.constant dense<0.000000e+00> : vector<8x256xf32>
    %165 = tpu.matmul %162, %164, %cst_96 {dimension_numbers = #tpu.dot_dimension_numbers<[1], [0], [0], [1], [0, 0, 1, 1], [], []>} : vector<8x224xbf16>, vector<224x256xbf16>, vector<8x256xf32> -> vector<8x256xf32>
    %166 = arith.addf %160, %165 : vector<8x256xf32>
    %167 = vector.extract_strided_slice %141 {offsets = [4, 0], sizes = [8, 224], strides = [1, 1]} : vector<14x224xf32> to vector<8x224xf32>
    %168 = arith.truncf %167 : vector<8x224xf32> to vector<8x224xbf16>
    %c4_97 = arith.constant 4 : index
    %c0_98 = arith.constant 0 : index
    %c0_99 = arith.constant 0 : index
    %169 = vector.load %arg5[%c4_97, %c0_98, %c0_99] : memref<7x224x256xbf16, #tpu.memory_space<vmem>>, vector<1x224x256xbf16>
    %170 = vector.shape_cast %169 : vector<1x224x256xbf16> to vector<224x256xbf16>
    %cst_100 = arith.constant dense<0.000000e+00> : vector<8x256xf32>
    %171 = tpu.matmul %168, %170, %cst_100 {dimension_numbers = #tpu.dot_dimension_numbers<[1], [0], [0], [1], [0, 0, 1, 1], [], []>} : vector<8x224xbf16>, vector<224x256xbf16>, vector<8x256xf32> -> vector<8x256xf32>
    %172 = arith.addf %166, %171 : vector<8x256xf32>
    %173 = vector.extract_strided_slice %141 {offsets = [5, 0], sizes = [8, 224], strides = [1, 1]} : vector<14x224xf32> to vector<8x224xf32>
    %174 = arith.truncf %173 : vector<8x224xf32> to vector<8x224xbf16>
    %c5_101 = arith.constant 5 : index
    %c0_102 = arith.constant 0 : index
    %c0_103 = arith.constant 0 : index
    %175 = vector.load %arg5[%c5_101, %c0_102, %c0_103] : memref<7x224x256xbf16, #tpu.memory_space<vmem>>, vector<1x224x256xbf16>
    %176 = vector.shape_cast %175 : vector<1x224x256xbf16> to vector<224x256xbf16>
    %cst_104 = arith.constant dense<0.000000e+00> : vector<8x256xf32>
    %177 = tpu.matmul %174, %176, %cst_104 {dimension_numbers = #tpu.dot_dimension_numbers<[1], [0], [0], [1], [0, 0, 1, 1], [], []>} : vector<8x224xbf16>, vector<224x256xbf16>, vector<8x256xf32> -> vector<8x256xf32>
    %178 = arith.addf %172, %177 : vector<8x256xf32>
    %179 = vector.extract_strided_slice %141 {offsets = [6, 0], sizes = [8, 224], strides = [1, 1]} : vector<14x224xf32> to vector<8x224xf32>
    %180 = arith.truncf %179 : vector<8x224xf32> to vector<8x224xbf16>
    %c6_105 = arith.constant 6 : index
    %c0_106 = arith.constant 0 : index
    %c0_107 = arith.constant 0 : index
    %181 = vector.load %arg5[%c6_105, %c0_106, %c0_107] : memref<7x224x256xbf16, #tpu.memory_space<vmem>>, vector<1x224x256xbf16>
    %182 = vector.shape_cast %181 : vector<1x224x256xbf16> to vector<224x256xbf16>
    %cst_108 = arith.constant dense<0.000000e+00> : vector<8x256xf32>
    %183 = tpu.matmul %180, %182, %cst_108 {dimension_numbers = #tpu.dot_dimension_numbers<[1], [0], [0], [1], [0, 0, 1, 1], [], []>} : vector<8x224xbf16>, vector<224x256xbf16>, vector<8x256xf32> -> vector<8x256xf32>
    %184 = arith.addf %178, %183 : vector<8x256xf32>
    %c0_109 = arith.constant 0 : index
    %c0_110 = arith.constant 0 : index
    %185 = vector.load %arg6[%c0_109, %c0_110] : memref<1x256xf32, #tpu.memory_space<vmem>>, vector<1x256xf32>
    %186 = vector.broadcast %185 : vector<1x256xf32> to vector<8x256xf32>
    %187 = arith.mulf %184, %186 : vector<8x256xf32>
    %c0_111 = arith.constant 0 : index
    %c0_112 = arith.constant 0 : index
    %188 = vector.load %arg7[%c0_111, %c0_112] : memref<1x256xf32, #tpu.memory_space<vmem>>, vector<1x256xf32>
    %189 = vector.broadcast %188 : vector<1x256xf32> to vector<8x256xf32>
    %190 = arith.addf %187, %189 : vector<8x256xf32>
    %cst_113 = arith.constant 0.000000e+00 : f32
    %191 = vector.broadcast %cst_113 : f32 to vector<8x256xf32>
    %192 = arith.maximumf %190, %191 : vector<8x256xf32>
    %c0_114 = arith.constant 0 : index
    %c0_115 = arith.constant 0 : index
    %c0_116 = arith.constant 0 : index
    %193 = vector.load %arg33[%c0_114, %c0_115, %c0_116] : memref<1x8x256xf32, #tpu.memory_space<vmem>>, vector<1x8x256xf32>
    %194 = vector.shape_cast %193 : vector<1x8x256xf32> to vector<8x256xf32>
    %195 = vector.shape_cast %192 : vector<8x256xf32> to vector<1x8x256xf32>
    tpu.vector_store %arg33[%c0_114, %c0_115, %c0_116], %195 {strides = array<i32>} : memref<1x8x256xf32, #tpu.memory_space<vmem>>, vector<1x8x256xf32>,
    %196 = vector.extract_strided_slice %192 {offsets = [0, 0], sizes = [1, 256], strides = [1, 1]} : vector<8x256xf32> to vector<1x256xf32>
    %197 = vector.extract_strided_slice %192 {offsets = [1, 0], sizes = [1, 256], strides = [1, 1]} : vector<8x256xf32> to vector<1x256xf32>
    %198 = arith.maximumf %196, %197 : vector<1x256xf32>
    %c0_117 = arith.constant 0 : index
    %c0_118 = arith.constant 0 : index
    %199 = vector.load %arg35[%c0_117, %c0_118] : memref<24x384xf32, #tpu.memory_space<vmem>>, vector<1x256xf32>
    tpu.vector_store %arg35[%c0_117, %c0_118], %198 {strides = array<i32>} : memref<24x384xf32, #tpu.memory_space<vmem>>, vector<1x256xf32>,
    %200 = vector.extract_strided_slice %192 {offsets = [2, 0], sizes = [1, 256], strides = [1, 1]} : vector<8x256xf32> to vector<1x256xf32>
    %201 = vector.extract_strided_slice %192 {offsets = [3, 0], sizes = [1, 256], strides = [1, 1]} : vector<8x256xf32> to vector<1x256xf32>
    %202 = arith.maximumf %200, %201 : vector<1x256xf32>
    %c1_119 = arith.constant 1 : index
    %c0_120 = arith.constant 0 : index
    %203 = vector.load %arg35[%c1_119, %c0_120] : memref<24x384xf32, #tpu.memory_space<vmem>>, vector<1x256xf32>
    tpu.vector_store %arg35[%c1_119, %c0_120], %202 {strides = array<i32>} : memref<24x384xf32, #tpu.memory_space<vmem>>, vector<1x256xf32>,
    %204 = vector.extract_strided_slice %192 {offsets = [4, 0], sizes = [1, 256], strides = [1, 1]} : vector<8x256xf32> to vector<1x256xf32>
    %205 = vector.extract_strided_slice %192 {offsets = [5, 0], sizes = [1, 256], strides = [1, 1]} : vector<8x256xf32> to vector<1x256xf32>
    %206 = arith.maximumf %204, %205 : vector<1x256xf32>
    %c2_121 = arith.constant 2 : index
    %c0_122 = arith.constant 0 : index
    %207 = vector.load %arg35[%c2_121, %c0_122] : memref<24x384xf32, #tpu.memory_space<vmem>>, vector<1x256xf32>
    tpu.vector_store %arg35[%c2_121, %c0_122], %206 {strides = array<i32>} : memref<24x384xf32, #tpu.memory_space<vmem>>, vector<1x256xf32>,
    %208 = vector.extract_strided_slice %192 {offsets = [6, 0], sizes = [1, 256], strides = [1, 1]} : vector<8x256xf32> to vector<1x256xf32>
    %209 = vector.extract_strided_slice %192 {offsets = [7, 0], sizes = [1, 256], strides = [1, 1]} : vector<8x256xf32> to vector<1x256xf32>
    %210 = arith.maximumf %208, %209 : vector<1x256xf32>
    %c3_123 = arith.constant 3 : index
    %c0_124 = arith.constant 0 : index
    %211 = vector.load %arg35[%c3_123, %c0_124] : memref<24x384xf32, #tpu.memory_space<vmem>>, vector<1x256xf32>
    tpu.vector_store %arg35[%c3_123, %c0_124], %210 {strides = array<i32>} : memref<24x384xf32, #tpu.memory_space<vmem>>, vector<1x256xf32>,
    %c0_125 = arith.constant 0 : index
    %c0_126 = arith.constant 0 : index
    %212 = vector.load %arg35[%c0_125, %c0_126] : memref<24x384xf32, #tpu.memory_space<vmem>>, vector<4x256xf32>
    %213 = vector.extract_strided_slice %212 {offsets = [0, 0], sizes = [4, 32], strides = [1, 1]} : vector<4x256xf32> to vector<4x32xf32>
    %214 = vector.extract_strided_slice %212 {offsets = [0, 32], sizes = [4, 32], strides = [1, 1]} : vector<4x256xf32> to vector<4x32xf32>
    %215 = arith.maximumf %213, %214 : vector<4x32xf32>
    %c0_127 = arith.constant 0 : index
    %c0_128 = arith.constant 0 : index
    %216 = vector.load %arg36[%c0_127, %c0_128] : memref<8x192xf32, #tpu.memory_space<vmem>>, vector<4x32xf32>
    tpu.vector_store %arg36[%c0_127, %c0_128], %215 {strides = array<i32>} : memref<8x192xf32, #tpu.memory_space<vmem>>, vector<4x32xf32>,
    %217 = vector.extract_strided_slice %212 {offsets = [0, 64], sizes = [4, 32], strides = [1, 1]} : vector<4x256xf32> to vector<4x32xf32>
    %218 = vector.extract_strided_slice %212 {offsets = [0, 96], sizes = [4, 32], strides = [1, 1]} : vector<4x256xf32> to vector<4x32xf32>
    %219 = arith.maximumf %217, %218 : vector<4x32xf32>
    %c0_129 = arith.constant 0 : index
    %c32_130 = arith.constant 32 : index
    %220 = vector.load %arg36[%c0_129, %c32_130] : memref<8x192xf32, #tpu.memory_space<vmem>>, vector<4x32xf32>
    tpu.vector_store %arg36[%c0_129, %c32_130], %219 {strides = array<i32>} : memref<8x192xf32, #tpu.memory_space<vmem>>, vector<4x32xf32>,
    %221 = vector.extract_strided_slice %212 {offsets = [0, 128], sizes = [4, 32], strides = [1, 1]} : vector<4x256xf32> to vector<4x32xf32>
    %222 = vector.extract_strided_slice %212 {offsets = [0, 160], sizes = [4, 32], strides = [1, 1]} : vector<4x256xf32> to vector<4x32xf32>
    %223 = arith.maximumf %221, %222 : vector<4x32xf32>
    %c0_131 = arith.constant 0 : index
    %c64_132 = arith.constant 64 : index
    %224 = vector.load %arg36[%c0_131, %c64_132] : memref<8x192xf32, #tpu.memory_space<vmem>>, vector<4x32xf32>
    tpu.vector_store %arg36[%c0_131, %c64_132], %223 {strides = array<i32>} : memref<8x192xf32, #tpu.memory_space<vmem>>, vector<4x32xf32>,
    %225 = vector.extract_strided_slice %212 {offsets = [0, 192], sizes = [4, 32], strides = [1, 1]} : vector<4x256xf32> to vector<4x32xf32>
    %226 = vector.extract_strided_slice %212 {offsets = [0, 224], sizes = [4, 32], strides = [1, 1]} : vector<4x256xf32> to vector<4x32xf32>
    %227 = arith.maximumf %225, %226 : vector<4x32xf32>
    %c0_133 = arith.constant 0 : index
    %c96_134 = arith.constant 96 : index
    %228 = vector.load %arg36[%c0_133, %c96_134] : memref<8x192xf32, #tpu.memory_space<vmem>>, vector<4x32xf32>
    tpu.vector_store %arg36[%c0_133, %c96_134], %227 {strides = array<i32>} : memref<8x192xf32, #tpu.memory_space<vmem>>, vector<4x32xf32>,
    %c0_135 = arith.constant 0 : index
    %c0_136 = arith.constant 0 : index
    %229 = vector.load %arg36[%c0_135, %c0_136] : memref<8x192xf32, #tpu.memory_space<vmem>>, vector<4x128xf32>
    %cst_137 = arith.constant 0.000000e+00 : f32
    %230 = vector.broadcast %cst_137 : f32 to vector<10x320xf32>
    %c0_138 = arith.constant 0 : index
    %c0_139 = arith.constant 0 : index
    %231 = vector.load %arg35[%c0_138, %c0_139] : memref<24x384xf32, #tpu.memory_space<vmem>>, vector<10x320xf32>
    tpu.vector_store %arg35[%c0_138, %c0_139], %230 {strides = array<i32>} : memref<24x384xf32, #tpu.memory_space<vmem>>, vector<10x320xf32>,
    %c3_140 = arith.constant 3 : index
    %c96_141 = arith.constant 96 : index
    %232 = vector.load %arg35[%c3_140, %c96_141] : memref<24x384xf32, #tpu.memory_space<vmem>>, vector<4x128xf32>
    tpu.vector_store %arg35[%c3_140, %c96_141], %229 {strides = array<i32>} : memref<24x384xf32, #tpu.memory_space<vmem>>, vector<4x128xf32>,
    %c0_142 = arith.constant 0 : index
    %c0_143 = arith.constant 0 : index
    %233 = vector.load %arg35[%c0_142, %c0_143] : memref<24x384xf32, #tpu.memory_space<vmem>>, vector<10x320xf32>
    %cst_144 = arith.constant 0.000000e+00 : f32
    %234 = vector.broadcast %cst_144 : f32 to vector<4x64xf32>
    %235 = vector.extract_strided_slice %233 {offsets = [0, 0], sizes = [4, 320], strides = [1, 1]} : vector<10x320xf32> to vector<4x320xf32>
    %236 = arith.truncf %235 : vector<4x320xf32> to vector<4x320xbf16>
    %c0_145 = arith.constant 0 : index
    %c0_146 = arith.constant 0 : index
    %c0_147 = arith.constant 0 : index
    %237 = vector.load %arg8[%c0_145, %c0_146, %c0_147] : memref<7x320x64xbf16, #tpu.memory_space<vmem>>, vector<1x320x64xbf16>
    %238 = vector.shape_cast %237 : vector<1x320x64xbf16> to vector<320x64xbf16>
    %cst_148 = arith.constant dense<0.000000e+00> : vector<4x64xf32>
    %239 = tpu.matmul %236, %238, %cst_148 {dimension_numbers = #tpu.dot_dimension_numbers<[1], [0], [0], [1], [0, 0, 1, 1], [], []>} : vector<4x320xbf16>, vector<320x64xbf16>, vector<4x64xf32> -> vector<4x64xf32>
    %240 = arith.addf %234, %239 : vector<4x64xf32>
    %241 = vector.extract_strided_slice %233 {offsets = [1, 0], sizes = [4, 320], strides = [1, 1]} : vector<10x320xf32> to vector<4x320xf32>
    %242 = arith.truncf %241 : vector<4x320xf32> to vector<4x320xbf16>
    %c1_149 = arith.constant 1 : index
    %c0_150 = arith.constant 0 : index
    %c0_151 = arith.constant 0 : index
    %243 = vector.load %arg8[%c1_149, %c0_150, %c0_151] : memref<7x320x64xbf16, #tpu.memory_space<vmem>>, vector<1x320x64xbf16>
    %244 = vector.shape_cast %243 : vector<1x320x64xbf16> to vector<320x64xbf16>
    %cst_152 = arith.constant dense<0.000000e+00> : vector<4x64xf32>
    %245 = tpu.matmul %242, %244, %cst_152 {dimension_numbers = #tpu.dot_dimension_numbers<[1], [0], [0], [1], [0, 0, 1, 1], [], []>} : vector<4x320xbf16>, vector<320x64xbf16>, vector<4x64xf32> -> vector<4x64xf32>
    %246 = arith.addf %240, %245 : vector<4x64xf32>
    %247 = vector.extract_strided_slice %233 {offsets = [2, 0], sizes = [4, 320], strides = [1, 1]} : vector<10x320xf32> to vector<4x320xf32>
    %248 = arith.truncf %247 : vector<4x320xf32> to vector<4x320xbf16>
    %c2_153 = arith.constant 2 : index
    %c0_154 = arith.constant 0 : index
    %c0_155 = arith.constant 0 : index
    %249 = vector.load %arg8[%c2_153, %c0_154, %c0_155] : memref<7x320x64xbf16, #tpu.memory_space<vmem>>, vector<1x320x64xbf16>
    %250 = vector.shape_cast %249 : vector<1x320x64xbf16> to vector<320x64xbf16>
    %cst_156 = arith.constant dense<0.000000e+00> : vector<4x64xf32>
    %251 = tpu.matmul %248, %250, %cst_156 {dimension_numbers = #tpu.dot_dimension_numbers<[1], [0], [0], [1], [0, 0, 1, 1], [], []>} : vector<4x320xbf16>, vector<320x64xbf16>, vector<4x64xf32> -> vector<4x64xf32>
    %252 = arith.addf %246, %251 : vector<4x64xf32>
    %253 = vector.extract_strided_slice %233 {offsets = [3, 0], sizes = [4, 320], strides = [1, 1]} : vector<10x320xf32> to vector<4x320xf32>
    %254 = arith.truncf %253 : vector<4x320xf32> to vector<4x320xbf16>
    %c3_157 = arith.constant 3 : index
    %c0_158 = arith.constant 0 : index
    %c0_159 = arith.constant 0 : index
    %255 = vector.load %arg8[%c3_157, %c0_158, %c0_159] : memref<7x320x64xbf16, #tpu.memory_space<vmem>>, vector<1x320x64xbf16>
    %256 = vector.shape_cast %255 : vector<1x320x64xbf16> to vector<320x64xbf16>
    %cst_160 = arith.constant dense<0.000000e+00> : vector<4x64xf32>
    %257 = tpu.matmul %254, %256, %cst_160 {dimension_numbers = #tpu.dot_dimension_numbers<[1], [0], [0], [1], [0, 0, 1, 1], [], []>} : vector<4x320xbf16>, vector<320x64xbf16>, vector<4x64xf32> -> vector<4x64xf32>
    %258 = arith.addf %252, %257 : vector<4x64xf32>
    %259 = vector.extract_strided_slice %233 {offsets = [4, 0], sizes = [4, 320], strides = [1, 1]} : vector<10x320xf32> to vector<4x320xf32>
    %260 = arith.truncf %259 : vector<4x320xf32> to vector<4x320xbf16>
    %c4_161 = arith.constant 4 : index
    %c0_162 = arith.constant 0 : index
    %c0_163 = arith.constant 0 : index
    %261 = vector.load %arg8[%c4_161, %c0_162, %c0_163] : memref<7x320x64xbf16, #tpu.memory_space<vmem>>, vector<1x320x64xbf16>
    %262 = vector.shape_cast %261 : vector<1x320x64xbf16> to vector<320x64xbf16>
    %cst_164 = arith.constant dense<0.000000e+00> : vector<4x64xf32>
    %263 = tpu.matmul %260, %262, %cst_164 {dimension_numbers = #tpu.dot_dimension_numbers<[1], [0], [0], [1], [0, 0, 1, 1], [], []>} : vector<4x320xbf16>, vector<320x64xbf16>, vector<4x64xf32> -> vector<4x64xf32>
    %264 = arith.addf %258, %263 : vector<4x64xf32>
    %265 = vector.extract_strided_slice %233 {offsets = [5, 0], sizes = [4, 320], strides = [1, 1]} : vector<10x320xf32> to vector<4x320xf32>
    %266 = arith.truncf %265 : vector<4x320xf32> to vector<4x320xbf16>
    %c5_165 = arith.constant 5 : index
    %c0_166 = arith.constant 0 : index
    %c0_167 = arith.constant 0 : index
    %267 = vector.load %arg8[%c5_165, %c0_166, %c0_167] : memref<7x320x64xbf16, #tpu.memory_space<vmem>>, vector<1x320x64xbf16>
    %268 = vector.shape_cast %267 : vector<1x320x64xbf16> to vector<320x64xbf16>
    %cst_168 = arith.constant dense<0.000000e+00> : vector<4x64xf32>
    %269 = tpu.matmul %266, %268, %cst_168 {dimension_numbers = #tpu.dot_dimension_numbers<[1], [0], [0], [1], [0, 0, 1, 1], [], []>} : vector<4x320xbf16>, vector<320x64xbf16>, vector<4x64xf32> -> vector<4x64xf32>
    %270 = arith.addf %264, %269 : vector<4x64xf32>
    %271 = vector.extract_strided_slice %233 {offsets = [6, 0], sizes = [4, 320], strides = [1, 1]} : vector<10x320xf32> to vector<4x320xf32>
    %272 = arith.truncf %271 : vector<4x320xf32> to vector<4x320xbf16>
    %c6_169 = arith.constant 6 : index
    %c0_170 = arith.constant 0 : index
    %c0_171 = arith.constant 0 : index
    %273 = vector.load %arg8[%c6_169, %c0_170, %c0_171] : memref<7x320x64xbf16, #tpu.memory_space<vmem>>, vector<1x320x64xbf16>
    %274 = vector.shape_cast %273 : vector<1x320x64xbf16> to vector<320x64xbf16>
    %cst_172 = arith.constant dense<0.000000e+00> : vector<4x64xf32>
    %275 = tpu.matmul %272, %274, %cst_172 {dimension_numbers = #tpu.dot_dimension_numbers<[1], [0], [0], [1], [0, 0, 1, 1], [], []>} : vector<4x320xbf16>, vector<320x64xbf16>, vector<4x64xf32> -> vector<4x64xf32>
    %276 = arith.addf %270, %275 : vector<4x64xf32>
    %c0_173 = arith.constant 0 : index
    %c0_174 = arith.constant 0 : index
    %277 = vector.load %arg9[%c0_173, %c0_174] : memref<1x64xf32, #tpu.memory_space<vmem>>, vector<1x64xf32>
    %278 = vector.broadcast %277 : vector<1x64xf32> to vector<4x64xf32>
    %279 = arith.mulf %276, %278 : vector<4x64xf32>
    %c0_175 = arith.constant 0 : index
    %c0_176 = arith.constant 0 : index
    %280 = vector.load %arg10[%c0_175, %c0_176] : memref<1x64xf32, #tpu.memory_space<vmem>>, vector<1x64xf32>
    %281 = vector.broadcast %280 : vector<1x64xf32> to vector<4x64xf32>
    %282 = arith.addf %279, %281 : vector<4x64xf32>
    %cst_177 = arith.constant 0.000000e+00 : f32
    %283 = vector.broadcast %cst_177 : f32 to vector<4x64xf32>
    %284 = arith.maximumf %282, %283 : vector<4x64xf32>
    %cst_178 = arith.constant 0.000000e+00 : f32
    %285 = vector.broadcast %cst_178 : f32 to vector<10x160xf32>
    %c0_179 = arith.constant 0 : index
    %c0_180 = arith.constant 0 : index
    %286 = vector.load %arg35[%c0_179, %c0_180] : memref<24x384xf32, #tpu.memory_space<vmem>>, vector<10x160xf32>
    tpu.vector_store %arg35[%c0_179, %c0_180], %285 {strides = array<i32>} : memref<24x384xf32, #tpu.memory_space<vmem>>, vector<10x160xf32>,
    %c3_181 = arith.constant 3 : index
    %c48_182 = arith.constant 48 : index
    %287 = vector.load %arg35[%c3_181, %c48_182] : memref<24x384xf32, #tpu.memory_space<vmem>>, vector<4x64xf32>
    tpu.vector_store %arg35[%c3_181, %c48_182], %284 {strides = array<i32>} : memref<24x384xf32, #tpu.memory_space<vmem>>, vector<4x64xf32>,
    %c0_183 = arith.constant 0 : index
    %c0_184 = arith.constant 0 : index
    %288 = vector.load %arg35[%c0_183, %c0_184] : memref<24x384xf32, #tpu.memory_space<vmem>>, vector<10x160xf32>
    %cst_185 = arith.constant 0.000000e+00 : f32
    %289 = vector.broadcast %cst_185 : f32 to vector<4x32xf32>
    %290 = vector.extract_strided_slice %288 {offsets = [0, 0], sizes = [4, 160], strides = [1, 1]} : vector<10x160xf32> to vector<4x160xf32>
    %291 = arith.truncf %290 : vector<4x160xf32> to vector<4x160xbf16>
    %c0_186 = arith.constant 0 : index
    %c0_187 = arith.constant 0 : index
    %c0_188 = arith.constant 0 : index
    %292 = vector.load %arg11[%c0_186, %c0_187, %c0_188] : memref<7x160x32xbf16, #tpu.memory_space<vmem>>, vector<1x160x32xbf16>
    %293 = vector.shape_cast %292 : vector<1x160x32xbf16> to vector<160x32xbf16>
    %cst_189 = arith.constant dense<0.000000e+00> : vector<4x32xf32>
    %294 = tpu.matmul %291, %293, %cst_189 {dimension_numbers = #tpu.dot_dimension_numbers<[1], [0], [0], [1], [0, 0, 1, 1], [], []>} : vector<4x160xbf16>, vector<160x32xbf16>, vector<4x32xf32> -> vector<4x32xf32>
    %295 = arith.addf %289, %294 : vector<4x32xf32>
    %296 = vector.extract_strided_slice %288 {offsets = [1, 0], sizes = [4, 160], strides = [1, 1]} : vector<10x160xf32> to vector<4x160xf32>
    %297 = arith.truncf %296 : vector<4x160xf32> to vector<4x160xbf16>
    %c1_190 = arith.constant 1 : index
    %c0_191 = arith.constant 0 : index
    %c0_192 = arith.constant 0 : index
    %298 = vector.load %arg11[%c1_190, %c0_191, %c0_192] : memref<7x160x32xbf16, #tpu.memory_space<vmem>>, vector<1x160x32xbf16>
    %299 = vector.shape_cast %298 : vector<1x160x32xbf16> to vector<160x32xbf16>
    %cst_193 = arith.constant dense<0.000000e+00> : vector<4x32xf32>
    %300 = tpu.matmul %297, %299, %cst_193 {dimension_numbers = #tpu.dot_dimension_numbers<[1], [0], [0], [1], [0, 0, 1, 1], [], []>} : vector<4x160xbf16>, vector<160x32xbf16>, vector<4x32xf32> -> vector<4x32xf32>
    %301 = arith.addf %295, %300 : vector<4x32xf32>
    %302 = vector.extract_strided_slice %288 {offsets = [2, 0], sizes = [4, 160], strides = [1, 1]} : vector<10x160xf32> to vector<4x160xf32>
    %303 = arith.truncf %302 : vector<4x160xf32> to vector<4x160xbf16>
    %c2_194 = arith.constant 2 : index
    %c0_195 = arith.constant 0 : index
    %c0_196 = arith.constant 0 : index
    %304 = vector.load %arg11[%c2_194, %c0_195, %c0_196] : memref<7x160x32xbf16, #tpu.memory_space<vmem>>, vector<1x160x32xbf16>
    %305 = vector.shape_cast %304 : vector<1x160x32xbf16> to vector<160x32xbf16>
    %cst_197 = arith.constant dense<0.000000e+00> : vector<4x32xf32>
    %306 = tpu.matmul %303, %305, %cst_197 {dimension_numbers = #tpu.dot_dimension_numbers<[1], [0], [0], [1], [0, 0, 1, 1], [], []>} : vector<4x160xbf16>, vector<160x32xbf16>, vector<4x32xf32> -> vector<4x32xf32>
    %307 = arith.addf %301, %306 : vector<4x32xf32>
    %308 = vector.extract_strided_slice %288 {offsets = [3, 0], sizes = [4, 160], strides = [1, 1]} : vector<10x160xf32> to vector<4x160xf32>
    %309 = arith.truncf %308 : vector<4x160xf32> to vector<4x160xbf16>
    %c3_198 = arith.constant 3 : index
    %c0_199 = arith.constant 0 : index
    %c0_200 = arith.constant 0 : index
    %310 = vector.load %arg11[%c3_198, %c0_199, %c0_200] : memref<7x160x32xbf16, #tpu.memory_space<vmem>>, vector<1x160x32xbf16>
    %311 = vector.shape_cast %310 : vector<1x160x32xbf16> to vector<160x32xbf16>
    %cst_201 = arith.constant dense<0.000000e+00> : vector<4x32xf32>
    %312 = tpu.matmul %309, %311, %cst_201 {dimension_numbers = #tpu.dot_dimension_numbers<[1], [0], [0], [1], [0, 0, 1, 1], [], []>} : vector<4x160xbf16>, vector<160x32xbf16>, vector<4x32xf32> -> vector<4x32xf32>
    %313 = arith.addf %307, %312 : vector<4x32xf32>
    %314 = vector.extract_strided_slice %288 {offsets = [4, 0], sizes = [4, 160], strides = [1, 1]} : vector<10x160xf32> to vector<4x160xf32>
    %315 = arith.truncf %314 : vector<4x160xf32> to vector<4x160xbf16>
    %c4_202 = arith.constant 4 : index
    %c0_203 = arith.constant 0 : index
    %c0_204 = arith.constant 0 : index
    %316 = vector.load %arg11[%c4_202, %c0_203, %c0_204] : memref<7x160x32xbf16, #tpu.memory_space<vmem>>, vector<1x160x32xbf16>
    %317 = vector.shape_cast %316 : vector<1x160x32xbf16> to vector<160x32xbf16>
    %cst_205 = arith.constant dense<0.000000e+00> : vector<4x32xf32>
    %318 = tpu.matmul %315, %317, %cst_205 {dimension_numbers = #tpu.dot_dimension_numbers<[1], [0], [0], [1], [0, 0, 1, 1], [], []>} : vector<4x160xbf16>, vector<160x32xbf16>, vector<4x32xf32> -> vector<4x32xf32>
    %319 = arith.addf %313, %318 : vector<4x32xf32>
    %320 = vector.extract_strided_slice %288 {offsets = [5, 0], sizes = [4, 160], strides = [1, 1]} : vector<10x160xf32> to vector<4x160xf32>
    %321 = arith.truncf %320 : vector<4x160xf32> to vector<4x160xbf16>
    %c5_206 = arith.constant 5 : index
    %c0_207 = arith.constant 0 : index
    %c0_208 = arith.constant 0 : index
    %322 = vector.load %arg11[%c5_206, %c0_207, %c0_208] : memref<7x160x32xbf16, #tpu.memory_space<vmem>>, vector<1x160x32xbf16>
    %323 = vector.shape_cast %322 : vector<1x160x32xbf16> to vector<160x32xbf16>
    %cst_209 = arith.constant dense<0.000000e+00> : vector<4x32xf32>
    %324 = tpu.matmul %321, %323, %cst_209 {dimension_numbers = #tpu.dot_dimension_numbers<[1], [0], [0], [1], [0, 0, 1, 1], [], []>} : vector<4x160xbf16>, vector<160x32xbf16>, vector<4x32xf32> -> vector<4x32xf32>
    %325 = arith.addf %319, %324 : vector<4x32xf32>
    %326 = vector.extract_strided_slice %288 {offsets = [6, 0], sizes = [4, 160], strides = [1, 1]} : vector<10x160xf32> to vector<4x160xf32>
    %327 = arith.truncf %326 : vector<4x160xf32> to vector<4x160xbf16>
    %c6_210 = arith.constant 6 : index
    %c0_211 = arith.constant 0 : index
    %c0_212 = arith.constant 0 : index
    %328 = vector.load %arg11[%c6_210, %c0_211, %c0_212] : memref<7x160x32xbf16, #tpu.memory_space<vmem>>, vector<1x160x32xbf16>
    %329 = vector.shape_cast %328 : vector<1x160x32xbf16> to vector<160x32xbf16>
    %cst_213 = arith.constant dense<0.000000e+00> : vector<4x32xf32>
    %330 = tpu.matmul %327, %329, %cst_213 {dimension_numbers = #tpu.dot_dimension_numbers<[1], [0], [0], [1], [0, 0, 1, 1], [], []>} : vector<4x160xbf16>, vector<160x32xbf16>, vector<4x32xf32> -> vector<4x32xf32>
    %331 = arith.addf %325, %330 : vector<4x32xf32>
    %c0_214 = arith.constant 0 : index
    %c0_215 = arith.constant 0 : index
    %332 = vector.load %arg12[%c0_214, %c0_215] : memref<1x32xf32, #tpu.memory_space<vmem>>, vector<1x32xf32>
    %333 = vector.broadcast %332 : vector<1x32xf32> to vector<4x32xf32>
    %334 = arith.mulf %331, %333 : vector<4x32xf32>
    %c0_216 = arith.constant 0 : index
    %c0_217 = arith.constant 0 : index
    %335 = vector.load %arg13[%c0_216, %c0_217] : memref<1x32xf32, #tpu.memory_space<vmem>>, vector<1x32xf32>
    %336 = vector.broadcast %335 : vector<1x32xf32> to vector<4x32xf32>
    %337 = arith.addf %334, %336 : vector<4x32xf32>
    %cst_218 = arith.constant 0.000000e+00 : f32
    %338 = vector.broadcast %cst_218 : f32 to vector<4x32xf32>
    %339 = arith.maximumf %337, %338 : vector<4x32xf32>
    %cst_219 = arith.constant 0.000000e+00 : f32
    %340 = vector.broadcast %cst_219 : f32 to vector<20x60xf32>
    %c0_220 = arith.constant 0 : index
    %c0_221 = arith.constant 0 : index
    %341 = vector.load %arg35[%c0_220, %c0_221] : memref<24x384xf32, #tpu.memory_space<vmem>>, vector<20x60xf32>
    tpu.vector_store %arg35[%c0_220, %c0_221], %340 {strides = array<i32>} : memref<24x384xf32, #tpu.memory_space<vmem>>, vector<20x60xf32>,
    %c2_222 = arith.constant 2 : index
    %c6_223 = arith.constant 6 : index
    %342 = vector.load %arg35[%c2_222, %c6_223] : memref<24x384xf32, #tpu.memory_space<vmem>>, vector<16x48xf32>
    tpu.vector_store %arg35[%c2_222, %c6_223], %1 {strides = array<i32>} : memref<24x384xf32, #tpu.memory_space<vmem>>, vector<16x48xf32>,
    %c0_224 = arith.constant 0 : index
    %c0_225 = arith.constant 0 : index
    %343 = vector.load %arg35[%c0_224, %c0_225] : memref<24x384xf32, #tpu.memory_space<vmem>>, vector<20x60xf32>
    %cst_226 = arith.constant 0.000000e+00 : f32
    %344 = vector.broadcast %cst_226 : f32 to vector<16x384xf32>
    %345 = vector.extract_strided_slice %343 {offsets = [0, 0], sizes = [16, 60], strides = [1, 1]} : vector<20x60xf32> to vector<16x60xf32>
    %346 = arith.truncf %345 : vector<16x60xf32> to vector<16x60xbf16>
    %c0_227 = arith.constant 0 : index
    %c0_228 = arith.constant 0 : index
    %c0_229 = arith.constant 0 : index
    %347 = vector.load %arg14[%c0_227, %c0_228, %c0_229] : memref<5x60x384xbf16, #tpu.memory_space<vmem>>, vector<1x60x384xbf16>
    %348 = vector.shape_cast %347 : vector<1x60x384xbf16> to vector<60x384xbf16>
    %cst_230 = arith.constant dense<0.000000e+00> : vector<16x384xf32>
    %349 = tpu.matmul %346, %348, %cst_230 {dimension_numbers = #tpu.dot_dimension_numbers<[1], [0], [0], [1], [0, 0, 1, 1], [], []>} : vector<16x60xbf16>, vector<60x384xbf16>, vector<16x384xf32> -> vector<16x384xf32>
    %350 = arith.addf %344, %349 : vector<16x384xf32>
    %351 = vector.extract_strided_slice %343 {offsets = [1, 0], sizes = [16, 60], strides = [1, 1]} : vector<20x60xf32> to vector<16x60xf32>
    %352 = arith.truncf %351 : vector<16x60xf32> to vector<16x60xbf16>
    %c1_231 = arith.constant 1 : index
    %c0_232 = arith.constant 0 : index
    %c0_233 = arith.constant 0 : index
    %353 = vector.load %arg14[%c1_231, %c0_232, %c0_233] : memref<5x60x384xbf16, #tpu.memory_space<vmem>>, vector<1x60x384xbf16>
    %354 = vector.shape_cast %353 : vector<1x60x384xbf16> to vector<60x384xbf16>
    %cst_234 = arith.constant dense<0.000000e+00> : vector<16x384xf32>
    %355 = tpu.matmul %352, %354, %cst_234 {dimension_numbers = #tpu.dot_dimension_numbers<[1], [0], [0], [1], [0, 0, 1, 1], [], []>} : vector<16x60xbf16>, vector<60x384xbf16>, vector<16x384xf32> -> vector<16x384xf32>
    %356 = arith.addf %350, %355 : vector<16x384xf32>
    %357 = vector.extract_strided_slice %343 {offsets = [2, 0], sizes = [16, 60], strides = [1, 1]} : vector<20x60xf32> to vector<16x60xf32>
    %358 = arith.truncf %357 : vector<16x60xf32> to vector<16x60xbf16>
    %c2_235 = arith.constant 2 : index
    %c0_236 = arith.constant 0 : index
    %c0_237 = arith.constant 0 : index
    %359 = vector.load %arg14[%c2_235, %c0_236, %c0_237] : memref<5x60x384xbf16, #tpu.memory_space<vmem>>, vector<1x60x384xbf16>
    %360 = vector.shape_cast %359 : vector<1x60x384xbf16> to vector<60x384xbf16>
    %cst_238 = arith.constant dense<0.000000e+00> : vector<16x384xf32>
    %361 = tpu.matmul %358, %360, %cst_238 {dimension_numbers = #tpu.dot_dimension_numbers<[1], [0], [0], [1], [0, 0, 1, 1], [], []>} : vector<16x60xbf16>, vector<60x384xbf16>, vector<16x384xf32> -> vector<16x384xf32>
    %362 = arith.addf %356, %361 : vector<16x384xf32>
    %363 = vector.extract_strided_slice %343 {offsets = [3, 0], sizes = [16, 60], strides = [1, 1]} : vector<20x60xf32> to vector<16x60xf32>
    %364 = arith.truncf %363 : vector<16x60xf32> to vector<16x60xbf16>
    %c3_239 = arith.constant 3 : index
    %c0_240 = arith.constant 0 : index
    %c0_241 = arith.constant 0 : index
    %365 = vector.load %arg14[%c3_239, %c0_240, %c0_241] : memref<5x60x384xbf16, #tpu.memory_space<vmem>>, vector<1x60x384xbf16>
    %366 = vector.shape_cast %365 : vector<1x60x384xbf16> to vector<60x384xbf16>
    %cst_242 = arith.constant dense<0.000000e+00> : vector<16x384xf32>
    %367 = tpu.matmul %364, %366, %cst_242 {dimension_numbers = #tpu.dot_dimension_numbers<[1], [0], [0], [1], [0, 0, 1, 1], [], []>} : vector<16x60xbf16>, vector<60x384xbf16>, vector<16x384xf32> -> vector<16x384xf32>
    %368 = arith.addf %362, %367 : vector<16x384xf32>
    %369 = vector.extract_strided_slice %343 {offsets = [4, 0], sizes = [16, 60], strides = [1, 1]} : vector<20x60xf32> to vector<16x60xf32>
    %370 = arith.truncf %369 : vector<16x60xf32> to vector<16x60xbf16>
    %c4_243 = arith.constant 4 : index
    %c0_244 = arith.constant 0 : index
    %c0_245 = arith.constant 0 : index
    %371 = vector.load %arg14[%c4_243, %c0_244, %c0_245] : memref<5x60x384xbf16, #tpu.memory_space<vmem>>, vector<1x60x384xbf16>
    %372 = vector.shape_cast %371 : vector<1x60x384xbf16> to vector<60x384xbf16>
    %cst_246 = arith.constant dense<0.000000e+00> : vector<16x384xf32>
    %373 = tpu.matmul %370, %372, %cst_246 {dimension_numbers = #tpu.dot_dimension_numbers<[1], [0], [0], [1], [0, 0, 1, 1], [], []>} : vector<16x60xbf16>, vector<60x384xbf16>, vector<16x384xf32> -> vector<16x384xf32>
    %374 = arith.addf %368, %373 : vector<16x384xf32>
    %c0_247 = arith.constant 0 : index
    %c0_248 = arith.constant 0 : index
    %375 = vector.load %arg15[%c0_247, %c0_248] : memref<1x384xf32, #tpu.memory_space<vmem>>, vector<1x384xf32>
    %376 = vector.broadcast %375 : vector<1x384xf32> to vector<16x384xf32>
    %377 = arith.mulf %374, %376 : vector<16x384xf32>
    %c0_249 = arith.constant 0 : index
    %c0_250 = arith.constant 0 : index
    %378 = vector.load %arg16[%c0_249, %c0_250] : memref<1x384xf32, #tpu.memory_space<vmem>>, vector<1x384xf32>
    %379 = vector.broadcast %378 : vector<1x384xf32> to vector<16x384xf32>
    %380 = arith.addf %377, %379 : vector<16x384xf32>
    %cst_251 = arith.constant 0.000000e+00 : f32
    %381 = vector.broadcast %cst_251 : f32 to vector<16x384xf32>
    %382 = arith.maximumf %380, %381 : vector<16x384xf32>
    %383 = vector.extract_strided_slice %382 {offsets = [0, 0], sizes = [1, 384], strides = [1, 1]} : vector<16x384xf32> to vector<1x384xf32>
    %384 = vector.extract_strided_slice %382 {offsets = [1, 0], sizes = [1, 384], strides = [1, 1]} : vector<16x384xf32> to vector<1x384xf32>
    %385 = arith.maximumf %383, %384 : vector<1x384xf32>
    %c0_252 = arith.constant 0 : index
    %c0_253 = arith.constant 0 : index
    %386 = vector.load %arg35[%c0_252, %c0_253] : memref<24x384xf32, #tpu.memory_space<vmem>>, vector<1x384xf32>
    tpu.vector_store %arg35[%c0_252, %c0_253], %385 {strides = array<i32>} : memref<24x384xf32, #tpu.memory_space<vmem>>, vector<1x384xf32>,
    %387 = vector.extract_strided_slice %382 {offsets = [2, 0], sizes = [1, 384], strides = [1, 1]} : vector<16x384xf32> to vector<1x384xf32>
    %388 = vector.extract_strided_slice %382 {offsets = [3, 0], sizes = [1, 384], strides = [1, 1]} : vector<16x384xf32> to vector<1x384xf32>
    %389 = arith.maximumf %387, %388 : vector<1x384xf32>
    %c1_254 = arith.constant 1 : index
    %c0_255 = arith.constant 0 : index
    %390 = vector.load %arg35[%c1_254, %c0_255] : memref<24x384xf32, #tpu.memory_space<vmem>>, vector<1x384xf32>
    tpu.vector_store %arg35[%c1_254, %c0_255], %389 {strides = array<i32>} : memref<24x384xf32, #tpu.memory_space<vmem>>, vector<1x384xf32>,
    %391 = vector.extract_strided_slice %382 {offsets = [4, 0], sizes = [1, 384], strides = [1, 1]} : vector<16x384xf32> to vector<1x384xf32>
    %392 = vector.extract_strided_slice %382 {offsets = [5, 0], sizes = [1, 384], strides = [1, 1]} : vector<16x384xf32> to vector<1x384xf32>
    %393 = arith.maximumf %391, %392 : vector<1x384xf32>
    %c2_256 = arith.constant 2 : index
    %c0_257 = arith.constant 0 : index
    %394 = vector.load %arg35[%c2_256, %c0_257] : memref<24x384xf32, #tpu.memory_space<vmem>>, vector<1x384xf32>
    tpu.vector_store %arg35[%c2_256, %c0_257], %393 {strides = array<i32>} : memref<24x384xf32, #tpu.memory_space<vmem>>, vector<1x384xf32>,
    %395 = vector.extract_strided_slice %382 {offsets = [6, 0], sizes = [1, 384], strides = [1, 1]} : vector<16x384xf32> to vector<1x384xf32>
    %396 = vector.extract_strided_slice %382 {offsets = [7, 0], sizes = [1, 384], strides = [1, 1]} : vector<16x384xf32> to vector<1x384xf32>
    %397 = arith.maximumf %395, %396 : vector<1x384xf32>
    %c3_258 = arith.constant 3 : index
    %c0_259 = arith.constant 0 : index
    %398 = vector.load %arg35[%c3_258, %c0_259] : memref<24x384xf32, #tpu.memory_space<vmem>>, vector<1x384xf32>
    tpu.vector_store %arg35[%c3_258, %c0_259], %397 {strides = array<i32>} : memref<24x384xf32, #tpu.memory_space<vmem>>, vector<1x384xf32>,
    %399 = vector.extract_strided_slice %382 {offsets = [8, 0], sizes = [1, 384], strides = [1, 1]} : vector<16x384xf32> to vector<1x384xf32>
    %400 = vector.extract_strided_slice %382 {offsets = [9, 0], sizes = [1, 384], strides = [1, 1]} : vector<16x384xf32> to vector<1x384xf32>
    %401 = arith.maximumf %399, %400 : vector<1x384xf32>
    %c4_260 = arith.constant 4 : index
    %c0_261 = arith.constant 0 : index
    %402 = vector.load %arg35[%c4_260, %c0_261] : memref<24x384xf32, #tpu.memory_space<vmem>>, vector<1x384xf32>
    tpu.vector_store %arg35[%c4_260, %c0_261], %401 {strides = array<i32>} : memref<24x384xf32, #tpu.memory_space<vmem>>, vector<1x384xf32>,
    %403 = vector.extract_strided_slice %382 {offsets = [10, 0], sizes = [1, 384], strides = [1, 1]} : vector<16x384xf32> to vector<1x384xf32>
    %404 = vector.extract_strided_slice %382 {offsets = [11, 0], sizes = [1, 384], strides = [1, 1]} : vector<16x384xf32> to vector<1x384xf32>
    %405 = arith.maximumf %403, %404 : vector<1x384xf32>
    %c5_262 = arith.constant 5 : index
    %c0_263 = arith.constant 0 : index
    %406 = vector.load %arg35[%c5_262, %c0_263] : memref<24x384xf32, #tpu.memory_space<vmem>>, vector<1x384xf32>
    tpu.vector_store %arg35[%c5_262, %c0_263], %405 {strides = array<i32>} : memref<24x384xf32, #tpu.memory_space<vmem>>, vector<1x384xf32>,
    %407 = vector.extract_strided_slice %382 {offsets = [12, 0], sizes = [1, 384], strides = [1, 1]} : vector<16x384xf32> to vector<1x384xf32>
    %408 = vector.extract_strided_slice %382 {offsets = [13, 0], sizes = [1, 384], strides = [1, 1]} : vector<16x384xf32> to vector<1x384xf32>
    %409 = arith.maximumf %407, %408 : vector<1x384xf32>
    %c6_264 = arith.constant 6 : index
    %c0_265 = arith.constant 0 : index
    %410 = vector.load %arg35[%c6_264, %c0_265] : memref<24x384xf32, #tpu.memory_space<vmem>>, vector<1x384xf32>
    tpu.vector_store %arg35[%c6_264, %c0_265], %409 {strides = array<i32>} : memref<24x384xf32, #tpu.memory_space<vmem>>, vector<1x384xf32>,
    %411 = vector.extract_strided_slice %382 {offsets = [14, 0], sizes = [1, 384], strides = [1, 1]} : vector<16x384xf32> to vector<1x384xf32>
    %412 = vector.extract_strided_slice %382 {offsets = [15, 0], sizes = [1, 384], strides = [1, 1]} : vector<16x384xf32> to vector<1x384xf32>
    %413 = arith.maximumf %411, %412 : vector<1x384xf32>
    %c7_266 = arith.constant 7 : index
    %c0_267 = arith.constant 0 : index
    %414 = vector.load %arg35[%c7_266, %c0_267] : memref<24x384xf32, #tpu.memory_space<vmem>>, vector<1x384xf32>
    tpu.vector_store %arg35[%c7_266, %c0_267], %413 {strides = array<i32>} : memref<24x384xf32, #tpu.memory_space<vmem>>, vector<1x384xf32>,
    %c0_268 = arith.constant 0 : index
    %c0_269 = arith.constant 0 : index
    %415 = vector.load %arg35[%c0_268, %c0_269] : memref<24x384xf32, #tpu.memory_space<vmem>>, vector<8x384xf32>
    %416 = vector.extract_strided_slice %415 {offsets = [0, 0], sizes = [8, 24], strides = [1, 1]} : vector<8x384xf32> to vector<8x24xf32>
    %417 = vector.extract_strided_slice %415 {offsets = [0, 24], sizes = [8, 24], strides = [1, 1]} : vector<8x384xf32> to vector<8x24xf32>
    %418 = arith.maximumf %416, %417 : vector<8x24xf32>
    %c0_270 = arith.constant 0 : index
    %c0_271 = arith.constant 0 : index
    %419 = vector.load %arg36[%c0_270, %c0_271] : memref<8x192xf32, #tpu.memory_space<vmem>>, vector<8x24xf32>
    tpu.vector_store %arg36[%c0_270, %c0_271], %418 {strides = array<i32>} : memref<8x192xf32, #tpu.memory_space<vmem>>, vector<8x24xf32>,
    %420 = vector.extract_strided_slice %415 {offsets = [0, 48], sizes = [8, 24], strides = [1, 1]} : vector<8x384xf32> to vector<8x24xf32>
    %421 = vector.extract_strided_slice %415 {offsets = [0, 72], sizes = [8, 24], strides = [1, 1]} : vector<8x384xf32> to vector<8x24xf32>
    %422 = arith.maximumf %420, %421 : vector<8x24xf32>
    %c0_272 = arith.constant 0 : index
    %c24 = arith.constant 24 : index
    %423 = vector.load %arg36[%c0_272, %c24] : memref<8x192xf32, #tpu.memory_space<vmem>>, vector<8x24xf32>
    tpu.vector_store %arg36[%c0_272, %c24], %422 {strides = array<i32>} : memref<8x192xf32, #tpu.memory_space<vmem>>, vector<8x24xf32>,
    %424 = vector.extract_strided_slice %415 {offsets = [0, 96], sizes = [8, 24], strides = [1, 1]} : vector<8x384xf32> to vector<8x24xf32>
    %425 = vector.extract_strided_slice %415 {offsets = [0, 120], sizes = [8, 24], strides = [1, 1]} : vector<8x384xf32> to vector<8x24xf32>
    %426 = arith.maximumf %424, %425 : vector<8x24xf32>
    %c0_273 = arith.constant 0 : index
    %c48_274 = arith.constant 48 : index
    %427 = vector.load %arg36[%c0_273, %c48_274] : memref<8x192xf32, #tpu.memory_space<vmem>>, vector<8x24xf32>
    tpu.vector_store %arg36[%c0_273, %c48_274], %426 {strides = array<i32>} : memref<8x192xf32, #tpu.memory_space<vmem>>, vector<8x24xf32>,
    %428 = vector.extract_strided_slice %415 {offsets = [0, 144], sizes = [8, 24], strides = [1, 1]} : vector<8x384xf32> to vector<8x24xf32>
    %429 = vector.extract_strided_slice %415 {offsets = [0, 168], sizes = [8, 24], strides = [1, 1]} : vector<8x384xf32> to vector<8x24xf32>
    %430 = arith.maximumf %428, %429 : vector<8x24xf32>
    %c0_275 = arith.constant 0 : index
    %c72 = arith.constant 72 : index
    %431 = vector.load %arg36[%c0_275, %c72] : memref<8x192xf32, #tpu.memory_space<vmem>>, vector<8x24xf32>
    tpu.vector_store %arg36[%c0_275, %c72], %430 {strides = array<i32>} : memref<8x192xf32, #tpu.memory_space<vmem>>, vector<8x24xf32>,
    %432 = vector.extract_strided_slice %415 {offsets = [0, 192], sizes = [8, 24], strides = [1, 1]} : vector<8x384xf32> to vector<8x24xf32>
    %433 = vector.extract_strided_slice %415 {offsets = [0, 216], sizes = [8, 24], strides = [1, 1]} : vector<8x384xf32> to vector<8x24xf32>
    %434 = arith.maximumf %432, %433 : vector<8x24xf32>
    %c0_276 = arith.constant 0 : index
    %c96_277 = arith.constant 96 : index
    %435 = vector.load %arg36[%c0_276, %c96_277] : memref<8x192xf32, #tpu.memory_space<vmem>>, vector<8x24xf32>
    tpu.vector_store %arg36[%c0_276, %c96_277], %434 {strides = array<i32>} : memref<8x192xf32, #tpu.memory_space<vmem>>, vector<8x24xf32>,
    %436 = vector.extract_strided_slice %415 {offsets = [0, 240], sizes = [8, 24], strides = [1, 1]} : vector<8x384xf32> to vector<8x24xf32>
    %437 = vector.extract_strided_slice %415 {offsets = [0, 264], sizes = [8, 24], strides = [1, 1]} : vector<8x384xf32> to vector<8x24xf32>
    %438 = arith.maximumf %436, %437 : vector<8x24xf32>
    %c0_278 = arith.constant 0 : index
    %c120 = arith.constant 120 : index
    %439 = vector.load %arg36[%c0_278, %c120] : memref<8x192xf32, #tpu.memory_space<vmem>>, vector<8x24xf32>
    tpu.vector_store %arg36[%c0_278, %c120], %438 {strides = array<i32>} : memref<8x192xf32, #tpu.memory_space<vmem>>, vector<8x24xf32>,
    %440 = vector.extract_strided_slice %415 {offsets = [0, 288], sizes = [8, 24], strides = [1, 1]} : vector<8x384xf32> to vector<8x24xf32>
    %441 = vector.extract_strided_slice %415 {offsets = [0, 312], sizes = [8, 24], strides = [1, 1]} : vector<8x384xf32> to vector<8x24xf32>
    %442 = arith.maximumf %440, %441 : vector<8x24xf32>
    %c0_279 = arith.constant 0 : index
    %c144 = arith.constant 144 : index
    %443 = vector.load %arg36[%c0_279, %c144] : memref<8x192xf32, #tpu.memory_space<vmem>>, vector<8x24xf32>
    tpu.vector_store %arg36[%c0_279, %c144], %442 {strides = array<i32>} : memref<8x192xf32, #tpu.memory_space<vmem>>, vector<8x24xf32>,
    %444 = vector.extract_strided_slice %415 {offsets = [0, 336], sizes = [8, 24], strides = [1, 1]} : vector<8x384xf32> to vector<8x24xf32>
    %445 = vector.extract_strided_slice %415 {offsets = [0, 360], sizes = [8, 24], strides = [1, 1]} : vector<8x384xf32> to vector<8x24xf32>
    %446 = arith.maximumf %444, %445 : vector<8x24xf32>
    %c0_280 = arith.constant 0 : index
    %c168 = arith.constant 168 : index
    %447 = vector.load %arg36[%c0_280, %c168] : memref<8x192xf32, #tpu.memory_space<vmem>>, vector<8x24xf32>
    tpu.vector_store %arg36[%c0_280, %c168], %446 {strides = array<i32>} : memref<8x192xf32, #tpu.memory_space<vmem>>, vector<8x24xf32>,
    %c0_281 = arith.constant 0 : index
    %c0_282 = arith.constant 0 : index
    %448 = vector.load %arg36[%c0_281, %c0_282] : memref<8x192xf32, #tpu.memory_space<vmem>>, vector<8x192xf32>
    %c0_283 = arith.constant 0 : index
    %c0_284 = arith.constant 0 : index
    %c0_285 = arith.constant 0 : index
    %449 = vector.load %arg32[%c0_283, %c0_284, %c0_285] : memref<1x8x192xf32, #tpu.memory_space<vmem>>, vector<1x8x192xf32>
    %450 = vector.shape_cast %449 : vector<1x8x192xf32> to vector<8x192xf32>
    %451 = vector.shape_cast %448 : vector<8x192xf32> to vector<1x8x192xf32>
    tpu.vector_store %arg32[%c0_283, %c0_284, %c0_285], %451 {strides = array<i32>} : memref<1x8x192xf32, #tpu.memory_space<vmem>>, vector<1x8x192xf32>,
    %cst_286 = arith.constant 0.000000e+00 : f32
    %452 = vector.broadcast %cst_286 : f32 to vector<10x240xf32>
    %c0_287 = arith.constant 0 : index
    %c0_288 = arith.constant 0 : index
    %453 = vector.load %arg35[%c0_287, %c0_288] : memref<24x384xf32, #tpu.memory_space<vmem>>, vector<10x240xf32>
    tpu.vector_store %arg35[%c0_287, %c0_288], %452 {strides = array<i32>} : memref<24x384xf32, #tpu.memory_space<vmem>>, vector<10x240xf32>,
    %c1_289 = arith.constant 1 : index
    %c24_290 = arith.constant 24 : index
    %454 = vector.load %arg35[%c1_289, %c24_290] : memref<24x384xf32, #tpu.memory_space<vmem>>, vector<8x192xf32>
    tpu.vector_store %arg35[%c1_289, %c24_290], %448 {strides = array<i32>} : memref<24x384xf32, #tpu.memory_space<vmem>>, vector<8x192xf32>,
    %c0_291 = arith.constant 0 : index
    %c0_292 = arith.constant 0 : index
    %455 = vector.load %arg35[%c0_291, %c0_292] : memref<24x384xf32, #tpu.memory_space<vmem>>, vector<10x240xf32>
    %cst_293 = arith.constant 0.000000e+00 : f32
    %456 = vector.broadcast %cst_293 : f32 to vector<8x384xf32>
    %457 = vector.extract_strided_slice %455 {offsets = [0, 0], sizes = [8, 240], strides = [1, 1]} : vector<10x240xf32> to vector<8x240xf32>
    %458 = arith.truncf %457 : vector<8x240xf32> to vector<8x240xbf16>
    %c0_294 = arith.constant 0 : index
    %c0_295 = arith.constant 0 : index
    %c0_296 = arith.constant 0 : index
    %459 = vector.load %arg17[%c0_294, %c0_295, %c0_296] : memref<3x240x384xbf16, #tpu.memory_space<vmem>>, vector<1x240x384xbf16>
    %460 = vector.shape_cast %459 : vector<1x240x384xbf16> to vector<240x384xbf16>
    %cst_297 = arith.constant dense<0.000000e+00> : vector<8x384xf32>
    %461 = tpu.matmul %458, %460, %cst_297 {dimension_numbers = #tpu.dot_dimension_numbers<[1], [0], [0], [1], [0, 0, 1, 1], [], []>} : vector<8x240xbf16>, vector<240x384xbf16>, vector<8x384xf32> -> vector<8x384xf32>
    %462 = arith.addf %456, %461 : vector<8x384xf32>
    %463 = vector.extract_strided_slice %455 {offsets = [1, 0], sizes = [8, 240], strides = [1, 1]} : vector<10x240xf32> to vector<8x240xf32>
    %464 = arith.truncf %463 : vector<8x240xf32> to vector<8x240xbf16>
    %c1_298 = arith.constant 1 : index
    %c0_299 = arith.constant 0 : index
    %c0_300 = arith.constant 0 : index
    %465 = vector.load %arg17[%c1_298, %c0_299, %c0_300] : memref<3x240x384xbf16, #tpu.memory_space<vmem>>, vector<1x240x384xbf16>
    %466 = vector.shape_cast %465 : vector<1x240x384xbf16> to vector<240x384xbf16>
    %cst_301 = arith.constant dense<0.000000e+00> : vector<8x384xf32>
    %467 = tpu.matmul %464, %466, %cst_301 {dimension_numbers = #tpu.dot_dimension_numbers<[1], [0], [0], [1], [0, 0, 1, 1], [], []>} : vector<8x240xbf16>, vector<240x384xbf16>, vector<8x384xf32> -> vector<8x384xf32>
    %468 = arith.addf %462, %467 : vector<8x384xf32>
    %469 = vector.extract_strided_slice %455 {offsets = [2, 0], sizes = [8, 240], strides = [1, 1]} : vector<10x240xf32> to vector<8x240xf32>
    %470 = arith.truncf %469 : vector<8x240xf32> to vector<8x240xbf16>
    %c2_302 = arith.constant 2 : index
    %c0_303 = arith.constant 0 : index
    %c0_304 = arith.constant 0 : index
    %471 = vector.load %arg17[%c2_302, %c0_303, %c0_304] : memref<3x240x384xbf16, #tpu.memory_space<vmem>>, vector<1x240x384xbf16>
    %472 = vector.shape_cast %471 : vector<1x240x384xbf16> to vector<240x384xbf16>
    %cst_305 = arith.constant dense<0.000000e+00> : vector<8x384xf32>
    %473 = tpu.matmul %470, %472, %cst_305 {dimension_numbers = #tpu.dot_dimension_numbers<[1], [0], [0], [1], [0, 0, 1, 1], [], []>} : vector<8x240xbf16>, vector<240x384xbf16>, vector<8x384xf32> -> vector<8x384xf32>
    %474 = arith.addf %468, %473 : vector<8x384xf32>
    %c0_306 = arith.constant 0 : index
    %c0_307 = arith.constant 0 : index
    %475 = vector.load %arg18[%c0_306, %c0_307] : memref<1x384xf32, #tpu.memory_space<vmem>>, vector<1x384xf32>
    %476 = vector.broadcast %475 : vector<1x384xf32> to vector<8x384xf32>
    %477 = arith.mulf %474, %476 : vector<8x384xf32>
    %c0_308 = arith.constant 0 : index
    %c0_309 = arith.constant 0 : index
    %478 = vector.load %arg19[%c0_308, %c0_309] : memref<1x384xf32, #tpu.memory_space<vmem>>, vector<1x384xf32>
    %479 = vector.broadcast %478 : vector<1x384xf32> to vector<8x384xf32>
    %480 = arith.addf %477, %479 : vector<8x384xf32>
    %cst_310 = arith.constant 0.000000e+00 : f32
    %481 = vector.broadcast %cst_310 : f32 to vector<8x384xf32>
    %482 = arith.maximumf %480, %481 : vector<8x384xf32>
    %c0_311 = arith.constant 0 : index
    %c0_312 = arith.constant 0 : index
    %c0_313 = arith.constant 0 : index
    %483 = vector.load %arg34[%c0_311, %c0_312, %c0_313] : memref<1x8x384xf32, #tpu.memory_space<vmem>>, vector<1x8x384xf32>
    %484 = vector.shape_cast %483 : vector<1x8x384xf32> to vector<8x384xf32>
    %485 = vector.shape_cast %482 : vector<8x384xf32> to vector<1x8x384xf32>
    tpu.vector_store %arg34[%c0_311, %c0_312, %c0_313], %485 {strides = array<i32>} : memref<1x8x384xf32, #tpu.memory_space<vmem>>, vector<1x8x384xf32>,
    %486 = vector.extract_strided_slice %482 {offsets = [0, 0], sizes = [1, 384], strides = [1, 1]} : vector<8x384xf32> to vector<1x384xf32>
    %487 = vector.extract_strided_slice %482 {offsets = [1, 0], sizes = [1, 384], strides = [1, 1]} : vector<8x384xf32> to vector<1x384xf32>
    %488 = arith.maximumf %486, %487 : vector<1x384xf32>
    %c0_314 = arith.constant 0 : index
    %c0_315 = arith.constant 0 : index
    %489 = vector.load %arg35[%c0_314, %c0_315] : memref<24x384xf32, #tpu.memory_space<vmem>>, vector<1x384xf32>
    tpu.vector_store %arg35[%c0_314, %c0_315], %488 {strides = array<i32>} : memref<24x384xf32, #tpu.memory_space<vmem>>, vector<1x384xf32>,
    %490 = vector.extract_strided_slice %482 {offsets = [2, 0], sizes = [1, 384], strides = [1, 1]} : vector<8x384xf32> to vector<1x384xf32>
    %491 = vector.extract_strided_slice %482 {offsets = [3, 0], sizes = [1, 384], strides = [1, 1]} : vector<8x384xf32> to vector<1x384xf32>
    %492 = arith.maximumf %490, %491 : vector<1x384xf32>
    %c1_316 = arith.constant 1 : index
    %c0_317 = arith.constant 0 : index
    %493 = vector.load %arg35[%c1_316, %c0_317] : memref<24x384xf32, #tpu.memory_space<vmem>>, vector<1x384xf32>
    tpu.vector_store %arg35[%c1_316, %c0_317], %492 {strides = array<i32>} : memref<24x384xf32, #tpu.memory_space<vmem>>, vector<1x384xf32>,
    %494 = vector.extract_strided_slice %482 {offsets = [4, 0], sizes = [1, 384], strides = [1, 1]} : vector<8x384xf32> to vector<1x384xf32>
    %495 = vector.extract_strided_slice %482 {offsets = [5, 0], sizes = [1, 384], strides = [1, 1]} : vector<8x384xf32> to vector<1x384xf32>
    %496 = arith.maximumf %494, %495 : vector<1x384xf32>
    %c2_318 = arith.constant 2 : index
    %c0_319 = arith.constant 0 : index
    %497 = vector.load %arg35[%c2_318, %c0_319] : memref<24x384xf32, #tpu.memory_space<vmem>>, vector<1x384xf32>
    tpu.vector_store %arg35[%c2_318, %c0_319], %496 {strides = array<i32>} : memref<24x384xf32, #tpu.memory_space<vmem>>, vector<1x384xf32>,
    %498 = vector.extract_strided_slice %482 {offsets = [6, 0], sizes = [1, 384], strides = [1, 1]} : vector<8x384xf32> to vector<1x384xf32>
    %499 = vector.extract_strided_slice %482 {offsets = [7, 0], sizes = [1, 384], strides = [1, 1]} : vector<8x384xf32> to vector<1x384xf32>
    %500 = arith.maximumf %498, %499 : vector<1x384xf32>
    %c3_320 = arith.constant 3 : index
    %c0_321 = arith.constant 0 : index
    %501 = vector.load %arg35[%c3_320, %c0_321] : memref<24x384xf32, #tpu.memory_space<vmem>>, vector<1x384xf32>
    tpu.vector_store %arg35[%c3_320, %c0_321], %500 {strides = array<i32>} : memref<24x384xf32, #tpu.memory_space<vmem>>, vector<1x384xf32>,
    %c0_322 = arith.constant 0 : index
    %c0_323 = arith.constant 0 : index
    %502 = vector.load %arg35[%c0_322, %c0_323] : memref<24x384xf32, #tpu.memory_space<vmem>>, vector<4x384xf32>
    %503 = vector.extract_strided_slice %502 {offsets = [0, 0], sizes = [4, 48], strides = [1, 1]} : vector<4x384xf32> to vector<4x48xf32>
    %504 = vector.extract_strided_slice %502 {offsets = [0, 48], sizes = [4, 48], strides = [1, 1]} : vector<4x384xf32> to vector<4x48xf32>
    %505 = arith.maximumf %503, %504 : vector<4x48xf32>
    %c0_324 = arith.constant 0 : index
    %c0_325 = arith.constant 0 : index
    %506 = vector.load %arg36[%c0_324, %c0_325] : memref<8x192xf32, #tpu.memory_space<vmem>>, vector<4x48xf32>
    tpu.vector_store %arg36[%c0_324, %c0_325], %505 {strides = array<i32>} : memref<8x192xf32, #tpu.memory_space<vmem>>, vector<4x48xf32>,
    %507 = vector.extract_strided_slice %502 {offsets = [0, 96], sizes = [4, 48], strides = [1, 1]} : vector<4x384xf32> to vector<4x48xf32>
    %508 = vector.extract_strided_slice %502 {offsets = [0, 144], sizes = [4, 48], strides = [1, 1]} : vector<4x384xf32> to vector<4x48xf32>
    %509 = arith.maximumf %507, %508 : vector<4x48xf32>
    %c0_326 = arith.constant 0 : index
    %c48_327 = arith.constant 48 : index
    %510 = vector.load %arg36[%c0_326, %c48_327] : memref<8x192xf32, #tpu.memory_space<vmem>>, vector<4x48xf32>
    tpu.vector_store %arg36[%c0_326, %c48_327], %509 {strides = array<i32>} : memref<8x192xf32, #tpu.memory_space<vmem>>, vector<4x48xf32>,
    %511 = vector.extract_strided_slice %502 {offsets = [0, 192], sizes = [4, 48], strides = [1, 1]} : vector<4x384xf32> to vector<4x48xf32>
    %512 = vector.extract_strided_slice %502 {offsets = [0, 240], sizes = [4, 48], strides = [1, 1]} : vector<4x384xf32> to vector<4x48xf32>
    %513 = arith.maximumf %511, %512 : vector<4x48xf32>
    %c0_328 = arith.constant 0 : index
    %c96_329 = arith.constant 96 : index
    %514 = vector.load %arg36[%c0_328, %c96_329] : memref<8x192xf32, #tpu.memory_space<vmem>>, vector<4x48xf32>
    tpu.vector_store %arg36[%c0_328, %c96_329], %513 {strides = array<i32>} : memref<8x192xf32, #tpu.memory_space<vmem>>, vector<4x48xf32>,
    %515 = vector.extract_strided_slice %502 {offsets = [0, 288], sizes = [4, 48], strides = [1, 1]} : vector<4x384xf32> to vector<4x48xf32>
    %516 = vector.extract_strided_slice %502 {offsets = [0, 336], sizes = [4, 48], strides = [1, 1]} : vector<4x384xf32> to vector<4x48xf32>
    %517 = arith.maximumf %515, %516 : vector<4x48xf32>
    %c0_330 = arith.constant 0 : index
    %c144_331 = arith.constant 144 : index
    %518 = vector.load %arg36[%c0_330, %c144_331] : memref<8x192xf32, #tpu.memory_space<vmem>>, vector<4x48xf32>
    tpu.vector_store %arg36[%c0_330, %c144_331], %517 {strides = array<i32>} : memref<8x192xf32, #tpu.memory_space<vmem>>, vector<4x48xf32>,
    %c0_332 = arith.constant 0 : index
    %c0_333 = arith.constant 0 : index
    %519 = vector.load %arg36[%c0_332, %c0_333] : memref<8x192xf32, #tpu.memory_space<vmem>>, vector<4x192xf32>
    %cst_334 = arith.constant 0.000000e+00 : f32
    %520 = vector.broadcast %cst_334 : f32 to vector<6x288xf32>
    %c0_335 = arith.constant 0 : index
    %c0_336 = arith.constant 0 : index
    %521 = vector.load %arg35[%c0_335, %c0_336] : memref<24x384xf32, #tpu.memory_space<vmem>>, vector<6x288xf32>
    tpu.vector_store %arg35[%c0_335, %c0_336], %520 {strides = array<i32>} : memref<24x384xf32, #tpu.memory_space<vmem>>, vector<6x288xf32>,
    %c1_337 = arith.constant 1 : index
    %c48_338 = arith.constant 48 : index
    %522 = vector.load %arg35[%c1_337, %c48_338] : memref<24x384xf32, #tpu.memory_space<vmem>>, vector<4x192xf32>
    tpu.vector_store %arg35[%c1_337, %c48_338], %519 {strides = array<i32>} : memref<24x384xf32, #tpu.memory_space<vmem>>, vector<4x192xf32>,
    %c0_339 = arith.constant 0 : index
    %c0_340 = arith.constant 0 : index
    %523 = vector.load %arg35[%c0_339, %c0_340] : memref<24x384xf32, #tpu.memory_space<vmem>>, vector<6x288xf32>
    %cst_341 = arith.constant 0.000000e+00 : f32
    %524 = vector.broadcast %cst_341 : f32 to vector<4x96xf32>
    %525 = vector.extract_strided_slice %523 {offsets = [0, 0], sizes = [4, 288], strides = [1, 1]} : vector<6x288xf32> to vector<4x288xf32>
    %526 = arith.truncf %525 : vector<4x288xf32> to vector<4x288xbf16>
    %c0_342 = arith.constant 0 : index
    %c0_343 = arith.constant 0 : index
    %c0_344 = arith.constant 0 : index
    %527 = vector.load %arg20[%c0_342, %c0_343, %c0_344] : memref<3x288x96xbf16, #tpu.memory_space<vmem>>, vector<1x288x96xbf16>
    %528 = vector.shape_cast %527 : vector<1x288x96xbf16> to vector<288x96xbf16>
    %cst_345 = arith.constant dense<0.000000e+00> : vector<4x96xf32>
    %529 = tpu.matmul %526, %528, %cst_345 {dimension_numbers = #tpu.dot_dimension_numbers<[1], [0], [0], [1], [0, 0, 1, 1], [], []>} : vector<4x288xbf16>, vector<288x96xbf16>, vector<4x96xf32> -> vector<4x96xf32>
    %530 = arith.addf %524, %529 : vector<4x96xf32>
    %531 = vector.extract_strided_slice %523 {offsets = [1, 0], sizes = [4, 288], strides = [1, 1]} : vector<6x288xf32> to vector<4x288xf32>
    %532 = arith.truncf %531 : vector<4x288xf32> to vector<4x288xbf16>
    %c1_346 = arith.constant 1 : index
    %c0_347 = arith.constant 0 : index
    %c0_348 = arith.constant 0 : index
    %533 = vector.load %arg20[%c1_346, %c0_347, %c0_348] : memref<3x288x96xbf16, #tpu.memory_space<vmem>>, vector<1x288x96xbf16>
    %534 = vector.shape_cast %533 : vector<1x288x96xbf16> to vector<288x96xbf16>
    %cst_349 = arith.constant dense<0.000000e+00> : vector<4x96xf32>
    %535 = tpu.matmul %532, %534, %cst_349 {dimension_numbers = #tpu.dot_dimension_numbers<[1], [0], [0], [1], [0, 0, 1, 1], [], []>} : vector<4x288xbf16>, vector<288x96xbf16>, vector<4x96xf32> -> vector<4x96xf32>
    %536 = arith.addf %530, %535 : vector<4x96xf32>
    %537 = vector.extract_strided_slice %523 {offsets = [2, 0], sizes = [4, 288], strides = [1, 1]} : vector<6x288xf32> to vector<4x288xf32>
    %538 = arith.truncf %537 : vector<4x288xf32> to vector<4x288xbf16>
    %c2_350 = arith.constant 2 : index
    %c0_351 = arith.constant 0 : index
    %c0_352 = arith.constant 0 : index
    %539 = vector.load %arg20[%c2_350, %c0_351, %c0_352] : memref<3x288x96xbf16, #tpu.memory_space<vmem>>, vector<1x288x96xbf16>
    %540 = vector.shape_cast %539 : vector<1x288x96xbf16> to vector<288x96xbf16>
    %cst_353 = arith.constant dense<0.000000e+00> : vector<4x96xf32>
    %541 = tpu.matmul %538, %540, %cst_353 {dimension_numbers = #tpu.dot_dimension_numbers<[1], [0], [0], [1], [0, 0, 1, 1], [], []>} : vector<4x288xbf16>, vector<288x96xbf16>, vector<4x96xf32> -> vector<4x96xf32>
    %542 = arith.addf %536, %541 : vector<4x96xf32>
    %c0_354 = arith.constant 0 : index
    %c0_355 = arith.constant 0 : index
    %543 = vector.load %arg21[%c0_354, %c0_355] : memref<1x96xf32, #tpu.memory_space<vmem>>, vector<1x96xf32>
    %544 = vector.broadcast %543 : vector<1x96xf32> to vector<4x96xf32>
    %545 = arith.mulf %542, %544 : vector<4x96xf32>
    %c0_356 = arith.constant 0 : index
    %c0_357 = arith.constant 0 : index
    %546 = vector.load %arg22[%c0_356, %c0_357] : memref<1x96xf32, #tpu.memory_space<vmem>>, vector<1x96xf32>
    %547 = vector.broadcast %546 : vector<1x96xf32> to vector<4x96xf32>
    %548 = arith.addf %545, %547 : vector<4x96xf32>
    %cst_358 = arith.constant 0.000000e+00 : f32
    %549 = vector.broadcast %cst_358 : f32 to vector<4x96xf32>
    %550 = arith.maximumf %548, %549 : vector<4x96xf32>
    %cst_359 = arith.constant 0.000000e+00 : f32
    %551 = vector.broadcast %cst_359 : f32 to vector<6x144xf32>
    %c0_360 = arith.constant 0 : index
    %c0_361 = arith.constant 0 : index
    %552 = vector.load %arg35[%c0_360, %c0_361] : memref<24x384xf32, #tpu.memory_space<vmem>>, vector<6x144xf32>
    tpu.vector_store %arg35[%c0_360, %c0_361], %551 {strides = array<i32>} : memref<24x384xf32, #tpu.memory_space<vmem>>, vector<6x144xf32>,
    %c1_362 = arith.constant 1 : index
    %c24_363 = arith.constant 24 : index
    %553 = vector.load %arg35[%c1_362, %c24_363] : memref<24x384xf32, #tpu.memory_space<vmem>>, vector<4x96xf32>
    tpu.vector_store %arg35[%c1_362, %c24_363], %550 {strides = array<i32>} : memref<24x384xf32, #tpu.memory_space<vmem>>, vector<4x96xf32>,
    %c0_364 = arith.constant 0 : index
    %c0_365 = arith.constant 0 : index
    %554 = vector.load %arg35[%c0_364, %c0_365] : memref<24x384xf32, #tpu.memory_space<vmem>>, vector<6x144xf32>
    %cst_366 = arith.constant 0.000000e+00 : f32
    %555 = vector.broadcast %cst_366 : f32 to vector<4x48xf32>
    %556 = vector.extract_strided_slice %554 {offsets = [0, 0], sizes = [4, 144], strides = [1, 1]} : vector<6x144xf32> to vector<4x144xf32>
    %557 = arith.truncf %556 : vector<4x144xf32> to vector<4x144xbf16>
    %c0_367 = arith.constant 0 : index
    %c0_368 = arith.constant 0 : index
    %c0_369 = arith.constant 0 : index
    %558 = vector.load %arg23[%c0_367, %c0_368, %c0_369] : memref<3x144x48xbf16, #tpu.memory_space<vmem>>, vector<1x144x48xbf16>
    %559 = vector.shape_cast %558 : vector<1x144x48xbf16> to vector<144x48xbf16>
    %cst_370 = arith.constant dense<0.000000e+00> : vector<4x48xf32>
    %560 = tpu.matmul %557, %559, %cst_370 {dimension_numbers = #tpu.dot_dimension_numbers<[1], [0], [0], [1], [0, 0, 1, 1], [], []>} : vector<4x144xbf16>, vector<144x48xbf16>, vector<4x48xf32> -> vector<4x48xf32>
    %561 = arith.addf %555, %560 : vector<4x48xf32>
    %562 = vector.extract_strided_slice %554 {offsets = [1, 0], sizes = [4, 144], strides = [1, 1]} : vector<6x144xf32> to vector<4x144xf32>
    %563 = arith.truncf %562 : vector<4x144xf32> to vector<4x144xbf16>
    %c1_371 = arith.constant 1 : index
    %c0_372 = arith.constant 0 : index
    %c0_373 = arith.constant 0 : index
    %564 = vector.load %arg23[%c1_371, %c0_372, %c0_373] : memref<3x144x48xbf16, #tpu.memory_space<vmem>>, vector<1x144x48xbf16>
    %565 = vector.shape_cast %564 : vector<1x144x48xbf16> to vector<144x48xbf16>
    %cst_374 = arith.constant dense<0.000000e+00> : vector<4x48xf32>
    %566 = tpu.matmul %563, %565, %cst_374 {dimension_numbers = #tpu.dot_dimension_numbers<[1], [0], [0], [1], [0, 0, 1, 1], [], []>} : vector<4x144xbf16>, vector<144x48xbf16>, vector<4x48xf32> -> vector<4x48xf32>
    %567 = arith.addf %561, %566 : vector<4x48xf32>
    %568 = vector.extract_strided_slice %554 {offsets = [2, 0], sizes = [4, 144], strides = [1, 1]} : vector<6x144xf32> to vector<4x144xf32>
    %569 = arith.truncf %568 : vector<4x144xf32> to vector<4x144xbf16>
    %c2_375 = arith.constant 2 : index
    %c0_376 = arith.constant 0 : index
    %c0_377 = arith.constant 0 : index
    %570 = vector.load %arg23[%c2_375, %c0_376, %c0_377] : memref<3x144x48xbf16, #tpu.memory_space<vmem>>, vector<1x144x48xbf16>
    %571 = vector.shape_cast %570 : vector<1x144x48xbf16> to vector<144x48xbf16>
    %cst_378 = arith.constant dense<0.000000e+00> : vector<4x48xf32>
    %572 = tpu.matmul %569, %571, %cst_378 {dimension_numbers = #tpu.dot_dimension_numbers<[1], [0], [0], [1], [0, 0, 1, 1], [], []>} : vector<4x144xbf16>, vector<144x48xbf16>, vector<4x48xf32> -> vector<4x48xf32>
    %573 = arith.addf %567, %572 : vector<4x48xf32>
    %c0_379 = arith.constant 0 : index
    %c0_380 = arith.constant 0 : index
    %574 = vector.load %arg24[%c0_379, %c0_380] : memref<1x48xf32, #tpu.memory_space<vmem>>, vector<1x48xf32>
    %575 = vector.broadcast %574 : vector<1x48xf32> to vector<4x48xf32>
    %576 = arith.mulf %573, %575 : vector<4x48xf32>
    %c0_381 = arith.constant 0 : index
    %c0_382 = arith.constant 0 : index
    %577 = vector.load %arg25[%c0_381, %c0_382] : memref<1x48xf32, #tpu.memory_space<vmem>>, vector<1x48xf32>
    %578 = vector.broadcast %577 : vector<1x48xf32> to vector<4x48xf32>
    %579 = arith.addf %576, %578 : vector<4x48xf32>
    %cst_383 = arith.constant 0.000000e+00 : f32
    %580 = vector.broadcast %cst_383 : f32 to vector<4x48xf32>
    %581 = arith.maximumf %579, %580 : vector<4x48xf32>
    %582 = vector.extract_strided_slice %284 {offsets = [0, 0], sizes = [4, 16], strides = [1, 1]} : vector<4x64xf32> to vector<4x16xf32>
    %c0_384 = arith.constant 0 : index
    %c0_385 = arith.constant 0 : index
    %583 = vector.load %arg35[%c0_384, %c0_385] : memref<24x384xf32, #tpu.memory_space<vmem>>, vector<4x16xf32>
    tpu.vector_store %arg35[%c0_384, %c0_385], %582 {strides = array<i32>} : memref<24x384xf32, #tpu.memory_space<vmem>>, vector<4x16xf32>,
    %584 = vector.extract_strided_slice %550 {offsets = [0, 0], sizes = [4, 24], strides = [1, 1]} : vector<4x96xf32> to vector<4x24xf32>
    %c0_386 = arith.constant 0 : index
    %c16_387 = arith.constant 16 : index
    %585 = vector.load %arg35[%c0_386, %c16_387] : memref<24x384xf32, #tpu.memory_space<vmem>>, vector<4x24xf32>
    tpu.vector_store %arg35[%c0_386, %c16_387], %584 {strides = array<i32>} : memref<24x384xf32, #tpu.memory_space<vmem>>, vector<4x24xf32>,
    %586 = vector.extract_strided_slice %284 {offsets = [0, 16], sizes = [4, 16], strides = [1, 1]} : vector<4x64xf32> to vector<4x16xf32>
    %c0_388 = arith.constant 0 : index
    %c40 = arith.constant 40 : index
    %587 = vector.load %arg35[%c0_388, %c40] : memref<24x384xf32, #tpu.memory_space<vmem>>, vector<4x16xf32>
    tpu.vector_store %arg35[%c0_388, %c40], %586 {strides = array<i32>} : memref<24x384xf32, #tpu.memory_space<vmem>>, vector<4x16xf32>,
    %588 = vector.extract_strided_slice %550 {offsets = [0, 24], sizes = [4, 24], strides = [1, 1]} : vector<4x96xf32> to vector<4x24xf32>
    %c0_389 = arith.constant 0 : index
    %c56 = arith.constant 56 : index
    %589 = vector.load %arg35[%c0_389, %c56] : memref<24x384xf32, #tpu.memory_space<vmem>>, vector<4x24xf32>
    tpu.vector_store %arg35[%c0_389, %c56], %588 {strides = array<i32>} : memref<24x384xf32, #tpu.memory_space<vmem>>, vector<4x24xf32>,
    %590 = vector.extract_strided_slice %284 {offsets = [0, 32], sizes = [4, 16], strides = [1, 1]} : vector<4x64xf32> to vector<4x16xf32>
    %c0_390 = arith.constant 0 : index
    %c80_391 = arith.constant 80 : index
    %591 = vector.load %arg35[%c0_390, %c80_391] : memref<24x384xf32, #tpu.memory_space<vmem>>, vector<4x16xf32>
    tpu.vector_store %arg35[%c0_390, %c80_391], %590 {strides = array<i32>} : memref<24x384xf32, #tpu.memory_space<vmem>>, vector<4x16xf32>,
    %592 = vector.extract_strided_slice %550 {offsets = [0, 48], sizes = [4, 24], strides = [1, 1]} : vector<4x96xf32> to vector<4x24xf32>
    %c0_392 = arith.constant 0 : index
    %c96_393 = arith.constant 96 : index
    %593 = vector.load %arg35[%c0_392, %c96_393] : memref<24x384xf32, #tpu.memory_space<vmem>>, vector<4x24xf32>
    tpu.vector_store %arg35[%c0_392, %c96_393], %592 {strides = array<i32>} : memref<24x384xf32, #tpu.memory_space<vmem>>, vector<4x24xf32>,
    %594 = vector.extract_strided_slice %284 {offsets = [0, 48], sizes = [4, 16], strides = [1, 1]} : vector<4x64xf32> to vector<4x16xf32>
    %c0_394 = arith.constant 0 : index
    %c120_395 = arith.constant 120 : index
    %595 = vector.load %arg35[%c0_394, %c120_395] : memref<24x384xf32, #tpu.memory_space<vmem>>, vector<4x16xf32>
    tpu.vector_store %arg35[%c0_394, %c120_395], %594 {strides = array<i32>} : memref<24x384xf32, #tpu.memory_space<vmem>>, vector<4x16xf32>,
    %596 = vector.extract_strided_slice %550 {offsets = [0, 72], sizes = [4, 24], strides = [1, 1]} : vector<4x96xf32> to vector<4x24xf32>
    %c0_396 = arith.constant 0 : index
    %c136 = arith.constant 136 : index
    %597 = vector.load %arg35[%c0_396, %c136] : memref<24x384xf32, #tpu.memory_space<vmem>>, vector<4x24xf32>
    tpu.vector_store %arg35[%c0_396, %c136], %596 {strides = array<i32>} : memref<24x384xf32, #tpu.memory_space<vmem>>, vector<4x24xf32>,
    %c0_397 = arith.constant 0 : index
    %c0_398 = arith.constant 0 : index
    %598 = vector.load %arg35[%c0_397, %c0_398] : memref<24x384xf32, #tpu.memory_space<vmem>>, vector<4x160xf32>
    %c0_399 = arith.constant 0 : index
    %c0_400 = arith.constant 0 : index
    %c0_401 = arith.constant 0 : index
    %599 = vector.load %arg30[%c0_399, %c0_400, %c0_401] : memref<1x4x160xf32, #tpu.memory_space<vmem>>, vector<1x4x160xf32>
    %600 = vector.shape_cast %599 : vector<1x4x160xf32> to vector<4x160xf32>
    %601 = vector.shape_cast %598 : vector<4x160xf32> to vector<1x4x160xf32>
    tpu.vector_store %arg30[%c0_399, %c0_400, %c0_401], %601 {strides = array<i32>} : memref<1x4x160xf32, #tpu.memory_space<vmem>>, vector<1x4x160xf32>,
    %602 = vector.extract_strided_slice %339 {offsets = [0, 0], sizes = [4, 8], strides = [1, 1]} : vector<4x32xf32> to vector<4x8xf32>
    %c0_402 = arith.constant 0 : index
    %c0_403 = arith.constant 0 : index
    %603 = vector.load %arg36[%c0_402, %c0_403] : memref<8x192xf32, #tpu.memory_space<vmem>>, vector<4x8xf32>
    tpu.vector_store %arg36[%c0_402, %c0_403], %602 {strides = array<i32>} : memref<8x192xf32, #tpu.memory_space<vmem>>, vector<4x8xf32>,
    %604 = vector.extract_strided_slice %581 {offsets = [0, 0], sizes = [4, 12], strides = [1, 1]} : vector<4x48xf32> to vector<4x12xf32>
    %c0_404 = arith.constant 0 : index
    %c8_405 = arith.constant 8 : index
    %605 = vector.load %arg36[%c0_404, %c8_405] : memref<8x192xf32, #tpu.memory_space<vmem>>, vector<4x12xf32>
    tpu.vector_store %arg36[%c0_404, %c8_405], %604 {strides = array<i32>} : memref<8x192xf32, #tpu.memory_space<vmem>>, vector<4x12xf32>,
    %606 = vector.extract_strided_slice %339 {offsets = [0, 8], sizes = [4, 8], strides = [1, 1]} : vector<4x32xf32> to vector<4x8xf32>
    %c0_406 = arith.constant 0 : index
    %c20 = arith.constant 20 : index
    %607 = vector.load %arg36[%c0_406, %c20] : memref<8x192xf32, #tpu.memory_space<vmem>>, vector<4x8xf32>
    tpu.vector_store %arg36[%c0_406, %c20], %606 {strides = array<i32>} : memref<8x192xf32, #tpu.memory_space<vmem>>, vector<4x8xf32>,
    %608 = vector.extract_strided_slice %581 {offsets = [0, 12], sizes = [4, 12], strides = [1, 1]} : vector<4x48xf32> to vector<4x12xf32>
    %c0_407 = arith.constant 0 : index
    %c28 = arith.constant 28 : index
    %609 = vector.load %arg36[%c0_407, %c28] : memref<8x192xf32, #tpu.memory_space<vmem>>, vector<4x12xf32>
    tpu.vector_store %arg36[%c0_407, %c28], %608 {strides = array<i32>} : memref<8x192xf32, #tpu.memory_space<vmem>>, vector<4x12xf32>,
    %610 = vector.extract_strided_slice %339 {offsets = [0, 16], sizes = [4, 8], strides = [1, 1]} : vector<4x32xf32> to vector<4x8xf32>
    %c0_408 = arith.constant 0 : index
    %c40_409 = arith.constant 40 : index
    %611 = vector.load %arg36[%c0_408, %c40_409] : memref<8x192xf32, #tpu.memory_space<vmem>>, vector<4x8xf32>
    tpu.vector_store %arg36[%c0_408, %c40_409], %610 {strides = array<i32>} : memref<8x192xf32, #tpu.memory_space<vmem>>, vector<4x8xf32>,
    %612 = vector.extract_strided_slice %581 {offsets = [0, 24], sizes = [4, 12], strides = [1, 1]} : vector<4x48xf32> to vector<4x12xf32>
    %c0_410 = arith.constant 0 : index
    %c48_411 = arith.constant 48 : index
    %613 = vector.load %arg36[%c0_410, %c48_411] : memref<8x192xf32, #tpu.memory_space<vmem>>, vector<4x12xf32>
    tpu.vector_store %arg36[%c0_410, %c48_411], %612 {strides = array<i32>} : memref<8x192xf32, #tpu.memory_space<vmem>>, vector<4x12xf32>,
    %614 = vector.extract_strided_slice %339 {offsets = [0, 24], sizes = [4, 8], strides = [1, 1]} : vector<4x32xf32> to vector<4x8xf32>
    %c0_412 = arith.constant 0 : index
    %c60 = arith.constant 60 : index
    %615 = vector.load %arg36[%c0_412, %c60] : memref<8x192xf32, #tpu.memory_space<vmem>>, vector<4x8xf32>
    tpu.vector_store %arg36[%c0_412, %c60], %614 {strides = array<i32>} : memref<8x192xf32, #tpu.memory_space<vmem>>, vector<4x8xf32>,
    %616 = vector.extract_strided_slice %581 {offsets = [0, 36], sizes = [4, 12], strides = [1, 1]} : vector<4x48xf32> to vector<4x12xf32>
    %c0_413 = arith.constant 0 : index
    %c68 = arith.constant 68 : index
    %617 = vector.load %arg36[%c0_413, %c68] : memref<8x192xf32, #tpu.memory_space<vmem>>, vector<4x12xf32>
    tpu.vector_store %arg36[%c0_413, %c68], %616 {strides = array<i32>} : memref<8x192xf32, #tpu.memory_space<vmem>>, vector<4x12xf32>,
    %c0_414 = arith.constant 0 : index
    %c0_415 = arith.constant 0 : index
    %618 = vector.load %arg36[%c0_414, %c0_415] : memref<8x192xf32, #tpu.memory_space<vmem>>, vector<4x80xf32>
    %cst_416 = arith.constant 0.000000e+00 : f32
    %619 = vector.broadcast %cst_416 : f32 to vector<4x4xf32>
    %620 = arith.truncf %618 : vector<4x80xf32> to vector<4x80xbf16>
    %c0_417 = arith.constant 0 : index
    %c0_418 = arith.constant 0 : index
    %c0_419 = arith.constant 0 : index
    %621 = vector.load %arg26[%c0_417, %c0_418, %c0_419] : memref<1x80x4xbf16, #tpu.memory_space<vmem>>, vector<1x80x4xbf16>
    %622 = vector.shape_cast %621 : vector<1x80x4xbf16> to vector<80x4xbf16>
    %cst_420 = arith.constant dense<0.000000e+00> : vector<4x4xf32>
    %623 = tpu.matmul %620, %622, %cst_420 {dimension_numbers = #tpu.dot_dimension_numbers<[1], [0], [0], [1], [0, 0, 1, 1], [], []>} : vector<4x80xbf16>, vector<80x4xbf16>, vector<4x4xf32> -> vector<4x4xf32>
    %624 = arith.addf %619, %623 : vector<4x4xf32>
    %c0_421 = arith.constant 0 : index
    %c0_422 = arith.constant 0 : index
    %625 = vector.load %arg27[%c0_421, %c0_422] : memref<1x4xf32, #tpu.memory_space<vmem>>, vector<1x4xf32>
    %626 = vector.broadcast %625 : vector<1x4xf32> to vector<4x4xf32>
    %627 = arith.mulf %624, %626 : vector<4x4xf32>
    %c0_423 = arith.constant 0 : index
    %c0_424 = arith.constant 0 : index
    %628 = vector.load %arg28[%c0_423, %c0_424] : memref<1x4xf32, #tpu.memory_space<vmem>>, vector<1x4xf32>
    %629 = vector.broadcast %628 : vector<1x4xf32> to vector<4x4xf32>
    %630 = arith.addf %627, %629 : vector<4x4xf32>
    %cst_425 = arith.constant 0.000000e+00 : f32
    %631 = vector.broadcast %cst_425 : f32 to vector<4x4xf32>
    %632 = arith.maximumf %630, %631 : vector<4x4xf32>
    %c0_426 = arith.constant 0 : index
    %c0_427 = arith.constant 0 : index
    %c0_428 = arith.constant 0 : index
    %633 = vector.load %arg29[%c0_426, %c0_427, %c0_428] : memref<1x4x4xf32, #tpu.memory_space<vmem>>, vector<1x4x4xf32>
    %634 = vector.shape_cast %633 : vector<1x4x4xf32> to vector<4x4xf32>
    %635 = vector.shape_cast %632 : vector<4x4xf32> to vector<1x4x4xf32>
    tpu.vector_store %arg29[%c0_426, %c0_427, %c0_428], %635 {strides = array<i32>} : memref<1x4x4xf32, #tpu.memory_space<vmem>>, vector<1x4x4xf32>,
    return
  }
  func.func @transform_0(%arg0: i32) -> (i32, i32, i32) {
    %c0_i32 = arith.constant 0 : i32
    %c0_i32_0 = arith.constant 0 : i32
    %c0_i32_1 = arith.constant 0 : i32
    return %arg0, %c0_i32, %c0_i32_0 : i32, i32, i32
  }
  func.func @transform_1(%arg0: i32) -> (i32, i32, i32) {
    %c0_i32 = arith.constant 0 : i32
    %c0_i32_0 = arith.constant 0 : i32
    %c0_i32_1 = arith.constant 0 : i32
    %c0_i32_2 = arith.constant 0 : i32
    return %c0_i32, %c0_i32_0, %c0_i32_1 : i32, i32, i32
  }
  func.func @transform_2(%arg0: i32) -> (i32, i32) {
    %c0_i32 = arith.constant 0 : i32
    %c0_i32_0 = arith.constant 0 : i32
    %c0_i32_1 = arith.constant 0 : i32
    return %c0_i32, %c0_i32_0 : i32, i32
  }
  func.func @transform_3(%arg0: i32) -> (i32, i32) {
    %c0_i32 = arith.constant 0 : i32
    %c0_i32_0 = arith.constant 0 : i32
    %c0_i32_1 = arith.constant 0 : i32
    return %c0_i32, %c0_i32_0 : i32, i32
  }
  func.func @transform_4(%arg0: i32) -> (i32, i32, i32) {
    %c0_i32 = arith.constant 0 : i32
    %c0_i32_0 = arith.constant 0 : i32
    %c0_i32_1 = arith.constant 0 : i32
    %c0_i32_2 = arith.constant 0 : i32
    return %c0_i32, %c0_i32_0, %c0_i32_1 : i32, i32, i32
  }
  func.func @transform_5(%arg0: i32) -> (i32, i32) {
    %c0_i32 = arith.constant 0 : i32
    %c0_i32_0 = arith.constant 0 : i32
    %c0_i32_1 = arith.constant 0 : i32
    return %c0_i32, %c0_i32_0 : i32, i32
  }
  func.func @transform_6(%arg0: i32) -> (i32, i32) {
    %c0_i32 = arith.constant 0 : i32
    %c0_i32_0 = arith.constant 0 : i32
    %c0_i32_1 = arith.constant 0 : i32
    return %c0_i32, %c0_i32_0 : i32, i32
  }
  func.func @transform_7(%arg0: i32) -> (i32, i32, i32) {
    %c0_i32 = arith.constant 0 : i32
    %c0_i32_0 = arith.constant 0 : i32
    %c0_i32_1 = arith.constant 0 : i32
    %c0_i32_2 = arith.constant 0 : i32
    return %c0_i32, %c0_i32_0, %c0_i32_1 : i32, i32, i32
  }
  func.func @transform_8(%arg0: i32) -> (i32, i32) {
    %c0_i32 = arith.constant 0 : i32
    %c0_i32_0 = arith.constant 0 : i32
    %c0_i32_1 = arith.constant 0 : i32
    return %c0_i32, %c0_i32_0 : i32, i32
  }
  func.func @transform_9(%arg0: i32) -> (i32, i32) {
    %c0_i32 = arith.constant 0 : i32
    %c0_i32_0 = arith.constant 0 : i32
    %c0_i32_1 = arith.constant 0 : i32
    return %c0_i32, %c0_i32_0 : i32, i32
  }
  func.func @transform_10(%arg0: i32) -> (i32, i32, i32) {
    %c0_i32 = arith.constant 0 : i32
    %c0_i32_0 = arith.constant 0 : i32
    %c0_i32_1 = arith.constant 0 : i32
    %c0_i32_2 = arith.constant 0 : i32
    return %c0_i32, %c0_i32_0, %c0_i32_1 : i32, i32, i32
  }
  func.func @transform_11(%arg0: i32) -> (i32, i32) {
    %c0_i32 = arith.constant 0 : i32
    %c0_i32_0 = arith.constant 0 : i32
    %c0_i32_1 = arith.constant 0 : i32
    return %c0_i32, %c0_i32_0 : i32, i32
  }
  func.func @transform_12(%arg0: i32) -> (i32, i32) {
    %c0_i32 = arith.constant 0 : i32
    %c0_i32_0 = arith.constant 0 : i32
    %c0_i32_1 = arith.constant 0 : i32
    return %c0_i32, %c0_i32_0 : i32, i32
  }
  func.func @transform_13(%arg0: i32) -> (i32, i32, i32) {
    %c0_i32 = arith.constant 0 : i32
    %c0_i32_0 = arith.constant 0 : i32
    %c0_i32_1 = arith.constant 0 : i32
    %c0_i32_2 = arith.constant 0 : i32
    return %c0_i32, %c0_i32_0, %c0_i32_1 : i32, i32, i32
  }
  func.func @transform_14(%arg0: i32) -> (i32, i32) {
    %c0_i32 = arith.constant 0 : i32
    %c0_i32_0 = arith.constant 0 : i32
    %c0_i32_1 = arith.constant 0 : i32
    return %c0_i32, %c0_i32_0 : i32, i32
  }
  func.func @transform_15(%arg0: i32) -> (i32, i32) {
    %c0_i32 = arith.constant 0 : i32
    %c0_i32_0 = arith.constant 0 : i32
    %c0_i32_1 = arith.constant 0 : i32
    return %c0_i32, %c0_i32_0 : i32, i32
  }
  func.func @transform_16(%arg0: i32) -> (i32, i32, i32) {
    %c0_i32 = arith.constant 0 : i32
    %c0_i32_0 = arith.constant 0 : i32
    %c0_i32_1 = arith.constant 0 : i32
    %c0_i32_2 = arith.constant 0 : i32
    return %c0_i32, %c0_i32_0, %c0_i32_1 : i32, i32, i32
  }
  func.func @transform_17(%arg0: i32) -> (i32, i32) {
    %c0_i32 = arith.constant 0 : i32
    %c0_i32_0 = arith.constant 0 : i32
    %c0_i32_1 = arith.constant 0 : i32
    return %c0_i32, %c0_i32_0 : i32, i32
  }
  func.func @transform_18(%arg0: i32) -> (i32, i32) {
    %c0_i32 = arith.constant 0 : i32
    %c0_i32_0 = arith.constant 0 : i32
    %c0_i32_1 = arith.constant 0 : i32
    return %c0_i32, %c0_i32_0 : i32, i32
  }
  func.func @transform_19(%arg0: i32) -> (i32, i32, i32) {
    %c0_i32 = arith.constant 0 : i32
    %c0_i32_0 = arith.constant 0 : i32
    %c0_i32_1 = arith.constant 0 : i32
    %c0_i32_2 = arith.constant 0 : i32
    return %c0_i32, %c0_i32_0, %c0_i32_1 : i32, i32, i32
  }
  func.func @transform_20(%arg0: i32) -> (i32, i32) {
    %c0_i32 = arith.constant 0 : i32
    %c0_i32_0 = arith.constant 0 : i32
    %c0_i32_1 = arith.constant 0 : i32
    return %c0_i32, %c0_i32_0 : i32, i32
  }
  func.func @transform_21(%arg0: i32) -> (i32, i32) {
    %c0_i32 = arith.constant 0 : i32
    %c0_i32_0 = arith.constant 0 : i32
    %c0_i32_1 = arith.constant 0 : i32
    return %c0_i32, %c0_i32_0 : i32, i32
  }
  func.func @transform_22(%arg0: i32) -> (i32, i32, i32) {
    %c0_i32 = arith.constant 0 : i32
    %c0_i32_0 = arith.constant 0 : i32
    %c0_i32_1 = arith.constant 0 : i32
    %c0_i32_2 = arith.constant 0 : i32
    return %c0_i32, %c0_i32_0, %c0_i32_1 : i32, i32, i32
  }
  func.func @transform_23(%arg0: i32) -> (i32, i32) {
    %c0_i32 = arith.constant 0 : i32
    %c0_i32_0 = arith.constant 0 : i32
    %c0_i32_1 = arith.constant 0 : i32
    return %c0_i32, %c0_i32_0 : i32, i32
  }
  func.func @transform_24(%arg0: i32) -> (i32, i32) {
    %c0_i32 = arith.constant 0 : i32
    %c0_i32_0 = arith.constant 0 : i32
    %c0_i32_1 = arith.constant 0 : i32
    return %c0_i32, %c0_i32_0 : i32, i32
  }
  func.func @transform_25(%arg0: i32) -> (i32, i32, i32) {
    %c0_i32 = arith.constant 0 : i32
    %c0_i32_0 = arith.constant 0 : i32
    %c0_i32_1 = arith.constant 0 : i32
    %c0_i32_2 = arith.constant 0 : i32
    return %c0_i32, %c0_i32_0, %c0_i32_1 : i32, i32, i32
  }
  func.func @transform_26(%arg0: i32) -> (i32, i32) {
    %c0_i32 = arith.constant 0 : i32
    %c0_i32_0 = arith.constant 0 : i32
    %c0_i32_1 = arith.constant 0 : i32
    return %c0_i32, %c0_i32_0 : i32, i32
  }
  func.func @transform_27(%arg0: i32) -> (i32, i32) {
    %c0_i32 = arith.constant 0 : i32
    %c0_i32_0 = arith.constant 0 : i32
    %c0_i32_1 = arith.constant 0 : i32
    return %c0_i32, %c0_i32_0 : i32, i32
  }
  func.func @transform_28(%arg0: i32) -> (i32, i32, i32) {
    %c0_i32 = arith.constant 0 : i32
    %c0_i32_0 = arith.constant 0 : i32
    %c0_i32_1 = arith.constant 0 : i32
    return %arg0, %c0_i32, %c0_i32_0 : i32, i32, i32
  }
  func.func @transform_29(%arg0: i32) -> (i32, i32, i32) {
    %c0_i32 = arith.constant 0 : i32
    %c0_i32_0 = arith.constant 0 : i32
    %c0_i32_1 = arith.constant 0 : i32
    return %arg0, %c0_i32, %c0_i32_0 : i32, i32, i32
  }
  func.func @transform_30(%arg0: i32) -> (i32, i32, i32) {
    %c0_i32 = arith.constant 0 : i32
    %c0_i32_0 = arith.constant 0 : i32
    %c0_i32_1 = arith.constant 0 : i32
    return %arg0, %c0_i32, %c0_i32_0 : i32, i32, i32
  }
  func.func @transform_31(%arg0: i32) -> (i32, i32, i32) {
    %c0_i32 = arith.constant 0 : i32
    %c0_i32_0 = arith.constant 0 : i32
    %c0_i32_1 = arith.constant 0 : i32
    return %arg0, %c0_i32, %c0_i32_0 : i32, i32, i32
  }
  func.func @transform_32(%arg0: i32) -> (i32, i32, i32) {
    %c0_i32 = arith.constant 0 : i32
    %c0_i32_0 = arith.constant 0 : i32
    %c0_i32_1 = arith.constant 0 : i32
    return %arg0, %c0_i32, %c0_i32_0 : i32, i32, i32
  }
  func.func @transform_33(%arg0: i32) -> (i32, i32, i32) {
    %c0_i32 = arith.constant 0 : i32
    %c0_i32_0 = arith.constant 0 : i32
    %c0_i32_1 = arith.constant 0 : i32
    return %arg0, %c0_i32, %c0_i32_0 : i32, i32, i32
  }
}

</mosaic_0001>

<bundles_post_ra>
// kernel: tpu_custom_call.1
= control target key start
LH: loop header
LB: loop body
LE: loop exit
PB: predicated region body
PF: predicated region fallthrough
CT: control target
= control target key end

     0   :  { %s14683_s6 = smov 1   ;;  %s14684_s10 = smov 2   ;;  %s16702_s0 = inlined_call_operand.smem [shape: u32[34], index: -1, kind: input, shape index: {}] }
   0x1   :  { %s14759_s5 = sld [smem:[%s16702_s0]]   ;;  %s14685_s14 = smov 3  }
   0x2   :  { %s14764_s9 = sld [smem:[%s16702_s0 + %s14683_s6]]   ;;  %s14686_s18 = smov 4  }
   0x3   :  { %s14769_s13 = sld [smem:[%s16702_s0 + %s14684_s10]]   ;;  %s14687_s22 = smov 5  }
   0x4   :  { %s14774_s17 = sld [smem:[%s16702_s0 + %s14685_s14]]   ;;  %s14688_s26 = smov 6  }
   0x5   :  { %s14779_s21 = sld [smem:[%s16702_s0 + %s14686_s18]]   ;;  %s14689_s30 = smov 7  }
   0x6   :  { %s14784_s25 = sld [smem:[%s16702_s0 + %s14687_s22]]   ;;  %s14690_s4 = smov 8  }
   0x7   :  { %16740 = sst [smem:[#allocation25_spill]] %s14759_s5  ;;  %s14691_s10 = smov 9  }
   0x8   :  { %16741 = sst [smem:[#allocation26_spill]] %s14764_s9  ;;  %s14692_s15 = smov 10  }
   0x9   :  { %16742 = sst [smem:[#allocation27_spill]] %s14769_s13  ;;  %s14693_s20 = smov 11  }
   0xa   :  { %s14789_s29 = sld [smem:[%s16702_s0 + %s14688_s26]]   ;;  %s14694_s26 = smov 12  }
   0xb   :  { %s14794_s3 = sld [smem:[%s16702_s0 + %s14689_s30]]   ;;  %s14695_s1 = smov 13  }
   0xc   :  { %s14799_s8 = sld [smem:[%s16702_s0 + %s14690_s4]]   ;;  %s14696_s7 = smov 14  }
   0xd   :  { %s14804_s14 = sld [smem:[%s16702_s0 + %s14691_s10]]   ;;  %s14698_s22 = smov 16  }
   0xe   :  { %s14809_s19 = sld [smem:[%s16702_s0 + %s14692_s15]]   ;;  %s14697_s15 = smov 15  }
   0xf   :  { %s14814_s24 = sld [smem:[%s16702_s0 + %s14693_s20]]   ;;  %s14699_s28 = smov 17  }
  0x10   :  { %s14819_s30 = sld [smem:[%s16702_s0 + %s14694_s26]]  }
  0x11   :  { %16743 = sst [smem:[#allocation28_spill]] %s14794_s3 }
  0x12   :  { %16744 = sst [smem:[#allocation29_spill]] %s14799_s8 }
  0x13   :  { %16745 = sst [smem:[#allocation30_spill]] %s14804_s14 }
  0x14   :  { %s14824_s6 = sld [smem:[%s16702_s0 + %s14695_s1]]  }
  0x15   :  { %16746 = sst [smem:[#allocation31_spill]] %s14814_s24 }
  0x16   :  { %16747 = sst [smem:[#allocation32_spill]] %s14819_s30 }
  0x17   :  { %s14829_s12 = sld [smem:[%s16702_s0 + %s14696_s7]]   ;;  %s14700_s7 = smov 18  }
  0x18   :  { %s14834_s20 = sld [smem:[%s16702_s0 + %s14697_s15]]   ;;  %s14701_s15 = smov 19  }
  0x19   :  { %s14839_s27 = sld [smem:[%s16702_s0 + %s14698_s22]]   ;;  %s14702_s22 = smov 20  }
  0x1a   :  { %16748 = sst [smem:[#allocation33_spill]] %s14824_s6 }
  0x1b   :  { %s14844_s4 = sld [smem:[%s16702_s0 + %s14699_s28]]   ;;  %s14703_s28 = smov 21  }
  0x1c   :  { %s14849_s30 = sld [smem:[%s16702_s0 + %s14700_s7]]   ;;  %s14704_s7 = smov 22  }
  0x1d   :  { %16749 = sst [smem:[#allocation34_spill]] %s14829_s12 }
  0x1e   :  { %16750 = sst [smem:[#allocation35_spill]] %s14834_s20 }
  0x1f   :  { %16751 = sst [smem:[#allocation36_spill]] %s14839_s27 }
  0x20   :  { %s14854_s24 = sld [smem:[%s16702_s0 + %s14701_s15]]   ;;  %s14705_s15 = smov 23  }
  0x21   :  { %16752 = sst [smem:[#allocation37_spill]] %s14844_s4 }
  0x22   :  { %16753 = sst [smem:[#allocation38_spill]] %s14849_s30 }
  0x23   :  { %s14859_s27 = sld [smem:[%s16702_s0 + %s14702_s22]]   ;;  %s14706_s22 = smov 24  }
  0x24   :  { %s14864_s4 = sld [smem:[%s16702_s0 + %s14703_s28]]   ;;  %s14707_s28 = smov 25  }
  0x25   :  { %s14869_s30 = sld [smem:[%s16702_s0 + %s14704_s7]]   ;;  %s14708_s7 = smov 26  }
  0x26   :  { %s14874_s20 = sld [smem:[%s16702_s0 + %s14705_s15]]   ;;  %s14709_s15 = smov 27  }
  0x29   :  { %16754 = sst [smem:[#allocation39_spill]] %s14859_s27 }
  0x2a   :  { %16755 = sst [smem:[#allocation40_spill]] %s14864_s4 }
  0x2b   :  { %16756 = sst [smem:[#allocation41_spill]] %s14869_s30 }
  0x2c   :  { %16757 = sst [smem:[#allocation42_spill]] %s14874_s20 }
  0x2d   :  { %s14879_s27 = sld [smem:[%s16702_s0 + %s14706_s22]]   ;;  %s14710_s22 = smov 28  }
  0x2e   :  { %s14884_s4 = sld [smem:[%s16702_s0 + %s14707_s28]]   ;;  %s14711_s28 = smov 29  }
  0x2f   :  { %s14889_s30 = sld [smem:[%s16702_s0 + %s14708_s7]]   ;;  %s14712_s7 = smov 30  }
  0x30   :  { %s14894_s20 = sld [smem:[%s16702_s0 + %s14709_s15]]   ;;  %s14713_s15 = smov 31  }
  0x33   :  { %16758 = sst [smem:[#allocation43_spill]] %s14879_s27 }
  0x34   :  { %16759 = sst [smem:[#allocation44_spill]] %s14884_s4 }
  0x35   :  { %16760 = sst [smem:[#allocation45_spill]] %s14889_s30 }
  0x36   :  { %16761 = sst [smem:[#allocation46_spill]] %s14894_s20 }
  0x37   :  { %s14899_s27 = sld [smem:[%s16702_s0 + %s14710_s22]]   ;;  %s14714_s22 = smov 32  }
  0x38   :  { %s14904_s4 = sld [smem:[%s16702_s0 + %s14711_s28]]   ;;  %s14715_s28 = smov 33  }
  0x39   :  { %s14909_s30 = sld [smem:[%s16702_s0 + %s14712_s7]]  }
  0x3a   :  { %s14914_s20 = sld [smem:[%s16702_s0 + %s14713_s15]]  }
  0x3d   :  { %16762 = sst [smem:[#allocation47_spill]] %s14899_s27 }
  0x3e   :  { %16763 = sst [smem:[#allocation48_spill]] %s14904_s4 }
  0x3f   :  { %s14919_s27 = sld [smem:[%s16702_s0 + %s14714_s22]]  }
  0x40   :  { %s14924_s4 = sld [smem:[%s16702_s0 + %s14715_s28]]  }
  0x41   :  { %73 = vsyncpa [#allocation5], 0 }
  0x42   :  { %74 = vsyncpa [#allocation8], 0 }
  0x43   :  { %75 = vsyncpa [#allocation6], 0 }
  0x44   :  { %77 = vsyncpa [#allocation6 + $0x1], 0 }
  0x45   :  { %78 = vsyncpa [#allocation12], 0 }
  0x46   :  { %80 = vsyncpa [#allocation12 + $0x1], 0 }
  0x47   :  { %81 = vsyncpa [#allocation15], 0 }
  0x48   :  { %83 = vsyncpa [#allocation15 + $0x1], 0 }
  0x49   :  { %84 = vsyncpa [#allocation18], 0 }
  0x4a   :  { %86 = vsyncpa [#allocation18 + $0x1], 0  ;;  %s14926_s7 = smov 0   ;;  %s14928_s10 = smov 0  }
  0x4b   :  { %s14930_s11 = smov 0   ;;  %s14932_s15 = smov 0  }
  0x4c LB: > { %s16764_s3 = sld [smem:[#allocation28_spill]]  ;;  %s14947_s0 = sadd.s32 4294967295, %s14681_s15   ;;  %s14669_s7 = sphi %s14926_s7, %s16828_s7   ;;  %s14681_s15 = sphi %s14932_s15, %s16825_s15   ;;  %s14677_s11 = sphi %s14930_s11, %s16827_s11   ;;  %s14673_s10 = sphi %s14928_s10, %s16829_s10  }
  0x4d   : > { %16765 = sst [smem:[#allocation49_spill]] %s14669_s7  ;;  %s16708_s16 = sadd.s32 4294967294, %s14681_s15  }
  0x4e   : > { %16766 = sst [smem:[#allocation50_spill]] %s14677_s11  ;;  %s14951_s18 = sadd.s32 1, %s14681_s15  }
  0x4f   : > { %16767 = sst [smem:[#allocation51_spill]] %s14681_s15  ;;  %s692_s22 = sadd.s32 1, %s14677_s11 }
  0x50   : > { %16768 = sst [smem:[#allocation52_spill]] %s14951_s18  ;;  %s689_s23 = ssub.s32 %s14681_s15, %s14951_s18 }
  0x51   : > { %p702_p0 = scmp.ne.s32.totalorder %s14677_s11, %s14673_s10  ;;  %p690_p1 = scmp.eq.s32.totalorder %s689_s23, 0 }
  0x52   : > { %p703_p2 = scmp.eq.s32.totalorder %s14947_s0, 1  ;;  %p708_p3 = scmp.ne.s32.totalorder %s14673_s10, %s14669_s7 }
  0x53   : > { %p709_p4 = scmp.eq.s32.totalorder %s16708_s16, 1  ;;  %p11208_p7 = scmp.ge.s32.totalorder %s14681_s15, 1 }
  0x54   : > { %s14964_s26 = scalar_select %p690_p1, %s14677_s11, %s692_s22  }
  0x55   : > { %p14966_p5 = por %p703_p2, %p702_p0  ;;  %p14970_p6 = por %p709_p4, %p708_p3 }
  0x56   : > { %16769 = sst [smem:[#allocation53_spill]] %s14964_s26  ;;  %p846_p8 = scmp.lt.s32.totalorder %s14681_s15, 3 }
  0x57   : > { %s16770_s28 = scalar_select %p14966_p5, 1, 0 }
  0x58   : > { %s16771_s1 = scalar_select %p14970_p6, 1, 0 }
  0x59   : > { %p16713_p9 = scmp.eq.s32.totalorder %s14947_s0, 0  ;;  %p14977_p10 = pnand %p11208_p7, %p846_p8 }
  0x5a   : > { %16772 = sst [smem:[#allocation54_spill]] %s16771_s1  ;;  %s14716_s23 = smov [#allocation7]  }
  0x5b   : > { %s16773_s2 = scalar_select %p14977_p10, 1, 0 }
  0x5c   : > { %s904_s16 = sshll.u32 %s14716_s23, 4  ;;  %p13285_p11 = pneg %p14977_p10  ;;  %s905_s16 = int_to_ptr.vmem [resolvable:$true] %s904_s16 }
  0x5d   : > { %s14717_s26 = smov [#allocation4]   ;;  %s14404_s18 = scalar_lea.vmem %s905_s16, 7680 }
  0x5e   : > { %p14985_p12 = pnand %p16713_p9, %p13285_p11  ;;  %s858_s11 = sshll.u32 %s14717_s26, 4  ;;  %s859_s11 = int_to_ptr.vmem [resolvable:$true] %s858_s11 }
  0x5f   : > { %p14405_p0 = scmp.ne.s32.totalorder %s905_s16, %s14404_s18  ;;  %p14412_p3 = scmp.lt.s32.totalorder %s905_s16, %s905_s16 }
  0x60   : > { %p14395_p13 = pneg %p14985_p12  ;;  %p14413_p4 = scmp.lt.s32.totalorder %s14404_s18, %s14404_s18 }
  0x62   : > { %p14407_p1 = pnand %p14405_p0, %p14395_p13  ;;  %p14414_p7 = por %p14413_p4, %p14412_p3 }
  0x64   : > { %p14408_p2 = pneg %p14407_p1 }
  0x66   : > { %p14415_p8 = pnand %p14414_p7, %p14408_p2 }
  0x68   : > { %14418 = shalt.err (!%p14415_p8)
}
  0x69   : > { %s14718_s23 = smov 192   ;;  %s16775_s6 = sld [smem:[#allocation33_spill]] }
  0x6a   : > { %s14719_s1 = smov 12   ;;  %s14430_s26 = scalar_lea.vmem %s859_s11, 10368 }
  0x6b   : > { %p14431_p11 = scmp.ne.s32.totalorder %s859_s11, %s14430_s26  ;;  %p14438_p0 = scmp.lt.s32.totalorder %s859_s11, %s859_s11 }
  0x6c   : > { %p14439_p1 = scmp.lt.s32.totalorder %s14430_s26, %s14430_s26 }
  0x6d   : > { %p14433_p9 = pnand %p14431_p11, %p14395_p13 }
  0x6e   : > { %p14440_p5 = por %p14439_p1, %p14438_p0 }
  0x6f   : > { %13291 = dma.hbm_to_vmem [thread:$0]  (!%p14985_p12), %s16775_s6, 7680, %s905_s16, [#allocation8], %s14718_s23, %s14718_s23, %s14719_s1  }
  0x70   : > { %p14434_p6 = pneg %p14433_p9 }
  0x72   : > { %p14441_p10 = pnand %p14440_p5, %p14434_p6 }
  0x74   : > { %14444 = shalt.err (!%p14441_p10)
}
  0x75   : > { %s14720_s18 = smov 128   ;;  %s16776_s9 = sld [smem:[#allocation26_spill]] }
  0x76   : > { %s14721_s7 = smov 8   ;;  %s14722_s15 = smov [#allocation9]  }
  0x77   : > { %s932_s16 = sshll.u32 %s14722_s15, 4  ;;  %s933_s16 = int_to_ptr.vmem [resolvable:$true] %s932_s16 }
  0x78   : > { %s14456_s1 = scalar_lea.vmem %s933_s16, 6912  ;;  %p14464_p4 = scmp.lt.s32.totalorder %s933_s16, %s933_s16 }
  0x79   : > { %p14457_p2 = scmp.ne.s32.totalorder %s933_s16, %s14456_s1  ;;  %p14465_p7 = scmp.lt.s32.totalorder %s14456_s1, %s14456_s1 }
  0x7b   : > { %13288 = dma.hbm_to_vmem [thread:$0]  (!%p14985_p12), %s16776_s9, 10368, %s859_s11, [#allocation5], %s14720_s18, %s14720_s18, %s14721_s7  }
  0x7c   : > { %p14459_p9 = pnand %p14457_p2, %p14395_p13  ;;  %p14466_p5 = por %p14465_p7, %p14464_p4 }
  0x7e   : > { %p14460_p3 = pneg %p14459_p9 }
  0x80   : > { %p14467_p6 = pnand %p14466_p5, %p14460_p3 }
  0x82   : > { %14470 = shalt.err (!%p14467_p6)
}
  0x83   : > { %s14723_s23 = smov 64   ;;  %s14724_s26 = smov 4  }
  0x84   : > { %13294 = dma.hbm_to_vmem [thread:$0]  (!%p14985_p12), %s14854_s24, 6912, %s933_s16, [#allocation8], %s14723_s23, %s14723_s23, %s14724_s26  }
  0x85   : > { %p16777_p10 = scmp.ne.s32.totalorder %s16773_s2, 0 }
  0x86   : > { %p16778_p8 = scmp.eq.s32.totalorder (!%p16777_p10), %s14947_s0, 0 }
  0x87   : > { %980 = sbr.rel (%p16777_p10) target bundleno = 4757 (0x1295), region = 132 }
  0x8c   : > { %14644 = dma.done.wait (%p16778_p8), [#allocation5], 10368   ;;  %p16779_p13 = pmov %p16778_p8 }
  0x8d   : > { %p16780_p11 = pmov %p16778_p8 }
  0x8e   : > { %14646 = vsyncadd (%p16779_p13), [#allocation5], 4294956928 }
  0x8f   : > { %14648 = dma.done.wait (%p16780_p11), [#allocation8], 14592   ;;  %p16781_p0 = pmov %p16778_p8 }
  0x90   : > { %s16782_s5 = sld [smem:[#allocation25_spill]]  ;;  %p1097_p1 = scmp.lt.s32.totalorder %s14947_s0, 1  ;;  %vm1105_vm0 = vcmask 588800   ;;  %v14725_v0 = vmov 0.0   ;;  %v1142_v3 = vld [vmem:[#allocation4 + $0x40] sm:$0xff]  ;;  %vm1111_vm1 = vcmask 1043456  }
  0x91   : > { %14650 = vsyncadd (%p16781_p0), [#allocation8], 4294952704  ;;  %1106 = vst.msk [vmem:[#allocation2] sm:$0xff] %vm1105_vm0, %v14725_v0  ;;  %v11245_v6 = vcombine.high %v1142_v3, %v1142_v3  ;;  %v11244_v7 = vcombine.low %v1142_v3, %v1142_v3  ;;  %v13417_v8 = vld [vmem:[#allocation4 + $0x34] ss:$8 sps:$4 sm:$0xff]   ;;  %v1153_v9 = vld [vmem:[#allocation4 + $0x88] sm:$0xff] }
  0x92   : > { %s1098_s7 = scalar_select %p1097_p1, %s14947_s0, 1  ;;  %1107 = vst.msk [vmem:[#allocation2 + $0x18] sm:$0xff] %vm1105_vm0, %v14725_v0  ;;  %1108 = vst.msk [vmem:[#allocation2 + $0x30] sm:$0xff] %vm1105_vm0, %v14725_v0  ;;  %v11233_v10 = vcombine.high %v1153_v9, %v1153_v9  ;;  %v11232_v11 = vcombine.low %v1153_v9, %v1153_v9  ;;  %v14727_v14 = vmov 0   ;;  %v13419_v15 = vld [vmem:[#allocation4 + $0x30] ss:$8 sps:$4 sm:$0xff]  }
  0x93   : > { %s16721_s2 = smov 12   ;;  %11246 = vmatprep.subr.msk.bf16.mxu1 %vm1111_vm1, %v11245_v6  ;;  %v1312_v13 = vsel %vm1111_vm1, %v11244_v7, 0  ;;  %1349 = vmatprep.mubr.bf16.mxu1 %v14727_v14  ;;  %v13425_v17 = vld [vmem:[#allocation4 + $0x7c] ss:$8 sps:$4 sm:$0xff]   ;;  %v13427_v19 = vld [vmem:[#allocation4 + $0x78] ss:$8 sps:$4 sm:$0xff]  }
  0x94   : > { %s12778_s11 = sshll.u32 %s1098_s7, 4  ;;  %1324 = vmatpush1.bf16.msra.mxu1 %v1312_v13  ;;  %11234 = vmatprep.subr.msk.bf16.mxu0 %vm1111_vm1, %v11233_v10  ;;  %v1216_v16 = vsel %vm1111_vm1, %v11232_v11, 0  ;;  %v13422_v18 = vld [vmem:[#allocation4 + $0x24] ss:$8 sps:$4 sm:$0xff]   ;;  %v13424_v21 = vld [vmem:[#allocation4 + $0x20] ss:$8 sps:$4 sm:$0xff]  }
  0x95   : > { %1325 = vmatprep.subr.bf16.mxu1 %v13417_v8  ;;  %1228 = vmatpush1.bf16.msra.mxu0 %v1216_v16  ;;  %v13431_v20 = vld [vmem:[#allocation4 + $0x6c] ss:$8 sps:$4 sm:$0xff]   ;;  %v13433_v23 = vld [vmem:[#allocation4 + $0x68] ss:$8 sps:$4 sm:$0xff]   ;;  %v13437_v24 = vld [vmem:[#allocation4 + $0x5c] ss:$8 sps:$4 sm:$0xff]  }
  0x96   : > { %s15028_s15 = scalar_lea.vmem %s16782_s5, %s12778_s11  ;;  %1229 = vmatprep.subr.bf16.mxu0 %v13425_v17  ;;  %1253 = vmatprep.mubr.bf16.mxu0 %v14727_v14  ;;  %v13428_v22 = vld [vmem:[#allocation4 + $0x14] ss:$8 sps:$4 sm:$0xff]   ;;  %v13430_v25 = vld [vmem:[#allocation4 + $0x10] ss:$8 sps:$4 sm:$0xff]   ;;  %v13434_v26 = vld [vmem:[#allocation4 + $0x4] ss:$8 sps:$4 sm:$0xff]  }
  0x97   : > { %v1103_v1 = vld [vmem:[%s15028_s15] sm:$0xff]  ;;  %v1104_v2 = vld [vmem:[%s15028_s15 + $0x8] sm:$0xff]  ;;  %v13439_v27 = vld [vmem:[#allocation4 + $0x58] ss:$8 sps:$4 sm:$0xff]   ;;  %vm1124_vm2 = vcmask 490596   ;;  %vm1128_vm3 = vcmask 486496  }
  0x98   : > { %v1112_v4 = vrot.slane %v1103_v1, 4  ;;  %v1113_v5 = vrot.slane %v1104_v2, 4  ;;  %1326 = vmatpush1.bf16.msra.mxu1 %v13419_v15  ;;  %v1486_v28 = vld [vmem:[#allocation4 + $0x118] sm:$0xff]  ;;  %v13442_v29 = vld [vmem:[#allocation4 + $0x4c] ss:$8 sps:$4 sm:$0xff]   ;;  %v15046_v36 = vld [vmem:[#allocation4 + $0x160] sm:$0xff] }
  0x99   : > { %1327 = vmatprep.subr.bf16.mxu1 %v13422_v18  ;;  %1230 = vmatpush1.bf16.msra.mxu0 %v13427_v19  ;;  %v1369_v30 = vld [vmem:[#allocation4 + $0xd0] sm:$0xff]  ;;  %v13436_v31 = vld [vmem:[#allocation4] ss:$8 sps:$4 sm:$0xff]   ;;  %v11269_v32 = vcombine.high %v1486_v28, %v1486_v28  ;;  %v11268_v37 = vcombine.low %v1486_v28, %v1486_v28  ;;  %v11280_v40 = vcombine.low %v15046_v36, %v15046_v36  ;;  %vm6873_vm4 = vcmask 486400   ;;  %v15059_v44 = vld [vmem:[#allocation4 + $0x238] sm:$0xff]  ;;  %s16783_s13 = sld [smem:[#allocation27_spill]] }
  0x9a   : > { %1115 = vrot.lane.b32.xlu0 %v1112_v4, %s16721_s2  ;;  %1119 = vrot.lane.b32.xlu1 %v1113_v5, %s16721_s2  ;;  %v1114_v12 = vsel %vm1111_vm1, %v1112_v4, %v1113_v5  ;;  %v13444_v33 = vld [vmem:[#allocation4 + $0x48] ss:$8 sps:$4 sm:$0xff]   ;;  %v11257_v34 = vcombine.high %v1369_v30, %v1369_v30  ;;  %v11256_v38 = vcombine.low %v1369_v30, %v1369_v30  ;;  %vm1126_vm5 = vcmask 490592   ;;  %v15063_v46 = vld [vmem:[#allocation4 + $0x280] sm:$0xff]  ;;  %v13447_v60 = vld [vmem:[#allocation4 + $0x10c] ss:$8 sps:$4 sm:$0xff]  }
  0x9b   : > { %1231 = vmatprep.subr.bf16.mxu0 %v13431_v20  ;;  %v15044_v35 = vld [vmem:[#allocation4 + $0x1a8] sm:$0xff]  ;;  %v1546_v41 = vsel %vm1111_vm1, %v11268_v37, 0  ;;  %v15061_v45 = vld [vmem:[#allocation4 + $0x1f0] sm:$0xff]  ;;  %v15066_v49 = vsel %vm1111_vm1, %v11280_v40, 0  ;;  %v11316_v51 = vcombine.low %v15059_v44, %v15059_v44  ;;  %v11328_v53 = vcombine.low %v15063_v46, %v15063_v46  ;;  %v13452_v16 = vld [vmem:[#allocation4 + $0xfc] ss:$8 sps:$4 sm:$0xff]  }
  0x9c   : > { %1328 = vmatpush1.bf16.msra.mxu1 %v13424_v21  ;;  %v11292_v39 = vcombine.low %v15044_v35, %v15044_v35  ;;  %v15054_v42 = vsel %vm1111_vm1, %v11256_v38, 0  ;;  %v11304_v52 = vcombine.low %v15061_v45, %v15061_v45  ;;  %vm1154_vm6 = vsmask.f32 7424  ;;  %v13445_v8 = vld [vmem:[#allocation4 + $0x108] ss:$8 sps:$4 sm:$0xff]   ;;  %s16723_s22 = smov 112  }
  0x9d   : > { %1329 = vmatprep.subr.bf16.mxu1 %v13428_v22  ;;  %1232 = vmatpush1.bf16.msra.mxu0 %v13433_v23  ;;  %v15078_v55 = vsel %vm1111_vm1, %v11316_v51, 0  ;;  %v15084_v57 = vsel %vm1111_vm1, %v11328_v53, 0  ;;  %v13450_v23 = vld [vmem:[#allocation4 + $0xf8] ss:$8 sps:$4 sm:$0xff]   ;;  %v13464_v37 = vld [vmem:[#allocation4 + $0xdc] ss:$8 sps:$4 sm:$0xff]  }
  0x9e   : > { %1117 = vrot.lane.b32.xlu0 %v1114_v12, %s16721_s2  ;;  %1233 = vmatprep.subr.bf16.mxu0 %v13437_v24  ;;  %v15057_v43 = vsel %vm1111_vm1, %v11292_v39, 0  ;;  %v15081_v56 = vsel %vm1111_vm1, %v11304_v52, 0  ;;  %v13455_v24 = vld [vmem:[#allocation4 + $0xc4] ss:$8 sps:$4 sm:$0xff]   ;;  %vm1487_vm7 = vsmask.f32 6400 }
  0x9f   : > { %v13459_v38 = vld [vmem:[#allocation4 + $0xb0] ss:$8 sps:$4 sm:$0xff]   ;;  %v13467_v40 = vld [vmem:[#allocation4 + $0xa4] ss:$8 sps:$4 sm:$0xff]   ;;  %vm1372_vm8 = vcmask 1046528   ;;  %vm1608_vm10 = vcmask 1045504  }
  0xa0   : > { %1330 = vmatpush1.bf16.msra.mxu1 %v13430_v25  ;;  %v13462_v39 = vld [vmem:[#allocation4 + $0xd8] ss:$8 sps:$4 sm:$0xff]   ;;  %v13475_v51 = vld [vmem:[#allocation4 + $0x19c] ss:$8 sps:$4 sm:$0xff]   ;;  %vm1723_vm9 = vsmask.f32 5376 }
  0xa1   : > { %1331 = vmatprep.subr.bf16.mxu1 %v13434_v26  ;;  %1234 = vmatpush1.bf16.msra.mxu0 %v13439_v27  ;;  %v13470_v52 = vld [vmem:[#allocation4 + $0x90] ss:$8 sps:$4 sm:$0xff]   ;;  %vm1957_vm11 = vsmask.f32 4352  ;;  %vm1842_vm12 = vcmask 1044480   ;;  %vm2340_vm14 = vcmask 130048  }
  0xa2   : > { %1235 = vmatprep.subr.bf16.mxu0 %v13442_v29  ;;  %v13458_v29 = vld [vmem:[#allocation4 + $0xec] ss:$8 sps:$4 sm:$0xff]   ;;  %s14730_s18 = smov 96   ;;  %s16725_s16 = smov 64   ;;  %vm2387_vm15 = vcmask 785408  }
  0xa3   : > { %s14732_s1 = smov 80   ;;  %s16732_s23 = smov 32  }
  0xa4   : > { %1332 = vmatpush1.bf16.msra.mxu1 %v13436_v31  ;;  %s16726_s26 = smov 48   ;;  %s16719_s7 = smov 16  }
  0xa5   : > { %11270 = vmatprep.subr.msk.bf16.mxu1 %vm1111_vm1, %v11269_v32  ;;  %1236 = vmatpush1.bf16.msra.mxu0 %v13444_v33  ;;  %v13453_v32 = vld [vmem:[#allocation4 + $0xc0] ss:$8 sps:$4 sm:$0xff]   ;;  %s15311_s11 = sand.u32 1, %s14673_s10   ;;  %s16786_s8 = sld [smem:[#allocation29_spill]] }
  0xa6   : > { %11258 = vmatprep.subr.msk.bf16.mxu0 %vm1111_vm1, %v11257_v34  ;;  %v13456_v33 = vld [vmem:[#allocation4 + $0xe8] ss:$8 sps:$4 sm:$0xff]   ;;  %v13461_v34 = vld [vmem:[#allocation4 + $0xb4] ss:$8 sps:$4 sm:$0xff]   ;;  %s16787_s14 = sld [smem:[#allocation30_spill]]  ;;  %s14743_s5 = smov 36  }
  0xa7   : > { %s16788_s12 = sld [smem:[#allocation34_spill]]  ;;  %s16807_s6 = smov 16  }
  0xa8   : > { %p16815_p2 = scmp.ne.s32.totalorder %s16770_s28, 0 }
 0x10c   : > { %v1116_v47 = vpop.permute.xlu0 %1115  ;;  %v1120_v48 = vpop.permute.xlu1 %1119 }
 0x10d   : > { %1125 = vst.msk [vmem:[#allocation2] sm:$0xf0] %vm1124_vm2, %v1116_v47  ;;  %v11293_v47 = vcombine.high %v15044_v35, %v15044_v35  ;;  %v11281_v35 = vcombine.high %v15046_v36, %v15046_v36  ;;  %v13484_v36 = vld [vmem:[#allocation4 + $0x178] ss:$8 sps:$4 sm:$0xff]   ;;  %vm2346_vm2 = vcmask 261248  }
 0x10e   : > { %1129 = vst.msk [vmem:[#allocation2 + $0x30] sm:$0xf] %vm1128_vm3, %v1120_v48  ;;  %vm2351_vm3 = vcmask 392448  }
 0x110   : > { %v1118_v50 = vpop.permute.xlu0 %1117 }
 0x111   : > { %1127 = vst.msk [vmem:[#allocation2 + $0x18] sm:$0xff] %vm1126_vm5, %v1118_v50  ;;  %v13472_v50 = vld [vmem:[#allocation4 + $0x94] ss:$8 sps:$4 sm:$0xff]   ;;  %vm2367_vm5 = vcmask 654848  }
 0x114   : > { %v1130_v59 = vld [vmem:[#allocation2] sm:$0xff] }
 0x115   : > { %v15075_v54 = vld [vmem:[#allocation2 + $0x30] sm:$0xff] }
 0x116   : > { %v15088_v58 = vpack.c.bf16 %v15075_v54, %v15075_v54  ;;  %6874 = vst.msk [vmem:[#allocation2 + $0x30] sm:$0xf] %vm6873_vm4, %v14725_v0  ;;  %vm2356_vm4 = vcmask 523648  }
 0x118   : > { %v15093_v61 = vshll.u32 %v15088_v58, 16  ;;  %v15096_v62 = vshrl.u32 %v15088_v58, 16  ;;  %v1374_v63 = vrot.slane %v15088_v58, 1  ;;  %v1610_v1 = vrot.slane %v15088_v58, 2  ;;  %v15100_v2 = vld [vmem:[#allocation2 + $0x18] sm:$0xff] }
 0x119   : > { %v1844_v3 = vrot.slane %v15088_v58, 3  ;;  %2389 = vst [vmem:[#allocation2 + $0x18] sm:$0x3f] %v14725_v0  ;;  %v15105_v4 = vpack.c.bf16 %v15100_v2, %v1130_v59  ;;  %v13473_v59 = vld [vmem:[#allocation4 + $0x198] ss:$8 sps:$4 sm:$0xff]  }
 0x11a   : > { %v1165_v5 = vrot.slane %v15093_v61, 1  ;;  %v1493_v6 = vrot.slane %v15096_v62, 1  ;;  %v1494_v7 = vrot.slane %v15093_v61, 2  ;;  %v1727_v9 = vrot.slane %v15096_v62, 2  ;;  %v13538_v58 = vld [vmem:[#allocation4 + $0x240] ss:$8 sps:$4 sm:$0xff]  }
 0x11b   : > { %v1728_v10 = vrot.slane %v15093_v61, 3  ;;  %v1961_v11 = vrot.slane %v15096_v62, 3  ;;  %v1962_v12 = vrot.slane %v15093_v61, 4  ;;  %11247 = vmatmul.mubr.msk.bf16.vlgmr.msra.gmra.mxu1 %vm1105_vm0, %v15105_v4  ;;  %v15117_v13 = vshrl.u32 %v15105_v4, 16  ;;  %v13529_v62 = vld [vmem:[#allocation4 + $0x270] ss:$8 sps:$4 sm:$0xff]  }
 0x11c   : > { %v15120_v15 = vshll.u32 %v15105_v4, 16  ;;  %v1373_v17 = vrot.slane %v15105_v4, 1  ;;  %1558 = vmatpush1.bf16.msra.mxu1 %v1546_v41  ;;  %1583 = vmatprep.mubr.bf16.mxu1 %v14727_v14  ;;  %v1609_v18 = vrot.slane %v15105_v4, 2  ;;  %v1843_v19 = vrot.slane %v15105_v4, 3  ;;  %v13465_v41 = vld [vmem:[#allocation4 + $0xa0] ss:$8 sps:$4 sm:$0xff]  }
 0x11d   : > { %1559 = vmatprep.subr.bf16.mxu1 %v13447_v60  ;;  %v1488_v21 = vrot.slane %v15117_v13, 1  ;;  %v1724_v25 = vrot.slane %v15117_v13, 2  ;;  %v1958_v27 = vrot.slane %v15117_v13, 3  ;;  %v13480_v60 = vld [vmem:[#allocation4 + $0x18c] ss:$8 sps:$4 sm:$0xff]  }
 0x11e   : > { %v1160_v20 = vrot.slane %v15120_v15, 1  ;;  %v1489_v22 = vrot.slane %v15120_v15, 2  ;;  %v1725_v26 = vrot.slane %v15120_v15, 3  ;;  %v1959_v30 = vrot.slane %v15120_v15, 4  ;;  %v13531_v15 = vld [vmem:[#allocation4 + $0x274] ss:$8 sps:$4 sm:$0xff]  }
 0x11f   : > { %v1845_v61 = vsel %vm1842_vm12, %v1843_v19, %v1844_v3  ;;  %v2066_v3 = vpack.c.bf16 %v15075_v54, %v15100_v2  ;;  %vm2382_vm12 = vcmask 1048448  }
 0x120   : > { %v1161_v28 = vor.u32 %v1160_v20, %v15117_v13  ;;  %1560 = vmatpush1.bf16.msra.mxu1 %v13445_v8  ;;  %v1490_v48 = vor.u32 %v1489_v22, %v1488_v21  ;;  %v13481_v8 = vld [vmem:[#allocation4 + $0x150] ss:$8 sps:$4 sm:$0xff]   ;;  %v13492_v20 = vld [vmem:[#allocation4 + $0x16c] ss:$8 sps:$4 sm:$0xff]   ;;  %v13487_v21 = vld [vmem:[#allocation4 + $0x140] ss:$8 sps:$4 sm:$0xff]   ;;  %v11329_v13 = vcombine.high %v15063_v46, %v15063_v46 }
 0x121   : > { %1561 = vmatprep.subr.bf16.mxu1 %v13452_v16  ;;  %v13489_v16 = vld [vmem:[#allocation4 + $0x144] ss:$8 sps:$4 sm:$0xff]   ;;  %v13490_v22 = vld [vmem:[#allocation4 + $0x168] ss:$8 sps:$4 sm:$0xff]   ;;  %v13537_v46 = vld [vmem:[#allocation4 + $0x254] ss:$8 sps:$4 sm:$0xff]  }
 0x122   : > { %v1166_v31 = vsel %vm1154_vm6, %v1161_v28, %v1165_v5  ;;  %v13478_v5 = vld [vmem:[#allocation4 + $0x188] ss:$8 sps:$4 sm:$0xff]   ;;  %v13500_v28 = vld [vmem:[#allocation4 + $0x124] ss:$8 sps:$4 sm:$0xff]  }
 0x123   : > { %11235 = vmatmul.mubr.msk.bf16.vlgmr.msra.gmra.mxu0 %vm1105_vm0, %v1166_v31  ;;  %v13498_v31 = vld [vmem:[#allocation4 + $0x120] ss:$8 sps:$4 sm:$0xff]  }
 0x124   : > { %1437 = vmatpush1.bf16.msra.mxu0 %v15054_v42  ;;  %1462 = vmatprep.mubr.bf16.mxu0 %v14727_v14  ;;  %v1495_v42 = vor.u32 %v1494_v7, %v1493_v6  ;;  %v13483_v6 = vld [vmem:[#allocation4 + $0x154] ss:$8 sps:$4 sm:$0xff]  }
 0x125   : > { %1562 = vmatpush1.bf16.msra.mxu1 %v13450_v23  ;;  %1438 = vmatprep.subr.bf16.mxu0 %v13455_v24  ;;  %v13486_v7 = vld [vmem:[#allocation4 + $0x17c] ss:$8 sps:$4 sm:$0xff]   ;;  %v1729_v24 = vor.u32 %v1728_v10, %v1727_v9  ;;  %v11305_v9 = vcombine.high %v15061_v45, %v15061_v45  ;;  %v13506_v10 = vld [vmem:[#allocation4 + $0x218] ss:$8 sps:$4 sm:$0xff]   ;;  %v13512_v45 = vld [vmem:[#allocation4 + $0x208] ss:$8 sps:$4 sm:$0xff]  }
 0x126   : > { %1563 = vmatprep.subr.bf16.mxu1 %v13458_v29  ;;  %v1496_v53 = vsel %vm1487_vm7, %v1490_v48, %v1495_v42  ;;  %v13495_v23 = vld [vmem:[#allocation4 + $0x134] ss:$8 sps:$4 sm:$0xff]   ;;  %v13524_v48 = vld [vmem:[#allocation4 + $0x1b0] ss:$8 sps:$4 sm:$0xff]  }
 0x127   : > { %v13503_v29 = vld [vmem:[#allocation4 + $0x22c] ss:$8 sps:$4 sm:$0xff]  }
 0x128   : > { %1439 = vmatpush1.bf16.msra.mxu0 %v13453_v32  ;;  %v13501_v32 = vld [vmem:[#allocation4 + $0x228] ss:$8 sps:$4 sm:$0xff]  }
 0x129   : > { %1564 = vmatpush1.bf16.msra.mxu1 %v13456_v33  ;;  %1440 = vmatprep.subr.bf16.mxu0 %v13461_v34  ;;  %v13514_v33 = vld [vmem:[#allocation4 + $0x20c] ss:$8 sps:$4 sm:$0xff]   ;;  %v13509_v34 = vld [vmem:[#allocation4 + $0x1e0] ss:$8 sps:$4 sm:$0xff]  }
 0x12a   : > { %1565 = vmatprep.subr.bf16.mxu1 %v13464_v37  ;;  %v13517_v37 = vld [vmem:[#allocation4 + $0x1d4] ss:$8 sps:$4 sm:$0xff]  }
 0x12c   : > { %1441 = vmatpush1.bf16.msra.mxu0 %v13459_v38  ;;  %v13520_v38 = vld [vmem:[#allocation4 + $0x1fc] ss:$8 sps:$4 sm:$0xff]  }
 0x12d   : > { %1566 = vmatpush1.bf16.msra.mxu1 %v13462_v39  ;;  %1442 = vmatprep.subr.bf16.mxu0 %v13467_v40  ;;  %v13515_v39 = vld [vmem:[#allocation4 + $0x1d0] ss:$8 sps:$4 sm:$0xff]  }
 0x12e   : > { %11294 = vmatprep.subr.msk.bf16.mxu1 %vm1111_vm1, %v11293_v47  ;;  %v13518_v40 = vld [vmem:[#allocation4 + $0x1f8] ss:$8 sps:$4 sm:$0xff]   ;;  %v13526_v47 = vld [vmem:[#allocation4 + $0x1b4] ss:$8 sps:$4 sm:$0xff]  }
 0x130   : > { %1443 = vmatpush1.bf16.msra.mxu0 %v13465_v41  ;;  %11271 = vmatmul.mubr.msk.bf16.vlgmr.msra.gmra.mxu1 %vm1105_vm0, %v1496_v53  ;;  %v13523_v41 = vld [vmem:[#allocation4 + $0x1c4] ss:$8 sps:$4 sm:$0xff]  }
 0x131   : > { %1792 = vmatpush1.bf16.msra.mxu1 %v15057_v43  ;;  %1444 = vmatprep.subr.bf16.mxu0 %v13472_v50  ;;  %v1375_v43 = vsel %vm1372_vm8, %v1373_v17, %v1374_v63  ;;  %v13493_v63 = vld [vmem:[#allocation4 + $0x130] ss:$8 sps:$4 sm:$0xff]   ;;  %v11317_v17 = vcombine.high %v15059_v44, %v15059_v44 }
 0x132   : > { %1793 = vmatprep.subr.bf16.mxu1 %v13475_v51  ;;  %1817 = vmatprep.mubr.bf16.mxu1 %v14727_v14 }
 0x134   : > { %1445 = vmatpush1.bf16.msra.mxu0 %v13470_v52 }
 0x135   : > { %1794 = vmatpush1.bf16.msra.mxu1 %v13473_v59  ;;  %11282 = vmatprep.subr.msk.bf16.mxu0 %vm1111_vm1, %v11281_v35 }
 0x136   : > { %1795 = vmatprep.subr.bf16.mxu1 %v13480_v60 }
 0x137   : > { %11259 = vmatmul.mubr.msk.bf16.vlgmr.msra.gmra.mxu0 %vm1105_vm0, %v1375_v43 }
 0x138   : > { %1673 = vmatpush1.bf16.msra.mxu0 %v15066_v49  ;;  %1698 = vmatprep.mubr.bf16.mxu0 %v14727_v14  ;;  %v1726_v49 = vor.u32 %v1725_v26, %v1724_v25  ;;  %v13508_v25 = vld [vmem:[#allocation4 + $0x21c] ss:$8 sps:$4 sm:$0xff]  }
 0x139   : > { %1796 = vmatpush1.bf16.msra.mxu1 %v13478_v5  ;;  %1674 = vmatprep.subr.bf16.mxu0 %v13483_v6  ;;  %v13511_v26 = vld [vmem:[#allocation4 + $0x1e4] ss:$8 sps:$4 sm:$0xff]  }
 0x13a   : > { %1797 = vmatprep.subr.bf16.mxu1 %v13486_v7  ;;  %v1730_v44 = vsel %vm1723_vm9, %v1726_v49, %v1729_v24  ;;  %vm2372_vm9 = vcmask 786048  }
 0x13c   : > { %1675 = vmatpush1.bf16.msra.mxu0 %v13481_v8 }
 0x13d   : > { %1798 = vmatpush1.bf16.msra.mxu1 %v13484_v36  ;;  %1676 = vmatprep.subr.bf16.mxu0 %v13489_v16 }
 0x13e   : > { %1799 = vmatprep.subr.bf16.mxu1 %v13492_v20 }
 0x140   : > { %1677 = vmatpush1.bf16.msra.mxu0 %v13487_v21 }
 0x141   : > { %1800 = vmatpush1.bf16.msra.mxu1 %v13490_v22  ;;  %1678 = vmatprep.subr.bf16.mxu0 %v13495_v23 }
 0x142   : > { %11318 = vmatprep.subr.msk.bf16.mxu1 %vm1111_vm1, %v11317_v17 }
 0x144   : > { %1679 = vmatpush1.bf16.msra.mxu0 %v13493_v63  ;;  %11295 = vmatmul.mubr.msk.bf16.vlgmr.msra.gmra.mxu1 %vm1105_vm0, %v1730_v44 }
 0x145   : > { %2026 = vmatpush1.bf16.msra.mxu1 %v15078_v55  ;;  %1680 = vmatprep.subr.bf16.mxu0 %v13500_v28  ;;  %v1611_v55 = vsel %vm1608_vm10, %v1609_v18, %v1610_v1  ;;  %v13521_v1 = vld [vmem:[#allocation4 + $0x1c0] ss:$8 sps:$4 sm:$0xff]   ;;  %v1963_v18 = vor.u32 %v1962_v12, %v1961_v11  ;;  %v13534_v11 = vld [vmem:[#allocation4 + $0x264] ss:$8 sps:$4 sm:$0xff]  }
 0x146   : > { %2027 = vmatprep.subr.bf16.mxu1 %v13503_v29  ;;  %2051 = vmatprep.mubr.bf16.mxu1 %v14727_v14  ;;  %v13532_v12 = vld [vmem:[#allocation4 + $0x260] ss:$8 sps:$4 sm:$0xff]  }
 0x148   : > { %1681 = vmatpush1.bf16.msra.mxu0 %v13498_v31 }
 0x149   : > { %2028 = vmatpush1.bf16.msra.mxu1 %v13501_v32  ;;  %11306 = vmatprep.subr.msk.bf16.mxu0 %vm1111_vm1, %v11305_v9 }
 0x14a   : > { %2029 = vmatprep.subr.bf16.mxu1 %v13508_v25 }
 0x14b   : > { %11283 = vmatmul.mubr.msk.bf16.vlgmr.msra.gmra.mxu0 %vm1105_vm0, %v1611_v55 }
 0x14c   : > { %1907 = vmatpush1.bf16.msra.mxu0 %v15081_v56  ;;  %1932 = vmatprep.mubr.bf16.mxu0 %v14727_v14  ;;  %v1960_v56 = vor.u32 %v1959_v30, %v1958_v27  ;;  %v13535_v27 = vld [vmem:[#allocation4 + $0x250] ss:$8 sps:$4 sm:$0xff]   ;;  %v13540_v30 = vld [vmem:[#allocation4 + $0x244] ss:$8 sps:$4 sm:$0xff]  }
 0x14d   : > { %2030 = vmatpush1.bf16.msra.mxu1 %v13506_v10  ;;  %1908 = vmatprep.subr.bf16.mxu0 %v13511_v26 }
 0x14e   : > { %2031 = vmatprep.subr.bf16.mxu1 %v13514_v33  ;;  %v1964_v42 = vsel %vm1957_vm11, %v1960_v56, %v1963_v18  ;;  %vm2377_vm11 = vcmask 917248  }
 0x150   : > { %1909 = vmatpush1.bf16.msra.mxu0 %v13509_v34 }
 0x151   : > { %2032 = vmatpush1.bf16.msra.mxu1 %v13512_v45  ;;  %1910 = vmatprep.subr.bf16.mxu0 %v13517_v37 }
 0x152   : > { %2033 = vmatprep.subr.bf16.mxu1 %v13520_v38 }
 0x154   : > { %1911 = vmatpush1.bf16.msra.mxu0 %v13515_v39 }
 0x155   : > { %2034 = vmatpush1.bf16.msra.mxu1 %v13518_v40  ;;  %1912 = vmatprep.subr.bf16.mxu0 %v13523_v41 }
 0x158   : > { %1913 = vmatpush1.bf16.msra.mxu0 %v13521_v1  ;;  %11319 = vmatmul.mubr.msk.bf16.vlgmr.msra.gmra.mxu1 %vm1105_vm0, %v1964_v42 }
 0x159   : > { %1914 = vmatprep.subr.bf16.mxu0 %v13526_v47 }
 0x15c   : > { %1915 = vmatpush1.bf16.msra.mxu0 %v13524_v48 }
 0x15d   : > { %11330 = vmatprep.subr.msk.bf16.mxu0 %vm1111_vm1, %v11329_v13  ;;  %v2178_v13 = vld [vmem:[%s16783_s13] sm:$0x3] }
 0x15f   : > { %11307 = vmatmul.mubr.msk.bf16.vlgmr.msra.gmra.mxu0 %vm1105_vm0, %v1845_v61 }
 0x160   : > { %2138 = vmatpush1.bf16.msra.mxu0 %v15084_v57  ;;  %2163 = vmatprep.mubr.bf16.mxu0 %v14727_v14  ;;  %v2180_v57 = vlaneseq }
 0x161   : > { %2139 = vmatprep.subr.bf16.mxu0 %v13531_v15 }
 0x162   : > { %v15206_v4 = vshrl.u32 %v2180_v57, 7  ;;  %vm15226_vm13 = vcmp.lt.s32.totalorder %v2180_v57, 256 }
 0x164   : > { %2140 = vmatpush1.bf16.msra.mxu0 %v13529_v62  ;;  %v15209_v48 = vsub.s32 0, %v15206_v4  ;;  %v15213_v15 = vsub.s32 1, %v15206_v4 }
 0x165   : > { %2141 = vmatprep.subr.bf16.mxu0 %v13534_v11  ;;  %v2194_v11 = vld [vmem:[%s14774_s17] sm:$0x3] }
 0x168   : > { %2142 = vmatpush1.bf16.msra.mxu0 %v13532_v12 }
 0x169   : > { %2143 = vmatprep.subr.bf16.mxu0 %v13537_v46 }
 0x16c   : > { %2144 = vmatpush1.bf16.msra.mxu0 %v13535_v27 }
 0x16d   : > { %2145 = vmatprep.subr.bf16.mxu0 %v13540_v30 }
 0x170   : > { %2146 = vmatpush1.bf16.msra.mxu0 %v13538_v58  ;;  %v2183_v58 = vrot.slane %v2178_v13, %v15209_v48 }
 0x173   : > { %11331 = vmatmul.mubr.msk.bf16.vlgmr.msra.gmra.mxu0 %vm1105_vm0, %v2066_v3  ;;  %vm2390_vm0 = vcmask 783360  }
 0x174   : > { %2391 = vst.msk [vmem:[#allocation2 + $0x20] sm:$0x3f] %vm2390_vm0, %v14725_v0  ;;  %vm2397_vm0 = vcmask 1047939  }
 0x1db   : > { %v1351_v51 = vpop.f32.mrf.mxu1 }
 0x1dd   : > { %v1353_v53 = vpop.f32.mrf.mxu1 }
 0x1df   : > { %v1355_v60 = vpop.f32.mrf.mxu1 }
 0x1e1   : > { %v1357_v5 = vpop.f32.mrf.mxu1 }
 0x1e3   : > { %v1255_v19 = vpop.f32.mrf.mxu0 }
 0x1e4   : > { %v1352_v23 = vadd.f32 %v1351_v51, %v1255_v19  ;;  %v2187_v51 = vrot.slane %v2178_v13, %v15213_v15 }
 0x1e5   : > { %v1257_v50 = vpop.f32.mrf.mxu0 }
 0x1e6   : > { %v1354_v17 = vadd.f32 %v1353_v53, %v1257_v50  ;;  %v2199_v50 = vrot.slane %v2194_v11, %v15209_v48 }
 0x1e7   : > { %v1259_v52 = vpop.f32.mrf.mxu0 }
 0x1e8   : > { %v1356_v28 = vadd.f32 %v1355_v60, %v1259_v52 }
 0x1e9   : > { %v1261_v59 = vpop.f32.mrf.mxu0 }
 0x1ea   : > { %v1358_v32 = vadd.f32 %v1357_v5, %v1261_v59 }
 0x1f0   : > { %v1585_v7 = vpop.f32.mrf.mxu1 }
 0x1f2   : > { %v1587_v8 = vpop.f32.mrf.mxu1 }
 0x1f4   : > { %v1589_v2 = vpop.f32.mrf.mxu1 }
 0x1f6   : > { %v1591_v16 = vpop.f32.mrf.mxu1 }
 0x1f7   : > { %v1464_v35 = vpop.f32.mrf.mxu0 }
 0x1f8   : > { %v1473_v49 = vadd.f32 %v1464_v35, %v1352_v23 }
 0x1f9   : > { %v1466_v6 = vpop.f32.mrf.mxu0 }
 0x1fa   : > { %v1474_v29 = vadd.f32 %v1466_v6, %v1354_v17  ;;  %v1594_v9 = vadd.f32 %v1585_v7, %v1473_v49  ;;  %v2203_v6 = vrot.slane %v2194_v11, %v15213_v15 }
 0x1fb   : > { %v1468_v43 = vpop.f32.mrf.mxu0 }
 0x1fc   : > { %v1475_v25 = vadd.f32 %v1468_v43, %v1356_v28  ;;  %v1595_v33 = vadd.f32 %v1587_v8, %v1474_v29  ;;  %v14728_v8 = vmov 1966171168  }
 0x1fd   : > { %v1470_v54 = vpop.f32.mrf.mxu0 }
 0x1fe   : > { %v1476_v10 = vadd.f32 %v1470_v54, %v1358_v32  ;;  %v1596_v37 = vadd.f32 %v1589_v2, %v1475_v25  ;;  %v2226_v54 = vunpack.c.l.s4 %v14728_v8  ;;  %v13552_v8 = vld [vmem:[%s14779_s21 + $0x54] ss:$8 sps:$4 sm:$0xff]  }
 0x200   : > { %v1597_v40 = vadd.f32 %v1591_v16, %v1476_v10 }
 0x204   : > { %v1819_v21 = vpop.f32.mrf.mxu1 }
 0x206   : > { %v1821_v63 = vpop.f32.mrf.mxu1 }
 0x208   : > { %v1823_v31 = vpop.f32.mrf.mxu1 }
 0x20a   : > { %v1825_v55 = vpop.f32.mrf.mxu1 }
 0x20b   : > { %v1700_v36 = vpop.f32.mrf.mxu0 }
 0x20c   : > { %v1709_v26 = vadd.f32 %v1700_v36, %v1594_v9 }
 0x20d   : > { %v1702_v20 = vpop.f32.mrf.mxu0 }
 0x20e   : > { %v1710_v45 = vadd.f32 %v1702_v20, %v1595_v33  ;;  %v1828_v41 = vadd.f32 %v1819_v21, %v1709_v26 }
 0x20f   : > { %v1704_v22 = vpop.f32.mrf.mxu0 }
 0x210   : > { %v1711_v39 = vadd.f32 %v1704_v22, %v1596_v37  ;;  %v1829_v47 = vadd.f32 %v1821_v63, %v1710_v45 }
 0x211   : > { %v1706_v24 = vpop.f32.mrf.mxu0 }
 0x212   : > { %v1712_v56 = vadd.f32 %v1706_v24, %v1597_v40  ;;  %v1830_v62 = vadd.f32 %v1823_v31, %v1711_v39  ;;  %v2227_v24 = vunpack.c.0.s8 %v2226_v54  ;;  %v13553_v54 = vld [vmem:[%s14779_s21 + $0x140] ss:$8 sps:$4 sm:$0xff]  }
 0x214   : > { %v1831_v27 = vadd.f32 %v1825_v55, %v1712_v56  ;;  %v15221_v10 = vsub.s32 %v2227_v24, %v15206_v4  ;;  %v13570_v24 = vld [vmem:[%s14779_s21 + $0x24] ss:$8 sps:$4 sm:$0xff]  }
 0x218   : > { %v2053_v38 = vpop.f32.mrf.mxu1 }
 0x21a   : > { %v2055_v42 = vpop.f32.mrf.mxu1 }
 0x21c   : > { %v2057_v3 = vpop.f32.mrf.mxu1 }
 0x21e   : > { %v2059_v43 = vpop.f32.mrf.mxu1 }
 0x21f   : > { %v1934_v44 = vpop.f32.mrf.mxu0 }
 0x220   : > { %v1943_v18 = vadd.f32 %v1934_v44, %v1828_v41 }
 0x221   : > { %v1936_v34 = vpop.f32.mrf.mxu0 }
 0x222   : > { %v1944_v61 = vadd.f32 %v1936_v34, %v1829_v47  ;;  %v2062_v30 = vadd.f32 %v2053_v38, %v1943_v18 }
 0x223   : > { %v1938_v1 = vpop.f32.mrf.mxu0 }
 0x224   : > { %v1945_v46 = vadd.f32 %v1938_v1, %v1830_v62  ;;  %v2063_v59 = vadd.f32 %v2055_v42, %v1944_v61 }
 0x225   : > { %v1940_v12 = vpop.f32.mrf.mxu0 }
 0x226   : > { %v1946_v52 = vadd.f32 %v1940_v12, %v1831_v27  ;;  %v2064_v7 = vadd.f32 %v2057_v3, %v1945_v46 }
 0x228   : > { %v2065_v21 = vadd.f32 %v2059_v43, %v1946_v52  ;;  %v13555_v43 = vld [vmem:[%s14779_s21 + $0x144] ss:$8 sps:$4 sm:$0xff]  }
 0x233   : > { %v2165_v19 = vpop.f32.mrf.mxu0 }
 0x234   : > { %v2174_v53 = vadd.f32 %v2165_v19, %v2062_v30 }
 0x235   : > { %v2167_v60 = vpop.f32.mrf.mxu0 }
 0x236   : > { %v2190_v35 = vmul.f32 %v2183_v58, %v2174_v53  ;;  %v2175_v5 = vadd.f32 %v2167_v60, %v2063_v59  ;;  %v13541_v59 = vld [vmem:[%s14779_s21 + $0x70] ss:$8 sps:$4 sm:$0xff]   ;;  %v13543_v60 = vld [vmem:[%s14779_s21 + $0x74] ss:$8 sps:$4 sm:$0xff]  }
 0x237   : > { %v2169_v2 = vpop.f32.mrf.mxu0  ;;  %2812 = vmatprep.subr.bf16.mxu0 %v13543_v60  ;;  %v13616_v60 = vld [vmem:[%s14779_s21 + $0x80] ss:$8 sps:$4 sm:$0xff]  }
 0x238   : > { %v2206_v36 = vadd.f32 %v2199_v50, %v2190_v35  ;;  %v2191_v16 = vmul.f32 %v2187_v51, %v2175_v5  ;;  %v2176_v20 = vadd.f32 %v2169_v2, %v2064_v7  ;;  %v13546_v35 = vld [vmem:[%s14779_s21 + $0x64] ss:$8 sps:$4 sm:$0xff]   ;;  %v13547_v5 = vld [vmem:[%s14779_s21 + $0x150] ss:$8 sps:$4 sm:$0xff]   ;;  %2813 = vmatpush1.bf16.msra.mxu0 %v13541_v59  ;;  %v13544_v7 = vld [vmem:[%s14779_s21 + $0x60] ss:$8 sps:$4 sm:$0xff]  }
 0x239   : > { %v2171_v22 = vpop.f32.mrf.mxu0  ;;  %2814 = vmatprep.subr.bf16.mxu0 %v13546_v35  ;;  %v13561_v2 = vld [vmem:[%s14779_s21 + $0x134] ss:$8 sps:$4 sm:$0xff]   ;;  %v13615_v59 = vld [vmem:[%s14779_s21 + $0x184] ss:$8 sps:$4 sm:$0xff]  }
 0x23a   : > { %v2210_v23 = vmax.f32 %v2206_v36, 0.0  ;;  %v2207_v63 = vadd.f32 %v2203_v6, %v2191_v16  ;;  %v2192_v17 = vmul.f32 %v2183_v58, %v2176_v20  ;;  %v2177_v49 = vadd.f32 %v2171_v22, %v2065_v21  ;;  %v13550_v36 = vld [vmem:[%s14779_s21 + $0x50] ss:$8 sps:$4 sm:$0xff]   ;;  %v13558_v16 = vld [vmem:[%s14779_s21 + $0x44] ss:$8 sps:$4 sm:$0xff]  }
 0x23b   : > { %v13559_v20 = vld [vmem:[%s14779_s21 + $0x130] ss:$8 sps:$4 sm:$0xff]   ;;  %v13567_v21 = vld [vmem:[%s14779_s21 + $0x124] ss:$8 sps:$4 sm:$0xff]   ;;  %v13556_v22 = vld [vmem:[%s14779_s21 + $0x40] ss:$8 sps:$4 sm:$0xff]  }
 0x23c   : > { %v2216_v28 = vrot.slane %v2210_v23, 1  ;;  %v2211_v29 = vmax.f32 %v2207_v63, 0.0  ;;  %v2208_v31 = vadd.f32 %v2199_v50, %v2192_v17  ;;  %v2193_v44 = vmul.f32 %v2187_v51, %v2177_v49  ;;  %2815 = vmatpush1.bf16.msra.mxu0 %v13544_v7  ;;  %v13565_v63 = vld [vmem:[%s14779_s21 + $0x120] ss:$8 sps:$4 sm:$0xff]   ;;  %v13573_v17 = vld [vmem:[%s14779_s21 + $0x114] ss:$8 sps:$4 sm:$0xff]  }
 0x23d   : > { %2816 = vmatprep.subr.bf16.mxu0 %v13552_v8  ;;  %v13562_v49 = vld [vmem:[%s14779_s21 + $0x30] ss:$8 sps:$4 sm:$0xff]   ;;  %v13618_v35 = vld [vmem:[%s14779_s21 + $0x84] ss:$8 sps:$4 sm:$0xff]   ;;  %v13624_v7 = vld [vmem:[%s14779_s21 + $0x314] ss:$8 sps:$4 sm:$0xff]  }
 0x23e   : > { %v2217_v32 = vrot.slane %v2211_v29, 1  ;;  %v2212_v25 = vmax.f32 %v2208_v31, 0.0  ;;  %v2209_v9 = vadd.f32 %v2203_v6, %v2193_v44  ;;  %v2220_v26 = vmax.f32 %v2210_v23, %v2216_v28  ;;  %v13549_v6 = vld [vmem:[%s14779_s21 + $0x154] ss:$8 sps:$4 sm:$0xff]   ;;  %v13571_v28 = vld [vmem:[%s14779_s21 + $0x110] ss:$8 sps:$4 sm:$0xff]  }
 0x23f   : > { %2628 = vmatprep.subr.bf16.mxu1 %v13549_v6  ;;  %v13564_v23 = vld [vmem:[%s14779_s21 + $0x34] ss:$8 sps:$4 sm:$0xff]   ;;  %v13568_v31 = vld [vmem:[%s14779_s21 + $0x20] ss:$8 sps:$4 sm:$0xff]   ;;  %v13619_v8 = vld [vmem:[%s14779_s21 + $0x170] ss:$8 sps:$4 sm:$0xff]  }
 0x240   : > { %v2221_v33 = vmax.f32 %v2211_v29, %v2217_v32  ;;  %v2277_v55 = vrot.slane %v2212_v25, 1  ;;  %v2213_v34 = vmax.f32 %v2209_v9, 0.0  ;;  %2629 = vmatpush1.bf16.msra.mxu1 %v13547_v5  ;;  %2817 = vmatpush1.bf16.msra.mxu0 %v13550_v36  ;;  %v13579_v29 = vld [vmem:[%s14779_s21 + $0x104] ss:$8 sps:$4 sm:$0xff]   ;;  %v13576_v44 = vld [vmem:[%s14779_s21 + $0x14] ss:$8 sps:$4 sm:$0xff]  }
 0x241   : > { %2630 = vmatprep.subr.bf16.mxu1 %v13555_v43  ;;  %2818 = vmatprep.subr.bf16.mxu0 %v13558_v16  ;;  %v13577_v32 = vld [vmem:[%s14779_s21 + $0x100] ss:$8 sps:$4 sm:$0xff]   ;;  %v13574_v9 = vld [vmem:[%s14779_s21 + $0x10] ss:$8 sps:$4 sm:$0xff]   ;;  %v13621_v5 = vld [vmem:[%s14779_s21 + $0x174] ss:$8 sps:$4 sm:$0xff]  }
 0x242   : > { %v2224_v45 = vcombine.low %v2220_v26, %v2221_v33  ;;  %v2251_v37 = vcombine.high %v2220_v26, %v2221_v33  ;;  %v2278_v38 = vrot.slane %v2213_v34, 1  ;;  %v2281_v41 = vmax.f32 %v2212_v25, %v2277_v55  ;;  %v13585_v25 = vld [vmem:[%s14779_s21 + $0xf4] ss:$8 sps:$4 sm:$0xff]   ;;  %v13582_v26 = vld [vmem:[%s14779_s21 + $0x4] ss:$8 sps:$4 sm:$0xff]  }
 0x243   : > { %v13583_v33 = vld [vmem:[%s14779_s21 + $0xf0] ss:$8 sps:$4 sm:$0xff]   ;;  %v13591_v55 = vld [vmem:[%s14779_s21 + $0xe4] ss:$8 sps:$4 sm:$0xff]   ;;  %v13633_v36 = vld [vmem:[%s14779_s21 + $0x234] ss:$8 sps:$4 sm:$0xff]  }
 0x244   : > { %v2231_v39 = vrot.slane %v2224_v45, %v15221_v10  ;;  %v2258_v40 = vrot.slane %v2251_v37, %v15221_v10  ;;  %v2282_v1 = vmax.f32 %v2213_v34, %v2278_v38  ;;  %2631 = vmatpush1.bf16.msra.mxu1 %v13553_v54  ;;  %2819 = vmatpush1.bf16.msra.mxu0 %v13556_v22  ;;  %v13580_v34 = vld [vmem:[%s14779_s21] ss:$8 sps:$4 sm:$0xff]   ;;  %v13588_v45 = vld [vmem:[%s14779_s21 + $0xd4] ss:$8 sps:$4 sm:$0xff]   ;;  %v13627_v54 = vld [vmem:[%s14779_s21 + $0x164] ss:$8 sps:$4 sm:$0xff]  }
 0x245   : > { %2632 = vmatprep.subr.bf16.mxu1 %v13561_v2  ;;  %2820 = vmatprep.subr.bf16.mxu0 %v13564_v23  ;;  %v13589_v37 = vld [vmem:[%s14779_s21 + $0xe0] ss:$8 sps:$4 sm:$0xff]   ;;  %v13597_v38 = vld [vmem:[%s14779_s21 + $0x1b4] ss:$8 sps:$4 sm:$0xff]  }
 0x246   : > { %v2238_v18 = vrot.slane %v2231_v39, %v15221_v10  ;;  %v2265_v47 = vrot.slane %v2258_v40, %v15221_v10  ;;  %v2285_v42 = vcombine.low %v2281_v41, %v2282_v1  ;;  %v2309_v13 = vcombine.high %v2281_v41, %v2282_v1  ;;  %v13586_v39 = vld [vmem:[%s14779_s21 + $0xd0] ss:$8 sps:$4 sm:$0xff]   ;;  %v13594_v40 = vld [vmem:[%s14779_s21 + $0xc4] ss:$8 sps:$4 sm:$0xff]   ;;  %v13625_v2 = vld [vmem:[%s14779_s21 + $0x160] ss:$8 sps:$4 sm:$0xff]  }
 0x247   : > { %v13595_v41 = vld [vmem:[%s14779_s21 + $0x1b0] ss:$8 sps:$4 sm:$0xff]   ;;  %v13603_v1 = vld [vmem:[%s14779_s21 + $0x1a4] ss:$8 sps:$4 sm:$0xff]  }
 0x248   : > { %2244 = vst.msk [vmem:[#allocation2] ss:$8 sm:$0x3] %vm15226_vm13, %v2238_v18  ;;  %v2246_v61 = vcombine.high %v2238_v18, %v2238_v18  ;;  %2268 = vst.msk [vmem:[#allocation2 + $0x2] ss:$8 sm:$0x3] %vm15226_vm13, %v2265_v47  ;;  %v2270_v62 = vcombine.high %v2265_v47, %v2265_v47  ;;  %v2292_v11 = vrot.slane %v2285_v42, %v15221_v10  ;;  %2633 = vmatpush1.bf16.msra.mxu1 %v13559_v20 }
 0x249   : > { %v2316_v12 = vrot.slane %v2309_v13, %v15221_v10  ;;  %2634 = vmatprep.subr.bf16.mxu1 %v13567_v21  ;;  %2821 = vmatpush1.bf16.msra.mxu0 %v13562_v49  ;;  %v13592_v18 = vld [vmem:[%s14779_s21 + $0xc0] ss:$8 sps:$4 sm:$0xff]   ;;  %v13600_v47 = vld [vmem:[%s14779_s21 + $0xb4] ss:$8 sps:$4 sm:$0xff]   ;;  %v13598_v13 = vld [vmem:[%s14779_s21 + $0xb0] ss:$8 sps:$4 sm:$0xff]  }
 0x24a   : > { %2249 = vst.msk [vmem:[#allocation2 + $0x1] ss:$8 sm:$0x3] %vm15226_vm13, %v2246_v61  ;;  %2273 = vst.msk [vmem:[#allocation2 + $0x3] ss:$8 sm:$0x3] %vm15226_vm13, %v2270_v62  ;;  %v2299_v46 = vrot.slane %v2292_v11, %v15221_v10  ;;  %2822 = vmatprep.subr.bf16.mxu0 %v13570_v24 }
 0x24b   : > { %v2323_v27 = vrot.slane %v2316_v12, %v15221_v10  ;;  %v13601_v42 = vld [vmem:[%s14779_s21 + $0x1a0] ss:$8 sps:$4 sm:$0xff]   ;;  %v13606_v61 = vld [vmem:[%s14779_s21 + $0xa4] ss:$8 sps:$4 sm:$0xff]  }
 0x24c   : > { %2302 = vst.msk [vmem:[#allocation2 + $0x4] ss:$8 sm:$0x3] %vm15226_vm13, %v2299_v46  ;;  %v2304_v30 = vcombine.high %v2299_v46, %v2299_v46  ;;  %2635 = vmatpush1.bf16.msra.mxu1 %v13565_v63  ;;  %v13604_v62 = vld [vmem:[%s14779_s21 + $0xa0] ss:$8 sps:$4 sm:$0xff]  }
 0x24d   : > { %2326 = vst.msk [vmem:[#allocation2 + $0x6] ss:$8 sm:$0x3] %vm15226_vm13, %v2323_v27  ;;  %v2328_v58 = vcombine.high %v2323_v27, %v2323_v27  ;;  %2636 = vmatprep.subr.bf16.mxu1 %v13573_v17  ;;  %2823 = vmatpush1.bf16.msra.mxu0 %v13568_v31  ;;  %v13622_v63 = vld [vmem:[%s14779_s21 + $0x310] ss:$8 sps:$4 sm:$0xff]  }
 0x24e   : > { %2307 = vst.msk [vmem:[#allocation2 + $0x5] ss:$8 sm:$0x3] %vm15226_vm13, %v2304_v30  ;;  %2824 = vmatprep.subr.bf16.mxu0 %v13576_v44 }
 0x24f   : > { %2331 = vst.msk [vmem:[#allocation2 + $0x7] ss:$8 sm:$0x3] %vm15226_vm13, %v2328_v58 }
 0x250   : > { %2637 = vmatpush1.bf16.msra.mxu1 %v13571_v28  ;;  %v13630_v28 = vld [vmem:[%s14779_s21 + $0x304] ss:$8 sps:$4 sm:$0xff]  }
 0x251   : > { %2638 = vmatprep.subr.bf16.mxu1 %v13579_v29  ;;  %2825 = vmatpush1.bf16.msra.mxu0 %v13574_v9  ;;  %v13628_v9 = vld [vmem:[%s14779_s21 + $0x300] ss:$8 sps:$4 sm:$0xff]  }
 0x252   : > { %2826 = vmatprep.subr.bf16.mxu0 %v13582_v26 }
 0x254   : > { %2639 = vmatpush1.bf16.msra.mxu1 %v13577_v32 }
 0x255   : > { %2640 = vmatprep.subr.bf16.mxu1 %v13585_v25  ;;  %2827 = vmatpush1.bf16.msra.mxu0 %v13580_v34 }
 0x256   : > { %v2334_v3 = vld [vmem:[#allocation2 + $0x8] sm:$0xff]  ;;  %v2333_v19 = vld [vmem:[#allocation2] sm:$0xff]  ;;  %2832 = vmatprep.subr.bf16.mxu0 %v13588_v45 }
 0x257   : > { %2359 = vrot.lane.b32.xlu0 %v2334_v3, %s16723_s22  ;;  %2336 = vrot.lane.b32.xlu1 %v2333_v19, %s16723_s22  ;;  %2386 = vst [vmem:[#allocation2] sm:$0xff] %v14725_v0  ;;  %2388 = vst.msk [vmem:[#allocation2 + $0x8] sm:$0xff] %vm2387_vm15, %v14725_v0 }
 0x258   : > { %2641 = vmatpush1.bf16.msra.mxu1 %v13583_v33 }
 0x259   : > { %2642 = vmatprep.subr.bf16.mxu1 %v13591_v55  ;;  %2833 = vmatpush2.bf16.msra.mxu0 %v13586_v39 }
 0x25a   : > { %2834 = vmatprep.subr.bf16.mxu0 %v13594_v40 }
 0x25c   : > { %2643 = vmatpush1.bf16.msra.mxu1 %v13589_v37  ;;  %v13631_v37 = vld [vmem:[%s14779_s21 + $0x230] ss:$8 sps:$4 sm:$0xff]  }
 0x25d   : > { %2648 = vmatprep.subr.bf16.mxu1 %v13597_v38  ;;  %2835 = vmatpush2.bf16.msra.mxu0 %v13592_v18  ;;  %v13639_v18 = vld [vmem:[%s14779_s21 + $0x224] ss:$8 sps:$4 sm:$0xff]  }
 0x25e   : > { %2836 = vmatprep.subr.bf16.mxu0 %v13600_v47 }
 0x260   : > { %2649 = vmatpush2.bf16.msra.mxu1 %v13595_v41 }
 0x261   : > { %2650 = vmatprep.subr.bf16.mxu1 %v13603_v1  ;;  %2837 = vmatpush2.bf16.msra.mxu0 %v13598_v13  ;;  %v13636_v1 = vld [vmem:[%s14779_s21 + $0x2f4] ss:$8 sps:$4 sm:$0xff]  }
 0x262   : > { %2838 = vmatprep.subr.bf16.mxu0 %v13606_v61  ;;  %v13642_v61 = vld [vmem:[%s14779_s21 + $0x2e4] ss:$8 sps:$4 sm:$0xff]  }
 0x264   : > { %2651 = vmatpush2.bf16.msra.mxu1 %v13601_v42  ;;  %v13634_v42 = vld [vmem:[%s14779_s21 + $0x2f0] ss:$8 sps:$4 sm:$0xff]  }
 0x265   : > { %2839 = vmatpush2.bf16.msra.mxu0 %v13604_v62  ;;  %v13637_v62 = vld [vmem:[%s14779_s21 + $0x220] ss:$8 sps:$4 sm:$0xff]  }
 0x2c9   : > { %v2337_v50 = vpop.permute.xlu1 %2336  ;;  %v2360_v52 = vpop.permute.xlu0 %2359 }
 0x2ca   : > { %v2339_v51 = vmax.f32 %v2333_v19, %v2337_v50  ;;  %v2362_v53 = vmax.f32 %v2334_v3, %v2360_v52  ;;  %v13609_v19 = vld [vmem:[%s14779_s21 + $0x194] ss:$8 sps:$4 sm:$0xff]   ;;  %v13607_v50 = vld [vmem:[%s14779_s21 + $0x190] ss:$8 sps:$4 sm:$0xff]  }
 0x2cb   : > { %2652 = vmatprep.subr.bf16.mxu1 %v13609_v19  ;;  %v13610_v52 = vld [vmem:[%s14779_s21 + $0x90] ss:$8 sps:$4 sm:$0xff]   ;;  %v13649_v19 = vld [vmem:[%s14779_s21 + $0x200] ss:$8 sps:$4 sm:$0xff]  }
 0x2cc   : > { %2348 = vrot.lane.b32.xlu0 %v2339_v51, %s14730_s18  ;;  %2343 = vrot.lane.b32.xlu1 %v2339_v51, %s16723_s22  ;;  %2341 = vst.msk [vmem:[#allocation3] sm:$0xff] %vm2340_vm14, %v2339_v51 }
 0x2cd   : > { %2653 = vmatpush2.bf16.msra.mxu1 %v13607_v50  ;;  %v13657_v50 = vld [vmem:[%s14779_s21 + $0x1f4] ss:$8 sps:$4 sm:$0xff]  }
 0x2ce   : > { %2654 = vmatprep.subr.bf16.mxu1 %v13615_v59  ;;  %v13663_v59 = vld [vmem:[%s14779_s21 + $0x1e4] ss:$8 sps:$4 sm:$0xff]  }
 0x2d0   : > { %2364 = vrot.lane.b32.xlu0 %v2362_v53, %s16725_s16  ;;  %2353 = vrot.lane.b32.xlu1 %v2339_v51, %s14732_s1  ;;  %v13612_v51 = vld [vmem:[%s14779_s21 + $0x94] ss:$8 sps:$4 sm:$0xff]  }
 0x2d1   : > { %2840 = vmatprep.subr.bf16.mxu0 %v13612_v51  ;;  %v13652_v51 = vld [vmem:[%s14779_s21 + $0x2c0] ss:$8 sps:$4 sm:$0xff]  }
 0x2d2   : > { %2841 = vmatpush2.bf16.msra.mxu0 %v13610_v52  ;;  %v13660_v52 = vld [vmem:[%s14779_s21 + $0x2b4] ss:$8 sps:$4 sm:$0xff]  }
 0x2d3   : > { %2842 = vmatprep.subr.bf16.mxu0 %v13618_v35  ;;  %v13666_v35 = vld [vmem:[%s14779_s21 + $0x2a4] ss:$8 sps:$4 sm:$0xff]  }
 0x2d4   : > { %2374 = vrot.lane.b32.xlu0 %v2362_v53, %s16732_s23  ;;  %2369 = vrot.lane.b32.xlu1 %v2362_v53, %s16726_s26 }
 0x2d6   : > { %2843 = vmatpush2.bf16.msra.mxu0 %v13616_v60  ;;  %v13658_v60 = vld [vmem:[%s14779_s21 + $0x2b0] ss:$8 sps:$4 sm:$0xff]  }
 0x2d7   : > { %3252 = vmatprep.subr.bf16.mxu0 %v13624_v7  ;;  %v13664_v7 = vld [vmem:[%s14779_s21 + $0x2a0] ss:$8 sps:$4 sm:$0xff]  }
 0x2d8   : > { %2379 = vrot.lane.b32.xlu1 %v2362_v53, %s16719_s7  ;;  %s16722_s7 = sshll.u32 %s15311_s11, 3  ;;  %v13613_v53 = vld [vmem:[%s14779_s21 + $0x180] ss:$8 sps:$4 sm:$0xff]  }
 0x2d9   : > { %2655 = vmatpush2.bf16.msra.mxu1 %v13613_v53  ;;  %s15327_s2 = scalar_lea.vmem [#allocation13], %s16722_s7  ;;  %v13655_v53 = vld [vmem:[%s14779_s21 + $0x1f0] ss:$8 sps:$4 sm:$0xff]   ;;  %s16728_s7 = sshll.u32 %s15311_s11, 4 }
 0x2da   : > { %2656 = vmatprep.subr.bf16.mxu1 %v13621_v5  ;;  %v13661_v5 = vld [vmem:[%s14779_s21 + $0x1e0] ss:$8 sps:$4 sm:$0xff]   ;;  %s15527_s22 = scalar_lea.vmem [#allocation16], %s16728_s7  ;;  %s16794_s7 = smov 112  }
 0x2dd   : > { %2657 = vmatpush2.bf16.msra.mxu1 %v13619_v8  ;;  %v13667_v8 = vld [vmem:[%s14779_s21 + $0x1d0] ss:$8 sps:$4 sm:$0xff]  }
 0x2de   : > { %2658 = vmatprep.subr.bf16.mxu1 %v13627_v54  ;;  %v13675_v54 = vld [vmem:[%s14779_s21 + $0x1c4] ss:$8 sps:$4 sm:$0xff]  }
 0x2e1   : > { %2659 = vmatpush2.bf16.msra.mxu1 %v13625_v2  ;;  %v13670_v2 = vld [vmem:[%s14779_s21 + $0x370] ss:$8 sps:$4 sm:$0xff]  }
 0x2e2   : > { %3030 = vmatprep.subr.bf16.mxu1 %v13633_v36  ;;  %v13678_v36 = vld [vmem:[%s14779_s21 + $0x364] ss:$8 sps:$4 sm:$0xff]  }
 0x33e   : > { %v2349_v11 = vpop.permute.xlu0 %2348  ;;  %v2344_v12 = vpop.permute.xlu1 %2343 }
 0x33f   : > { %2347 = vst.msk [vmem:[#allocation3] sm:$0xff] %vm2346_vm2, %v2344_v12  ;;  %vm2399_vm2 = vcmask 392195   ;;  %v13640_v12 = vld [vmem:[%s14779_s21 + $0x2e0] ss:$8 sps:$4 sm:$0xff]  }
 0x340   : > { %2352 = vst.msk [vmem:[#allocation3] sm:$0xff] %vm2351_vm3, %v2349_v11  ;;  %vm2401_vm3 = vcmask 1042816   ;;  %v13645_v11 = vld [vmem:[%s14779_s21 + $0x214] ss:$8 sps:$4 sm:$0xff]  }
 0x342   : > { %v2365_v46 = vpop.permute.xlu0 %2364  ;;  %v2354_v27 = vpop.permute.xlu1 %2353 }
 0x343   : > { %2357 = vst.msk [vmem:[#allocation3] sm:$0xff] %vm2356_vm4, %v2354_v27  ;;  %vm2403_vm4 = vcmask 387072   ;;  %v13643_v27 = vld [vmem:[%s14779_s21 + $0x210] ss:$8 sps:$4 sm:$0xff]  }
 0x344   : > { %2368 = vst.msk [vmem:[#allocation3] sm:$0xff] %vm2367_vm5, %v2365_v46  ;;  %v13648_v46 = vld [vmem:[%s14779_s21 + $0x2d4] ss:$8 sps:$4 sm:$0xff]   ;;  %vm4063_vm5 = vcmask 781824  }
 0x346   : > { %v2375_v30 = vpop.permute.xlu0 %2374  ;;  %v2370_v58 = vpop.permute.xlu1 %2369 }
 0x347   : > { %2373 = vst.msk [vmem:[#allocation3] sm:$0xff] %vm2372_vm9, %v2370_v58  ;;  %v13646_v58 = vld [vmem:[%s14779_s21 + $0x2d0] ss:$8 sps:$4 sm:$0xff]   ;;  %vm4068_vm9 = vcmask 1044224  }
 0x348   : > { %2378 = vst.msk [vmem:[#allocation3] sm:$0xff] %vm2377_vm11, %v2375_v30  ;;  %v13651_v30 = vld [vmem:[%s14779_s21 + $0x204] ss:$8 sps:$4 sm:$0xff]   ;;  %vm4073_vm11 = vcmask 523264  }
 0x349   : > { %4074 = vst.msk [vmem:[#allocation2 + $0x10] sm:$0xff] %vm4073_vm11, %v14725_v0 }
 0x34a   : > { %v2380_v3 = vpop.permute.xlu1 %2379 }
 0x34b   : > { %2383 = vst.msk [vmem:[#allocation3] sm:$0xff] %vm2382_vm12, %v2380_v3  ;;  %v13654_v3 = vld [vmem:[%s14779_s21 + $0x2c4] ss:$8 sps:$4 sm:$0xff]   ;;  %vm5913_vm12 = vcmask 254976  }
 0x352   : > { %v2384_v6 = vld [vmem:[#allocation3] sm:$0xff] }
 0x353   : > { %v2393_v43 = vrot.slane %v2384_v6, 5  ;;  %2385 = vst [vmem:[%s15327_s2] sm:$0xff] %v2384_v6  ;;  %v13669_v6 = vld [vmem:[%s14779_s21 + $0x1d4] ss:$8 sps:$4 sm:$0xff]  }
 0x355   : > { %2394 = vrot.lane.b32.xlu0 %v2393_v43, %s16726_s26  ;;  %v13672_v43 = vld [vmem:[%s14779_s21 + $0x374] ss:$8 sps:$4 sm:$0xff]  }
 0x3c7   : > { %v2395_v16 = vpop.permute.xlu0 %2394 }
 0x3c8   : > { %2398 = vst.msk [vmem:[#allocation2] sm:$0xf8] %vm2397_vm0, %v2395_v16  ;;  %vm4084_vm0 = vcmask 1047299  }
 0x3c9   : > { %2400 = vst.msk [vmem:[#allocation2 + $0x8] sm:$0xf8] %vm2399_vm2, %v2395_v16  ;;  %vm4086_vm2 = vcmask 784387  }
 0x3ca   : > { %2402 = vst.msk [vmem:[#allocation2 + $0x18] sm:$0x7] %vm2401_vm3, %v2395_v16  ;;  %vm5910_vm3 = vcmask 261120  }
 0x3cb   : > { %2404 = vst.msk [vmem:[#allocation2 + $0x20] sm:$0x7] %vm2403_vm4, %v2395_v16  ;;  %v13673_v16 = vld [vmem:[%s14779_s21 + $0x1c0] ss:$8 sps:$4 sm:$0xff]   ;;  %vm4077_vm4 = vcmask 517120  }
 0x3cc   : > { %4078 = vst.msk [vmem:[#allocation2 + $0x28] sm:$0x3] %vm4077_vm4, %v14725_v0  ;;  %vm6888_vm4 = vcmask 441394  }
 0x3cf   : > { %v2405_v17 = vld [vmem:[#allocation2] sm:$0xff] }
 0x3d0   : > { %v2406_v22 = vld [vmem:[#allocation2 + $0x8] sm:$0xff]  ;;  %v2409_v24 = vpack.c.bf16 %v2405_v17, %v2405_v17 }
 0x3d1   : > { %v2407_v20 = vld [vmem:[#allocation2 + $0x18] sm:$0x3f]  ;;  %v2410_v23 = vpack.c.bf16 %v2406_v22, %v2406_v22 }
 0x3d2   : > { %v2408_v21 = vld [vmem:[#allocation2 + $0x20] sm:$0x3f]  ;;  %4075 = vst [vmem:[#allocation2 + $0x18] sm:$0x3] %v14725_v0  ;;  %v15340_v29 = vpack.c.bf16 %v2407_v20, %v2405_v17  ;;  %v13681_v20 = vld [vmem:[%s14779_s21 + $0x294] ss:$8 sps:$4 sm:$0xff]  }
 0x3d3   : > { %4076 = vst [vmem:[#allocation2 + $0x20] sm:$0x3] %v14725_v0  ;;  %v15337_v49 = vpack.c.bf16 %v2408_v21, %v2406_v22  ;;  %11417 = vmatprep.mubr.msk.bf16.mxu0 %vm2387_vm15, %v2410_v23  ;;  %v13676_v21 = vld [vmem:[%s14779_s21 + $0x360] ss:$8 sps:$4 sm:$0xff]   ;;  %v13684_v22 = vld [vmem:[%s14779_s21 + $0x354] ss:$8 sps:$4 sm:$0xff]  }
 0x3d4   : > { %2845 = vmatmul.mubr.bf16.vlgmr.msra.gmra.mxu0 %v2409_v24  ;;  %v15350_v32 = vshrl.u32 %v15340_v29, 16  ;;  %v15353_v25 = vshll.u32 %v15340_v29, 16  ;;  %v13679_v23 = vld [vmem:[%s14779_s21 + $0x290] ss:$8 sps:$4 sm:$0xff]   ;;  %v13690_v24 = vld [vmem:[%s14779_s21 + $0x344] ss:$8 sps:$4 sm:$0xff]  }
 0x3d5   : > { %v15344_v31 = vshrl.u32 %v15337_v49, 16  ;;  %v15347_v44 = vshll.u32 %v15337_v49, 16  ;;  %3253 = vmatpush1.bf16.msra.mxu0 %v13622_v63  ;;  %v2885_v47 = vrot.slane %v15337_v49, 1  ;;  %v13687_v63 = vld [vmem:[%s14779_s21 + $0x284] ss:$8 sps:$4 sm:$0xff]  }
 0x3d6   : > { %3254 = vmatprep.subr.bf16.mxu0 %v13630_v28  ;;  %v2475_v34 = vrot.slane %v15353_v25, 1  ;;  %v3542_v39 = vrot.slane %v15350_v32, 2  ;;  %v3543_v40 = vrot.slane %v15353_v25, 3  ;;  %v13682_v17 = vld [vmem:[%s14779_s21 + $0x350] ss:$8 sps:$4 sm:$0xff]  }
 0x3d7   : > { %v2482_v26 = vrot.slane %v15347_v44, 1  ;;  %v3105_v33 = vrot.slane %v15344_v31, 1  ;;  %v3106_v55 = vrot.slane %v15347_v44, 2  ;;  %v13685_v28 = vld [vmem:[%s14779_s21 + $0x280] ss:$8 sps:$4 sm:$0xff]  }
 0x3d8   : > { %v2476_v41 = vor.u32 %v2475_v34, %v15350_v32  ;;  %v15370_v13 = vor.u32 %v3543_v40, %v3542_v39  ;;  %v13699_v34 = vld [vmem:[%s14779_s21 + $0x264] ss:$8 sps:$4 sm:$0xff]   ;;  %v13705_v39 = vld [vmem:[%s14779_s21 + $0x254] ss:$8 sps:$4 sm:$0xff]   ;;  %v13700_v40 = vld [vmem:[%s14779_s21 + $0x320] ss:$8 sps:$4 sm:$0xff]  }
 0x3d9   : > { %v2483_v45 = vor.u32 %v2482_v26, %v15344_v31  ;;  %v3107_v38 = vor.u32 %v3106_v55, %v3105_v33  ;;  %3255 = vmatpush1.bf16.msra.mxu0 %v13628_v9  ;;  %v13693_v9 = vld [vmem:[%s14779_s21 + $0x274] ss:$8 sps:$4 sm:$0xff]   ;;  %v13688_v26 = vld [vmem:[%s14779_s21 + $0x340] ss:$8 sps:$4 sm:$0xff]   ;;  %v13691_v55 = vld [vmem:[%s14779_s21 + $0x270] ss:$8 sps:$4 sm:$0xff]  }
 0x3da   : > { %3256 = vmatprep.subr.bf16.mxu0 %v13636_v1  ;;  %v13696_v33 = vld [vmem:[%s14779_s21 + $0x334] ss:$8 sps:$4 sm:$0xff]   ;;  %v3103_v1 = vrot.slane %v15353_v25, 2 }
 0x3db   : > { %11388 = vmatprep.mubr.msk.bf16.mxu1 %vm2387_vm15, %v2483_v45  ;;  %11531 = vmatprep.mubr.msk.bf16.mxu0 %vm2387_vm15, %v3107_v38  ;;  %v13694_v45 = vld [vmem:[%s14779_s21 + $0x330] ss:$8 sps:$4 sm:$0xff]   ;;  %v13697_v38 = vld [vmem:[%s14779_s21 + $0x260] ss:$8 sps:$4 sm:$0xff]  }
 0x3dc   : > { %2661 = vmatmul.mubr.bf16.vlgmr.msra.gmra.mxu1 %v2476_v41  ;;  %v3102_v41 = vrot.slane %v15350_v32, 1  ;;  %v13714_v32 = vld [vmem:[%s14779_s21 + $0x4c4] ss:$8 sps:$4 sm:$0xff]  }
 0x3dd   : > { %3031 = vmatpush1.bf16.msra.mxu1 %v13631_v37  ;;  %11474 = vmatprep.mubr.msk.bf16.mxu1 %vm2387_vm15, %v2885_v47  ;;  %v13702_v37 = vld [vmem:[%s14779_s21 + $0x324] ss:$8 sps:$4 sm:$0xff]   ;;  %v13703_v47 = vld [vmem:[%s14779_s21 + $0x250] ss:$8 sps:$4 sm:$0xff]  }
 0x3de   : > { %3032 = vmatprep.subr.bf16.mxu1 %v13639_v18  ;;  %3257 = vmatpush1.bf16.msra.mxu0 %v13634_v42  ;;  %v13708_v18 = vld [vmem:[%s14779_s21 + $0x4d4] ss:$8 sps:$4 sm:$0xff]   ;;  %v3545_v42 = vrot.slane %v15344_v31, 2 }
 0x3df   : > { %3258 = vmatprep.subr.bf16.mxu0 %v13642_v61  ;;  %v3546_v61 = vrot.slane %v15347_v44, 3  ;;  %v13717_v31 = vld [vmem:[%s14779_s21 + $0x3f4] ss:$8 sps:$4 sm:$0xff]   ;;  %v13712_v44 = vld [vmem:[%s14779_s21 + $0x4c0] ss:$8 sps:$4 sm:$0xff]  }
 0x3e1   : > { %3033 = vmatpush1.bf16.msra.mxu1 %v13637_v62  ;;  %v13711_v62 = vld [vmem:[%s14779_s21 + $0x244] ss:$8 sps:$4 sm:$0xff]   ;;  %v3547_v25 = vor.u32 %v3546_v61, %v3545_v42  ;;  %v13775_v42 = vld [vmem:[%s14779_s21 + $0x430] ss:$8 sps:$4 sm:$0xff]  }
 0x3e2   : > { %3034 = vmatprep.subr.bf16.mxu1 %v13645_v11  ;;  %3259 = vmatpush1.bf16.msra.mxu0 %v13640_v12  ;;  %v13706_v11 = vld [vmem:[%s14779_s21 + $0x4d0] ss:$8 sps:$4 sm:$0xff]   ;;  %v3104_v12 = vor.u32 %v3103_v1, %v3102_v41  ;;  %v13769_v41 = vld [vmem:[%s14779_s21 + $0x440] ss:$8 sps:$4 sm:$0xff]   ;;  %v13777_v1 = vld [vmem:[%s14779_s21 + $0x434] ss:$8 sps:$4 sm:$0xff]  }
 0x3e3   : > { %3260 = vmatprep.subr.bf16.mxu0 %v13648_v46  ;;  %v13709_v46 = vld [vmem:[%s14779_s21 + $0x240] ss:$8 sps:$4 sm:$0xff]   ;;  %v13783_v61 = vld [vmem:[%s14779_s21 + $0x424] ss:$8 sps:$4 sm:$0xff]  }
 0x3e5   : > { %3035 = vmatpush1.bf16.msra.mxu1 %v13643_v27  ;;  %v13720_v27 = vld [vmem:[%s14779_s21 + $0x4b4] ss:$8 sps:$4 sm:$0xff]  }
 0x3e6   : > { %3036 = vmatprep.subr.bf16.mxu1 %v13651_v30  ;;  %3261 = vmatpush1.bf16.msra.mxu0 %v13646_v58  ;;  %v13715_v30 = vld [vmem:[%s14779_s21 + $0x3f0] ss:$8 sps:$4 sm:$0xff]   ;;  %v2884_v58 = vrot.slane %v15340_v29, 1 }
 0x3e7   : > { %3262 = vmatprep.subr.bf16.mxu0 %v13654_v3  ;;  %v13723_v3 = vld [vmem:[%s14779_s21 + $0x3e4] ss:$8 sps:$4 sm:$0xff]  }
 0x3e9   : > { %3037 = vmatpush1.bf16.msra.mxu1 %v13649_v19  ;;  %v3325_v19 = vrot.slane %v15337_v49, 2 }
 0x3ea   : > { %3038 = vmatprep.subr.bf16.mxu1 %v13657_v50  ;;  %3263 = vmatpush1.bf16.msra.mxu0 %v13652_v51  ;;  %v13718_v50 = vld [vmem:[%s14779_s21 + $0x4b0] ss:$8 sps:$4 sm:$0xff]   ;;  %v13726_v51 = vld [vmem:[%s14779_s21 + $0x4a4] ss:$8 sps:$4 sm:$0xff]  }
 0x3eb   : > { %3264 = vmatprep.subr.bf16.mxu0 %v13660_v52  ;;  %v13721_v52 = vld [vmem:[%s14779_s21 + $0x3e0] ss:$8 sps:$4 sm:$0xff]  }
 0x3ed   : > { %3039 = vmatpush1.bf16.msra.mxu1 %v13655_v53  ;;  %v13729_v53 = vld [vmem:[%s14779_s21 + $0x3d4] ss:$8 sps:$4 sm:$0xff]  }
 0x3ee   : > { %3040 = vmatprep.subr.bf16.mxu1 %v13663_v59  ;;  %3265 = vmatpush1.bf16.msra.mxu0 %v13658_v60  ;;  %v13724_v59 = vld [vmem:[%s14779_s21 + $0x4a0] ss:$8 sps:$4 sm:$0xff]   ;;  %v13732_v60 = vld [vmem:[%s14779_s21 + $0x494] ss:$8 sps:$4 sm:$0xff]  }
 0x3ef   : > { %3266 = vmatprep.subr.bf16.mxu0 %v13666_v35  ;;  %v13727_v35 = vld [vmem:[%s14779_s21 + $0x3d0] ss:$8 sps:$4 sm:$0xff]  }
 0x3f1   : > { %3041 = vmatpush1.bf16.msra.mxu1 %v13661_v5  ;;  %v13735_v5 = vld [vmem:[%s14779_s21 + $0x3c4] ss:$8 sps:$4 sm:$0xff]  }
 0x3f2   : > { %3042 = vmatprep.subr.bf16.mxu1 %v13669_v6  ;;  %3267 = vmatpush1.bf16.msra.mxu0 %v13664_v7  ;;  %v13730_v6 = vld [vmem:[%s14779_s21 + $0x490] ss:$8 sps:$4 sm:$0xff]   ;;  %v13738_v7 = vld [vmem:[%s14779_s21 + $0x484] ss:$8 sps:$4 sm:$0xff]  }
 0x3f3   : > { %3272 = vmatprep.subr.bf16.mxu0 %v13672_v43  ;;  %v13733_v43 = vld [vmem:[%s14779_s21 + $0x3c0] ss:$8 sps:$4 sm:$0xff]  }
 0x3f5   : > { %3043 = vmatpush1.bf16.msra.mxu1 %v13667_v8  ;;  %v13741_v8 = vld [vmem:[%s14779_s21 + $0x3b4] ss:$8 sps:$4 sm:$0xff]  }
 0x3f6   : > { %3044 = vmatprep.subr.bf16.mxu1 %v13675_v54  ;;  %3273 = vmatpush2.bf16.msra.mxu0 %v13670_v2  ;;  %v13736_v54 = vld [vmem:[%s14779_s21 + $0x480] ss:$8 sps:$4 sm:$0xff]   ;;  %v13744_v2 = vld [vmem:[%s14779_s21 + $0x474] ss:$8 sps:$4 sm:$0xff]  }
 0x3f7   : > { %3274 = vmatprep.subr.bf16.mxu0 %v13678_v36  ;;  %v13739_v36 = vld [vmem:[%s14779_s21 + $0x3b0] ss:$8 sps:$4 sm:$0xff]  }
 0x3f9   : > { %3045 = vmatpush1.bf16.msra.mxu1 %v13673_v16  ;;  %v13747_v16 = vld [vmem:[%s14779_s21 + $0x3a4] ss:$8 sps:$4 sm:$0xff]  }
 0x3fa   : > { %3050 = vmatprep.subr.bf16.mxu1 %v13681_v20  ;;  %3275 = vmatpush2.bf16.msra.mxu0 %v13676_v21  ;;  %v13742_v20 = vld [vmem:[%s14779_s21 + $0x470] ss:$8 sps:$4 sm:$0xff]   ;;  %v13750_v21 = vld [vmem:[%s14779_s21 + $0x464] ss:$8 sps:$4 sm:$0xff]  }
 0x3fb   : > { %3276 = vmatprep.subr.bf16.mxu0 %v13684_v22  ;;  %v13745_v22 = vld [vmem:[%s14779_s21 + $0x3a0] ss:$8 sps:$4 sm:$0xff]  }
 0x3fd   : > { %3051 = vmatpush2.bf16.msra.mxu1 %v13679_v23  ;;  %v13753_v23 = vld [vmem:[%s14779_s21 + $0x394] ss:$8 sps:$4 sm:$0xff]  }
 0x3fe   : > { %3052 = vmatprep.subr.bf16.mxu1 %v13687_v63  ;;  %3277 = vmatpush2.bf16.msra.mxu0 %v13682_v17  ;;  %v13748_v63 = vld [vmem:[%s14779_s21 + $0x460] ss:$8 sps:$4 sm:$0xff]   ;;  %v13756_v17 = vld [vmem:[%s14779_s21 + $0x534] ss:$8 sps:$4 sm:$0xff]  }
 0x3ff   : > { %3278 = vmatprep.subr.bf16.mxu0 %v13690_v24  ;;  %v13751_v24 = vld [vmem:[%s14779_s21 + $0x390] ss:$8 sps:$4 sm:$0xff]  }
 0x401   : > { %3053 = vmatpush2.bf16.msra.mxu1 %v13685_v28  ;;  %v13759_v28 = vld [vmem:[%s14779_s21 + $0x384] ss:$8 sps:$4 sm:$0xff]  }
 0x402   : > { %3054 = vmatprep.subr.bf16.mxu1 %v13693_v9  ;;  %3279 = vmatpush2.bf16.msra.mxu0 %v13688_v26  ;;  %v13754_v9 = vld [vmem:[%s14779_s21 + $0x530] ss:$8 sps:$4 sm:$0xff]   ;;  %v13762_v26 = vld [vmem:[%s14779_s21 + $0x524] ss:$8 sps:$4 sm:$0xff]  }
 0x403   : > { %3280 = vmatprep.subr.bf16.mxu0 %v13696_v33  ;;  %v13757_v33 = vld [vmem:[%s14779_s21 + $0x380] ss:$8 sps:$4 sm:$0xff]  }
 0x405   : > { %3055 = vmatpush2.bf16.msra.mxu1 %v13691_v55  ;;  %v13765_v55 = vld [vmem:[%s14779_s21 + $0x454] ss:$8 sps:$4 sm:$0xff]  }
 0x406   : > { %3056 = vmatprep.subr.bf16.mxu1 %v13699_v34  ;;  %3281 = vmatpush2.bf16.msra.mxu0 %v13694_v45  ;;  %v13760_v34 = vld [vmem:[%s14779_s21 + $0x520] ss:$8 sps:$4 sm:$0xff]   ;;  %v13768_v45 = vld [vmem:[%s14779_s21 + $0x514] ss:$8 sps:$4 sm:$0xff]  }
 0x407   : > { %3282 = vmatprep.subr.bf16.mxu0 %v13702_v37  ;;  %v13763_v37 = vld [vmem:[%s14779_s21 + $0x450] ss:$8 sps:$4 sm:$0xff]  }
 0x409   : > { %3057 = vmatpush2.bf16.msra.mxu1 %v13697_v38  ;;  %v13771_v38 = vld [vmem:[%s14779_s21 + $0x444] ss:$8 sps:$4 sm:$0xff]  }
 0x40a   : > { %3058 = vmatprep.subr.bf16.mxu1 %v13705_v39  ;;  %3283 = vmatpush2.bf16.msra.mxu0 %v13700_v40  ;;  %v13766_v39 = vld [vmem:[%s14779_s21 + $0x510] ss:$8 sps:$4 sm:$0xff]   ;;  %v13774_v40 = vld [vmem:[%s14779_s21 + $0x504] ss:$8 sps:$4 sm:$0xff]  }
 0x40b   : > { %3692 = vmatprep.subr.bf16.mxu0 %v13708_v18  ;;  %v13772_v18 = vld [vmem:[%s14779_s21 + $0x500] ss:$8 sps:$4 sm:$0xff]  }
 0x40d   : > { %3059 = vmatpush2.bf16.msra.mxu1 %v13703_v47  ;;  %3285 = vmatmul.mubr.bf16.vlgmr.msra.gmra.mxu0 %v3104_v12  ;;  %v13780_v47 = vld [vmem:[%s14779_s21 + $0x4f4] ss:$8 sps:$4 sm:$0xff]   ;;  %v13781_v12 = vld [vmem:[%s14779_s21 + $0x420] ss:$8 sps:$4 sm:$0xff]  }
 0x40e   : > { %3060 = vmatprep.subr.bf16.mxu1 %v13711_v62  ;;  %3693 = vmatpush1.bf16.msra.mxu0 %v13706_v11  ;;  %v13778_v62 = vld [vmem:[%s14779_s21 + $0x4f0] ss:$8 sps:$4 sm:$0xff]   ;;  %v13786_v11 = vld [vmem:[%s14779_s21 + $0x4e4] ss:$8 sps:$4 sm:$0xff]  }
 0x40f   : > { %11645 = vmatprep.mubr.msk.bf16.mxu0 %vm2387_vm15, %v3547_v25  ;;  %3694 = vmatprep.subr.bf16.mxu0 %v13714_v32  ;;  %v13789_v32 = vld [vmem:[%s14779_s21 + $0x414] ss:$8 sps:$4 sm:$0xff]   ;;  %v13784_v25 = vld [vmem:[%s14779_s21 + $0x4e0] ss:$8 sps:$4 sm:$0xff]  }
 0x411   : > { %3061 = vmatpush2.bf16.msra.mxu1 %v13709_v46  ;;  %v13787_v46 = vld [vmem:[%s14779_s21 + $0x410] ss:$8 sps:$4 sm:$0xff]  }
 0x412   : > { %3470 = vmatprep.subr.bf16.mxu1 %v13717_v31  ;;  %3695 = vmatpush1.bf16.msra.mxu0 %v13712_v44  ;;  %v13792_v31 = vld [vmem:[%s14779_s21 + $0x404] ss:$8 sps:$4 sm:$0xff]   ;;  %v13790_v44 = vld [vmem:[%s14779_s21 + $0x400] ss:$8 sps:$4 sm:$0xff]  }
 0x413   : > { %3696 = vmatprep.subr.bf16.mxu0 %v13720_v27  ;;  %v13795_v27 = vld [vmem:[%s14779_s21 + $0x5b4] ss:$8 sps:$4 sm:$0xff]  }
 0x414   : > { %3063 = vmatmul.mubr.bf16.vlgmr.msra.gmra.mxu1 %v2884_v58  ;;  %v3324_v58 = vrot.slane %v15340_v29, 2 }
 0x415   : > { %3471 = vmatpush1.bf16.msra.mxu1 %v13715_v30  ;;  %11588 = vmatprep.mubr.msk.bf16.mxu1 %vm2387_vm15, %v3325_v19  ;;  %v13793_v30 = vld [vmem:[%s14779_s21 + $0x5b0] ss:$8 sps:$4 sm:$0xff]   ;;  %v3765_v19 = vrot.slane %v15337_v49, 3  ;;  %v13807_v49 = vld [vmem:[%s14779_s21 + $0x574] ss:$8 sps:$4 sm:$0xff]  }
 0x416   : > { %3472 = vmatprep.subr.bf16.mxu1 %v13723_v3  ;;  %3697 = vmatpush1.bf16.msra.mxu0 %v13718_v50  ;;  %v13798_v3 = vld [vmem:[%s14779_s21 + $0x5a4] ss:$8 sps:$4 sm:$0xff]   ;;  %v13801_v50 = vld [vmem:[%s14779_s21 + $0x594] ss:$8 sps:$4 sm:$0xff]  }
 0x417   : > { %3698 = vmatprep.subr.bf16.mxu0 %v13726_v51  ;;  %v13799_v51 = vld [vmem:[%s14779_s21 + $0x590] ss:$8 sps:$4 sm:$0xff]  }
 0x419   : > { %3473 = vmatpush1.bf16.msra.mxu1 %v13721_v52  ;;  %v13804_v52 = vld [vmem:[%s14779_s21 + $0x584] ss:$8 sps:$4 sm:$0xff]  }
 0x41a   : > { %3474 = vmatprep.subr.bf16.mxu1 %v13729_v53  ;;  %3699 = vmatpush1.bf16.msra.mxu0 %v13724_v59  ;;  %v13802_v53 = vld [vmem:[%s14779_s21 + $0x580] ss:$8 sps:$4 sm:$0xff]   ;;  %v13805_v59 = vld [vmem:[%s14779_s21 + $0x570] ss:$8 sps:$4 sm:$0xff]  }
 0x41b   : > { %3700 = vmatprep.subr.bf16.mxu0 %v13732_v60  ;;  %v13810_v60 = vld [vmem:[%s14779_s21 + $0x564] ss:$8 sps:$4 sm:$0xff]  }
 0x41d   : > { %3475 = vmatpush1.bf16.msra.mxu1 %v13727_v35  ;;  %v13808_v35 = vld [vmem:[%s14779_s21 + $0x560] ss:$8 sps:$4 sm:$0xff]  }
 0x41e   : > { %3476 = vmatprep.subr.bf16.mxu1 %v13735_v5  ;;  %3701 = vmatpush1.bf16.msra.mxu0 %v13730_v6  ;;  %v13813_v5 = vld [vmem:[%s14779_s21 + $0x554] ss:$8 sps:$4 sm:$0xff]   ;;  %v13811_v6 = vld [vmem:[%s14779_s21 + $0x550] ss:$8 sps:$4 sm:$0xff]  }
 0x41f   : > { %3702 = vmatprep.subr.bf16.mxu0 %v13738_v7  ;;  %v13816_v7 = vld [vmem:[%s14779_s21 + $0x544] ss:$8 sps:$4 sm:$0xff]  }
 0x421   : > { %3477 = vmatpush1.bf16.msra.mxu1 %v13733_v43  ;;  %v13814_v43 = vld [vmem:[%s14779_s21 + $0x540] ss:$8 sps:$4 sm:$0xff]  }
 0x422   : > { %3478 = vmatprep.subr.bf16.mxu1 %v13741_v8  ;;  %3703 = vmatpush1.bf16.msra.mxu0 %v13736_v54  ;;  %v13819_v8 = vld [vmem:[%s14779_s21 + $0x614] ss:$8 sps:$4 sm:$0xff]   ;;  %v13817_v54 = vld [vmem:[%s14779_s21 + $0x610] ss:$8 sps:$4 sm:$0xff]  }
 0x423   : > { %3704 = vmatprep.subr.bf16.mxu0 %v13744_v2  ;;  %v13822_v2 = vld [vmem:[%s14779_s21 + $0x604] ss:$8 sps:$4 sm:$0xff]  }
 0x425   : > { %3479 = vmatpush1.bf16.msra.mxu1 %v13739_v36  ;;  %v13820_v36 = vld [vmem:[%s14779_s21 + $0x600] ss:$8 sps:$4 sm:$0xff]  }
 0x426   : > { %3480 = vmatprep.subr.bf16.mxu1 %v13747_v16  ;;  %3705 = vmatpush1.bf16.msra.mxu0 %v13742_v20  ;;  %v13825_v16 = vld [vmem:[%s14779_s21 + $0x5f4] ss:$8 sps:$4 sm:$0xff]   ;;  %v13823_v20 = vld [vmem:[%s14779_s21 + $0x5f0] ss:$8 sps:$4 sm:$0xff]  }
 0x427   : > { %3706 = vmatprep.subr.bf16.mxu0 %v13750_v21  ;;  %v13828_v21 = vld [vmem:[%s14779_s21 + $0x5e4] ss:$8 sps:$4 sm:$0xff]  }
 0x429   : > { %3481 = vmatpush1.bf16.msra.mxu1 %v13745_v22  ;;  %v13826_v22 = vld [vmem:[%s14779_s21 + $0x5e0] ss:$8 sps:$4 sm:$0xff]  }
 0x42a   : > { %3482 = vmatprep.subr.bf16.mxu1 %v13753_v23  ;;  %3707 = vmatpush1.bf16.msra.mxu0 %v13748_v63  ;;  %v13831_v23 = vld [vmem:[%s14779_s21 + $0x5d4] ss:$8 sps:$4 sm:$0xff]   ;;  %v13829_v63 = vld [vmem:[%s14779_s21 + $0x5d0] ss:$8 sps:$4 sm:$0xff]  }
 0x42b   : > { %3712 = vmatprep.subr.bf16.mxu0 %v13756_v17  ;;  %v13834_v17 = vld [vmem:[%s14779_s21 + $0x5c4] ss:$8 sps:$4 sm:$0xff]  }
 0x42d   : > { %3483 = vmatpush1.bf16.msra.mxu1 %v13751_v24  ;;  %v13832_v24 = vld [vmem:[%s14779_s21 + $0x5c0] ss:$8 sps:$4 sm:$0xff]  }
 0x42e   : > { %3484 = vmatprep.subr.bf16.mxu1 %v13759_v28  ;;  %3713 = vmatpush2.bf16.msra.mxu0 %v13754_v9  ;;  %v3764_v28 = vrot.slane %v15340_v29, 3 }
 0x42f   : > { %3714 = vmatprep.subr.bf16.mxu0 %v13762_v26 }
 0x431   : > { %3485 = vmatpush1.bf16.msra.mxu1 %v13757_v33 }
 0x432   : > { %3490 = vmatprep.subr.bf16.mxu1 %v13765_v55  ;;  %3715 = vmatpush2.bf16.msra.mxu0 %v13760_v34 }
 0x433   : > { %3716 = vmatprep.subr.bf16.mxu0 %v13768_v45 }
 0x435   : > { %3491 = vmatpush2.bf16.msra.mxu1 %v13763_v37 }
 0x436   : > { %3492 = vmatprep.subr.bf16.mxu1 %v13771_v38  ;;  %3717 = vmatpush2.bf16.msra.mxu0 %v13766_v39 }
 0x437   : > { %3718 = vmatprep.subr.bf16.mxu0 %v13774_v40 }
 0x439   : > { %3493 = vmatpush2.bf16.msra.mxu1 %v13769_v41 }
 0x43a   : > { %3494 = vmatprep.subr.bf16.mxu1 %v13777_v1  ;;  %3719 = vmatpush2.bf16.msra.mxu0 %v13772_v18 }
 0x43b   : > { %3720 = vmatprep.subr.bf16.mxu0 %v13780_v47 }
 0x43d   : > { %3495 = vmatpush2.bf16.msra.mxu1 %v13775_v42 }
 0x43e   : > { %3496 = vmatprep.subr.bf16.mxu1 %v13783_v61  ;;  %3721 = vmatpush2.bf16.msra.mxu0 %v13778_v62 }
 0x43f   : > { %3722 = vmatprep.subr.bf16.mxu0 %v13786_v11 }
 0x441   : > { %3497 = vmatpush2.bf16.msra.mxu1 %v13781_v12 }
 0x442   : > { %3498 = vmatprep.subr.bf16.mxu1 %v13789_v32  ;;  %3723 = vmatpush2.bf16.msra.mxu0 %v13784_v25 }
 0x445   : > { %3499 = vmatpush2.bf16.msra.mxu1 %v13787_v46  ;;  %3725 = vmatmul.mubr.bf16.vlgmr.msra.gmra.mxu0 %v15370_v13  ;;  %v13796_v13 = vld [vmem:[%s14779_s21 + $0x5a0] ss:$8 sps:$4 sm:$0xff]  }
 0x446   : > { %3500 = vmatprep.subr.bf16.mxu1 %v13792_v31 }
 0x449   : > { %3501 = vmatpush2.bf16.msra.mxu1 %v13790_v44 }
 0x44a   : > { %3910 = vmatprep.subr.bf16.mxu1 %v13795_v27 }
 0x44c   : > { %3503 = vmatmul.mubr.bf16.vlgmr.msra.gmra.mxu1 %v3324_v58 }
 0x44d   : > { %3911 = vmatpush1.bf16.msra.mxu1 %v13793_v30  ;;  %11702 = vmatprep.mubr.msk.bf16.mxu1 %vm2387_vm15, %v3765_v19  ;;  %vm4046_vm15 = vcmask 257024  }
 0x44e   : > { %3912 = vmatprep.subr.bf16.mxu1 %v13798_v3 }
 0x451   : > { %3913 = vmatpush1.bf16.msra.mxu1 %v13796_v13 }
 0x452   : > { %3914 = vmatprep.subr.bf16.mxu1 %v13801_v50  ;;  %v3953_v50 = vld [vmem:[%s14784_s25] sm:$0x3] }
 0x455   : > { %3915 = vmatpush1.bf16.msra.mxu1 %v13799_v51 }
 0x456   : > { %3916 = vmatprep.subr.bf16.mxu1 %v13804_v52  ;;  %v3967_v52 = vld [vmem:[%s14789_s29] sm:$0x3] }
 0x459   : > { %3917 = vmatpush1.bf16.msra.mxu1 %v13802_v53 }
 0x45a   : > { %3918 = vmatprep.subr.bf16.mxu1 %v13807_v49  ;;  %v3958_v49 = vrot.slane %v3953_v50, %v15209_v48 }
 0x45d   : > { %3919 = vmatpush1.bf16.msra.mxu1 %v13805_v59 }
 0x45e   : > { %3920 = vmatprep.subr.bf16.mxu1 %v13810_v60 }
 0x461   : > { %3921 = vmatpush1.bf16.msra.mxu1 %v13808_v35  ;;  %v3972_v35 = vrot.slane %v3967_v52, %v15209_v48 }
 0x462   : > { %3922 = vmatprep.subr.bf16.mxu1 %v13813_v5 }
 0x465   : > { %3923 = vmatpush1.bf16.msra.mxu1 %v13811_v6  ;;  %v3962_v6 = vrot.slane %v3953_v50, %v15213_v15  ;;  %v13853_v50 = vld [vmem:[%s16764_s3 + $0x50] sm:$0xff]  }
 0x466   : > { %3924 = vmatprep.subr.bf16.mxu1 %v13816_v7 }
 0x469   : > { %3925 = vmatpush1.bf16.msra.mxu1 %v13814_v43 }
 0x46a   : > { %3930 = vmatprep.subr.bf16.mxu1 %v13819_v8 }
 0x46d   : > { %3931 = vmatpush2.bf16.msra.mxu1 %v13817_v54  ;;  %v3976_v54 = vrot.slane %v3967_v52, %v15213_v15 }
 0x46e   : > { %3932 = vmatprep.subr.bf16.mxu1 %v13822_v2 }
 0x471   : > { %3933 = vmatpush2.bf16.msra.mxu1 %v13820_v36 }
 0x472   : > { %3934 = vmatprep.subr.bf16.mxu1 %v13825_v16 }
 0x475   : > { %3935 = vmatpush2.bf16.msra.mxu1 %v13823_v20 }
 0x476   : > { %3936 = vmatprep.subr.bf16.mxu1 %v13828_v21 }
 0x479   : > { %3937 = vmatpush2.bf16.msra.mxu1 %v13826_v22 }
 0x47a   : > { %3938 = vmatprep.subr.bf16.mxu1 %v13831_v23 }
 0x47d   : > { %3939 = vmatpush2.bf16.msra.mxu1 %v13829_v63 }
 0x47e   : > { %3940 = vmatprep.subr.bf16.mxu1 %v13834_v17 }
 0x481   : > { %3941 = vmatpush2.bf16.msra.mxu1 %v13832_v24 }
 0x484   : > { %3943 = vmatmul.mubr.bf16.vlgmr.msra.gmra.mxu1 %v3764_v28 }
 0x494   : > { %v2846_v9 = vpop.f32.mrf.mxu0 }
 0x496   : > { %v2848_v26 = vpop.f32.mrf.mxu0 }
 0x498   : > { %v2850_v33 = vpop.f32.mrf.mxu0 }
 0x49a   : > { %v2851_v34 = vpop.f32.mrf.mxu0 }
 0x49c   : > { %v2662_v55 = vpop.f32.mrf.mxu1 }
 0x49d   : > { %v2847_v45 = vadd.f32 %v2846_v9, %v2662_v55 }
 0x49e   : > { %v2664_v37 = vpop.f32.mrf.mxu1 }
 0x49f   : > { %v2849_v38 = vadd.f32 %v2848_v26, %v2664_v37 }
 0x4a0   : > { %v2666_v39 = vpop.f32.mrf.mxu1 }
 0x4a2   : > { %v2667_v40 = vpop.f32.mrf.mxu1 }
 0x4cd   : > { %v3286_v41 = vpop.f32.mrf.mxu0 }
 0x4cf   : > { %v3288_v1 = vpop.f32.mrf.mxu0 }
 0x4d1   : > { %v3290_v18 = vpop.f32.mrf.mxu0 }
 0x4d3   : > { %v3291_v42 = vpop.f32.mrf.mxu0 }
 0x4d4   : > { %v3064_v47 = vpop.f32.mrf.mxu1  ;;  %v13836_v42 = vld [vmem:[%s16764_s3 + $0x38] sm:$0xff]  }
 0x4d5   : > { %v3071_v61 = vadd.f32 %v3064_v47, %v2847_v45  ;;  %v13835_v47 = vld [vmem:[%s16764_s3 + $0x78] sm:$0xff]  }
 0x4d6   : > { %v3066_v62 = vpop.f32.mrf.mxu1  ;;  %12809 = vmatprep.subr.bf16.mxu1 %v13835_v47  ;;  %v13871_v47 = vld [vmem:[%s16764_s3 + $0x130] sm:$0xff]  }
 0x4d7   : > { %v3072_v29 = vadd.f32 %v3066_v62, %v2849_v38  ;;  %v3293_v11 = vadd.f32 %v3286_v41, %v3071_v61  ;;  %v13837_v61 = vld [vmem:[%s16764_s3 + $0x70] sm:$0xff]   ;;  %v13839_v62 = vld [vmem:[%s16764_s3 + $0x118] sm:$0xff]   ;;  %12810 = vmatpush3.bf16.msra.mxu1 %v13836_v42 }
 0x4d8   : > { %v3068_v12 = vpop.f32.mrf.mxu1  ;;  %12811 = vmatprep.subr.bf16.mxu1 %v13837_v61  ;;  %12782 = vmatprep.subr.bf16.mxu0 %v13839_v62  ;;  %v13872_v61 = vld [vmem:[%s16764_s3 + $0x1c0] sm:$0xff]   ;;  %v13874_v62 = vld [vmem:[%s16764_s3 + $0x258] sm:$0xff]  }
 0x4d9   : > { %v3294_v32 = vadd.f32 %v3288_v1, %v3072_v29  ;;  %v13840_v29 = vld [vmem:[%s16764_s3 + $0xd8] sm:$0xff]   ;;  %v13838_v12 = vld [vmem:[%s16764_s3 + $0x30] sm:$0xff]  }
 0x4da   : > { %v3069_v25 = vpop.f32.mrf.mxu1  ;;  %12783 = vmatpush3.bf16.msra.mxu0 %v13840_v29 }
 0x4db   : > { %v13844_v25 = vld [vmem:[%s16764_s3 + $0xd0] sm:$0xff]   ;;  %12812 = vmatpush3.bf16.msra.mxu1 %v13838_v12 }
 0x505   : > { %v3726_v46 = vpop.f32.mrf.mxu0 }
 0x507   : > { %v3728_v31 = vpop.f32.mrf.mxu0 }
 0x509   : > { %v3730_v44 = vpop.f32.mrf.mxu0 }
 0x50a   : > { %v13845_v44 = vld [vmem:[%s16764_s3 + $0x60] sm:$0xff]  }
 0x50b   : > { %v3731_v30 = vpop.f32.mrf.mxu0 }
 0x50c   : > { %v3504_v27 = vpop.f32.mrf.mxu1  ;;  %v13851_v30 = vld [vmem:[%s16764_s3 + $0x100] sm:$0xff]  }
 0x50d   : > { %v3511_v13 = vadd.f32 %v3504_v27, %v3293_v11  ;;  %v13843_v11 = vld [vmem:[%s16764_s3 + $0x110] sm:$0xff]   ;;  %v13848_v27 = vld [vmem:[%s16764_s3 + $0xc8] sm:$0xff]  }
 0x50e   : > { %v3506_v58 = vpop.f32.mrf.mxu1  ;;  %12784 = vmatprep.subr.bf16.mxu0 %v13843_v11  ;;  %v13873_v11 = vld [vmem:[%s16764_s3 + $0x128] sm:$0xff]  }
 0x50f   : > { %v3512_v51 = vadd.f32 %v3506_v58, %v3294_v32  ;;  %v3733_v53 = vadd.f32 %v3726_v46, %v3511_v13  ;;  %v13841_v32 = vld [vmem:[%s16764_s3 + $0x68] sm:$0xff]   ;;  %12785 = vmatpush3.bf16.msra.mxu0 %v13844_v25  ;;  %v13846_v58 = vld [vmem:[%s16764_s3 + $0x20] sm:$0xff]   ;;  %v13850_v13 = vld [vmem:[%s16764_s3 + $0x18] sm:$0xff]  }
 0x510   : > { %v3508_v3 = vpop.f32.mrf.mxu1  ;;  %v13847_v46 = vld [vmem:[%s16764_s3 + $0x108] sm:$0xff]   ;;  %12813 = vmatprep.subr.bf16.mxu1 %v13841_v32 }
 0x511   : > { %v3734_v5 = vadd.f32 %v3728_v31, %v3512_v51  ;;  %v13842_v31 = vld [vmem:[%s16764_s3 + $0x28] sm:$0xff]   ;;  %12786 = vmatprep.subr.bf16.mxu0 %v13847_v46  ;;  %v13849_v3 = vld [vmem:[%s16764_s3 + $0x58] sm:$0xff]   ;;  %v13854_v51 = vld [vmem:[%s16764_s3 + $0x10] sm:$0xff]  }
 0x512   : > { %v3509_v19 = vpop.f32.mrf.mxu1  ;;  %12814 = vmatpush3.bf16.msra.mxu1 %v13842_v31  ;;  %v13875_v46 = vld [vmem:[%s16764_s3 + $0x218] sm:$0xff]   ;;  %v13877_v31 = vld [vmem:[%s16764_s3 + $0x250] sm:$0xff]  }
 0x513   : > { %12815 = vmatprep.subr.bf16.mxu1 %v13845_v44  ;;  %12787 = vmatpush3.bf16.msra.mxu0 %v13848_v27  ;;  %v13852_v19 = vld [vmem:[%s16764_s3 + $0xc0] sm:$0xff]  }
 0x514   : > { %12788 = vmatprep.subr.bf16.mxu0 %v13851_v30 }
 0x516   : > { %12816 = vmatpush3.bf16.msra.mxu1 %v13846_v58  ;;  %v13876_v58 = vld [vmem:[%s16764_s3 + $0x120] sm:$0xff]  }
 0x517   : > { %12817 = vmatprep.subr.bf16.mxu1 %v13849_v3  ;;  %12789 = vmatpush3.bf16.msra.mxu0 %v13852_v19  ;;  %v13878_v3 = vld [vmem:[%s16764_s3 + $0x210] sm:$0xff]  }
 0x51a   : > { %12818 = vmatpush3.bf16.msra.mxu1 %v13850_v13  ;;  %v13880_v13 = vld [vmem:[%s16764_s3 + $0x248] sm:$0xff]  }
 0x51b   : > { %12819 = vmatprep.subr.bf16.mxu1 %v13853_v50  ;;  %v13879_v50 = vld [vmem:[%s16764_s3 + $0x98] sm:$0xff]  }
 0x51e   : > { %12820 = vmatpush3.bf16.msra.mxu1 %v13854_v51  ;;  %v13881_v51 = vld [vmem:[%s16764_s3 + $0x208] sm:$0xff]  }
 0x544   : > { %v3944_v59 = vpop.f32.mrf.mxu1 }
 0x545   : > { %v3951_v60 = vadd.f32 %v3944_v59, %v3733_v53  ;;  %v13855_v59 = vld [vmem:[%s16764_s3 + $0xf8] sm:$0xff]  }
 0x546   : > { %v3946_v7 = vpop.f32.mrf.mxu1  ;;  %12790 = vmatprep.subr.bf16.mxu0 %v13855_v59  ;;  %v13886_v59 = vld [vmem:[%s16764_s3 + $0x238] sm:$0xff]  }
 0x547   : > { %v3965_v43 = vmul.f32 %v3958_v49, %v3951_v60  ;;  %v3952_v8 = vadd.f32 %v3946_v7, %v3734_v5  ;;  %v13856_v60 = vld [vmem:[%s16764_s3 + $0xb8] sm:$0xff]   ;;  %v13858_v5 = vld [vmem:[%s16764_s3 + $0x8] sm:$0xff]   ;;  %v13860_v7 = vld [vmem:[%s16764_s3 + $0xb0] sm:$0xff]  }
 0x548   : > { %v3948_v2 = vpop.f32.mrf.mxu1  ;;  %12791 = vmatpush3.bf16.msra.mxu0 %v13856_v60  ;;  %v13885_v60 = vld [vmem:[%s16764_s3 + $0x88] sm:$0xff]  }
 0x549   : > { %v3979_v36 = vadd.f32 %v3972_v35, %v3965_v43  ;;  %v3966_v16 = vmul.f32 %v3962_v6, %v3952_v8  ;;  %v13857_v35 = vld [vmem:[%s16764_s3 + $0x48] sm:$0xff]   ;;  %v13859_v6 = vld [vmem:[%s16764_s3 + $0xf0] sm:$0xff]   ;;  %v13861_v43 = vld [vmem:[%s16764_s3 + $0x40] sm:$0xff]  }
 0x54a   : > { %v3949_v20 = vpop.f32.mrf.mxu1  ;;  %12821 = vmatprep.subr.bf16.mxu1 %v13857_v35  ;;  %v13862_v8 = vld [vmem:[%s16764_s3] sm:$0xff]   ;;  %12792 = vmatprep.subr.bf16.mxu0 %v13859_v6  ;;  %v13887_v35 = vld [vmem:[%s16764_s3 + $0x1f8] sm:$0xff]  }
 0x54b   : > { %v3981_v21 = vmax.f32 %v3979_v36, 0.0  ;;  %v3980_v22 = vadd.f32 %v3976_v54, %v3966_v16  ;;  %12822 = vmatpush3.bf16.msra.mxu1 %v13858_v5  ;;  %v13863_v54 = vld [vmem:[%s16764_s3 + $0xe8] sm:$0xff]   ;;  %v13866_v20 = vld [vmem:[%s16764_s3 + $0xe0] sm:$0xff]   ;;  %v13889_v5 = vld [vmem:[%s16764_s3 + $0x230] sm:$0xff]  }
 0x54c   : > { %12793 = vmatpush3.bf16.msra.mxu0 %v13860_v7  ;;  %12823 = vmatprep.subr.bf16.mxu1 %v13861_v43  ;;  %v13864_v36 = vld [vmem:[%s16764_s3 + $0xa8] sm:$0xff]   ;;  %v13888_v6 = vld [vmem:[%s16764_s3 + $0x80] sm:$0xff]   ;;  %v13891_v7 = vld [vmem:[%s16764_s3 + $0x1b8] sm:$0xff]  }
 0x54d   : > { %3983 = vst [vmem:[%s15527_s22] sm:$0xff] %v3981_v21  ;;  %v3987_v23 = vrot.slane %v3981_v21, 1  ;;  %v3982_v63 = vmax.f32 %v3980_v22, 0.0  ;;  %12794 = vmatprep.subr.bf16.mxu0 %v13863_v54  ;;  %v13867_v22 = vld [vmem:[%s16764_s3 + $0xa0] sm:$0xff]   ;;  %v13890_v43 = vld [vmem:[%s16764_s3 + $0x1f0] sm:$0xff]   ;;  %v13892_v54 = vld [vmem:[%s16764_s3 + $0x178] sm:$0xff]  }
 0x54f   : > { %3984 = vst [vmem:[%s15527_s22 + $0x8] sm:$0xff] %v3982_v63  ;;  %v3988_v17 = vrot.slane %v3982_v63, 1  ;;  %v3991_v24 = vmax.f32 %v3981_v21, %v3987_v23  ;;  %12824 = vmatpush3.bf16.msra.mxu1 %v13862_v8  ;;  %v15584_v21 = vld [vmem:[#allocation2 + $0x18] sm:$0x3]  ;;  %v15591_v23 = vld [vmem:[#allocation2 + $0x20] sm:$0x3] }
 0x550   : > { %13101 = vmatprep.subr.bf16.mxu1 %v14725_v0  ;;  %12795 = vmatpush3.bf16.msra.mxu0 %v13864_v36  ;;  %5912 = vst [vmem:[#allocation2 + $0x18] sm:$0x3] %v14725_v0  ;;  %5914 = vst.msk [vmem:[#allocation2 + $0x20] sm:$0x3] %vm5913_vm12, %v14725_v0  ;;  %v13893_v8 = vld [vmem:[%s16764_s3 + $0x228] sm:$0xff]   ;;  %vm6892_vm12 = vcmask 435248  }
 0x551   : > { %v3992_v28 = vmax.f32 %v3982_v63, %v3988_v17  ;;  %12796 = vmatprep.subr.bf16.mxu0 %v13866_v20  ;;  %v13897_v20 = vld [vmem:[%s16764_s3 + $0x220] sm:$0xff]  }
 0x553   : > { %v3995_v9 = vcombine.low %v3991_v24, %v3992_v28  ;;  %v4017_v26 = vcombine.high %v3991_v24, %v3992_v28 }
 0x554   : > { %12797 = vmatpush3.bf16.msra.mxu0 %v13867_v22  ;;  %v13896_v22 = vld [vmem:[%s16764_s3 + $0x170] sm:$0xff]  }
 0x555   : > { %v4002_v33 = vrot.slane %v3995_v9, %v15221_v10  ;;  %v4024_v55 = vrot.slane %v4017_v26, %v15221_v10  ;;  %13077 = vmatprep.subr.bf16.mxu0 %v14725_v0  ;;  %v13865_v26 = vld [vmem:[%s16764_s3 + $0x1d8] sm:$0xff]  }
 0x557   : > { %v4009_v34 = vrot.slane %v4002_v33, %v15221_v10  ;;  %v4031_v45 = vrot.slane %v4024_v55, %v15221_v10 }
 0x559   : > { %v4013_v37 = vcombine.high %v4009_v34, %v4009_v34  ;;  %v4035_v38 = vcombine.high %v4031_v45, %v4031_v45  ;;  %4011 = vst.msk [vmem:[#allocation2] ss:$8 sm:$0x3] %vm15226_vm13, %v4009_v34  ;;  %4033 = vst.msk [vmem:[#allocation2 + $0x2] ss:$8 sm:$0x3] %vm15226_vm13, %v4031_v45 }
 0x55a   : > { %v13868_v34 = vld [vmem:[%s16764_s3 + $0x1d0] sm:$0xff]  }
 0x55b   : > { %4015 = vst.msk [vmem:[#allocation2 + $0x1] ss:$8 sm:$0x3] %vm15226_vm13, %v4013_v37  ;;  %4037 = vst.msk [vmem:[#allocation2 + $0x3] ss:$8 sm:$0x3] %vm15226_vm13, %v4035_v38 }
 0x55c   : > { %vm4052_vm13 = vcmask 519424  }
 0x562   : > { %v4040_v39 = vld [vmem:[#allocation2 + $0x8] sm:$0xf]  ;;  %v4039_v40 = vld [vmem:[#allocation2] sm:$0xf] }
 0x563   : > { %4055 = vrot.lane.b32.xlu0 %v4040_v39, %s14730_s18  ;;  %4072 = vst [vmem:[#allocation2 + $0x8] sm:$0xff] %v14725_v0  ;;  %4042 = vrot.lane.b32.xlu1 %v4039_v40, %s14730_s18  ;;  %4071 = vst [vmem:[#allocation2] sm:$0xff] %v14725_v0 }
 0x5d5   : > { %v4056_v41 = vpop.permute.xlu0 %4055  ;;  %v4043_v1 = vpop.permute.xlu1 %4042 }
 0x5d6   : > { %v4058_v56 = vmax.f32 %v4040_v39, %v4056_v41  ;;  %v4045_v18 = vmax.f32 %v4039_v40, %v4043_v1  ;;  %v13869_v1 = vld [vmem:[%s16764_s3 + $0x138] sm:$0xff]  }
 0x5d8   : > { %4060 = vrot.lane.b32.xlu0 %v4058_v56, %s16725_s16  ;;  %4049 = vrot.lane.b32.xlu1 %v4045_v18, %s14730_s18  ;;  %4047 = vst.msk [vmem:[#allocation3] sm:$0xf] %vm4046_vm15, %v4045_v18  ;;  %vm14736_vm15 = vmmov 0   ;;  %v15627_v18 = vld [vmem:[#allocation2 + $0x10] sm:$0xff] }
 0x5d9   : > { %v15636_v42 = vpack.c.bf16 %v15627_v18, %v15627_v18 }
 0x5db   : > { %v4195_v29 = vshll.u32 %v15636_v42, 16  ;;  %v4652_v25 = vrot.slane %v15636_v42, 1  ;;  %v4193_v44 = vshrl.u32 %v15636_v42, 16 }
 0x5dc   : > { %4065 = vrot.lane.b32.xlu1 %v4058_v56, %s16732_s23  ;;  %v13870_v56 = vld [vmem:[%s16764_s3 + $0x1c8] sm:$0xff]  }
 0x5dd   : > { %v4197_v27 = vrot.slane %v4195_v29, 1 }
 0x5df   : > { %v4198_v19 = vor.u32 %v4197_v27, %v4193_v44  ;;  %v5158_v27 = vrot.slane %v15636_v42, 2 }
 0x64a   : > { %v4061_v52 = vpop.permute.xlu0 %4060  ;;  %v4050_v53 = vpop.permute.xlu1 %4049 }
 0x64b   : > { %4053 = vst.msk [vmem:[#allocation3] sm:$0xf] %vm4052_vm13, %v4050_v53  ;;  %v13882_v53 = vld [vmem:[%s16764_s3 + $0x90] sm:$0xff]   ;;  %vm6875_vm13 = vcmask 1041408  }
 0x64c   : > { %4064 = vst.msk [vmem:[#allocation3] sm:$0xf] %vm4063_vm5, %v4061_v52  ;;  %v13883_v52 = vld [vmem:[%s16764_s3 + $0x240] sm:$0xff]   ;;  %vm6870_vm5 = vcmask 490496  }
 0x64e   : > { %v4066_v49 = vpop.permute.xlu1 %4065 }
 0x64f   : > { %4069 = vst.msk [vmem:[#allocation3] sm:$0xf] %vm4068_vm9, %v4066_v49  ;;  %v13884_v49 = vld [vmem:[%s16764_s3 + $0x200] sm:$0xff]  }
 0x656   : > { %v4070_v2 = vld [vmem:[#allocation3] sm:$0xf] }
 0x657   : > { %v4080_v16 = vrot.slane %v4070_v2, 5  ;;  %v13895_v2 = vld [vmem:[%s16764_s3 + $0x1b0] sm:$0xff]  }
 0x659   : > { %4081 = vrot.lane.b32.xlu0 %v4080_v16, %s14730_s18  ;;  %v13894_v16 = vld [vmem:[%s16764_s3 + $0x1e8] sm:$0xff]   ;;  %s14737_s18 = smov 6  }
 0x6cb   : > { %v4082_v63 = vpop.permute.xlu0 %4081 }
 0x6cc   : > { %4085 = vst.msk [vmem:[#allocation2] sm:$0x78] %vm4084_vm0, %v4082_v63  ;;  %vm5920_vm0 = vcmask 915843  }
 0x6cd   : > { %4087 = vst.msk [vmem:[#allocation2 + $0x8] sm:$0x78] %vm4086_vm2, %v4082_v63  ;;  %v13899_v63 = vld [vmem:[%s16764_s3 + $0x1a8] sm:$0xff]   ;;  %vm6890_vm2 = vcmask 441392  }
 0x6d3   : > { %v15597_v24 = vld [vmem:[#allocation2] sm:$0xff] }
 0x6d4   : > { %v15595_v17 = vld [vmem:[#allocation2 + $0x8] sm:$0xff]  ;;  %v15607_v9 = vpack.c.bf16 %v15597_v24, %v15597_v24  ;;  %5909 = vst [vmem:[#allocation2] sm:$0xff] %v14725_v0 }
 0x6d5   : > { %5911 = vst.msk [vmem:[#allocation2 + $0x8] sm:$0xff] %vm5910_vm3, %v14725_v0  ;;  %v15603_v28 = vpack.c.bf16 %v15595_v17, %v15595_v17 }
 0x6d6   : > { %v4181_v55 = vshll.u32 %v15607_v9, 16  ;;  %v4179_v38 = vshrl.u32 %v15607_v9, 16 }
 0x6d7   : > { %4558 = vmatprep.mubr.bf16.mxu1 %v15603_v28  ;;  %v4188_v33 = vshll.u32 %v15603_v28, 16  ;;  %v4186_v45 = vshrl.u32 %v15603_v28, 16  ;;  %v4651_v36 = vrot.slane %v15603_v28, 1 }
 0x6d8   : > { %4559 = vmatmul.mubr.bf16.vlgmr.msra.gmra.mxu1 %v15607_v9  ;;  %v4183_v39 = vrot.slane %v4181_v55, 1 }
 0x6d9   : > { %13102 = vmatpush3.bf16.msra.mxu1 %v13865_v26  ;;  %v4190_v37 = vrot.slane %v4188_v33, 1  ;;  %13109 = vmatprep.mubr.msk.bf16.mxu1 %vm14736_vm15, %v14725_v0  ;;  %v4903_v12 = vrot.slane %v4186_v45, 1  ;;  %v4904_v32 = vrot.slane %v4188_v33, 2  ;;  %v13898_v26 = vld [vmem:[%s16764_s3 + $0x1e0] sm:$0xff]   ;;  %v4900_v33 = vrot.slane %v4179_v38, 1 }
 0x6da   : > { %13103 = vmatprep.subr.bf16.mxu1 %v14725_v0  ;;  %v4184_v41 = vor.u32 %v4183_v39, %v4179_v38  ;;  %v13901_v39 = vld [vmem:[%s16764_s3 + $0x318] sm:$0xff]  }
 0x6db   : > { %v4191_v40 = vor.u32 %v4190_v37, %v4186_v45  ;;  %v4905_v30 = vor.u32 %v4904_v32, %v4903_v12  ;;  %v13900_v45 = vld [vmem:[%s16764_s3 + $0x168] sm:$0xff]   ;;  %v13902_v37 = vld [vmem:[%s16764_s3 + $0x1a0] sm:$0xff]   ;;  %v13905_v38 = vld [vmem:[%s16764_s3 + $0x198] sm:$0xff]  }
 0x6dc   : > { %v13911_v32 = vld [vmem:[%s16764_s3 + $0x188] sm:$0xff]  }
 0x6dd   : > { %13104 = vmatpush3.bf16.msra.mxu1 %v13868_v34  ;;  %4356 = vmatprep.mubr.bf16.mxu0 %v4191_v40  ;;  %v4901_v34 = vrot.slane %v4181_v55, 2  ;;  %v13904_v55 = vld [vmem:[%s16764_s3 + $0x310] sm:$0xff]  }
 0x6de   : > { %4357 = vmatmul.mubr.bf16.vlgmr.msra.gmra.mxu0 %v4184_v41  ;;  %13105 = vmatprep.subr.bf16.mxu1 %v14725_v0  ;;  %v13903_v41 = vld [vmem:[%s16764_s3 + $0x160] sm:$0xff]  }
 0x6df   : > { %13078 = vmatpush3.bf16.msra.mxu0 %v13869_v1  ;;  %13085 = vmatprep.mubr.msk.bf16.mxu0 %vm14736_vm15, %v14725_v0  ;;  %v4902_v40 = vor.u32 %v4901_v34, %v4900_v33  ;;  %v13906_v1 = vld [vmem:[%s16764_s3 + $0x158] sm:$0xff]   ;;  %v13937_v33 = vld [vmem:[%s16764_s3 + $0x360] sm:$0xff]  }
 0x6e0   : > { %13079 = vmatprep.subr.bf16.mxu0 %v14725_v0 }
 0x6e1   : > { %13106 = vmatpush3.bf16.msra.mxu1 %v13870_v56  ;;  %v15704_v56 = vpack.c.bf16 %v15591_v23, %v15595_v17  ;;  %v13910_v23 = vld [vmem:[%s16764_s3 + $0x300] sm:$0xff]   ;;  %v13913_v17 = vld [vmem:[%s16764_s3 + $0x398] sm:$0xff]  }
 0x6e2   : > { %13107 = vmatprep.subr.bf16.mxu1 %v14725_v0 }
 0x6e3   : > { %13080 = vmatpush3.bf16.msra.mxu0 %v13871_v47  ;;  %v13908_v47 = vld [vmem:[%s16764_s3 + $0x190] sm:$0xff]   ;;  %v5421_v12 = vshll.u32 %v15704_v56, 16 }
 0x6e4   : > { %13081 = vmatprep.subr.bf16.mxu0 %v14725_v0 }
 0x6e5   : > { %13108 = vmatpush3.bf16.msra.mxu1 %v13872_v61  ;;  %v13907_v61 = vld [vmem:[%s16764_s3 + $0x308] sm:$0xff]  }
 0x6e6   : > { %12863 = vmatprep.subr.bf16.mxu1 %v13874_v62  ;;  %v13909_v62 = vld [vmem:[%s16764_s3 + $0x150] sm:$0xff]  }
 0x6e7   : > { %13082 = vmatpush3.bf16.msra.mxu0 %v13873_v11  ;;  %v5418_v11 = vshrl.u32 %v15704_v56, 16 }
 0x6e8   : > { %13110 = vmatmul.mubr.msk.bf16.vlgmr.msra.gmra.mxu1 %vm4073_vm11, %v4652_v25  ;;  %13083 = vmatprep.subr.bf16.mxu0 %v14725_v0  ;;  %v13912_v25 = vld [vmem:[%s16764_s3 + $0x148] sm:$0xff]  }
 0x6e9   : > { %12864 = vmatpush3.bf16.msra.mxu1 %v13875_v46  ;;  %5066 = vmatprep.mubr.bf16.mxu1 %v4905_v30  ;;  %v5420_v46 = vrot.slane %v5418_v11, 2  ;;  %v13915_v30 = vld [vmem:[%s16764_s3 + $0x180] sm:$0xff]   ;;  %v13945_v11 = vld [vmem:[%s16764_s3 + $0x2d0] sm:$0xff]  }
 0x6ea   : > { %12865 = vmatprep.subr.bf16.mxu1 %v13877_v31  ;;  %v5423_v31 = vrot.slane %v5421_v12, 3  ;;  %v13969_v12 = vld [vmem:[%s16764_s3 + $0x448] sm:$0xff]  }
 0x6eb   : > { %13084 = vmatpush3.bf16.msra.mxu0 %v13876_v58  ;;  %v13914_v58 = vld [vmem:[%s16764_s3 + $0x358] sm:$0xff]  }
 0x6ec   : > { %13089 = vmatprep.subr.bf16.mxu0 %v14725_v0 }
 0x6ed   : > { %12866 = vmatpush3.bf16.msra.mxu1 %v13878_v3  ;;  %v13917_v3 = vld [vmem:[%s16764_s3 + $0x390] sm:$0xff]  }
 0x6ee   : > { %13086 = vmatmul.mubr.msk.bf16.vlgmr.msra.gmra.mxu0 %vm4073_vm11, %v4198_v19  ;;  %12867 = vmatprep.subr.bf16.mxu1 %v13880_v13  ;;  %v5424_v19 = vor.u32 %v5423_v31, %v5420_v46  ;;  %v13916_v13 = vld [vmem:[%s16764_s3 + $0x140] sm:$0xff]   ;;  %v13948_v31 = vld [vmem:[%s16764_s3 + $0x288] sm:$0xff]  }
 0x6ef   : > { %13090 = vmatpush3.bf16.msra.mxu0 %v13879_v50  ;;  %13097 = vmatprep.mubr.msk.bf16.mxu0 %vm14736_vm15, %v14725_v0  ;;  %v13918_v50 = vld [vmem:[%s16764_s3 + $0x350] sm:$0xff]  }
 0x6f0   : > { %13091 = vmatprep.subr.bf16.mxu0 %v14725_v0 }
 0x6f1   : > { %12868 = vmatpush3.bf16.msra.mxu1 %v13881_v51  ;;  %v13920_v51 = vld [vmem:[%s16764_s3 + $0x388] sm:$0xff]  }
 0x6f2   : > { %12869 = vmatprep.subr.bf16.mxu1 %v13883_v52  ;;  %v13919_v52 = vld [vmem:[%s16764_s3 + $0x278] sm:$0xff]  }
 0x6f3   : > { %13092 = vmatpush3.bf16.msra.mxu0 %v13882_v53  ;;  %v4650_v53 = vrot.slane %v15607_v9, 1 }
 0x6f4   : > { %13093 = vmatprep.subr.bf16.mxu0 %v14725_v0 }
 0x6f5   : > { %12870 = vmatpush3.bf16.msra.mxu1 %v13884_v49  ;;  %v13921_v49 = vld [vmem:[%s16764_s3 + $0x348] sm:$0xff]  }
 0x6f6   : > { %12871 = vmatprep.subr.bf16.mxu1 %v13886_v59  ;;  %v13923_v59 = vld [vmem:[%s16764_s3 + $0x380] sm:$0xff]  }
 0x6f7   : > { %13094 = vmatpush3.bf16.msra.mxu0 %v13885_v60  ;;  %v13922_v60 = vld [vmem:[%s16764_s3 + $0x270] sm:$0xff]  }
 0x6f8   : > { %13095 = vmatprep.subr.bf16.mxu0 %v14725_v0 }
 0x6f9   : > { %12872 = vmatpush3.bf16.msra.mxu1 %v13887_v35  ;;  %v13924_v35 = vld [vmem:[%s16764_s3 + $0x340] sm:$0xff]  }
 0x6fa   : > { %12873 = vmatprep.subr.bf16.mxu1 %v13889_v5  ;;  %v13926_v5 = vld [vmem:[%s16764_s3 + $0x378] sm:$0xff]  }
 0x6fb   : > { %13096 = vmatpush3.bf16.msra.mxu0 %v13888_v6  ;;  %v13925_v6 = vld [vmem:[%s16764_s3 + $0x268] sm:$0xff]  }
 0x6fc   : > { %12836 = vmatprep.subr.bf16.mxu0 %v13891_v7  ;;  %v13927_v7 = vld [vmem:[%s16764_s3 + $0x338] sm:$0xff]  }
 0x6fd   : > { %12874 = vmatpush3.bf16.msra.mxu1 %v13890_v43  ;;  %v13929_v43 = vld [vmem:[%s16764_s3 + $0x370] sm:$0xff]  }
 0x6fe   : > { %13098 = vmatmul.mubr.msk.bf16.vlgmr.msra.gmra.mxu0 %vm4073_vm11, %v15636_v42  ;;  %12875 = vmatprep.subr.bf16.mxu1 %v13893_v8  ;;  %v4906_v8 = vrot.slane %v4193_v44, 1  ;;  %v13932_v42 = vld [vmem:[%s16764_s3 + $0x2b8] sm:$0xff]   ;;  %v5157_v44 = vrot.slane %v15603_v28, 2  ;;  %v13938_v28 = vld [vmem:[%s16764_s3 + $0x320] sm:$0xff]  }
 0x6ff   : > { %12837 = vmatpush3.bf16.msra.mxu0 %v13892_v54  ;;  %4810 = vmatprep.mubr.bf16.mxu0 %v4651_v36  ;;  %v4907_v54 = vrot.slane %v4195_v29, 2  ;;  %v13931_v36 = vld [vmem:[%s16764_s3 + $0x2f8] sm:$0xff]   ;;  %v13935_v29 = vld [vmem:[%s16764_s3 + $0x2f0] sm:$0xff]  }
 0x700   : > { %12838 = vmatprep.subr.bf16.mxu0 %v13895_v2  ;;  %v13928_v2 = vld [vmem:[%s16764_s3 + $0x260] sm:$0xff]  }
 0x701   : > { %12876 = vmatpush3.bf16.msra.mxu1 %v13894_v16  ;;  %v13930_v16 = vld [vmem:[%s16764_s3 + $0x330] sm:$0xff]  }
 0x702   : > { %12877 = vmatprep.subr.bf16.mxu1 %v13897_v20  ;;  %v4908_v20 = vor.u32 %v4907_v54, %v4906_v8  ;;  %v13961_v8 = vld [vmem:[%s16764_s3 + $0x420] sm:$0xff]  }
 0x703   : > { %12839 = vmatpush3.bf16.msra.mxu0 %v13896_v22  ;;  %v13933_v22 = vld [vmem:[%s16764_s3 + $0x368] sm:$0xff]   ;;  %v13962_v54 = vld [vmem:[%s16764_s3 + $0x3e0] sm:$0xff]  }
 0x704   : > { %12840 = vmatprep.subr.bf16.mxu0 %v13899_v63  ;;  %v15751_v63 = vpack.c.bf16 %v15584_v21, %v15597_v24  ;;  %v13936_v24 = vld [vmem:[%s16764_s3 + $0x2b0] sm:$0xff]  }
 0x705   : > { %12878 = vmatpush3.bf16.msra.mxu1 %v13898_v26  ;;  %v13934_v26 = vld [vmem:[%s16764_s3 + $0x328] sm:$0xff]  }
 0x706   : > { %13125 = vmatprep.subr.bf16.mxu1 %v14725_v0  ;;  %v5410_v34 = vshrl.u32 %v15751_v63, 16  ;;  %v5413_v21 = vshll.u32 %v15751_v63, 16 }
 0x707   : > { %12841 = vmatpush3.bf16.msra.mxu0 %v13900_v45  ;;  %v13939_v45 = vld [vmem:[%s16764_s3 + $0x2e8] sm:$0xff]  }
 0x708   : > { %5067 = vmatmul.mubr.bf16.vlgmr.msra.gmra.mxu1 %v4902_v40  ;;  %12842 = vmatprep.subr.bf16.mxu0 %v13902_v37  ;;  %v5412_v37 = vrot.slane %v5410_v34, 2  ;;  %v13940_v40 = vld [vmem:[%s16764_s3 + $0x2a8] sm:$0xff]  }
 0x709   : > { %13126 = vmatpush3.bf16.msra.mxu1 %v13901_v39  ;;  %13133 = vmatprep.mubr.msk.bf16.mxu1 %vm14736_vm15, %v14725_v0  ;;  %v5415_v39 = vrot.slane %v5413_v21, 3 }
 0x70a   : > { %13127 = vmatprep.subr.bf16.mxu1 %v14725_v0 }
 0x70b   : > { %12843 = vmatpush3.bf16.msra.mxu0 %v13903_v41  ;;  %v13941_v41 = vld [vmem:[%s16764_s3 + $0x2e0] sm:$0xff]  }
 0x70c   : > { %12844 = vmatprep.subr.bf16.mxu0 %v13905_v38  ;;  %v13963_v38 = vld [vmem:[%s16764_s3 + $0x458] sm:$0xff]  }
 0x70d   : > { %13128 = vmatpush3.bf16.msra.mxu1 %v13904_v55  ;;  %v5416_v55 = vor.u32 %v5415_v39, %v5412_v37 }
 0x70e   : > { %13129 = vmatprep.subr.bf16.mxu1 %v14725_v0 }
 0x70f   : > { %12845 = vmatpush3.bf16.msra.mxu0 %v13906_v1  ;;  %v13942_v1 = vld [vmem:[%s16764_s3 + $0x2a0] sm:$0xff]  }
 0x710   : > { %12846 = vmatprep.subr.bf16.mxu0 %v13908_v47  ;;  %v13943_v47 = vld [vmem:[%s16764_s3 + $0x2d8] sm:$0xff]  }
 0x711   : > { %13130 = vmatpush3.bf16.msra.mxu1 %v13907_v61  ;;  %v13966_v61 = vld [vmem:[%s16764_s3 + $0x450] sm:$0xff]  }
 0x712   : > { %13131 = vmatprep.subr.bf16.mxu1 %v14725_v0 }
 0x713   : > { %12847 = vmatpush3.bf16.msra.mxu0 %v13909_v62  ;;  %v13944_v62 = vld [vmem:[%s16764_s3 + $0x298] sm:$0xff]  }
 0x714   : > { %12848 = vmatprep.subr.bf16.mxu0 %v13911_v32  ;;  %v13946_v32 = vld [vmem:[%s16764_s3 + $0x290] sm:$0xff]  }
 0x715   : > { %13132 = vmatpush3.bf16.msra.mxu1 %v13910_v23  ;;  %v4093_v23 = vld [vmem:[#allocation2 + $0x28] sm:$0x3] }
 0x716   : > { %12917 = vmatprep.subr.bf16.mxu1 %v13913_v17  ;;  %v13947_v17 = vld [vmem:[%s16764_s3 + $0x2c8] sm:$0xff]   ;;  %v5367_v46 = vpack.c.bf16 %v4093_v23, %v15627_v18  ;;  %v5156_v18 = vrot.slane %v15607_v9, 2 }
 0x717   : > { %12849 = vmatpush3.bf16.msra.mxu0 %v13912_v25  ;;  %v13972_v25 = vld [vmem:[%s16764_s3 + $0x440] sm:$0xff]  }
 0x718   : > { %13134 = vmatmul.mubr.msk.bf16.vlgmr.msra.gmra.mxu1 %vm4073_vm11, %v5158_v27  ;;  %12850 = vmatprep.subr.bf16.mxu0 %v13915_v30  ;;  %v13949_v27 = vld [vmem:[%s16764_s3 + $0x2c0] sm:$0xff]   ;;  %v5685_v30 = vrot.slane %v5367_v46, 3 }
 0x719   : > { %12918 = vmatpush3.bf16.msra.mxu1 %v13914_v58  ;;  %5590 = vmatprep.mubr.bf16.mxu1 %v5424_v19  ;;  %v13950_v58 = vld [vmem:[%s16764_s3 + $0x280] sm:$0xff]   ;;  %v13952_v19 = vld [vmem:[%s16764_s3 + $0x3b0] sm:$0xff]  }
 0x71a   : > { %12919 = vmatprep.subr.bf16.mxu1 %v13917_v3  ;;  %v13951_v3 = vld [vmem:[%s16764_s3 + $0x3b8] sm:$0xff]  }
 0x71b   : > { %12851 = vmatpush3.bf16.msra.mxu0 %v13916_v13  ;;  %v5426_v13 = vshrl.u32 %v5367_v46, 16 }
 0x71c   : > { %13113 = vmatprep.subr.bf16.mxu0 %v14725_v0 }
 0x71d   : > { %12920 = vmatpush3.bf16.msra.mxu1 %v13918_v50  ;;  %v5429_v50 = vshll.u32 %v5367_v46, 16  ;;  %v5428_v9 = vrot.slane %v5426_v13, 2 }
 0x71e   : > { %4811 = vmatmul.mubr.bf16.vlgmr.msra.gmra.mxu0 %v4650_v53  ;;  %12921 = vmatprep.subr.bf16.mxu1 %v13920_v51  ;;  %v13953_v51 = vld [vmem:[%s16764_s3 + $0x3a8] sm:$0xff]   ;;  %v13954_v53 = vld [vmem:[%s16764_s3 + $0x3a0] sm:$0xff]  }
 0x71f   : > { %13114 = vmatpush3.bf16.msra.mxu0 %v13919_v52  ;;  %13121 = vmatprep.mubr.msk.bf16.mxu0 %vm14736_vm15, %v14725_v0  ;;  %v5431_v52 = vrot.slane %v5429_v50, 3 }
 0x720   : > { %13115 = vmatprep.subr.bf16.mxu0 %v14725_v0 }
 0x721   : > { %12922 = vmatpush3.bf16.msra.mxu1 %v13921_v49  ;;  %v13955_v49 = vld [vmem:[%s16764_s3 + $0x438] sm:$0xff]  }
 0x722   : > { %12923 = vmatprep.subr.bf16.mxu1 %v13923_v59  ;;  %v5432_v59 = vor.u32 %v5431_v52, %v5428_v9  ;;  %v13976_v52 = vld [vmem:[%s14809_s19 + $0x30] sm:$0xff]  }
 0x723   : > { %13116 = vmatpush3.bf16.msra.mxu0 %v13922_v60  ;;  %v13956_v60 = vld [vmem:[%s16764_s3 + $0x3f8] sm:$0xff]  }
 0x724   : > { %13117 = vmatprep.subr.bf16.mxu0 %v14725_v0 }
 0x725   : > { %12924 = vmatpush3.bf16.msra.mxu1 %v13924_v35  ;;  %v13957_v35 = vld [vmem:[%s16764_s3 + $0x430] sm:$0xff]  }
 0x726   : > { %12925 = vmatprep.subr.bf16.mxu1 %v13926_v5  ;;  %v5684_v5 = vrot.slane %v15704_v56, 3  ;;  %v13964_v56 = vld [vmem:[%s16764_s3 + $0x418] sm:$0xff]  }
 0x727   : > { %13118 = vmatpush3.bf16.msra.mxu0 %v13925_v6  ;;  %v13958_v6 = vld [vmem:[%s16764_s3 + $0x3f0] sm:$0xff]  }
 0x728   : > { %13119 = vmatprep.subr.bf16.mxu0 %v14725_v0 }
 0x729   : > { %12926 = vmatpush3.bf16.msra.mxu1 %v13927_v7  ;;  %v13959_v7 = vld [vmem:[%s16764_s3 + $0x428] sm:$0xff]  }
 0x72a   : > { %12927 = vmatprep.subr.bf16.mxu1 %v13929_v43  ;;  %v13960_v43 = vld [vmem:[%s16764_s3 + $0x3e8] sm:$0xff]  }
 0x72b   : > { %13120 = vmatpush3.bf16.msra.mxu0 %v13928_v2  ;;  %v13965_v2 = vld [vmem:[%s16764_s3 + $0x3d8] sm:$0xff]  }
 0x72c   : > { %12890 = vmatprep.subr.bf16.mxu0 %v13931_v36  ;;  %v13967_v36 = vld [vmem:[%s16764_s3 + $0x410] sm:$0xff]  }
 0x72d   : > { %12928 = vmatpush3.bf16.msra.mxu1 %v13930_v16  ;;  %v13968_v16 = vld [vmem:[%s16764_s3 + $0x3d0] sm:$0xff]  }
 0x72e   : > { %13122 = vmatmul.mubr.msk.bf16.vlgmr.msra.gmra.mxu0 %vm4073_vm11, %v4908_v20  ;;  %12929 = vmatprep.subr.bf16.mxu1 %v13933_v22  ;;  %v13970_v20 = vld [vmem:[%s16764_s3 + $0x408] sm:$0xff]  }
 0x72f   : > { %12891 = vmatpush3.bf16.msra.mxu0 %v13932_v42  ;;  %5316 = vmatprep.mubr.bf16.mxu0 %v5157_v44  ;;  %v13971_v22 = vld [vmem:[%s16764_s3 + $0x3c8] sm:$0xff]   ;;  %v13973_v42 = vld [vmem:[%s16764_s3 + $0x400] sm:$0xff]   ;;  %v5683_v44 = vrot.slane %v15751_v63, 3 }
 0x730   : > { %12892 = vmatprep.subr.bf16.mxu0 %v13935_v29  ;;  %v13974_v29 = vld [vmem:[%s16764_s3 + $0x3c0] sm:$0xff]   ;;  %s16804_s3 = sld [smem:[#allocation40_spill]] }
 0x731   : > { %12930 = vmatpush3.bf16.msra.mxu1 %v13934_v26 }
 0x732   : > { %12931 = vmatprep.subr.bf16.mxu1 %v13937_v33 }
 0x733   : > { %12893 = vmatpush3.bf16.msra.mxu0 %v13936_v24 }
 0x734   : > { %12894 = vmatprep.subr.bf16.mxu0 %v13939_v45 }
 0x735   : > { %12932 = vmatpush3.bf16.msra.mxu1 %v13938_v28 }
 0x736   : > { %13149 = vmatprep.subr.bf16.mxu1 %v14725_v0 }
 0x737   : > { %12895 = vmatpush3.bf16.msra.mxu0 %v13940_v40 }
 0x738   : > { %5591 = vmatmul.mubr.bf16.vlgmr.msra.gmra.mxu1 %v5416_v55  ;;  %12896 = vmatprep.subr.bf16.mxu0 %v13941_v41 }
 0x739   : > { %13150 = vmatpush3.bf16.msra.mxu1 %v13963_v38  ;;  %13157 = vmatprep.mubr.msk.bf16.mxu1 %vm14736_vm15, %v14725_v0 }
 0x73a   : > { %13151 = vmatprep.subr.bf16.mxu1 %v14725_v0 }
 0x73b   : > { %12897 = vmatpush3.bf16.msra.mxu0 %v13942_v1 }
 0x73c   : > { %12898 = vmatprep.subr.bf16.mxu0 %v13943_v47 }
 0x73d   : > { %13152 = vmatpush3.bf16.msra.mxu1 %v13966_v61 }
 0x73e   : > { %13153 = vmatprep.subr.bf16.mxu1 %v14725_v0 }
 0x73f   : > { %12899 = vmatpush3.bf16.msra.mxu0 %v13944_v62 }
 0x740   : > { %12900 = vmatprep.subr.bf16.mxu0 %v13945_v11 }
 0x741   : > { %13154 = vmatpush3.bf16.msra.mxu1 %v13969_v12 }
 0x742   : > { %13155 = vmatprep.subr.bf16.mxu1 %v14725_v0 }
 0x743   : > { %12901 = vmatpush3.bf16.msra.mxu0 %v13946_v32 }
 0x744   : > { %12902 = vmatprep.subr.bf16.mxu0 %v13947_v17 }
 0x745   : > { %13156 = vmatpush3.bf16.msra.mxu1 %v13972_v25 }
 0x746   : > { %6047 = vmatprep.subr.bf16.mxu1 %v14727_v14 }
 0x747   : > { %12903 = vmatpush3.bf16.msra.mxu0 %v13948_v31 }
 0x748   : > { %12904 = vmatprep.subr.bf16.mxu0 %v13949_v27  ;;  %13158 = vmatmul.mubr.msk.bf16.vlgmr.msra.gmra.mxu1 %vm4073_vm11, %v5685_v30 }
 0x74b   : > { %12905 = vmatpush3.bf16.msra.mxu0 %v13950_v58  ;;  %v14391_v58 = vld [vmem:[%s15028_s15] sm:$0xff] }
 0x74c   : > { %13137 = vmatprep.subr.bf16.mxu0 %v14725_v0 }
 0x74e   : > { %5317 = vmatmul.mubr.bf16.vlgmr.msra.gmra.mxu0 %v5156_v18  ;;  %v14392_v18 = vld [vmem:[%s15028_s15 + $0x8] sm:$0xff]  ;;  %s16789_s15 = sld [smem:[#allocation35_spill]] }
 0x74f   : > { %13138 = vmatpush3.bf16.msra.mxu0 %v13951_v3  ;;  %13145 = vmatprep.mubr.msk.bf16.mxu0 %vm14736_vm15, %v14725_v0  ;;  %v6876_v3 = vrot.slane %v14391_v58, 6 }
 0x750   : > { %13139 = vmatprep.subr.bf16.mxu0 %v14725_v0 }
 0x751   : > { %6879 = vrot.lane.b32.xlu0 %v6876_v3, %s14737_s18 }
 0x753   : > { %13140 = vmatpush3.bf16.msra.mxu0 %v13952_v19  ;;  %v6877_v19 = vrot.slane %v14392_v18, 6 }
 0x754   : > { %13141 = vmatprep.subr.bf16.mxu0 %v14725_v0 }
 0x755   : > { %v15827_v9 = vsel %vm6875_vm13, %v6876_v3, %v6877_v19  ;;  %6883 = vrot.lane.b32.xlu0 %v6877_v19, %s14737_s18  ;;  %vm8075_vm13 = vcmask 64512  }
 0x757   : > { %13142 = vmatpush3.bf16.msra.mxu0 %v13953_v51  ;;  %v13975_v51 = vld [vmem:[%s14809_s19 + $0x38] sm:$0xff]  }
 0x758   : > { %13143 = vmatprep.subr.bf16.mxu0 %v14725_v0 }
 0x75b   : > { %13144 = vmatpush3.bf16.msra.mxu0 %v13954_v53  ;;  %v13977_v53 = vld [vmem:[%s14809_s19 + $0x88] sm:$0xff]  }
 0x75c   : > { %12944 = vmatprep.subr.bf16.mxu0 %v13955_v49  ;;  %6048 = vmatpush1.bf16.msra.mxu1 %v13977_v53  ;;  %v13978_v49 = vld [vmem:[%s14809_s19 + $0x28] sm:$0xff]  }
 0x75d   : > { %6049 = vmatprep.subr.bf16.mxu1 %v14727_v14  ;;  %v13990_v53 = vld [vmem:[%s14809_s19 + $0x48] sm:$0xff]  }
 0x75e   : > { %13146 = vmatmul.mubr.msk.bf16.vlgmr.msra.gmra.mxu0 %vm4073_vm11, %v5432_v59  ;;  %v13979_v59 = vld [vmem:[%s14809_s19 + $0x80] sm:$0xff]  }
 0x75f   : > { %12945 = vmatpush3.bf16.msra.mxu0 %v13956_v60  ;;  %5843 = vmatprep.mubr.bf16.mxu0 %v5684_v5  ;;  %v13981_v5 = vld [vmem:[%s14809_s19 + $0x78] sm:$0xff]  }
 0x760   : > { %12946 = vmatprep.subr.bf16.mxu0 %v13957_v35  ;;  %6050 = vmatpush1.bf16.msra.mxu1 %v13979_v59  ;;  %v13980_v35 = vld [vmem:[%s14809_s19 + $0x20] sm:$0xff]   ;;  %v15861_v59 = vld [vmem:[#allocation2 + $0x8] sm:$0xff] }
 0x761   : > { %6051 = vmatprep.subr.bf16.mxu1 %v14727_v14 }
 0x763   : > { %12947 = vmatpush3.bf16.msra.mxu0 %v13958_v6 }
 0x764   : > { %12948 = vmatprep.subr.bf16.mxu0 %v13959_v7  ;;  %6052 = vmatpush1.bf16.msra.mxu1 %v13981_v5  ;;  %v13991_v5 = vld [vmem:[%s14809_s19 + $0x50] sm:$0xff]  }
 0x765   : > { %6053 = vmatprep.subr.bf16.mxu1 %v14727_v14 }
 0x767   : > { %12949 = vmatpush3.bf16.msra.mxu0 %v13960_v43  ;;  %v13982_v43 = vld [vmem:[%s14809_s19 + $0x18] sm:$0xff]  }
 0x768   : > { %12950 = vmatprep.subr.bf16.mxu0 %v13961_v8  ;;  %v13983_v8 = vld [vmem:[%s14809_s19 + $0x70] sm:$0xff]  }
 0x769   : > { %6054 = vmatpush1.bf16.msra.mxu1 %v13983_v8  ;;  %v12091_v8 = vld [vmem:[%s16787_s14] ss:$0 sm:$0xff] }
 0x76a   : > { %6055 = vmatprep.subr.bf16.mxu1 %v14727_v14 }
 0x76b   : > { %12951 = vmatpush3.bf16.msra.mxu0 %v13962_v54 }
 0x76c   : > { %12952 = vmatprep.subr.bf16.mxu0 %v13964_v56 }
 0x76f   : > { %12953 = vmatpush3.bf16.msra.mxu0 %v13965_v2 }
 0x770   : > { %12954 = vmatprep.subr.bf16.mxu0 %v13967_v36 }
 0x773   : > { %12955 = vmatpush3.bf16.msra.mxu0 %v13968_v16  ;;  %v13984_v16 = vld [vmem:[%s14809_s19 + $0x10] sm:$0xff]  }
 0x774   : > { %12956 = vmatprep.subr.bf16.mxu0 %v13970_v20  ;;  %v13985_v20 = vld [vmem:[%s14809_s19 + $0x68] sm:$0xff]  }
 0x775   : > { %6056 = vmatpush1.bf16.msra.mxu1 %v13985_v20  ;;  %v13995_v20 = vld [vmem:[%s14809_s19 + $0x90] sm:$0xff]  }
 0x776   : > { %6057 = vmatprep.subr.bf16.mxu1 %v14727_v14 }
 0x777   : > { %12957 = vmatpush3.bf16.msra.mxu0 %v13971_v22 }
 0x778   : > { %12958 = vmatprep.subr.bf16.mxu0 %v13973_v42 }
 0x77b   : > { %12959 = vmatpush3.bf16.msra.mxu0 %v13974_v29 }
 0x77c   : > { %6149 = vmatprep.subr.bf16.mxu0 %v14727_v14 }
 0x77e   : > { %5844 = vmatmul.mubr.bf16.vlgmr.msra.gmra.mxu0 %v5683_v44 }
 0x77f   : > { %6150 = vmatpush1.bf16.msra.mxu0 %v13975_v51 }
 0x780   : > { %6151 = vmatprep.subr.bf16.mxu0 %v14727_v14 }
 0x783   : > { %6152 = vmatpush1.bf16.msra.mxu0 %v13976_v52  ;;  %v13989_v52 = vld [vmem:[%s14809_s19 + $0x58] sm:$0xff]  }
 0x784   : > { %6153 = vmatprep.subr.bf16.mxu0 %v14727_v14 }
 0x787   : > { %6154 = vmatpush1.bf16.msra.mxu0 %v13978_v49 }
 0x788   : > { %6155 = vmatprep.subr.bf16.mxu0 %v14727_v14 }
 0x78b   : > { %6156 = vmatpush1.bf16.msra.mxu0 %v13980_v35 }
 0x78c   : > { %6157 = vmatprep.subr.bf16.mxu0 %v14727_v14 }
 0x78f   : > { %6158 = vmatpush1.bf16.msra.mxu0 %v13982_v43 }
 0x790   : > { %6159 = vmatprep.subr.bf16.mxu0 %v14727_v14 }
 0x793   : > { %6160 = vmatpush1.bf16.msra.mxu0 %v13984_v16 }
 0x794   : > { %6161 = vmatprep.subr.bf16.mxu0 %v14727_v14 }
 0x798   : > { %v12825_v26 = vpop.f32.mrf.mxu1 }
 0x79a   : > { %v12826_v33 = vpop.f32.mrf.mxu1 }
 0x79b   : > { %v12827_v34 = vadd.f32 %v12826_v33, %v12825_v26  ;;  %v13986_v26 = vld [vmem:[%s14809_s19 + $0x8] sm:$0xff]   ;;  %v13987_v33 = vld [vmem:[%s14809_s19 + $0x60] sm:$0xff]  }
 0x79c   : > { %v12828_v21 = vpop.f32.mrf.mxu1  ;;  %6162 = vmatpush1.bf16.msra.mxu0 %v13986_v26  ;;  %6058 = vmatpush1.bf16.msra.mxu1 %v13987_v33 }
 0x79d   : > { %6163 = vmatprep.subr.bf16.mxu0 %v14727_v14  ;;  %6059 = vmatprep.subr.bf16.mxu1 %v14727_v14 }
 0x79e   : > { %v12798_v24 = vpop.f32.mrf.mxu0  ;;  %v12829_v45 = vpop.f32.mrf.mxu1 }
 0x7a0   : > { %v12799_v28 = vpop.f32.mrf.mxu0  ;;  %6060 = vmatpush1.bf16.msra.mxu1 %v13989_v52 }
 0x7a1   : > { %v12800_v37 = vadd.f32 %v12799_v28, %v12798_v24  ;;  %6061 = vmatprep.subr.bf16.mxu1 %v14727_v14 }
 0x7a2   : > { %v12801_v39 = vpop.f32.mrf.mxu0 }
 0x7a4   : > { %v12802_v40 = vpop.f32.mrf.mxu0  ;;  %6062 = vmatpush1.bf16.msra.mxu1 %v13991_v5 }
 0x7a5   : > { %6075 = vmatprep.subr.bf16.mxu1 %v14727_v14 }
 0x7a8   : > { %v15819_v41 = vpop.f32.mrf.mxu1 }
 0x7aa   : > { %v13111_v38 = vpop.f32.mrf.mxu1 }
 0x7ac   : > { %v4855_v55 = vpop.f32.mrf.mxu1 }
 0x7ae   : > { %v4398_v1 = vpop.f32.mrf.mxu0  ;;  %v13112_v63 = vpop.f32.mrf.mxu1 }
 0x7af   : > { %v4399_v47 = vadd.f32 %v12800_v37, %v4398_v1 }
 0x7b0   : > { %v13087_v61 = vpop.f32.mrf.mxu0 }
 0x7b1   : > { %v4561_v62 = vadd.f32 %v12827_v34, %v4399_v47  ;;  %v13988_v34 = vld [vmem:[%s14809_s19] sm:$0xff]  }
 0x7b2   : > { %v4401_v11 = vpop.f32.mrf.mxu0  ;;  %6164 = vmatpush1.bf16.msra.mxu0 %v13988_v34 }
 0x7b3   : > { %6177 = vmatprep.subr.bf16.mxu0 %v14727_v14 }
 0x7b4   : > { %v13088_v12 = vpop.f32.mrf.mxu0 }
 0x7b6   : > { %6178 = vmatpush2.bf16.msra.mxu0 %v13990_v53  ;;  %v14011_v53 = vld [vmem:[%s14809_s19 + $0xa0] sm:$0xff]  }
 0x7b7   : > { %6179 = vmatprep.subr.bf16.mxu0 %v14727_v14 }
 0x7be   : > { %v4600_v32 = vpop.f32.mrf.mxu0 }
 0x7bf   : > { %v4601_v23 = vadd.f32 %v4600_v32, %v4561_v62 }
 0x7c0   : > { %v13099_v17 = vpop.f32.mrf.mxu0 }
 0x7c2   : > { %v4603_v25 = vpop.f32.mrf.mxu0 }
 0x7c4   : > { %v13100_v46 = vpop.f32.mrf.mxu0 }
 0x7c8   : > { %v12879_v31 = vpop.f32.mrf.mxu1 }
 0x7ca   : > { %v12880_v27 = vpop.f32.mrf.mxu1 }
 0x7cb   : > { %v15821_v30 = vadd.f32 %v12880_v27, %v12879_v31 }
 0x7cc   : > { %v12882_v13 = vpop.f32.mrf.mxu1 }
 0x7ce   : > { %v12883_v50 = vpop.f32.mrf.mxu1 }
 0x7d8   : > { %v5358_v60 = vpop.f32.mrf.mxu1 }
 0x7da   : > { %v13135_v6 = vpop.f32.mrf.mxu1 }
 0x7db   : > { %v13992_v6 = vld [vmem:[%s14809_s19 + $0x40] sm:$0xff]  }
 0x7dc   : > { %v5361_v7 = vpop.f32.mrf.mxu1  ;;  %6180 = vmatpush2.bf16.msra.mxu0 %v13992_v6  ;;  %v14013_v6 = vld [vmem:[%s14809_s19 + $0xe8] sm:$0xff]  }
 0x7dd   : > { %v15868_v7 = vpack.c.bf16 %v15861_v59, %v15861_v59  ;;  %6410 = vmatprep.subr.bf16.mxu0 %v14727_v14 }
 0x7de   : > { %v12852_v54 = vpop.f32.mrf.mxu0  ;;  %v13136_v56 = vpop.f32.mrf.mxu1 }
 0x7df   : > { %12133 = vmatprep.mubr.msk.bf16.mxu0 %vm5910_vm3, %v15868_v7  ;;  %v13993_v56 = vld [vmem:[%s14809_s19 + $0x98] sm:$0xff]  }
 0x7e0   : > { %v12853_v2 = vpop.f32.mrf.mxu0  ;;  %6076 = vmatpush2.bf16.msra.mxu1 %v13993_v56  ;;  %v14015_v56 = vld [vmem:[%s14809_s19 + $0xe0] sm:$0xff]  }
 0x7e1   : > { %v12854_v36 = vadd.f32 %v12853_v2, %v12852_v54  ;;  %6077 = vmatprep.subr.bf16.mxu1 %v14727_v14 }
 0x7e2   : > { %v12855_v22 = vpop.f32.mrf.mxu0 }
 0x7e3   : > { %v4853_v42 = vadd.f32 %v12854_v36, %v15819_v41  ;;  %v5979_v22 = vshll.u32 %v15868_v7, 16 }
 0x7e4   : > { %v12856_v29 = vpop.f32.mrf.mxu0  ;;  %6078 = vmatpush2.bf16.msra.mxu1 %v13995_v20  ;;  %v6473_v20 = vrot.slane %v15868_v7, 2 }
 0x7e5   : > { %v4858_v44 = vadd.f32 %v4853_v42, %v4601_v23  ;;  %v5977_v42 = vshrl.u32 %v15868_v7, 16  ;;  %6278 = vmatprep.subr.bf16.mxu1 %v14727_v14  ;;  %v5981_v29 = vrot.slane %v5979_v22, 1  ;;  %v6344_v33 = vrot.slane %v5979_v22, 2 }
 0x7e7   : > { %v6343_v26 = vrot.slane %v5977_v42, 1 }
 0x7e9   : > { %v6345_v34 = vor.u32 %v6344_v33, %v6343_v26  ;;  %v14022_v26 = vld [vmem:[%s14809_s19 + $0x1a8] sm:$0xff]   ;;  %v14023_v33 = vld [vmem:[%s14809_s19 + $0x160] sm:$0xff]  }
 0x7ee   : > { %v5108_v21 = vpop.f32.mrf.mxu0 }
 0x7ef   : > { %v5109_v24 = vadd.f32 %v15821_v30, %v5108_v21  ;;  %v6880_v21 = vpop.permute.xlu0 %6879 }
 0x7f0   : > { %v13123_v45 = vpop.f32.mrf.mxu0 }
 0x7f1   : > { %v5114_v28 = vadd.f32 %v5109_v24, %v4858_v44  ;;  %v5982_v44 = vor.u32 %v5981_v29, %v5977_v42  ;;  %v5924_v24 = vld [vmem:[#allocation2 + $0x18] sm:$0x3]  ;;  %v14019_v29 = vld [vmem:[%s14809_s19 + $0x170] sm:$0xff]  }
 0x7f2   : > { %v5111_v37 = vpop.f32.mrf.mxu0  ;;  %6872 = vst.msk [vmem:[#allocation2 + $0x18] sm:$0xff] %vm6870_vm5, %v14725_v0  ;;  %v14018_v42 = vld [vmem:[%s14809_s19 + $0x1b8] sm:$0xff]  }
 0x7f3   : > { %12122 = vmatprep.mubr.msk.bf16.mxu1 %vm5910_vm3, %v5982_v44  ;;  %v6884_v45 = vpop.permute.xlu0 %6883  ;;  %v14021_v44 = vld [vmem:[%s14809_s19 + $0x168] sm:$0xff]  }
 0x7f4   : > { %v13124_v39 = vpop.f32.mrf.mxu0  ;;  %6893 = vst.msk [vmem:[#allocation2 + $0x30] sm:$0x3] %vm6892_vm12, %v6884_v45  ;;  %v14027_v45 = vld [vmem:[%s14809_s19 + $0x150] sm:$0xff]   ;;  %vm8085_vm12 = vcmask 326784  }
 0x7f5   : > { %v13994_v39 = vld [vmem:[%s14809_s19 + $0x128] sm:$0xff]  }
 0x7f8   : > { %v12933_v40 = vpop.f32.mrf.mxu1 }
 0x7fa   : > { %v12934_v41 = vpop.f32.mrf.mxu1 }
 0x7fb   : > { %v12935_v38 = vadd.f32 %v12934_v41, %v12933_v40 }
 0x7fc   : > { %v12936_v55 = vpop.f32.mrf.mxu1 }
 0x7fd   : > { %v13996_v55 = vld [vmem:[%s14809_s19 + $0x120] sm:$0xff]  }
 0x7fe   : > { %v12937_v1 = vpop.f32.mrf.mxu1 }
 0x808   : > { %v5885_v63 = vpop.f32.mrf.mxu1 }
 0x80a   : > { %v13159_v47 = vpop.f32.mrf.mxu1 }
 0x80c   : > { %v5888_v61 = vpop.f32.mrf.mxu1 }
 0x80d   : > { %v13997_v61 = vld [vmem:[%s14809_s19 + $0xd8] sm:$0xff]  }
 0x80e   : > { %v12906_v62 = vpop.f32.mrf.mxu0  ;;  %v13160_v11 = vpop.f32.mrf.mxu1 }
 0x810   : > { %v12907_v12 = vpop.f32.mrf.mxu0 }
 0x811   : > { %v12908_v32 = vadd.f32 %v12907_v12, %v12906_v62  ;;  %v6213_v62 = vrot.slane %v15868_v7, 1  ;;  %v13998_v12 = vld [vmem:[%s14809_s19 + $0x118] sm:$0xff]   ;;  %v14020_v7 = vld [vmem:[%s14809_s19 + $0x1b0] sm:$0xff]  }
 0x812   : > { %v12909_v23 = vpop.f32.mrf.mxu0 }
 0x813   : > { %v5359_v17 = vadd.f32 %v12908_v32, %v5358_v60  ;;  %v12090_v60 = vld [vmem:[%s16786_s8] ss:$0 sm:$0xff]  ;;  %v13999_v32 = vld [vmem:[%s14809_s19 + $0xd0] sm:$0xff]   ;;  %s16808_s8 = smov 64  }
 0x814   : > { %v12910_v25 = vpop.f32.mrf.mxu0  ;;  %v14000_v23 = vld [vmem:[%s14809_s19 + $0x110] sm:$0xff]  }
 0x815   : > { %v5364_v46 = vadd.f32 %v5359_v17, %v5114_v28  ;;  %v14001_v17 = vld [vmem:[%s14809_s19 + $0xc8] sm:$0xff]  }
 0x816   : > { %v14002_v25 = vld [vmem:[%s14809_s19 + $0x108] sm:$0xff]  }
 0x81e   : > { %v5632_v31 = vpop.f32.mrf.mxu0 }
 0x81f   : > { %v5633_v27 = vadd.f32 %v12935_v38, %v5632_v31  ;;  %v14004_v31 = vld [vmem:[%s14809_s19 + $0x100] sm:$0xff]  }
 0x820   : > { %v13147_v30 = vpop.f32.mrf.mxu0 }
 0x821   : > { %v5638_v58 = vadd.f32 %v5633_v27, %v5364_v46  ;;  %v14003_v46 = vld [vmem:[%s14809_s19 + $0xc0] sm:$0xff]   ;;  %v14005_v27 = vld [vmem:[%s14809_s19 + $0xb8] sm:$0xff]  }
 0x822   : > { %v5635_v3 = vpop.f32.mrf.mxu0  ;;  %v14006_v30 = vld [vmem:[%s14809_s19 + $0xf8] sm:$0xff]  }
 0x823   : > { %v14007_v3 = vld [vmem:[%s14809_s19 + $0xb0] sm:$0xff]  }
 0x824   : > { %v13148_v18 = vpop.f32.mrf.mxu0 }
 0x825   : > { %v14008_v18 = vld [vmem:[%s14809_s19 + $0xf0] sm:$0xff]  }
 0x83e   : > { %v12960_v19 = vpop.f32.mrf.mxu0 }
 0x840   : > { %v12961_v13 = vpop.f32.mrf.mxu0 }
 0x841   : > { %v12962_v50 = vadd.f32 %v12961_v13, %v12960_v19  ;;  %v14009_v13 = vld [vmem:[%s14809_s19 + $0xa8] sm:$0xff]  }
 0x842   : > { %v12963_v51 = vpop.f32.mrf.mxu0 }
 0x843   : > { %v5886_v49 = vadd.f32 %v12962_v50, %v5885_v63  ;;  %v14010_v50 = vld [vmem:[%s14809_s19 + $0x138] sm:$0xff]  }
 0x844   : > { %v12964_v35 = vpop.f32.mrf.mxu0 }
 0x845   : > { %v5891_v43 = vadd.f32 %v5886_v49, %v5638_v58  ;;  %v5925_v58 = vld [vmem:[#allocation2 + $0x20] sm:$0x3]  ;;  %v14012_v49 = vld [vmem:[%s14809_s19 + $0x130] sm:$0xff]  }
 0x846   : > { %v15935_v19 = vpack.c.bf16 %v5925_v58, %v15861_v59  ;;  %v14036_v58 = vld [vmem:[%s14809_s19 + $0x180] sm:$0xff]  }
 0x847   : > { %v5899_v54 = vmul.f32 %v12090_v60, %v5891_v43  ;;  %v14014_v43 = vld [vmem:[%s14809_s19 + $0x1c8] sm:$0xff]  }
 0x848   : > { %v6611_v51 = vshrl.u32 %v15935_v19, 16  ;;  %v6614_v52 = vshll.u32 %v15935_v19, 16 }
 0x849   : > { %v5907_v2 = vadd.f32 %v12091_v8, %v5899_v54 }
 0x84a   : > { %v6613_v59 = vrot.slane %v6611_v51, 2  ;;  %v6616_v60 = vrot.slane %v6614_v52, 3  ;;  %v6747_v51 = vrot.slane %v15935_v19, 3 }
 0x84b   : > { %v15878_v36 = vmax.f32 %v5907_v2, 0.0  ;;  %v14016_v2 = vld [vmem:[%s14809_s19 + $0x1c0] sm:$0xff]  }
 0x84c   : > { %v6617_v8 = vor.u32 %v6616_v60, %v6613_v59 }
 0x84d   : > { %v5916_v16 = vrot.slane %v15878_v36, 5 }
 0x84f   : > { %5917 = vrot.lane.b32.xlu1 %v5916_v16, %s16726_s26  ;;  %v14017_v16 = vld [vmem:[%s14809_s19 + $0x178] sm:$0xff]   ;;  %s16729_s26 = smov 8  }
 0x853   : > { %6881 = vrot.lane.b32.xlu1 %v15827_v9, %s14737_s18  ;;  %s14738_s18 = smov 104  }
 0x8c1   : > { %v5918_v28 = vpop.permute.xlu1 %5917 }
 0x8c2   : > { %5921 = vst.msk [vmem:[#allocation2] sm:$0x78] %vm5920_vm0, %v5918_v28  ;;  %v14028_v28 = vld [vmem:[%s14809_s19 + $0x190] sm:$0xff]   ;;  %vm8056_vm0 = vcmask 785984  }
 0x8c5   : > { %v6882_v9 = vpop.permute.xlu1 %6881 }
 0x8c6   : > { %6891 = vst.msk [vmem:[#allocation2 + $0x18] sm:$0xff] %vm6890_vm2, %v6882_v9  ;;  %v14029_v9 = vld [vmem:[%s14809_s19 + $0x148] sm:$0xff]   ;;  %vm8061_vm2 = vcmask 982784  }
 0x8c9   : > { %v5922_v37 = vld [vmem:[#allocation2] sm:$0xff] }
 0x8ca   : > { %v15893_v40 = vpack.c.bf16 %v5922_v37, %v5922_v37  ;;  %6871 = vst.msk [vmem:[#allocation2] sm:$0xff] %vm6870_vm5, %v14725_v0  ;;  %v15897_v41 = vpack.c.bf16 %v5924_v24, %v5922_v37  ;;  %v14026_v24 = vld [vmem:[%s14809_s19 + $0x198] sm:$0xff]  }
 0x8cb   : > { %6889 = vst.msk [vmem:[#allocation2] sm:$0xfc] %vm6888_vm4, %v6880_v21  ;;  %v14025_v21 = vld [vmem:[%s14809_s19 + $0x158] sm:$0xff]   ;;  %vm8079_vm4 = vcmask 1048512  }
 0x8cc   : > { %6182 = vmatmul.mubr.bf16.vlgmr.msra.gmra.mxu0 %v15893_v40  ;;  %v5972_v38 = vshll.u32 %v15893_v40, 16  ;;  %v5970_v63 = vshrl.u32 %v15893_v40, 16  ;;  %v6212_v22 = vrot.slane %v15893_v40, 1  ;;  %v14030_v37 = vld [vmem:[%s14809_s19 + $0x1d8] sm:$0xff]   ;;  %v6472_v52 = vrot.slane %v15893_v40, 2 }
 0x8cd   : > { %6411 = vmatpush1.bf16.msra.mxu0 %v13994_v39  ;;  %12195 = vmatprep.mubr.msk.bf16.mxu0 %vm5910_vm3, %v6345_v34  ;;  %v15903_v1 = vld [vmem:[#allocation2 + $0x18] sm:$0xff]  ;;  %v14024_v34 = vld [vmem:[%s14809_s19 + $0x1a0] sm:$0xff]   ;;  %v6603_v39 = vshrl.u32 %v15897_v41, 16 }
 0x8ce   : > { %6412 = vmatprep.subr.bf16.mxu0 %v14727_v14  ;;  %v5974_v47 = vrot.slane %v5972_v38, 1  ;;  %8099 = vst [vmem:[#allocation2 + $0x18] sm:$0x3] %v14725_v0  ;;  %v6340_v35 = vrot.slane %v5970_v63, 1  ;;  %v6341_v5 = vrot.slane %v5972_v38, 2  ;;  %v6606_v38 = vshll.u32 %v15897_v41, 16 }
 0x8cf   : > { %v14045_v40 = vld [vmem:[#allocation7 + $0x60] ss:$12 sps:$4 sm:$0xff]  }
 0x8d0   : > { %v5975_v11 = vor.u32 %v5974_v47, %v5970_v63  ;;  %v6342_v54 = vor.u32 %v6341_v5, %v6340_v35  ;;  %v6928_v63 = vld [vmem:[#allocation7 + $0xa8] sm:$0xff]  ;;  %v6930_v47 = vld [vmem:[#allocation7 + $0xb4] sm:$0x33]  ;;  %v14047_v35 = vld [vmem:[#allocation7 + $0x64] ss:$12 sps:$4 sm:$0xff]  }
 0x8d1   : > { %6413 = vmatpush1.bf16.msra.mxu0 %v13996_v55  ;;  %v14031_v55 = vld [vmem:[%s14809_s19 + $0x140] sm:$0xff]   ;;  %v14044_v5 = vld [vmem:[%s14809_s19 + $0x210] sm:$0xff]  }
 0x8d2   : > { %6080 = vmatmul.mubr.bf16.vlgmr.msra.gmra.mxu1 %v5975_v11  ;;  %6414 = vmatprep.subr.bf16.mxu0 %v14727_v14  ;;  %v6605_v11 = vrot.slane %v6603_v39, 2  ;;  %v14067_v39 = vld [vmem:[#allocation7 + $0x110] ss:$12 sps:$4 sm:$0x3f]  }
 0x8d3   : > { %6279 = vmatpush1.bf16.msra.mxu1 %v13997_v61  ;;  %12164 = vmatprep.mubr.msk.bf16.mxu1 %vm5910_vm3, %v6213_v62  ;;  %v14032_v61 = vld [vmem:[%s14809_s19 + $0x1d0] sm:$0xff]   ;;  %v6894_v62 = vld [vmem:[#allocation2] sm:$0xff] }
 0x8d4   : > { %6280 = vmatprep.subr.bf16.mxu1 %v14727_v14 }
 0x8d5   : > { %6415 = vmatpush1.bf16.msra.mxu0 %v13998_v12  ;;  %v6608_v12 = vrot.slane %v6606_v38, 3  ;;  %v6746_v38 = vrot.slane %v15897_v41, 3  ;;  %v14074_v41 = vld [vmem:[#allocation7 + $0x1c] ss:$12 sps:$4 sm:$0xff]  }
 0x8d6   : > { %6416 = vmatprep.subr.bf16.mxu0 %v14727_v14 }
 0x8d7   : > { %6281 = vmatpush1.bf16.msra.mxu1 %v13999_v32  ;;  %v14034_v32 = vld [vmem:[#allocation7 + $0xac] ss:$12 sps:$4 sm:$0x3f]  }
 0x8d8   : > { %6282 = vmatprep.subr.bf16.mxu1 %v14727_v14 }
 0x8d9   : > { %6417 = vmatpush1.bf16.msra.mxu0 %v14000_v23  ;;  %v12300_v23 = vcombine.low %v6928_v63, %v6930_v47  ;;  %v14070_v63 = vld [vmem:[#allocation7 + $0x34] ss:$12 sps:$4 sm:$0xff]   ;;  %v7351_v47 = vsel %vm1608_vm10, %v14067_v39, 0 }
 0x8da   : > { %6418 = vmatprep.subr.bf16.mxu0 %v14727_v14 }
 0x8db   : > { %6283 = vmatpush1.bf16.msra.mxu1 %v14001_v17  ;;  %v14033_v17 = vld [vmem:[%s14809_s19 + $0x188] sm:$0xff]  }
 0x8dc   : > { %6284 = vmatprep.subr.bf16.mxu1 %v14727_v14 }
 0x8dd   : > { %6419 = vmatpush1.bf16.msra.mxu0 %v14002_v25  ;;  %v15999_v25 = vpack.c.bf16 %v15903_v1, %v6894_v62  ;;  %v14071_v62 = vld [vmem:[#allocation7 + $0xf8] ss:$12 sps:$4 sm:$0xff]  }
 0x8de   : > { %6420 = vmatprep.subr.bf16.mxu0 %v14727_v14 }
 0x8df   : > { %6285 = vmatpush1.bf16.msra.mxu1 %v14003_v46  ;;  %v6609_v46 = vor.u32 %v6608_v12, %v6605_v11  ;;  %v6935_v1 = vshll.u32 %v15999_v25, 16  ;;  %v14072_v11 = vld [vmem:[#allocation7 + $0x18] ss:$12 sps:$4 sm:$0xff]   ;;  %v7649_v39 = vrot.slane %v15999_v25, 2 }
 0x8e0   : > { %6286 = vmatprep.subr.bf16.mxu1 %v14727_v14  ;;  %v14078_v12 = vld [vmem:[#allocation7 + $0x4] ss:$12 sps:$4 sm:$0xff]  }
 0x8e1   : > { %6421 = vmatpush1.bf16.msra.mxu0 %v14004_v31  ;;  %v7010_v31 = vsel %vm1608_vm10, %v12300_v23, 0  ;;  %v6937_v59 = vrot.slane %v6935_v1, 1  ;;  %v14076_v23 = vld [vmem:[#allocation7] ss:$12 sps:$4 sm:$0xff]  }
 0x8e2   : > { %6422 = vmatprep.subr.bf16.mxu0 %v14727_v14 }
 0x8e3   : > { %6287 = vmatpush1.bf16.msra.mxu1 %v14005_v27  ;;  %v14039_v27 = vld [vmem:[#allocation7 + $0x94] ss:$12 sps:$4 sm:$0xff]  }
 0x8e4   : > { %6288 = vmatprep.subr.bf16.mxu1 %v14727_v14 }
 0x8e5   : > { %6423 = vmatpush1.bf16.msra.mxu0 %v14006_v30  ;;  %v6896_v30 = vld [vmem:[#allocation2 + $0x30] sm:$0xf] }
 0x8e6   : > { %6424 = vmatprep.subr.bf16.mxu0 %v14727_v14 }
 0x8e7   : > { %6289 = vmatpush1.bf16.msra.mxu1 %v14007_v3  ;;  %v14037_v3 = vld [vmem:[#allocation7 + $0x90] ss:$12 sps:$4 sm:$0xff]  }
 0x8e8   : > { %6290 = vmatprep.subr.bf16.mxu1 %v14727_v14 }
 0x8e9   : > { %6425 = vmatpush1.bf16.msra.mxu0 %v14008_v18  ;;  %v16006_v18 = vpack.c.bf16 %v6896_v30, %v6896_v30  ;;  %v7277_v30 = vrot.slane %v15999_v25, 1 }
 0x8ea   : > { %6438 = vmatprep.subr.bf16.mxu0 %v14727_v14 }
 0x8eb   : > { %6291 = vmatpush1.bf16.msra.mxu1 %v14009_v13  ;;  %v14043_v13 = vld [vmem:[#allocation7 + $0x7c] ss:$12 sps:$4 sm:$0xff]   ;;  %v6940_v60 = vshll.u32 %v16006_v18, 16 }
 0x8ec   : > { %6292 = vmatprep.subr.bf16.mxu1 %v14727_v14 }
 0x8ed   : > { %6439 = vmatpush2.bf16.msra.mxu0 %v14010_v50  ;;  %v14040_v50 = vld [vmem:[%s14809_s19 + $0x218] sm:$0xff]  }
 0x8ee   : > { %6440 = vmatprep.subr.bf16.mxu0 %v14727_v14 }
 0x8ef   : > { %6293 = vmatpush1.bf16.msra.mxu1 %v14011_v53  ;;  %v14041_v53 = vld [vmem:[#allocation7 + $0x78] ss:$12 sps:$4 sm:$0xff]  }
 0x8f0   : > { %6306 = vmatprep.subr.bf16.mxu1 %v14727_v14 }
 0x8f1   : > { %6441 = vmatpush2.bf16.msra.mxu0 %v14012_v49  ;;  %v6933_v49 = vshrl.u32 %v15999_v25, 16 }
 0x8f2   : > { %6682 = vmatprep.subr.bf16.mxu0 %v14727_v14 }
 0x8f3   : > { %6307 = vmatpush2.bf16.msra.mxu1 %v14013_v6  ;;  %v6938_v19 = vor.u32 %v6937_v59, %v6933_v49  ;;  %v6942_v6 = vrot.slane %v6940_v60, 1  ;;  %v14087_v59 = vld [vmem:[#allocation7 + $0x158] ss:$12 sps:$4 sm:$0xff]  }
 0x8f4   : > { %6443 = vmatmul.mubr.bf16.vlgmr.msra.gmra.mxu0 %v6342_v54  ;;  %6308 = vmatprep.subr.bf16.mxu1 %v14727_v14 }
 0x8f5   : > { %6683 = vmatpush1.bf16.msra.mxu0 %v14014_v43  ;;  %12257 = vmatprep.mubr.msk.bf16.mxu0 %vm5910_vm3, %v6617_v8  ;;  %v14049_v43 = vld [vmem:[#allocation7 + $0xb0] ss:$12 sps:$4 sm:$0x3f]   ;;  %v14048_v8 = vld [vmem:[%s14809_s19 + $0x208] sm:$0xff]   ;;  %v6943_v54 = vsel %vm1154_vm6, %v6938_v19, %v6942_v6  ;;  %vm16137_vm6 = vcmp.lt.s32.totalorder %v2180_v57, 384 }
 0x8f6   : > { %6684 = vmatprep.subr.bf16.mxu0 %v14727_v14  ;;  %v14091_v19 = vld [vmem:[#allocation7 + $0x140] ss:$12 sps:$4 sm:$0xff]  }
 0x8f7   : > { %6309 = vmatpush2.bf16.msra.mxu1 %v14015_v56  ;;  %v7016_v56 = vsel %vm1608_vm10, %v14049_v43, 0  ;;  %v14092_v6 = vld [vmem:[#allocation7 + $0xc0] ss:$12 sps:$4 sm:$0xff]   ;;  %v7460_v43 = vrot.slane %v6933_v49, 1 }
 0x8f8   : > { %6538 = vmatprep.subr.bf16.mxu1 %v14727_v14 }
 0x8f9   : > { %6685 = vmatpush1.bf16.msra.mxu0 %v14016_v2  ;;  %v14050_v2 = vld [vmem:[%s14809_s19 + $0x200] sm:$0xff]  }
 0x8fa   : > { %6311 = vmatmul.mubr.bf16.vlgmr.msra.gmra.mxu1 %v6212_v22  ;;  %6686 = vmatprep.subr.bf16.mxu0 %v14727_v14  ;;  %v14053_v22 = vld [vmem:[#allocation7 + $0x80] ss:$12 sps:$4 sm:$0xff]  }
 0x8fb   : > { %6539 = vmatpush1.bf16.msra.mxu1 %v14017_v16  ;;  %12226 = vmatprep.mubr.msk.bf16.mxu1 %vm5910_vm3, %v6473_v20  ;;  %v14051_v16 = vld [vmem:[#allocation7 + $0x98] ss:$12 sps:$4 sm:$0xff]  }
 0x8fc   : > { %6540 = vmatprep.subr.bf16.mxu1 %v14727_v14  ;;  %v14052_v20 = vld [vmem:[%s14809_s19 + $0x1f8] sm:$0xff]  }
 0x8fd   : > { %6687 = vmatpush1.bf16.msra.mxu0 %v14018_v42  ;;  %v14054_v42 = vld [vmem:[%s14809_s19 + $0x1f0] sm:$0xff]  }
 0x8fe   : > { %6688 = vmatprep.subr.bf16.mxu0 %v14727_v14 }
 0x8ff   : > { %6541 = vmatpush1.bf16.msra.mxu1 %v14019_v29  ;;  %v14055_v29 = vld [vmem:[#allocation7 + $0x68] ss:$12 sps:$4 sm:$0xff]  }
 0x900   : > { %6542 = vmatprep.subr.bf16.mxu1 %v14727_v14 }
 0x901   : > { %6689 = vmatpush1.bf16.msra.mxu0 %v14020_v7  ;;  %v14057_v7 = vld [vmem:[#allocation7 + $0x50] ss:$12 sps:$4 sm:$0x3f]  }
 0x902   : > { %6690 = vmatprep.subr.bf16.mxu0 %v14727_v14 }
 0x903   : > { %6543 = vmatpush1.bf16.msra.mxu1 %v14021_v44  ;;  %v14056_v44 = vld [vmem:[%s14809_s19 + $0x1e8] sm:$0xff]  }
 0x904   : > { %6544 = vmatprep.subr.bf16.mxu1 %v14727_v14 }
 0x905   : > { %6691 = vmatpush1.bf16.msra.mxu0 %v14022_v26  ;;  %v7172_v26 = vsel %vm1608_vm10, %v14057_v7, 0 }
 0x906   : > { %6692 = vmatprep.subr.bf16.mxu0 %v14727_v14 }
 0x907   : > { %6545 = vmatpush1.bf16.msra.mxu1 %v14023_v33  ;;  %v14058_v33 = vld [vmem:[%s14809_s19 + $0x1e0] sm:$0xff]  }
 0x908   : > { %6546 = vmatprep.subr.bf16.mxu1 %v14727_v14 }
 0x909   : > { %6693 = vmatpush1.bf16.msra.mxu0 %v14024_v34  ;;  %v14059_v34 = vld [vmem:[#allocation7 + $0x38] ss:$12 sps:$4 sm:$0xff]  }
 0x90a   : > { %6694 = vmatprep.subr.bf16.mxu0 %v14727_v14 }
 0x90b   : > { %6547 = vmatpush1.bf16.msra.mxu1 %v14025_v21  ;;  %v14060_v21 = vld [vmem:[%s14809_s19 + $0x228] sm:$0xff]  }
 0x90c   : > { %6548 = vmatprep.subr.bf16.mxu1 %v14727_v14 }
 0x90d   : > { %6695 = vmatpush1.bf16.msra.mxu0 %v14026_v24  ;;  %v14061_v24 = vld [vmem:[#allocation7 + $0x20] ss:$12 sps:$4 sm:$0xff]  }
 0x90e   : > { %6696 = vmatprep.subr.bf16.mxu0 %v14727_v14 }
 0x90f   : > { %6549 = vmatpush1.bf16.msra.mxu1 %v14027_v45  ;;  %v14062_v45 = vld [vmem:[%s14809_s19 + $0x220] sm:$0xff]  }
 0x910   : > { %6550 = vmatprep.subr.bf16.mxu1 %v14727_v14 }
 0x911   : > { %6697 = vmatpush1.bf16.msra.mxu0 %v14028_v28  ;;  %v14064_v28 = vld [vmem:[#allocation7 + $0x4c] ss:$12 sps:$4 sm:$0x3f]  }
 0x912   : > { %6710 = vmatprep.subr.bf16.mxu0 %v14727_v14 }
 0x913   : > { %6551 = vmatpush1.bf16.msra.mxu1 %v14029_v9  ;;  %v14066_v9 = vld [vmem:[#allocation7 + $0x48] ss:$12 sps:$4 sm:$0x3f]  }
 0x914   : > { %6552 = vmatprep.subr.bf16.mxu1 %v14727_v14 }
 0x915   : > { %6711 = vmatpush2.bf16.msra.mxu0 %v14030_v37  ;;  %v14063_v37 = vld [vmem:[#allocation7 + $0x8] ss:$12 sps:$4 sm:$0xff]  }
 0x916   : > { %6712 = vmatprep.subr.bf16.mxu0 %v14727_v14 }
 0x917   : > { %6553 = vmatpush1.bf16.msra.mxu1 %v14031_v55  ;;  %v7166_v55 = vsel %vm1608_vm10, %v14066_v9, 0  ;;  %v14114_v9 = vld [vmem:[#allocation7 + $0x1c8] ss:$12 sps:$4 sm:$0x3f]  }
 0x918   : > { %6566 = vmatprep.subr.bf16.mxu1 %v14727_v14 }
 0x919   : > { %6713 = vmatpush2.bf16.msra.mxu0 %v14032_v61  ;;  %v14068_v61 = vld [vmem:[#allocation7 + $0x30] ss:$12 sps:$4 sm:$0xff]  }
 0x91a   : > { %12303 = vmatprep.subr.msk.bf16.mxu0 %vm1608_vm10, %v14034_v32  ;;  %v14075_v32 = vld [vmem:[#allocation7 + $0xe0] ss:$12 sps:$4 sm:$0xff]  }
 0x91b   : > { %6567 = vmatpush2.bf16.msra.mxu1 %v14033_v17  ;;  %v14080_v17 = vld [vmem:[#allocation7 + $0x10c] ss:$12 sps:$4 sm:$0x3f]  }
 0x91c   : > { %6715 = vmatmul.mubr.bf16.vlgmr.msra.gmra.mxu0 %v6609_v46  ;;  %6568 = vmatprep.subr.bf16.mxu1 %v14727_v14  ;;  %v14082_v46 = vld [vmem:[#allocation7 + $0x108] ss:$12 sps:$4 sm:$0x3f]  }
 0x91d   : > { %7027 = vmatpush1.bf16.msra.mxu0 %v7010_v31  ;;  %7050 = vmatprep.mubr.bf16.mxu0 %v14727_v14  ;;  %v14079_v31 = vld [vmem:[#allocation7 + $0xc8] ss:$12 sps:$4 sm:$0xff]  }
 0x91e   : > { %7028 = vmatprep.subr.bf16.mxu0 %v14039_v27  ;;  %v14083_v27 = vld [vmem:[#allocation7 + $0x170] ss:$12 sps:$4 sm:$0x3f]  }
 0x91f   : > { %6569 = vmatpush2.bf16.msra.mxu1 %v14036_v58  ;;  %v7278_v58 = vrot.slane %v16006_v18, 1 }
 0x920   : > { %6812 = vmatprep.subr.bf16.mxu1 %v14727_v14 }
 0x921   : > { %7029 = vmatpush1.bf16.msra.mxu0 %v14037_v3  ;;  %v7345_v3 = vsel %vm1608_vm10, %v14082_v46, 0 }
 0x922   : > { %6571 = vmatmul.mubr.bf16.vlgmr.msra.gmra.mxu1 %v6472_v52  ;;  %7030 = vmatprep.subr.bf16.mxu0 %v14043_v13  ;;  %v14086_v13 = vld [vmem:[#allocation7 + $0xf4] ss:$12 sps:$4 sm:$0xff]   ;;  %v14084_v52 = vld [vmem:[#allocation7 + $0xf0] ss:$12 sps:$4 sm:$0xff]  }
 0x923   : > { %6813 = vmatpush1.bf16.msra.mxu1 %v14040_v50  ;;  %12288 = vmatprep.mubr.msk.bf16.mxu1 %vm5910_vm3, %v6747_v51  ;;  %v7540_v50 = vsel %vm1608_vm10, %v14083_v27, 0  ;;  %v7279_v51 = vsel %vm1372_vm8, %v7277_v30, %v7278_v58  ;;  %vm8040_vm8 = vcmask 850944  }
 0x924   : > { %6814 = vmatprep.subr.bf16.mxu1 %v14727_v14 }
 0x925   : > { %7031 = vmatpush1.bf16.msra.mxu0 %v14041_v53  ;;  %v14090_v53 = vld [vmem:[#allocation7 + $0xdc] ss:$12 sps:$4 sm:$0xff]  }
 0x926   : > { %7032 = vmatprep.subr.bf16.mxu0 %v14047_v35  ;;  %v14088_v35 = vld [vmem:[#allocation7 + $0xd8] ss:$12 sps:$4 sm:$0xff]  }
 0x927   : > { %6815 = vmatpush1.bf16.msra.mxu1 %v14044_v5  ;;  %v7463_v5 = vshrl.u32 %v16006_v18, 16 }
 0x928   : > { %6816 = vmatprep.subr.bf16.mxu1 %v14727_v14 }
 0x929   : > { %7033 = vmatpush1.bf16.msra.mxu0 %v14045_v40  ;;  %v14094_v40 = vld [vmem:[#allocation7 + $0xc4] ss:$12 sps:$4 sm:$0xff]  }
 0x92a   : > { %13161 = vmatprep.subr.bf16.mxu0 %v14725_v0 }
 0x92b   : > { %6817 = vmatpush1.bf16.msra.mxu1 %v14048_v8  ;;  %v7461_v8 = vrot.slane %v6935_v1, 2  ;;  %v14102_v1 = vld [vmem:[#allocation7 + $0x154] ss:$12 sps:$4 sm:$0xff]  }
 0x92c   : > { %12304 = vmatmul.mubr.msk.bf16.vlgmr.msra.gmra.mxu0 %vm6870_vm5, %v6943_v54  ;;  %6818 = vmatprep.subr.bf16.mxu1 %v14727_v14 }
 0x92d   : > { %13162 = vmatpush3.bf16.msra.mxu0 %v7016_v56  ;;  %13169 = vmatprep.mubr.msk.bf16.mxu0 %vm14736_vm15, %v14725_v0  ;;  %v7466_v56 = vrot.slane %v6940_v60, 2 }
 0x92e   : > { %13163 = vmatprep.subr.bf16.mxu0 %v14725_v0 }
 0x92f   : > { %6819 = vmatpush1.bf16.msra.mxu1 %v14050_v2  ;;  %v14096_v2 = vld [vmem:[#allocation7 + $0x16c] ss:$12 sps:$4 sm:$0x3f]  }
 0x930   : > { %6820 = vmatprep.subr.bf16.mxu1 %v14727_v14 }
 0x931   : > { %13164 = vmatpush3.bf16.msra.mxu0 %v14051_v16  ;;  %v14098_v16 = vld [vmem:[#allocation7 + $0x168] ss:$12 sps:$4 sm:$0x3f]  }
 0x932   : > { %13165 = vmatprep.subr.bf16.mxu0 %v14725_v0  ;;  %v7534_v49 = vsel %vm1608_vm10, %v14098_v16, 0 }
 0x933   : > { %6821 = vmatpush1.bf16.msra.mxu1 %v14052_v20  ;;  %v14095_v20 = vld [vmem:[#allocation7 + $0x128] ss:$12 sps:$4 sm:$0xff]  }
 0x934   : > { %6822 = vmatprep.subr.bf16.mxu1 %v14727_v14 }
 0x935   : > { %13166 = vmatpush3.bf16.msra.mxu0 %v14053_v22  ;;  %v14099_v22 = vld [vmem:[#allocation7 + $0x1d0] ss:$12 sps:$4 sm:$0x3f]  }
 0x936   : > { %13167 = vmatprep.subr.bf16.mxu0 %v14725_v0  ;;  %v7723_v60 = vsel %vm1608_vm10, %v14099_v22, 0 }
 0x937   : > { %6823 = vmatpush1.bf16.msra.mxu1 %v14054_v42  ;;  %v7462_v42 = vor.u32 %v7461_v8, %v7460_v43 }
 0x938   : > { %6824 = vmatprep.subr.bf16.mxu1 %v14727_v14 }
 0x939   : > { %13168 = vmatpush3.bf16.msra.mxu0 %v14055_v29 }
 0x93a   : > { %13173 = vmatprep.subr.bf16.mxu0 %v14725_v0 }
 0x93b   : > { %6825 = vmatpush1.bf16.msra.mxu1 %v14056_v44  ;;  %v14100_v44 = vld [vmem:[#allocation7 + $0x150] ss:$12 sps:$4 sm:$0xff]  }
 0x93c   : > { %13170 = vmatmul.mubr.msk.bf16.vlgmr.msra.gmra.mxu0 %vm6870_vm5, %v6943_v54  ;;  %6826 = vmatprep.subr.bf16.mxu1 %v14727_v14  ;;  %v7465_v54 = vrot.slane %v7463_v5, 1 }
 0x93d   : > { %13174 = vmatpush3.bf16.msra.mxu0 %v7172_v26  ;;  %13181 = vmatprep.mubr.msk.bf16.mxu0 %vm14736_vm15, %v14725_v0  ;;  %v14106_v26 = vld [vmem:[#allocation7 + $0x13c] ss:$12 sps:$4 sm:$0xff]  }
 0x93e   : > { %13175 = vmatprep.subr.bf16.mxu0 %v14725_v0  ;;  %v7467_v29 = vor.u32 %v7466_v56, %v7465_v54 }
 0x93f   : > { %6827 = vmatpush1.bf16.msra.mxu1 %v14058_v33  ;;  %v14103_v33 = vld [vmem:[#allocation7 + $0x1b8] ss:$12 sps:$4 sm:$0xff]  }
 0x940   : > { %6840 = vmatprep.subr.bf16.mxu1 %v14727_v14  ;;  %v7468_v7 = vsel %vm1487_vm7, %v7462_v42, %v7467_v29  ;;  %vm8029_vm7 = vcmask 195584  }
 0x941   : > { %13176 = vmatpush3.bf16.msra.mxu0 %v14059_v34  ;;  %v14104_v34 = vld [vmem:[#allocation7 + $0x138] ss:$12 sps:$4 sm:$0xff]  }
 0x942   : > { %13177 = vmatprep.subr.bf16.mxu0 %v14725_v0 }
 0x943   : > { %6841 = vmatpush2.bf16.msra.mxu1 %v14060_v21  ;;  %v14110_v21 = vld [vmem:[#allocation7 + $0x124] ss:$12 sps:$4 sm:$0xff]  }
 0x944   : > { %6842 = vmatprep.subr.bf16.mxu1 %v14727_v14 }
 0x945   : > { %13178 = vmatpush3.bf16.msra.mxu0 %v14061_v24  ;;  %v14107_v24 = vld [vmem:[#allocation7 + $0x1a0] ss:$12 sps:$4 sm:$0xff]  }
 0x946   : > { %13179 = vmatprep.subr.bf16.mxu0 %v14725_v0 }
 0x947   : > { %6843 = vmatpush2.bf16.msra.mxu1 %v14062_v45  ;;  %v14108_v45 = vld [vmem:[#allocation7 + $0x120] ss:$12 sps:$4 sm:$0xff]  }
 0x948   : > { %12318 = vmatprep.subr.msk.bf16.mxu1 %vm1608_vm10, %v14064_v28  ;;  %v14112_v28 = vld [vmem:[#allocation7 + $0x1cc] ss:$12 sps:$4 sm:$0x3f]  }
 0x949   : > { %13180 = vmatpush3.bf16.msra.mxu0 %v14063_v37  ;;  %v14111_v37 = vld [vmem:[#allocation7 + $0x188] ss:$12 sps:$4 sm:$0xff]  }
 0x94a   : > { %6845 = vmatmul.mubr.bf16.vlgmr.msra.gmra.mxu1 %v6746_v38  ;;  %13185 = vmatprep.subr.bf16.mxu0 %v14725_v0  ;;  %v7650_v38 = vrot.slane %v16006_v18, 2  ;;  %v14118_v18 = vld [vmem:[#allocation7 + $0x198] ss:$12 sps:$4 sm:$0xff]  }
 0x94b   : > { %7183 = vmatpush1.bf16.msra.mxu1 %v7166_v55  ;;  %7206 = vmatprep.mubr.bf16.mxu1 %v14727_v14  ;;  %v7717_v55 = vsel %vm1608_vm10, %v14114_v9, 0 }
 0x94c   : > { %13182 = vmatmul.mubr.msk.bf16.vlgmr.msra.gmra.mxu0 %vm6870_vm5, %v15999_v25  ;;  %7184 = vmatprep.subr.bf16.mxu1 %v14070_v63  ;;  %v14117_v63 = vld [vmem:[#allocation7 + $0x1b4] ss:$12 sps:$4 sm:$0xff]  }
 0x94d   : > { %13186 = vmatpush3.bf16.msra.mxu0 %v7351_v47  ;;  %13193 = vmatprep.mubr.msk.bf16.mxu0 %vm14736_vm15, %v14725_v0  ;;  %v7651_v47 = vsel %vm1608_vm10, %v7649_v39, %v7650_v38 }
 0x94e   : > { %13187 = vmatprep.subr.bf16.mxu0 %v14725_v0 }
 0x94f   : > { %7185 = vmatpush1.bf16.msra.mxu1 %v14068_v61  ;;  %v14115_v61 = vld [vmem:[#allocation7 + $0x1b0] ss:$12 sps:$4 sm:$0xff]  }
 0x950   : > { %7186 = vmatprep.subr.bf16.mxu1 %v14074_v41  ;;  %v14123_v41 = vld [vmem:[#allocation7 + $0x184] ss:$12 sps:$4 sm:$0xff]  }
 0x951   : > { %13188 = vmatpush3.bf16.msra.mxu0 %v14071_v62  ;;  %v14121_v62 = vld [vmem:[#allocation7 + $0x180] ss:$12 sps:$4 sm:$0xff]  }
 0x952   : > { %13189 = vmatprep.subr.bf16.mxu0 %v14725_v0 }
 0x953   : > { %7187 = vmatpush1.bf16.msra.mxu1 %v14072_v11 }
 0x954   : > { %7188 = vmatprep.subr.bf16.mxu1 %v14078_v12 }
 0x955   : > { %13190 = vmatpush3.bf16.msra.mxu0 %v14075_v32 }
 0x956   : > { %13191 = vmatprep.subr.bf16.mxu0 %v14725_v0 }
 0x957   : > { %7189 = vmatpush1.bf16.msra.mxu1 %v14076_v23 }
 0x958   : > { %12333 = vmatprep.subr.msk.bf16.mxu1 %vm1608_vm10, %v14080_v17 }
 0x959   : > { %13192 = vmatpush3.bf16.msra.mxu0 %v14079_v31 }
 0x95a   : > { %12319 = vmatmul.mubr.msk.bf16.vlgmr.msra.gmra.mxu1 %vm6870_vm5, %v15999_v25  ;;  %13197 = vmatprep.subr.bf16.mxu0 %v14725_v0  ;;  %v14120_v25 = vld [vmem:[#allocation7 + $0x19c] ss:$12 sps:$4 sm:$0xff]  }
 0x95b   : > { %7362 = vmatpush1.bf16.msra.mxu1 %v7345_v3  ;;  %7385 = vmatprep.mubr.bf16.mxu1 %v14727_v14 }
 0x95c   : > { %13194 = vmatmul.mubr.msk.bf16.vlgmr.msra.gmra.mxu0 %vm6870_vm5, %v7279_v51  ;;  %7363 = vmatprep.subr.bf16.mxu1 %v14086_v13 }
 0x95d   : > { %13198 = vmatpush3.bf16.msra.mxu0 %v7540_v50  ;;  %13205 = vmatprep.mubr.msk.bf16.mxu0 %vm14736_vm15, %v14725_v0 }
 0x95e   : > { %13199 = vmatprep.subr.bf16.mxu0 %v14725_v0 }
 0x95f   : > { %7364 = vmatpush1.bf16.msra.mxu1 %v14084_v52 }
 0x960   : > { %7365 = vmatprep.subr.bf16.mxu1 %v14090_v53 }
 0x961   : > { %13200 = vmatpush3.bf16.msra.mxu0 %v14087_v59 }
 0x962   : > { %13201 = vmatprep.subr.bf16.mxu0 %v14725_v0 }
 0x963   : > { %7366 = vmatpush1.bf16.msra.mxu1 %v14088_v35 }
 0x964   : > { %7367 = vmatprep.subr.bf16.mxu1 %v14094_v40 }
 0x965   : > { %13202 = vmatpush3.bf16.msra.mxu0 %v14091_v19 }
 0x966   : > { %13203 = vmatprep.subr.bf16.mxu0 %v14725_v0 }
 0x967   : > { %7368 = vmatpush1.bf16.msra.mxu1 %v14092_v6 }
 0x968   : > { %12348 = vmatprep.subr.msk.bf16.mxu1 %vm1608_vm10, %v14096_v2 }
 0x969   : > { %13204 = vmatpush3.bf16.msra.mxu0 %v14095_v20 }
 0x96a   : > { %12334 = vmatmul.mubr.msk.bf16.vlgmr.msra.gmra.mxu1 %vm6870_vm5, %v7279_v51  ;;  %13209 = vmatprep.subr.bf16.mxu0 %v14725_v0 }
 0x96b   : > { %7551 = vmatpush1.bf16.msra.mxu1 %v7534_v49  ;;  %7574 = vmatprep.mubr.bf16.mxu1 %v14727_v14 }
 0x96c   : > { %13206 = vmatmul.mubr.msk.bf16.vlgmr.msra.gmra.mxu0 %vm6870_vm5, %v7468_v7  ;;  %7552 = vmatprep.subr.bf16.mxu1 %v14102_v1 }
 0x96d   : > { %13210 = vmatpush3.bf16.msra.mxu0 %v7723_v60  ;;  %13217 = vmatprep.mubr.msk.bf16.mxu0 %vm14736_vm15, %v14725_v0 }
 0x96e   : > { %13211 = vmatprep.subr.bf16.mxu0 %v14725_v0 }
 0x96f   : > { %7553 = vmatpush1.bf16.msra.mxu1 %v14100_v44 }
 0x970   : > { %7554 = vmatprep.subr.bf16.mxu1 %v14106_v26 }
 0x971   : > { %13212 = vmatpush3.bf16.msra.mxu0 %v14103_v33 }
 0x972   : > { %13213 = vmatprep.subr.bf16.mxu0 %v14725_v0 }
 0x973   : > { %7555 = vmatpush1.bf16.msra.mxu1 %v14104_v34 }
 0x974   : > { %7556 = vmatprep.subr.bf16.mxu1 %v14110_v21 }
 0x975   : > { %13214 = vmatpush3.bf16.msra.mxu0 %v14107_v24 }
 0x976   : > { %13215 = vmatprep.subr.bf16.mxu0 %v14725_v0 }
 0x977   : > { %7557 = vmatpush1.bf16.msra.mxu1 %v14108_v45 }
 0x978   : > { %12363 = vmatprep.subr.msk.bf16.mxu1 %vm1608_vm10, %v14112_v28  ;;  %vm8035_vm10 = vcmask 392384  }
 0x979   : > { %13216 = vmatpush3.bf16.msra.mxu0 %v14111_v37 }
 0x97a   : > { %12349 = vmatmul.mubr.msk.bf16.vlgmr.msra.gmra.mxu1 %vm6870_vm5, %v7468_v7  ;;  %8549 = vmatprep.subr.bf16.mxu0 %v14727_v14 }
 0x97b   : > { %7734 = vmatpush1.bf16.msra.mxu1 %v7717_v55  ;;  %7757 = vmatprep.mubr.bf16.mxu1 %v14727_v14 }
 0x97c   : > { %13218 = vmatmul.mubr.msk.bf16.vlgmr.msra.gmra.mxu0 %vm6870_vm5, %v7651_v47  ;;  %7735 = vmatprep.subr.bf16.mxu1 %v14117_v63 }
 0x97f   : > { %7736 = vmatpush1.bf16.msra.mxu1 %v14115_v61 }
 0x980   : > { %7737 = vmatprep.subr.bf16.mxu1 %v14120_v25 }
 0x983   : > { %7738 = vmatpush1.bf16.msra.mxu1 %v14118_v18 }
 0x984   : > { %7739 = vmatprep.subr.bf16.mxu1 %v14123_v41 }
 0x987   : > { %7740 = vmatpush1.bf16.msra.mxu1 %v14121_v62 }
 0x98a   : > { %12364 = vmatmul.mubr.msk.bf16.vlgmr.msra.gmra.mxu1 %vm6870_vm5, %v7651_v47  ;;  %vm8048_vm5 = vcmask 589184  }
 0x98c   : > { %v6183_v11 = vpop.f32.mrf.mxu0 }
 0x98e   : > { %v6185_v12 = vpop.f32.mrf.mxu0 }
 0x990   : > { %v6186_v32 = vpop.f32.mrf.mxu0 }
 0x992   : > { %v6081_v23 = vpop.f32.mrf.mxu1  ;;  %v6187_v17 = vpop.f32.mrf.mxu0 }
 0x993   : > { %v6184_v46 = vadd.f32 %v6183_v11, %v6081_v23 }
 0x994   : > { %v6083_v31 = vpop.f32.mrf.mxu1 }
 0x996   : > { %v6084_v27 = vpop.f32.mrf.mxu1 }
 0x998   : > { %v6085_v30 = vpop.f32.mrf.mxu1 }
 0x999   : > { %v16121_v30 = vsub.s32 2, %v15206_v4 }
 0x9b4   : > { %v6444_v58 = vpop.f32.mrf.mxu0 }
 0x9b6   : > { %v6446_v3 = vpop.f32.mrf.mxu0 }
 0x9b8   : > { %v6447_v13 = vpop.f32.mrf.mxu0 }
 0x9ba   : > { %v6312_v50 = vpop.f32.mrf.mxu1  ;;  %v6448_v51 = vpop.f32.mrf.mxu0 }
 0x9bb   : > { %v6318_v52 = vadd.f32 %v6312_v50, %v6184_v46 }
 0x9bc   : > { %v6314_v53 = vpop.f32.mrf.mxu1 }
 0x9bd   : > { %v6450_v59 = vadd.f32 %v6444_v58, %v6318_v52  ;;  %v7815_v58 = vld [vmem:[%s16788_s12] sm:$0x7]  ;;  %s14745_s12 = smov [#allocation11]  }
 0x9be   : > { %v6315_v35 = vpop.f32.mrf.mxu1  ;;  %s14475_s13 = sshll.u32 %s14745_s12, 4  ;;  %s14476_s13 = int_to_ptr.vmem [resolvable:$false] %s14475_s13 }
 0x9bf   : > { %s14477_s14 = scalar_lea.vmem %s14476_s13, 256 }
 0x9c0   : > { %v6316_v5 = vpop.f32.mrf.mxu1 }
 0x9c1   : > { %v7838_v5 = vld [vmem:[%s16789_s15] sm:$0x7]  ;;  %s16792_s15 = sld [smem:[#allocation36_spill]] }
 0x9c7   : > { %s16793_s16 = smov %s16792_s15 }
 0x9dc   : > { %v6716_v40 = vpop.f32.mrf.mxu0 }
 0x9de   : > { %v6718_v19 = vpop.f32.mrf.mxu0 }
 0x9e0   : > { %v6719_v6 = vpop.f32.mrf.mxu0 }
 0x9e2   : > { %v6572_v43 = vpop.f32.mrf.mxu1  ;;  %v6720_v8 = vpop.f32.mrf.mxu0 }
 0x9e3   : > { %v6578_v54 = vadd.f32 %v6572_v43, %v6450_v59  ;;  %v7828_v59 = vrot.slane %v7815_v58, %v16121_v30  ;;  %v7851_v8 = vrot.slane %v7838_v5, %v16121_v30 }
 0x9e4   : > { %v6574_v56 = vpop.f32.mrf.mxu1 }
 0x9e5   : > { %v6722_v2 = vadd.f32 %v6716_v40, %v6578_v54 }
 0x9e6   : > { %v6575_v16 = vpop.f32.mrf.mxu1 }
 0x9e8   : > { %v6576_v20 = vpop.f32.mrf.mxu1 }
 0x9ec   : > { %v7052_v22 = vpop.f32.mrf.mxu0 }
 0x9ee   : > { %v7054_v42 = vpop.f32.mrf.mxu0 }
 0x9f0   : > { %v7056_v29 = vpop.f32.mrf.mxu0 }
 0x9f2   : > { %v16116_v49 = vpop.f32.mrf.mxu0 }
 0x9fc   : > { %v7095_v1 = vpop.f32.mrf.mxu0 }
 0x9fe   : > { %v13171_v60 = vpop.f32.mrf.mxu0 }
 0xa00   : > { %v7098_v7 = vpop.f32.mrf.mxu0 }
 0xa02   : > { %v13172_v44 = vpop.f32.mrf.mxu0 }
 0xa0a   : > { %v6846_v26 = vpop.f32.mrf.mxu1 }
 0xa0b   : > { %v16118_v33 = vadd.f32 %v6846_v26, %v6722_v2 }
 0xa0c   : > { %v6848_v34 = vpop.f32.mrf.mxu1  ;;  %v7251_v21 = vpop.f32.mrf.mxu0 }
 0xa0d   : > { %v7252_v46 = vadd.f32 %v7251_v21, %v7095_v1  ;;  %v7820_v21 = vrot.slane %v7815_v58, %v15209_v48 }
 0xa0e   : > { %v6849_v24 = vpop.f32.mrf.mxu1  ;;  %v13183_v45 = vpop.f32.mrf.mxu0 }
 0xa10   : > { %v6850_v28 = vpop.f32.mrf.mxu1  ;;  %v7254_v9 = vpop.f32.mrf.mxu0 }
 0xa11   : > { %v7255_v3 = vadd.f32 %v7254_v9, %v7098_v7  ;;  %v7843_v9 = vrot.slane %v7838_v5, %v15209_v48 }
 0xa12   : > { %v13184_v37 = vpop.f32.mrf.mxu0 }
 0xa13   : > { %v7824_v37 = vrot.slane %v7815_v58, %v15213_v15 }
 0xa1a   : > { %v7208_v55 = vpop.f32.mrf.mxu1 }
 0xa1b   : > { %v7209_v2 = vadd.f32 %v7208_v55, %v7052_v22 }
 0xa1c   : > { %v7430_v39 = vpop.f32.mrf.mxu0  ;;  %v7210_v61 = vpop.f32.mrf.mxu1 }
 0xa1d   : > { %v7439_v31 = vadd.f32 %v7430_v39, %v7252_v46  ;;  %v7211_v1 = vadd.f32 %v7210_v61, %v7054_v42 }
 0xa1e   : > { %v13195_v38 = vpop.f32.mrf.mxu0  ;;  %v7212_v25 = vpop.f32.mrf.mxu1 }
 0xa1f   : > { %v7213_v44 = vadd.f32 %v7212_v25, %v7056_v29 }
 0xa20   : > { %v7433_v63 = vpop.f32.mrf.mxu0  ;;  %v7214_v18 = vpop.f32.mrf.mxu1 }
 0xa21   : > { %v7442_v52 = vadd.f32 %v7433_v63, %v7255_v3  ;;  %v7215_v39 = vadd.f32 %v7214_v18, %v16116_v49  ;;  %v7847_v63 = vrot.slane %v7838_v5, %v15213_v15 }
 0xa22   : > { %v13196_v47 = vpop.f32.mrf.mxu0 }
 0xa2a   : > { %v7387_v62 = vpop.f32.mrf.mxu1 }
 0xa2b   : > { %v7437_v60 = vadd.f32 %v7387_v62, %v7209_v2 }
 0xa2c   : > { %v7619_v41 = vpop.f32.mrf.mxu0  ;;  %v7389_v32 = vpop.f32.mrf.mxu1 }
 0xa2d   : > { %v7628_v13 = vadd.f32 %v7619_v41, %v7439_v31  ;;  %v7438_v26 = vadd.f32 %v7389_v32, %v7211_v1 }
 0xa2e   : > { %v13207_v11 = vpop.f32.mrf.mxu0  ;;  %v7391_v17 = vpop.f32.mrf.mxu1 }
 0xa2f   : > { %v7440_v22 = vadd.f32 %v7391_v17, %v7213_v44 }
 0xa30   : > { %v7622_v12 = vpop.f32.mrf.mxu0  ;;  %v7393_v27 = vpop.f32.mrf.mxu1 }
 0xa31   : > { %v7631_v40 = vadd.f32 %v7622_v12, %v7442_v52  ;;  %v7441_v29 = vadd.f32 %v7393_v27, %v7215_v39 }
 0xa32   : > { %v13208_v23 = vpop.f32.mrf.mxu0 }
 0xa3a   : > { %v7576_v50 = vpop.f32.mrf.mxu1 }
 0xa3b   : > { %v7626_v34 = vadd.f32 %v7576_v50, %v7437_v60 }
 0xa3c   : > { %v7802_v51 = vpop.f32.mrf.mxu0  ;;  %v7578_v19 = vpop.f32.mrf.mxu1 }
 0xa3d   : > { %v7811_v53 = vadd.f32 %v7802_v51, %v7628_v13  ;;  %v7627_v38 = vadd.f32 %v7578_v19, %v7438_v26 }
 0xa3e   : > { %v13219_v35 = vpop.f32.mrf.mxu0  ;;  %v7580_v56 = vpop.f32.mrf.mxu1 }
 0xa3f   : > { %v7834_v43 = vmul.f32 %v7828_v59, %v7811_v53  ;;  %v7629_v47 = vadd.f32 %v7580_v56, %v7440_v22 }
 0xa40   : > { %v7805_v6 = vpop.f32.mrf.mxu0  ;;  %v7582_v7 = vpop.f32.mrf.mxu1 }
 0xa41   : > { %v7814_v54 = vadd.f32 %v7805_v6, %v7631_v40  ;;  %v7857_v16 = vadd.f32 %v7851_v8, %v7834_v43  ;;  %v7630_v12 = vadd.f32 %v7582_v7, %v7441_v29 }
 0xa42   : > { %v13220_v4 = vpop.f32.mrf.mxu0 }
 0xa43   : > { %v7837_v20 = vmul.f32 %v7828_v59, %v7814_v54  ;;  %v7863_v24 = vmax.f32 %v7857_v16, 0.0 }
 0xa45   : > { %v7860_v45 = vadd.f32 %v7851_v8, %v7837_v20  ;;  %v7872_v41 = vrot.slane %v7863_v24, 1 }
 0xa47   : > { %v7866_v62 = vmax.f32 %v7860_v45, 0.0  ;;  %v7878_v3 = vmax.f32 %v7863_v24, %v7872_v41 }
 0xa49   : > { %v7950_v13 = vrot.slane %v7866_v62, 1  ;;  %v7915_v5 = vcombine.high %v7878_v3, %v7878_v3  ;;  %v7896_v2 = vrot.slane %v7878_v3, %v15221_v10  ;;  %v14124_v3 = vld [vmem:[%s16792_s15 + $0x210] ss:$12 sps:$4 sm:$0xff]  }
 0xa4a   : > { %v7759_v28 = vpop.f32.mrf.mxu1 }
 0xa4b   : > { %v7809_v55 = vadd.f32 %v7759_v28, %v7626_v34  ;;  %v7956_v40 = vmax.f32 %v7866_v62, %v7950_v13  ;;  %v7929_v16 = vrot.slane %v7915_v5, %v15221_v10  ;;  %v14126_v13 = vld [vmem:[%s16793_s16 + $0x214] ss:$12 sps:$4 sm:$0xff]   ;;  %v14138_v5 = vld [vmem:[%s16793_s16 + $0x1cc] ss:$12 sps:$4 sm:$0xff]  }
 0xa4c   : > { %v7761_v42 = vpop.f32.mrf.mxu1  ;;  %8508 = vmatprep.subr.bf16.mxu1 %v14126_v13  ;;  %v14180_v13 = vld [vmem:[%s16793_s16 + $0x228] ss:$12 sps:$4 sm:$0xff]  }
 0xa4d   : > { %v7832_v61 = vmul.f32 %v7820_v21, %v7809_v55  ;;  %v7810_v25 = vadd.f32 %v7761_v42, %v7627_v38  ;;  %v7991_v20 = vcombine.high %v7956_v40, %v7956_v40  ;;  %v7974_v28 = vrot.slane %v7956_v40, %v15221_v10  ;;  %8509 = vmatpush1.bf16.msra.mxu1 %v14124_v3  ;;  %v14139_v40 = vld [vmem:[%s16793_s16 + $0x1d0] ss:$12 sps:$4 sm:$0xff]   ;;  %v14182_v3 = vld [vmem:[%s16793_s16 + $0x22c] ss:$12 sps:$4 sm:$0xff]  }
 0xa4e   : > { %v7763_v11 = vpop.f32.mrf.mxu1 }
 0xa4f   : > { %v7855_v32 = vadd.f32 %v7843_v9, %v7832_v61  ;;  %v7833_v23 = vmul.f32 %v7824_v37, %v7810_v25  ;;  %v7812_v46 = vadd.f32 %v7763_v11, %v7629_v47 }
 0xa50   : > { %v7765_v31 = vpop.f32.mrf.mxu1 }
 0xa51   : > { %v7861_v58 = vmax.f32 %v7855_v32, 0.0  ;;  %v7856_v49 = vadd.f32 %v7847_v63, %v7833_v23  ;;  %v7835_v18 = vmul.f32 %v7820_v21, %v7812_v46  ;;  %v7813_v17 = vadd.f32 %v7765_v31, %v7630_v12 }
 0xa53   : > { %v7870_v50 = vrot.slane %v7861_v58, 1  ;;  %v7862_v51 = vmax.f32 %v7856_v49, 0.0  ;;  %v7858_v27 = vadd.f32 %v7843_v9, %v7835_v18  ;;  %v7836_v52 = vmul.f32 %v7824_v37, %v7813_v17 }
 0xa54   : > { %v8005_v9 = vrot.slane %v7991_v20, %v15221_v10  ;;  %v14148_v20 = vld [vmem:[%s16793_s16 + $0x180] ss:$12 sps:$4 sm:$0xff]  }
 0xa55   : > { %v7871_v53 = vrot.slane %v7862_v51, 1  ;;  %v7864_v59 = vmax.f32 %v7858_v27, 0.0  ;;  %v7859_v35 = vadd.f32 %v7847_v63, %v7836_v52  ;;  %v7876_v19 = vmax.f32 %v7861_v58, %v7870_v50  ;;  %v14127_v50 = vld [vmem:[%s16793_s16 + $0x218] ss:$12 sps:$4 sm:$0xff]   ;;  %v14131_v27 = vld [vmem:[%s16793_s16 + $0x200] ss:$12 sps:$4 sm:$0xff]  }
 0xa56   : > { %8550 = vmatpush1.bf16.msra.mxu0 %v14127_v50  ;;  %v14128_v52 = vld [vmem:[%s16793_s16 + $0x1f8] ss:$12 sps:$4 sm:$0xff]   ;;  %v14183_v50 = vld [vmem:[%s16793_s16 + $0x230] ss:$12 sps:$4 sm:$0xff]  }
 0xa57   : > { %v7877_v6 = vmax.f32 %v7862_v51, %v7871_v53  ;;  %v7948_v43 = vrot.slane %v7864_v59, 1  ;;  %v7865_v8 = vmax.f32 %v7859_v35, 0.0  ;;  %v14130_v51 = vld [vmem:[%s16793_s16 + $0x1fc] ss:$12 sps:$4 sm:$0xff]   ;;  %8551 = vmatprep.subr.bf16.mxu0 %v14727_v14  ;;  %v14134_v53 = vld [vmem:[%s16793_s16 + $0x1e4] ss:$12 sps:$4 sm:$0xff]  }
 0xa58   : > { %8510 = vmatprep.subr.bf16.mxu1 %v14130_v51  ;;  %v14132_v35 = vld [vmem:[%s16793_s16 + $0x1e0] ss:$12 sps:$4 sm:$0xff]  }
 0xa59   : > { %v7882_v54 = vcombine.low %v7876_v19, %v7877_v6  ;;  %v7914_v4 = vcombine.high %v7876_v19, %v7877_v6  ;;  %v7949_v56 = vrot.slane %v7865_v8, 1  ;;  %v7954_v7 = vmax.f32 %v7864_v59, %v7948_v43  ;;  %v14135_v59 = vld [vmem:[%s16793_s16 + $0x1e8] ss:$12 sps:$4 sm:$0xff]   ;;  %8511 = vmatpush1.bf16.msra.mxu1 %v14128_v52  ;;  %v14143_v43 = vld [vmem:[%s16793_s16 + $0x1b8] ss:$12 sps:$4 sm:$0xff]  }
 0xa5a   : > { %8552 = vmatpush1.bf16.msra.mxu0 %v14131_v27  ;;  %8512 = vmatprep.subr.bf16.mxu1 %v14134_v53  ;;  %v14136_v19 = vld [vmem:[%s16793_s16 + $0x1c8] ss:$12 sps:$4 sm:$0xff]   ;;  %v14186_v51 = vld [vmem:[%s16793_s16 + $0xac] ss:$12 sps:$4 sm:$0xff]  }
 0xa5b   : > { %v7889_v1 = vrot.slane %v7882_v54, %v15221_v10  ;;  %v7922_v60 = vrot.slane %v7914_v4, %v15221_v10  ;;  %v7955_v44 = vmax.f32 %v7865_v8, %v7949_v56  ;;  %8553 = vmatprep.subr.bf16.mxu0 %v14727_v14  ;;  %v14142_v6 = vld [vmem:[%s16793_s16 + $0x1b4] ss:$12 sps:$4 sm:$0xff]   ;;  %v14140_v8 = vld [vmem:[%s16793_s16 + $0x1b0] ss:$12 sps:$4 sm:$0xff]   ;;  %v14144_v56 = vld [vmem:[%s16793_s16 + $0x198] ss:$12 sps:$4 sm:$0xff]  }
 0xa5c   : > { %v14146_v54 = vld [vmem:[%s16793_s16 + $0x19c] ss:$12 sps:$4 sm:$0xff]   ;;  %v14147_v4 = vld [vmem:[%s16793_s16 + $0x1a0] ss:$12 sps:$4 sm:$0xff]  }
 0xa5d   : > { %v7897_v26 = vcombine.low %v7889_v1, %v7896_v2  ;;  %v7930_v34 = vcombine.low %v7922_v60, %v7929_v16  ;;  %v7960_v21 = vcombine.low %v7954_v7, %v7955_v44  ;;  %v7990_v24 = vcombine.high %v7954_v7, %v7955_v44  ;;  %8513 = vmatpush1.bf16.msra.mxu1 %v14132_v35  ;;  %v14150_v2 = vld [vmem:[%s16793_s16 + $0x184] ss:$12 sps:$4 sm:$0xff]   ;;  %v14151_v16 = vld [vmem:[%s16793_s16 + $0x188] ss:$12 sps:$4 sm:$0xff]   ;;  %v14154_v1 = vld [vmem:[%s16793_s16 + $0x16c] ss:$12 sps:$4 sm:$0xff]  }
 0xa5e   : > { %8554 = vmatpush1.bf16.msra.mxu0 %v14135_v59  ;;  %8514 = vmatprep.subr.bf16.mxu1 %v14138_v5  ;;  %v14155_v60 = vld [vmem:[%s16793_s16 + $0x170] ss:$12 sps:$4 sm:$0xff]   ;;  %v14152_v7 = vld [vmem:[%s16793_s16 + $0x168] ss:$12 sps:$4 sm:$0xff]  }
 0xa5f   : > { %v7904_v37 = vrot.slane %v7897_v26, %v15221_v10  ;;  %v7937_v39 = vrot.slane %v7930_v34, %v15221_v10  ;;  %v7967_v22 = vrot.slane %v7960_v21, %v15221_v10  ;;  %v7998_v38 = vrot.slane %v7990_v24, %v15221_v10  ;;  %8555 = vmatprep.subr.bf16.mxu0 %v14727_v14  ;;  %v14158_v44 = vld [vmem:[%s16793_s16 + $0x2bc] ss:$12 sps:$4 sm:$0xff]   ;;  %v14159_v26 = vld [vmem:[%s16793_s16 + $0x2c0] ss:$12 sps:$4 sm:$0xff]   ;;  %v14156_v34 = vld [vmem:[%s16793_s16 + $0x2b8] ss:$12 sps:$4 sm:$0xff]  }
 0xa60   : > { %v14162_v21 = vld [vmem:[%s16793_s16 + $0x2a4] ss:$12 sps:$4 sm:$0xff]   ;;  %v14163_v24 = vld [vmem:[%s16793_s16 + $0x2a8] ss:$12 sps:$4 sm:$0xff]  }
 0xa61   : > { %v7910_v55 = vcombine.high %v7904_v37, %v7904_v37  ;;  %v7941_v42 = vcombine.high %v7937_v39, %v7937_v39  ;;  %7908 = vst.msk [vmem:[#allocation2] ss:$8 sm:$0x7] %vm16137_vm6, %v7904_v37  ;;  %7939 = vst.msk [vmem:[#allocation2 + $0x2] ss:$8 sm:$0x7] %vm16137_vm6, %v7937_v39  ;;  %v7975_v57 = vcombine.low %v7967_v22, %v7974_v28  ;;  %8515 = vmatpush1.bf16.msra.mxu1 %v14136_v19 }
 0xa62   : > { %v8006_v63 = vcombine.low %v7998_v38, %v8005_v9  ;;  %8556 = vmatpush1.bf16.msra.mxu0 %v14139_v40  ;;  %8516 = vmatprep.subr.bf16.mxu1 %v14142_v6  ;;  %v14160_v28 = vld [vmem:[%s16793_s16 + $0x2a0] ss:$12 sps:$4 sm:$0xff]   ;;  %v14167_v37 = vld [vmem:[%s16793_s16 + $0x290] ss:$12 sps:$4 sm:$0xff]   ;;  %v14164_v39 = vld [vmem:[%s16793_s16 + $0x288] ss:$12 sps:$4 sm:$0xff]  }
 0xa63   : > { %7912 = vst.msk [vmem:[#allocation2 + $0x1] ss:$8 sm:$0x7] %vm16137_vm6, %v7910_v55  ;;  %7943 = vst.msk [vmem:[#allocation2 + $0x3] ss:$8 sm:$0x7] %vm16137_vm6, %v7941_v42  ;;  %v7982_v29 = vrot.slane %v7975_v57, %v15221_v10  ;;  %8557 = vmatprep.subr.bf16.mxu0 %v14727_v14 }
 0xa64   : > { %v8013_v47 = vrot.slane %v8006_v63, %v15221_v10  ;;  %v14166_v9 = vld [vmem:[%s16793_s16 + $0x28c] ss:$12 sps:$4 sm:$0xff]  }
 0xa65   : > { %v7986_v61 = vcombine.high %v7982_v29, %v7982_v29  ;;  %7984 = vst.msk [vmem:[#allocation2 + $0x4] ss:$8 sm:$0x7] %vm16137_vm6, %v7982_v29  ;;  %8517 = vmatpush1.bf16.msra.mxu1 %v14140_v8 }
 0xa66   : > { %v8017_v25 = vcombine.high %v8013_v47, %v8013_v47  ;;  %8015 = vst.msk [vmem:[#allocation2 + $0x6] ss:$8 sm:$0x7] %vm16137_vm6, %v8013_v47  ;;  %8558 = vmatpush1.bf16.msra.mxu0 %v14143_v43  ;;  %8518 = vmatprep.subr.bf16.mxu1 %v14146_v54 }
 0xa67   : > { %7988 = vst.msk [vmem:[#allocation2 + $0x5] ss:$8 sm:$0x7] %vm16137_vm6, %v7986_v61  ;;  %8559 = vmatprep.subr.bf16.mxu0 %v14727_v14 }
 0xa68   : > { %8019 = vst.msk [vmem:[#allocation2 + $0x7] ss:$8 sm:$0x7] %vm16137_vm6, %v8017_v25  ;;  %v14170_v25 = vld [vmem:[%s16793_s16 + $0x274] ss:$12 sps:$4 sm:$0xff]  }
 0xa69   : > { %8519 = vmatpush1.bf16.msra.mxu1 %v14144_v56 }
 0xa6a   : > { %8560 = vmatpush1.bf16.msra.mxu0 %v14147_v4  ;;  %8520 = vmatprep.subr.bf16.mxu1 %v14150_v2 }
 0xa6b   : > { %8561 = vmatprep.subr.bf16.mxu0 %v14727_v14 }
 0xa6d   : > { %8521 = vmatpush1.bf16.msra.mxu1 %v14148_v20  ;;  %v14184_v20 = vld [vmem:[%s16793_s16 + $0xa8] ss:$12 sps:$4 sm:$0xff]  }
 0xa6e   : > { %8562 = vmatpush1.bf16.msra.mxu0 %v14151_v16  ;;  %8522 = vmatprep.subr.bf16.mxu1 %v14154_v1  ;;  %v14187_v1 = vld [vmem:[%s16793_s16 + $0xb0] ss:$12 sps:$4 sm:$0xff]  }
 0xa6f   : > { %v8022_v41 = vld [vmem:[#allocation2 + $0x8] sm:$0xff]  ;;  %v8021_v62 = vld [vmem:[#allocation2] sm:$0xff]  ;;  %v8023_v11 = vld [vmem:[#allocation2 + $0x10] sm:$0xff]  ;;  %8563 = vmatprep.subr.bf16.mxu0 %v14727_v14 }
 0xa70   : > { %8038 = vrot.lane.b32.xlu0 %v8022_v41, %s14738_s18  ;;  %8025 = vrot.lane.b32.xlu1 %v8021_v62, %s14738_s18  ;;  %8096 = vst [vmem:[#allocation2] sm:$0xff] %v14725_v0 }
 0xa71   : > { %8523 = vmatpush1.bf16.msra.mxu1 %v14152_v7  ;;  %v14190_v7 = vld [vmem:[%s16793_s16 + $0x94] ss:$12 sps:$4 sm:$0xff]  }
 0xa72   : > { %8564 = vmatpush1.bf16.msra.mxu0 %v14155_v60  ;;  %8526 = vmatprep.subr.bf16.mxu1 %v14158_v44 }
 0xa73   : > { %8567 = vmatprep.subr.bf16.mxu0 %v14727_v14 }
 0xa74   : > { %8064 = vrot.lane.b32.xlu1 %v8023_v11, %s14738_s18 }
 0xa75   : > { %8527 = vmatpush2.bf16.msra.mxu1 %v14156_v34  ;;  %v14191_v34 = vld [vmem:[%s16793_s16 + $0x98] ss:$12 sps:$4 sm:$0xff]  }
 0xa76   : > { %8568 = vmatpush2.bf16.msra.mxu0 %v14159_v26  ;;  %8528 = vmatprep.subr.bf16.mxu1 %v14162_v21  ;;  %v14188_v26 = vld [vmem:[%s16793_s16 + $0x90] ss:$12 sps:$4 sm:$0xff]  }
 0xa77   : > { %8569 = vmatprep.subr.bf16.mxu0 %v14727_v14  ;;  %v14194_v21 = vld [vmem:[%s16793_s16 + $0x7c] ss:$12 sps:$4 sm:$0xff]  }
 0xa79   : > { %8529 = vmatpush2.bf16.msra.mxu1 %v14160_v28  ;;  %v14195_v28 = vld [vmem:[%s16793_s16 + $0x80] ss:$12 sps:$4 sm:$0xff]  }
 0xa7a   : > { %8570 = vmatpush2.bf16.msra.mxu0 %v14163_v24  ;;  %8530 = vmatprep.subr.bf16.mxu1 %v14166_v9  ;;  %v14192_v24 = vld [vmem:[%s16793_s16 + $0x78] ss:$12 sps:$4 sm:$0xff]  }
 0xa7b   : > { %8571 = vmatprep.subr.bf16.mxu0 %v14727_v14  ;;  %v14198_v9 = vld [vmem:[%s16793_s16 + $0x64] ss:$12 sps:$4 sm:$0xff]  }
 0xa7d   : > { %8531 = vmatpush2.bf16.msra.mxu1 %v14164_v39  ;;  %v14199_v39 = vld [vmem:[%s16793_s16 + $0x68] ss:$12 sps:$4 sm:$0xff]  }
 0xa7e   : > { %8572 = vmatpush2.bf16.msra.mxu0 %v14167_v37  ;;  %8532 = vmatprep.subr.bf16.mxu1 %v14170_v25  ;;  %v14196_v37 = vld [vmem:[%s16793_s16 + $0x60] ss:$12 sps:$4 sm:$0xff]   ;;  %v14214_v25 = vld [vmem:[%s16793_s16 + $0x4] ss:$12 sps:$4 sm:$0xff]  }
 0xa7f   : > { %8573 = vmatprep.subr.bf16.mxu0 %v14727_v14 }
 0xae2   : > { %v8026_v12 = vpop.permute.xlu1 %8025  ;;  %v8039_v58 = vpop.permute.xlu0 %8038 }
 0xae3   : > { %v8028_v32 = vmax.f32 %v8021_v62, %v8026_v12  ;;  %v8051_v49 = vmax.f32 %v8022_v41, %v8039_v58  ;;  %v8041_v18 = vsel %vm8040_vm8, %v8026_v12, %v8039_v58  ;;  %vm8090_vm8 = vcmask 523584   ;;  %v14172_v12 = vld [vmem:[%s16793_s16 + $0x258] ss:$12 sps:$4 sm:$0xff]  }
 0xae4   : > { %v8043_v17 = vmax.f32 %v8021_v62, %v8041_v18  ;;  %v14171_v62 = vld [vmem:[%s16793_s16 + $0x278] ss:$12 sps:$4 sm:$0xff]   ;;  %v14179_v18 = vld [vmem:[%s16793_s16 + $0x248] ss:$12 sps:$4 sm:$0xff]  }
 0xae5   : > { %8032 = vrot.lane.b32.xlu0 %v8028_v32, %s14738_s18  ;;  %8030 = vst.msk [vmem:[#allocation3] sm:$0xff] %vm8029_vm7, %v8028_v32  ;;  %s14740_s18 = smov 56   ;;  %8574 = vmatpush2.bf16.msra.mxu0 %v14171_v62  ;;  %v14175_v32 = vld [vmem:[%s16793_s16 + $0x260] ss:$12 sps:$4 sm:$0xff]   ;;  %v14215_v62 = vld [vmem:[%s16793_s16 + $0x8] ss:$12 sps:$4 sm:$0xff]  }
 0xae6   : > { %v8065_v23 = vpop.permute.xlu1 %8064  ;;  %8575 = vmatprep.subr.bf16.mxu0 %v14727_v14 }
 0xae7   : > { %v8067_v46 = vmax.f32 %v8022_v41, %v8065_v23  ;;  %v8068_v31 = vmax.f32 %v8023_v11, %v8065_v23  ;;  %v14168_v41 = vld [vmem:[%s16793_s16 + $0x270] ss:$12 sps:$4 sm:$0xff]  }
 0xae8   : > { %8533 = vmatpush2.bf16.msra.mxu1 %v14168_v41  ;;  %v14174_v11 = vld [vmem:[%s16793_s16 + $0x25c] ss:$12 sps:$4 sm:$0xff]   ;;  %v14212_v41 = vld [vmem:[%s16793_s16] ss:$12 sps:$4 sm:$0xff]  }
 0xae9   : > { %8073 = vrot.lane.b32.xlu1 %v8068_v31, %s16729_s26  ;;  %8071 = vrot.lane.b32.xlu0 %v8067_v46, %s16729_s26  ;;  %s14741_s26 = smov 88   ;;  %v14178_v46 = vld [vmem:[%s16793_s16 + $0x244] ss:$12 sps:$4 sm:$0xff]  }
 0xaea   : > { %8534 = vmatprep.subr.bf16.mxu1 %v14174_v11  ;;  %8576 = vmatpush2.bf16.msra.mxu0 %v14175_v32  ;;  %v14218_v11 = vld [vmem:[%s16793_s16 + $0x154] ss:$12 sps:$4 sm:$0xff]   ;;  %v14219_v32 = vld [vmem:[%s16793_s16 + $0x158] ss:$12 sps:$4 sm:$0xff]  }
 0xaeb   : > { %8577 = vmatprep.subr.bf16.mxu0 %v14727_v14 }
 0xaec   : > { %8535 = vmatpush2.bf16.msra.mxu1 %v14172_v12  ;;  %v14216_v12 = vld [vmem:[%s16793_s16 + $0x150] ss:$12 sps:$4 sm:$0xff]  }
 0xaed   : > { %8058 = vrot.lane.b32.xlu1 %v8051_v49, %s16732_s23  ;;  %8053 = vrot.lane.b32.xlu0 %v8051_v49, %s14740_s18  ;;  %v14176_v49 = vld [vmem:[%s16793_s16 + $0x240] ss:$12 sps:$4 sm:$0xff]   ;;  %s16730_s18 = smov 24   ;;  %s13259_s23 = smul.u32 24, %s15311_s11 }
 0xaee   : > { %8536 = vmatprep.subr.bf16.mxu1 %v14178_v46  ;;  %8578 = vmatpush2.bf16.msra.mxu0 %v14179_v18  ;;  %v14220_v46 = vld [vmem:[%s16793_s16 + $0x138] ss:$12 sps:$4 sm:$0xff]   ;;  %v14227_v18 = vld [vmem:[%s16793_s16 + $0x128] ss:$12 sps:$4 sm:$0xff]  }
 0xaef   : > { %8579 = vmatprep.subr.bf16.mxu0 %v14727_v14 }
 0xaf0   : > { %8537 = vmatpush2.bf16.msra.mxu1 %v14176_v49  ;;  %v14224_v49 = vld [vmem:[%s16793_s16 + $0x120] ss:$12 sps:$4 sm:$0xff]  }
 0xaf1   : > { %8045 = vrot.lane.b32.xlu1 %v8043_v17, %s14732_s1  ;;  %8082 = vrot.lane.b32.xlu0 %v8068_v31, %s16794_s7 }
 0xaf2   : > { %8538 = vmatprep.subr.bf16.mxu1 %v14182_v3  ;;  %8580 = vmatpush2.bf16.msra.mxu0 %v14183_v50  ;;  %v14228_v3 = vld [vmem:[%s16793_s16 + $0x108] ss:$12 sps:$4 sm:$0xff]  }
 0xaf3   : > { %8873 = vmatprep.subr.bf16.mxu0 %v14727_v14  ;;  %v14234_v50 = vld [vmem:[%s16793_s16 + $0xf4] ss:$12 sps:$4 sm:$0xff]  }
 0xaf4   : > { %8539 = vmatpush2.bf16.msra.mxu1 %v14180_v13  ;;  %v14231_v13 = vld [vmem:[%s16793_s16 + $0x110] ss:$12 sps:$4 sm:$0xff]  }
 0xaf5   : > { %8087 = vrot.lane.b32.xlu1 %v8068_v31, %s14741_s26  ;;  %s16795_s26 = sshll.u32 %s15311_s11, 4  ;;  %8832 = vmatprep.subr.bf16.mxu1 %v14186_v51  ;;  %v14232_v51 = vld [vmem:[%s16793_s16 + $0xf0] ss:$12 sps:$4 sm:$0xff]  }
 0xaf6   : > { %s16232_s15 = scalar_lea.vmem [#allocation14], %s16795_s26  ;;  %s16796_s26 = sld [smem:[#allocation37_spill]] }
 0xb57   : > { %v8033_v22 = vpop.permute.xlu0 %8032 }
 0xb58   : > { %8036 = vst.msk [vmem:[#allocation3] sm:$0xff] %vm8035_vm10, %v8033_v22  ;;  %vm8097_vm10 = vcmask 916480   ;;  %v14202_v22 = vld [vmem:[%s16793_s16 + $0x4c] ss:$12 sps:$4 sm:$0xff]  }
 0xb59   : > { %8098 = vst.msk [vmem:[#allocation2 + $0x8] sm:$0xff] %vm8097_vm10, %v14725_v0 }
 0xb5b   : > { %v8074_v38 = vpop.permute.xlu1 %8073  ;;  %v8072_v55 = vpop.permute.xlu0 %8071 }
 0xb5c   : > { %v8076_v42 = vsel %vm8075_vm13, %v8072_v55, %v8074_v38  ;;  %vm8100_vm13 = vcmask 910336   ;;  %v14200_v38 = vld [vmem:[%s16793_s16 + $0x48] ss:$12 sps:$4 sm:$0xff]  }
 0xb5d   : > { %8081 = vst.msk [vmem:[#allocation3 + $0x8] sm:$0xff] %vm2340_vm14, %v8076_v42  ;;  %v14206_v42 = vld [vmem:[%s16793_s16 + $0x34] ss:$12 sps:$4 sm:$0xff]  }
 0xb5e   : > { %8101 = vst.msk [vmem:[#allocation2 + $0x20] sm:$0x3] %vm8100_vm13, %v14725_v0  ;;  %vm10664_vm13 = vcmask 60416  }
 0xb5f   : > { %v8059_v57 = vpop.permute.xlu1 %8058  ;;  %v8054_v63 = vpop.permute.xlu0 %8053 }
 0xb63   : > { %v8046_v29 = vpop.permute.xlu1 %8045  ;;  %v8083_v47 = vpop.permute.xlu0 %8082 }
 0xb64   : > { %8049 = vst.msk [vmem:[#allocation3] sm:$0xff] %vm8048_vm5, %v8046_v29  ;;  %vm8113_vm5 = vcmask 1047745   ;;  %v14210_v29 = vld [vmem:[%s16793_s16 + $0x1c] ss:$12 sps:$4 sm:$0xff]  }
 0xb65   : > { %8086 = vst.msk [vmem:[#allocation3 + $0x8] sm:$0xff] %vm8085_vm12, %v8083_v47  ;;  %vm8115_vm12 = vcmask 719873   ;;  %v14208_v47 = vld [vmem:[%s16793_s16 + $0x18] ss:$12 sps:$4 sm:$0xff]  }
 0xb66   : > { %8057 = vst.msk [vmem:[#allocation3] sm:$0xff] %vm8056_vm0, %v8054_v63  ;;  %vm8119_vm0 = vcmask 712704   ;;  %v14207_v63 = vld [vmem:[%s16793_s16 + $0x38] ss:$12 sps:$4 sm:$0xff]  }
 0xb67   : > { %8062 = vst.msk [vmem:[#allocation3] sm:$0xff] %vm8061_vm2, %v8059_v57  ;;  %v8088_v61 = vpop.permute.xlu1 %8087  ;;  %v14204_v57 = vld [vmem:[%s16793_s16 + $0x30] ss:$12 sps:$4 sm:$0xff]   ;;  %vm9450_vm2 = vcmask 654336  }
 0xb68   : > { %8080 = vst.msk [vmem:[#allocation3] sm:$0xff] %vm8079_vm4, %v8072_v55  ;;  %v14203_v55 = vld [vmem:[%s16793_s16 + $0x50] ss:$12 sps:$4 sm:$0xff]   ;;  %vm9453_vm4 = vcmask 781696  }
 0xb69   : > { %8091 = vst.msk [vmem:[#allocation3 + $0x8] sm:$0xff] %vm8090_vm8, %v8088_v61  ;;  %v14211_v61 = vld [vmem:[%s16793_s16 + $0x20] ss:$12 sps:$4 sm:$0xff]   ;;  %vm9466_vm8 = vcmask 125952  }
 0xb6f   : > { %v8092_v23 = vld [vmem:[#allocation3] sm:$0xff] }
 0xb70   : > { %v8104_v31 = vrot.slane %v8092_v23, 7  ;;  %v8093_v58 = vld [vmem:[#allocation3 + $0x8] sm:$0xff]  ;;  %8094 = vst [vmem:[%s16232_s15] sm:$0xff] %v8092_v23  ;;  %v14222_v23 = vld [vmem:[%s16793_s16 + $0x13c] ss:$12 sps:$4 sm:$0xff]  }
 0xb71   : > { %v8105_v17 = vrot.slane %v8093_v58, 7  ;;  %8095 = vst.msk [vmem:[%s16232_s15 + $0x8] sm:$0xff] %vm4073_vm11, %v8093_v58  ;;  %vm8117_vm11 = vcmask 1040576   ;;  %v14226_v58 = vld [vmem:[%s16793_s16 + $0x124] ss:$12 sps:$4 sm:$0xff]  }
 0xb72   : > { %8106 = vrot.lane.b32.xlu0 %v8104_v31, %s16730_s18  ;;  %v14223_v31 = vld [vmem:[%s16793_s16 + $0x140] ss:$12 sps:$4 sm:$0xff]  }
 0xb73   : > { %8108 = vrot.lane.b32.xlu1 %v8105_v17, %s16730_s18  ;;  %v14230_v17 = vld [vmem:[%s16793_s16 + $0x10c] ss:$12 sps:$4 sm:$0xff]   ;;  %s16797_s18 = sld [smem:[#allocation38_spill]] }
 0xbe4   : > { %v8107_v27 = vpop.permute.xlu0 %8106 }
 0xbe5   : > { %8114 = vst.msk [vmem:[#allocation2] sm:$0xfe] %vm8113_vm5, %v8107_v27  ;;  %v8109_v52 = vpop.permute.xlu1 %8108  ;;  %vm9490_vm5 = vcmask 392192  }
 0xbe6   : > { %8118 = vst.msk [vmem:[#allocation2 + $0x18] sm:$0x1] %vm8117_vm11, %v8107_v27  ;;  %v8110_v53 = vsel %vm8029_vm7, %v8107_v27, %v8109_v52  ;;  %v14235_v27 = vld [vmem:[%s16793_s16 + $0xf8] ss:$12 sps:$4 sm:$0xff]   ;;  %v14238_v52 = vld [vmem:[%s16793_s16 + $0xdc] ss:$12 sps:$4 sm:$0xff]  }
 0xbe7   : > { %8116 = vst.msk [vmem:[#allocation2 + $0x8] sm:$0xfe] %vm8115_vm12, %v8110_v53  ;;  %vm9480_vm7 = vcmask 259072   ;;  %vm9496_vm11 = vcmask 913409   ;;  %vm10236_vm12 = vcmask 128000  }
 0xbe8   : > { %8120 = vst.msk [vmem:[#allocation2 + $0x20] sm:$0x1] %vm8119_vm0, %v8110_v53  ;;  %v14236_v53 = vld [vmem:[%s16793_s16 + $0xd8] ss:$12 sps:$4 sm:$0xff]   ;;  %vm10637_vm0 = vcmask 322688  }
 0xbec   : > { %v16247_v59 = vld [vmem:[#allocation2] sm:$0xff] }
 0xbed   : > { %v8123_v35 = vld [vmem:[#allocation2 + $0x18] sm:$0x3] }
 0xbee   : > { %v16250_v5 = vpack.c.bf16 %v8123_v35, %v16247_v59  ;;  %v8122_v40 = vld [vmem:[#allocation2 + $0x8] sm:$0xff] }
 0xbef   : > { %v8124_v19 = vld [vmem:[#allocation2 + $0x20] sm:$0x3]  ;;  %v8126_v44 = vpack.c.bf16 %v8122_v40, %v8122_v40 }
 0xbf0   : > { %v16252_v6 = vpack.c.bf16 %v8124_v19, %v8122_v40  ;;  %v8253_v43 = vshll.u32 %v16250_v5, 16  ;;  %v8251_v2 = vshrl.u32 %v16250_v5, 16  ;;  %v14239_v35 = vld [vmem:[%s16793_s16 + $0xe0] ss:$12 sps:$4 sm:$0xff]   ;;  %v14242_v40 = vld [vmem:[%s16793_s16 + $0xc4] ss:$12 sps:$4 sm:$0xff]  }
 0xbf1   : > { %v14240_v19 = vld [vmem:[%s16793_s16 + $0xc0] ss:$12 sps:$4 sm:$0xff]  }
 0xbf2   : > { %v8260_v8 = vshll.u32 %v16252_v6, 16  ;;  %v8255_v54 = vrot.slane %v8253_v43, 1  ;;  %v8258_v4 = vshrl.u32 %v16252_v6, 16  ;;  %v14243_v43 = vld [vmem:[%s16793_s16 + $0xc8] ss:$12 sps:$4 sm:$0xff]  }
 0xbf4   : > { %v8262_v56 = vrot.slane %v8260_v8, 1  ;;  %v8256_v60 = vor.u32 %v8255_v54, %v8251_v2  ;;  %v14246_v8 = vld [vmem:[%s16793_s16 + $0x37c] ss:$12 sps:$4 sm:$0xff]   ;;  %v14244_v54 = vld [vmem:[%s16793_s16 + $0x378] ss:$12 sps:$4 sm:$0xff]   ;;  %v8977_v2 = vrot.slane %v16252_v6, 1 }
 0xbf5   : > { %v14252_v6 = vld [vmem:[%s16793_s16 + $0x348] ss:$12 sps:$4 sm:$0xff]  }
 0xbf6   : > { %v8263_v16 = vor.u32 %v8262_v56, %v8258_v4  ;;  %v8125_v4 = vpack.c.bf16 %v16247_v59, %v16247_v59  ;;  %v14247_v56 = vld [vmem:[%s16793_s16 + $0x380] ss:$12 sps:$4 sm:$0xff]   ;;  %v14251_v59 = vld [vmem:[%s16793_s16 + $0x368] ss:$12 sps:$4 sm:$0xff]  }
 0xbf8   : > { %12471 = vmatprep.mubr.msk.bf16.mxu1 %vm8097_vm10, %v8263_v16  ;;  %12472 = vmatprep.mubr.msk.bf16.mxu0 %vm8097_vm10, %v8263_v16  ;;  %v14250_v16 = vld [vmem:[%s16793_s16 + $0x364] ss:$12 sps:$4 sm:$0xff]  }
 0xbf9   : > { %8541 = vmatmul.mubr.bf16.vlgmr.msra.gmra.mxu1 %v8256_v60  ;;  %8582 = vmatmul.mubr.bf16.vlgmr.msra.gmra.mxu0 %v8256_v60  ;;  %v14255_v60 = vld [vmem:[%s16793_s16 + $0x350] ss:$12 sps:$4 sm:$0xff]  }
 0xbfa   : > { %8833 = vmatpush1.bf16.msra.mxu1 %v14184_v20  ;;  %8874 = vmatpush1.bf16.msra.mxu0 %v14187_v1  ;;  %v14248_v20 = vld [vmem:[%s16793_s16 + $0x360] ss:$12 sps:$4 sm:$0xff]  }
 0xbfb   : > { %12518 = vmatprep.mubr.msk.bf16.mxu1 %vm8097_vm10, %v8126_v44  ;;  %12519 = vmatprep.mubr.msk.bf16.mxu0 %vm8097_vm10, %v8126_v44  ;;  %v14254_v1 = vld [vmem:[%s16793_s16 + $0x34c] ss:$12 sps:$4 sm:$0xff]   ;;  %v14256_v44 = vld [vmem:[%s16793_s16 + $0x330] ss:$12 sps:$4 sm:$0xff]  }
 0xbfc   : > { %8834 = vmatprep.subr.bf16.mxu1 %v14190_v7  ;;  %8875 = vmatprep.subr.bf16.mxu0 %v14727_v14  ;;  %v14258_v7 = vld [vmem:[%s16793_s16 + $0x334] ss:$12 sps:$4 sm:$0xff]  }
 0xbfe   : > { %8835 = vmatpush1.bf16.msra.mxu1 %v14188_v26  ;;  %8876 = vmatpush1.bf16.msra.mxu0 %v14191_v34  ;;  %v14259_v26 = vld [vmem:[%s16793_s16 + $0x338] ss:$12 sps:$4 sm:$0xff]   ;;  %v14262_v34 = vld [vmem:[%s16793_s16 + $0x31c] ss:$12 sps:$4 sm:$0xff]  }
 0xbff   : > { %8836 = vmatprep.subr.bf16.mxu1 %v14194_v21  ;;  %8877 = vmatprep.subr.bf16.mxu0 %v14727_v14  ;;  %v14260_v21 = vld [vmem:[%s16793_s16 + $0x318] ss:$12 sps:$4 sm:$0xff]  }
 0xc02   : > { %8837 = vmatpush1.bf16.msra.mxu1 %v14192_v24  ;;  %8878 = vmatpush1.bf16.msra.mxu0 %v14195_v28  ;;  %v14263_v24 = vld [vmem:[%s16793_s16 + $0x320] ss:$12 sps:$4 sm:$0xff]   ;;  %v14266_v28 = vld [vmem:[%s16793_s16 + $0x304] ss:$12 sps:$4 sm:$0xff]  }
 0xc03   : > { %8838 = vmatprep.subr.bf16.mxu1 %v14198_v9  ;;  %8879 = vmatprep.subr.bf16.mxu0 %v14727_v14  ;;  %v14264_v9 = vld [vmem:[%s16793_s16 + $0x300] ss:$12 sps:$4 sm:$0xff]  }
 0xc06   : > { %8839 = vmatpush1.bf16.msra.mxu1 %v14196_v37  ;;  %8880 = vmatpush1.bf16.msra.mxu0 %v14199_v39  ;;  %v14267_v37 = vld [vmem:[%s16793_s16 + $0x308] ss:$12 sps:$4 sm:$0xff]   ;;  %v14270_v39 = vld [vmem:[%s16793_s16 + $0x2ec] ss:$12 sps:$4 sm:$0xff]  }
 0xc07   : > { %8840 = vmatprep.subr.bf16.mxu1 %v14202_v22  ;;  %8881 = vmatprep.subr.bf16.mxu0 %v14727_v14  ;;  %v14268_v22 = vld [vmem:[%s16793_s16 + $0x2e8] ss:$12 sps:$4 sm:$0xff]  }
 0xc0a   : > { %8841 = vmatpush1.bf16.msra.mxu1 %v14200_v38  ;;  %8882 = vmatpush1.bf16.msra.mxu0 %v14203_v55  ;;  %v14271_v38 = vld [vmem:[%s16793_s16 + $0x2f0] ss:$12 sps:$4 sm:$0xff]   ;;  %v14274_v55 = vld [vmem:[%s16793_s16 + $0x2d4] ss:$12 sps:$4 sm:$0xff]  }
 0xc0b   : > { %8842 = vmatprep.subr.bf16.mxu1 %v14206_v42  ;;  %8883 = vmatprep.subr.bf16.mxu0 %v14727_v14  ;;  %v14272_v42 = vld [vmem:[%s16793_s16 + $0x2d0] ss:$12 sps:$4 sm:$0xff]  }
 0xc0e   : > { %8843 = vmatpush1.bf16.msra.mxu1 %v14204_v57  ;;  %8884 = vmatpush1.bf16.msra.mxu0 %v14207_v63  ;;  %v14275_v57 = vld [vmem:[%s16793_s16 + $0x2d8] ss:$12 sps:$4 sm:$0xff]  }
 0xc0f   : > { %8844 = vmatprep.subr.bf16.mxu1 %v14210_v29  ;;  %8885 = vmatprep.subr.bf16.mxu0 %v14727_v14  ;;  %v14278_v63 = vld [vmem:[%s16793_s16 + $0x424] ss:$12 sps:$4 sm:$0xff]   ;;  %v14276_v29 = vld [vmem:[%s16793_s16 + $0x420] ss:$12 sps:$4 sm:$0xff]  }
 0xc12   : > { %8845 = vmatpush1.bf16.msra.mxu1 %v14208_v47  ;;  %8886 = vmatpush1.bf16.msra.mxu0 %v14211_v61  ;;  %v14279_v47 = vld [vmem:[%s16793_s16 + $0x428] ss:$12 sps:$4 sm:$0xff]   ;;  %v14282_v61 = vld [vmem:[%s16793_s16 + $0x40c] ss:$12 sps:$4 sm:$0xff]  }
 0xc13   : > { %8846 = vmatprep.subr.bf16.mxu1 %v14214_v25  ;;  %8887 = vmatprep.subr.bf16.mxu0 %v14727_v14  ;;  %v14280_v25 = vld [vmem:[%s16793_s16 + $0x408] ss:$12 sps:$4 sm:$0xff]  }
 0xc16   : > { %8847 = vmatpush1.bf16.msra.mxu1 %v14212_v41  ;;  %8888 = vmatpush1.bf16.msra.mxu0 %v14215_v62  ;;  %v14283_v41 = vld [vmem:[%s16793_s16 + $0x410] ss:$12 sps:$4 sm:$0xff]   ;;  %v14286_v62 = vld [vmem:[%s16793_s16 + $0x3f4] ss:$12 sps:$4 sm:$0xff]  }
 0xc17   : > { %8850 = vmatprep.subr.bf16.mxu1 %v14218_v11  ;;  %8891 = vmatprep.subr.bf16.mxu0 %v14727_v14  ;;  %v14284_v11 = vld [vmem:[%s16793_s16 + $0x3f0] ss:$12 sps:$4 sm:$0xff]  }
 0xc1a   : > { %8851 = vmatpush2.bf16.msra.mxu1 %v14216_v12  ;;  %8892 = vmatpush2.bf16.msra.mxu0 %v14219_v32  ;;  %v14287_v12 = vld [vmem:[%s16793_s16 + $0x3f8] ss:$12 sps:$4 sm:$0xff]   ;;  %v14290_v32 = vld [vmem:[%s16793_s16 + $0x3dc] ss:$12 sps:$4 sm:$0xff]  }
 0xc1b   : > { %8852 = vmatprep.subr.bf16.mxu1 %v14222_v23  ;;  %8893 = vmatprep.subr.bf16.mxu0 %v14727_v14  ;;  %v14288_v23 = vld [vmem:[%s16793_s16 + $0x3d8] ss:$12 sps:$4 sm:$0xff]  }
 0xc1e   : > { %8853 = vmatpush2.bf16.msra.mxu1 %v14220_v46  ;;  %8894 = vmatpush2.bf16.msra.mxu0 %v14223_v31  ;;  %v14291_v46 = vld [vmem:[%s16793_s16 + $0x3e0] ss:$12 sps:$4 sm:$0xff]   ;;  %v14294_v31 = vld [vmem:[%s16793_s16 + $0x3c4] ss:$12 sps:$4 sm:$0xff]  }
 0xc1f   : > { %8854 = vmatprep.subr.bf16.mxu1 %v14226_v58  ;;  %8895 = vmatprep.subr.bf16.mxu0 %v14727_v14  ;;  %v14292_v58 = vld [vmem:[%s16793_s16 + $0x3c0] ss:$12 sps:$4 sm:$0xff]  }
 0xc22   : > { %8855 = vmatpush2.bf16.msra.mxu1 %v14224_v49  ;;  %8896 = vmatpush2.bf16.msra.mxu0 %v14227_v18  ;;  %v14295_v49 = vld [vmem:[%s16793_s16 + $0x3c8] ss:$12 sps:$4 sm:$0xff]   ;;  %v14298_v18 = vld [vmem:[%s16793_s16 + $0x3ac] ss:$12 sps:$4 sm:$0xff]  }
 0xc23   : > { %8856 = vmatprep.subr.bf16.mxu1 %v14230_v17  ;;  %8897 = vmatprep.subr.bf16.mxu0 %v14727_v14  ;;  %v14296_v17 = vld [vmem:[%s16793_s16 + $0x3a8] ss:$12 sps:$4 sm:$0xff]  }
 0xc26   : > { %8857 = vmatpush2.bf16.msra.mxu1 %v14228_v3  ;;  %8898 = vmatpush2.bf16.msra.mxu0 %v14231_v13  ;;  %v14299_v3 = vld [vmem:[%s16793_s16 + $0x3b0] ss:$12 sps:$4 sm:$0xff]   ;;  %v14302_v13 = vld [vmem:[%s16793_s16 + $0x394] ss:$12 sps:$4 sm:$0xff]  }
 0xc27   : > { %8858 = vmatprep.subr.bf16.mxu1 %v14234_v50  ;;  %8899 = vmatprep.subr.bf16.mxu0 %v14727_v14  ;;  %v14300_v50 = vld [vmem:[%s16793_s16 + $0x390] ss:$12 sps:$4 sm:$0xff]  }
 0xc2a   : > { %8859 = vmatpush2.bf16.msra.mxu1 %v14232_v51  ;;  %8900 = vmatpush2.bf16.msra.mxu0 %v14235_v27  ;;  %v14303_v51 = vld [vmem:[%s16793_s16 + $0x398] ss:$12 sps:$4 sm:$0xff]   ;;  %v8976_v27 = vrot.slane %v16250_v5, 1 }
 0xc2b   : > { %8860 = vmatprep.subr.bf16.mxu1 %v14238_v52  ;;  %8901 = vmatprep.subr.bf16.mxu0 %v14727_v14 }
 0xc2e   : > { %8861 = vmatpush2.bf16.msra.mxu1 %v14236_v53  ;;  %8902 = vmatpush2.bf16.msra.mxu0 %v14239_v35 }
 0xc2f   : > { %8862 = vmatprep.subr.bf16.mxu1 %v14242_v40  ;;  %8903 = vmatprep.subr.bf16.mxu0 %v14727_v14 }
 0xc32   : > { %8863 = vmatpush2.bf16.msra.mxu1 %v14240_v19  ;;  %8904 = vmatpush2.bf16.msra.mxu0 %v14243_v43 }
 0xc33   : > { %9222 = vmatprep.subr.bf16.mxu1 %v14246_v8  ;;  %9263 = vmatprep.subr.bf16.mxu0 %v14727_v14 }
 0xc35   : > { %8865 = vmatmul.mubr.bf16.vlgmr.msra.gmra.mxu1 %v8125_v4  ;;  %8906 = vmatmul.mubr.bf16.vlgmr.msra.gmra.mxu0 %v8125_v4 }
 0xc36   : > { %9223 = vmatpush1.bf16.msra.mxu1 %v14244_v54  ;;  %12625 = vmatprep.mubr.msk.bf16.mxu1 %vm8097_vm10, %v8977_v2 }
 0xc37   : > { %9264 = vmatpush1.bf16.msra.mxu0 %v14247_v56  ;;  %12626 = vmatprep.mubr.msk.bf16.mxu0 %vm8097_vm10, %v8977_v2  ;;  %vm9474_vm10 = vcmask 519296  }
 0xc38   : > { %9224 = vmatprep.subr.bf16.mxu1 %v14250_v16  ;;  %9265 = vmatprep.subr.bf16.mxu0 %v14727_v14 }
 0xc3a   : > { %9225 = vmatpush1.bf16.msra.mxu1 %v14248_v20 }
 0xc3b   : > { %9266 = vmatpush1.bf16.msra.mxu0 %v14251_v59  ;;  %9226 = vmatprep.subr.bf16.mxu1 %v14254_v1 }
 0xc3c   : > { %9267 = vmatprep.subr.bf16.mxu0 %v14727_v14 }
 0xc3e   : > { %9227 = vmatpush1.bf16.msra.mxu1 %v14252_v6  ;;  %v9306_v6 = vld [vmem:[%s16796_s26] sm:$0x7]  ;;  %s16801_s26 = smov 48  }
 0xc3f   : > { %9268 = vmatpush1.bf16.msra.mxu0 %v14255_v60  ;;  %9228 = vmatprep.subr.bf16.mxu1 %v14258_v7  ;;  %v9326_v60 = vld [vmem:[%s16797_s18] sm:$0x7]  ;;  %s16398_s18 = scalar_lea.vmem [#allocation17], %s13259_s23  ;;  %s16798_s23 = smov 32  }
 0xc40   : > { %9269 = vmatprep.subr.bf16.mxu0 %v14727_v14 }
 0xc42   : > { %9229 = vmatpush1.bf16.msra.mxu1 %v14256_v44  ;;  %v9311_v44 = vrot.slane %v9306_v6, %v15209_v48 }
 0xc43   : > { %9270 = vmatpush1.bf16.msra.mxu0 %v14259_v26  ;;  %9230 = vmatprep.subr.bf16.mxu1 %v14262_v34 }
 0xc44   : > { %9271 = vmatprep.subr.bf16.mxu0 %v14727_v14 }
 0xc46   : > { %9231 = vmatpush1.bf16.msra.mxu1 %v14260_v21  ;;  %v9319_v21 = vrot.slane %v9306_v6, %v16121_v30 }
 0xc47   : > { %9272 = vmatpush1.bf16.msra.mxu0 %v14263_v24  ;;  %9232 = vmatprep.subr.bf16.mxu1 %v14266_v28 }
 0xc48   : > { %9273 = vmatprep.subr.bf16.mxu0 %v14727_v14 }
 0xc4a   : > { %9233 = vmatpush1.bf16.msra.mxu1 %v14264_v9  ;;  %v9331_v9 = vrot.slane %v9326_v60, %v15209_v48 }
 0xc4b   : > { %9274 = vmatpush1.bf16.msra.mxu0 %v14267_v37  ;;  %9234 = vmatprep.subr.bf16.mxu1 %v14270_v39  ;;  %v9315_v39 = vrot.slane %v9306_v6, %v15213_v15 }
 0xc4c   : > { %9275 = vmatprep.subr.bf16.mxu0 %v14727_v14 }
 0xc4e   : > { %9235 = vmatpush1.bf16.msra.mxu1 %v14268_v22 }
 0xc4f   : > { %9276 = vmatpush1.bf16.msra.mxu0 %v14271_v38  ;;  %9236 = vmatprep.subr.bf16.mxu1 %v14274_v55  ;;  %v9339_v38 = vrot.slane %v9326_v60, %v16121_v30 }
 0xc50   : > { %9277 = vmatprep.subr.bf16.mxu0 %v14727_v14 }
 0xc52   : > { %9237 = vmatpush1.bf16.msra.mxu1 %v14272_v42 }
 0xc53   : > { %9278 = vmatpush1.bf16.msra.mxu0 %v14275_v57  ;;  %9240 = vmatprep.subr.bf16.mxu1 %v14278_v63  ;;  %v9335_v63 = vrot.slane %v9326_v60, %v15213_v15 }
 0xc54   : > { %9281 = vmatprep.subr.bf16.mxu0 %v14727_v14 }
 0xc56   : > { %9241 = vmatpush2.bf16.msra.mxu1 %v14276_v29 }
 0xc57   : > { %9282 = vmatpush2.bf16.msra.mxu0 %v14279_v47  ;;  %9242 = vmatprep.subr.bf16.mxu1 %v14282_v61 }
 0xc58   : > { %9283 = vmatprep.subr.bf16.mxu0 %v14727_v14 }
 0xc5a   : > { %9243 = vmatpush2.bf16.msra.mxu1 %v14280_v25 }
 0xc5b   : > { %9284 = vmatpush2.bf16.msra.mxu0 %v14283_v41  ;;  %9244 = vmatprep.subr.bf16.mxu1 %v14286_v62 }
 0xc5c   : > { %9285 = vmatprep.subr.bf16.mxu0 %v14727_v14 }
 0xc5e   : > { %9245 = vmatpush2.bf16.msra.mxu1 %v14284_v11 }
 0xc5f   : > { %9286 = vmatpush2.bf16.msra.mxu0 %v14287_v12  ;;  %9246 = vmatprep.subr.bf16.mxu1 %v14290_v32 }
 0xc60   : > { %9287 = vmatprep.subr.bf16.mxu0 %v14727_v14 }
 0xc62   : > { %9247 = vmatpush2.bf16.msra.mxu1 %v14288_v23 }
 0xc63   : > { %9288 = vmatpush2.bf16.msra.mxu0 %v14291_v46  ;;  %9248 = vmatprep.subr.bf16.mxu1 %v14294_v31 }
 0xc64   : > { %9289 = vmatprep.subr.bf16.mxu0 %v14727_v14 }
 0xc66   : > { %9249 = vmatpush2.bf16.msra.mxu1 %v14292_v58 }
 0xc67   : > { %9290 = vmatpush2.bf16.msra.mxu0 %v14295_v49  ;;  %9250 = vmatprep.subr.bf16.mxu1 %v14298_v18 }
 0xc68   : > { %9291 = vmatprep.subr.bf16.mxu0 %v14727_v14 }
 0xc6a   : > { %9251 = vmatpush2.bf16.msra.mxu1 %v14296_v17 }
 0xc6b   : > { %9292 = vmatpush2.bf16.msra.mxu0 %v14299_v3  ;;  %9252 = vmatprep.subr.bf16.mxu1 %v14302_v13 }
 0xc6c   : > { %9293 = vmatprep.subr.bf16.mxu0 %v14727_v14 }
 0xc6e   : > { %9253 = vmatpush2.bf16.msra.mxu1 %v14300_v50 }
 0xc6f   : > { %9294 = vmatpush2.bf16.msra.mxu0 %v14303_v51 }
 0xc70   : > { %13221 = vmatprep.subr.bf16.mxu0 %v14725_v0 }
 0xc71   : > { %9255 = vmatmul.mubr.bf16.vlgmr.msra.gmra.mxu1 %v8976_v27 }
 0xc72   : > { %9296 = vmatmul.mubr.bf16.vlgmr.msra.gmra.mxu0 %v8976_v27 }
 0xc73   : > { %13225 = vmatprep.mubr.msk.bf16.mxu0 %vm14736_vm15, %v14725_v0 }
 0xcb9   : > { %v8542_v52 = vpop.f32.mrf.mxu1  ;;  %v8583_v53 = vpop.f32.mrf.mxu0 }
 0xcbb   : > { %v8544_v35 = vpop.f32.mrf.mxu1  ;;  %v8585_v40 = vpop.f32.mrf.mxu0 }
 0xcbd   : > { %v8546_v19 = vpop.f32.mrf.mxu1  ;;  %v8586_v43 = vpop.f32.mrf.mxu0 }
 0xcbf   : > { %v8547_v8 = vpop.f32.mrf.mxu1  ;;  %v8587_v54 = vpop.f32.mrf.mxu0 }
 0xcf5   : > { %v8866_v4 = vpop.f32.mrf.mxu1  ;;  %v8907_v56 = vpop.f32.mrf.mxu0 }
 0xcf6   : > { %v8867_v7 = vadd.f32 %v8866_v4, %v8542_v52  ;;  %v8908_v26 = vadd.f32 %v8907_v56, %v8583_v53 }
 0xcf7   : > { %v8868_v5 = vpop.f32.mrf.mxu1  ;;  %v8909_v2 = vpop.f32.mrf.mxu0 }
 0xcf8   : > { %v8869_v24 = vadd.f32 %v8868_v5, %v8544_v35 }
 0xcf9   : > { %v8870_v16 = vpop.f32.mrf.mxu1  ;;  %v8910_v20 = vpop.f32.mrf.mxu0 }
 0xcfb   : > { %v8871_v59 = vpop.f32.mrf.mxu1  ;;  %v8911_v1 = vpop.f32.mrf.mxu0 }
 0xd31   : > { %v9256_v34 = vpop.f32.mrf.mxu1 }
 0xd32   : > { %v9303_v28 = vadd.f32 %v9256_v34, %v8867_v7  ;;  %v9297_v37 = vpop.f32.mrf.mxu0  ;;  %v14304_v7 = vld [vmem:[#allocation9 + $0x118] sm:$0xff]   ;;  %v14309_v34 = vld [vmem:[#allocation9 + $0x108] sm:$0xff]  }
 0xd33   : > { %v9305_v22 = vadd.f32 %v9297_v37, %v8908_v26  ;;  %v9258_v55 = vpop.f32.mrf.mxu1  ;;  %13222 = vmatpush3.bf16.msra.mxu0 %v14304_v7  ;;  %12996 = vmatprep.subr.bf16.mxu1 %v14309_v34 }
 0xd34   : > { %v9323_v42 = vmul.f32 %v9311_v44, %v9303_v28  ;;  %v9304_v57 = vadd.f32 %v9258_v55, %v8869_v24  ;;  %v9299_v29 = vpop.f32.mrf.mxu0  ;;  %v14305_v24 = vld [vmem:[#allocation9 + $0x110] sm:$0xff]   ;;  %v14313_v28 = vld [vmem:[#allocation9 + $0x100] sm:$0xff]   ;;  %13223 = vmatprep.subr.bf16.mxu0 %v14725_v0  ;;  %v14317_v55 = vld [vmem:[#allocation9 + $0xf8] sm:$0xff]  }
 0xd35   : > { %v9325_v47 = vmul.f32 %v9319_v21, %v9305_v22  ;;  %v9260_v61 = vpop.f32.mrf.mxu1  ;;  %v14311_v21 = vld [vmem:[#allocation9 + $0xc8] sm:$0xff]   ;;  %v14315_v22 = vld [vmem:[#allocation9 + $0xc0] sm:$0xff]   ;;  %v14319_v29 = vld [vmem:[#allocation9 + $0xb8] sm:$0xff]  }
 0xd36   : > { %v9343_v25 = vadd.f32 %v9331_v9, %v9323_v42  ;;  %v9324_v41 = vmul.f32 %v9315_v39, %v9304_v57  ;;  %v9300_v62 = vpop.f32.mrf.mxu0  ;;  %v14306_v9 = vld [vmem:[#allocation9 + $0x78] sm:$0xff]   ;;  %12997 = vmatpush3.bf16.msra.mxu1 %v14311_v21  ;;  %v14310_v61 = vld [vmem:[#allocation9 + $0x30] sm:$0xff]  }
 0xd37   : > { %v9345_v11 = vadd.f32 %v9339_v38, %v9325_v47  ;;  %v9261_v48 = vpop.f32.mrf.mxu1  ;;  %12998 = vmatprep.subr.bf16.mxu1 %v14313_v28  ;;  %13224 = vmatpush3.bf16.msra.mxu0 %v14305_v24  ;;  %v14307_v42 = vld [vmem:[#allocation9 + $0x38] sm:$0xff]   ;;  %v14321_v47 = vld [vmem:[#allocation9 + $0xf0] sm:$0xff]   ;;  %v14314_v62 = vld [vmem:[#allocation9 + $0x28] sm:$0xff]  }
 0xd38   : > { %v9346_v12 = vmax.f32 %v9343_v25, 0.0  ;;  %v9344_v32 = vadd.f32 %v9335_v63, %v9324_v41  ;;  %v9301_v23 = vpop.f32.mrf.mxu0  ;;  %13021 = vmatprep.subr.bf16.mxu0 %v14306_v9  ;;  %v14308_v63 = vld [vmem:[#allocation9 + $0x70] sm:$0xff]   ;;  %v14312_v25 = vld [vmem:[#allocation9 + $0x68] sm:$0xff]   ;;  %v14318_v48 = vld [vmem:[#allocation9 + $0x20] sm:$0xff]  }
 0xd39   : > { %v9348_v46 = vmax.f32 %v9345_v11, 0.0  ;;  %v14323_v41 = vld [vmem:[#allocation9 + $0xb0] sm:$0xff]   ;;  %v14316_v11 = vld [vmem:[#allocation9 + $0x60] sm:$0xff]   ;;  %v14352_v28 = vld [vmem:[#allocation9 + $0x1a8] sm:$0xff]  }
 0xd3a   : > { %9349 = vst [vmem:[%s16398_s18] sm:$0xff] %v9346_v12  ;;  %v9355_v30 = vrot.slane %v9346_v12, 1  ;;  %v9347_v15 = vmax.f32 %v9344_v32, 0.0  ;;  %12999 = vmatpush3.bf16.msra.mxu1 %v14315_v22  ;;  %v14322_v32 = vld [vmem:[#allocation9 + $0x18] sm:$0xff]  }
 0xd3b   : > { %9351 = vst [vmem:[%s16398_s18 + $0x10] sm:$0xff] %v9348_v46  ;;  %v9357_v31 = vrot.slane %v9348_v46, 1  ;;  %13000 = vmatprep.subr.bf16.mxu1 %v14317_v55 }
 0xd3c   : > { %9350 = vst [vmem:[%s16398_s18 + $0x8] sm:$0xff] %v9347_v15  ;;  %v9356_v58 = vrot.slane %v9347_v15, 1  ;;  %v9361_v18 = vmax.f32 %v9346_v12, %v9355_v30  ;;  %v14320_v12 = vld [vmem:[#allocation9 + $0x58] sm:$0xff]  }
 0xd3d   : > { %v9363_v49 = vmax.f32 %v9348_v46, %v9357_v31 }
 0xd3e   : > { %v9362_v17 = vmax.f32 %v9347_v15, %v9356_v58  ;;  %13001 = vmatpush3.bf16.msra.mxu1 %v14319_v29 }
 0xd3f   : > { %v9398_v3 = vcombine.high %v9363_v49, %v9363_v49  ;;  %v9381_v51 = vrot.slane %v9363_v49, %v15221_v10  ;;  %13002 = vmatprep.subr.bf16.mxu1 %v14321_v47  ;;  %v14339_v47 = vld [vmem:[#allocation9 + $0x80] sm:$0xff]  }
 0xd40   : > { %v9367_v13 = vcombine.low %v9361_v18, %v9362_v17  ;;  %v9397_v50 = vcombine.high %v9361_v18, %v9362_v17  ;;  %v14324_v17 = vld [vmem:[#allocation9 + $0x50] sm:$0xff]  }
 0xd41   : > { %v9412_v27 = vrot.slane %v9398_v3, %v15221_v10  ;;  %v14325_v3 = vld [vmem:[#allocation9 + $0xe8] sm:$0xff]  }
 0xd42   : > { %v9374_v52 = vrot.slane %v9367_v13, %v15221_v10  ;;  %v9405_v53 = vrot.slane %v9397_v50, %v15221_v10  ;;  %13003 = vmatpush3.bf16.msra.mxu1 %v14323_v41  ;;  %v14326_v13 = vld [vmem:[#allocation9 + $0x10] sm:$0xff]   ;;  %v14327_v50 = vld [vmem:[#allocation9 + $0xa8] sm:$0xff]  }
 0xd43   : > { %13004 = vmatprep.subr.bf16.mxu1 %v14325_v3  ;;  %v14342_v41 = vld [vmem:[#allocation9 + $0x190] sm:$0xff]  }
 0xd44   : > { %v9382_v35 = vcombine.low %v9374_v52, %v9381_v51  ;;  %v9413_v40 = vcombine.low %v9405_v53, %v9412_v27  ;;  %v14328_v27 = vld [vmem:[#allocation9 + $0x48] sm:$0xff]   ;;  %v14331_v53 = vld [vmem:[#allocation9 + $0xa0] sm:$0xff]  }
 0xd45   : > { %v14330_v52 = vld [vmem:[#allocation9 + $0x8] sm:$0xff]  }
 0xd46   : > { %v9389_v19 = vrot.slane %v9382_v35, %v15221_v10  ;;  %v9420_v43 = vrot.slane %v9413_v40, %v15221_v10  ;;  %13005 = vmatpush3.bf16.msra.mxu1 %v14327_v50  ;;  %v14332_v35 = vld [vmem:[#allocation9 + $0x40] sm:$0xff]   ;;  %v14333_v40 = vld [vmem:[#allocation9 + $0xd8] sm:$0xff]  }
 0xd48   : > { %v9393_v8 = vcombine.high %v9389_v19, %v9389_v19  ;;  %v9424_v54 = vcombine.high %v9420_v43, %v9420_v43  ;;  %9391 = vst.msk [vmem:[#allocation2] ss:$8 sm:$0x7] %vm16137_vm6, %v9389_v19  ;;  %9422 = vst.msk [vmem:[#allocation2 + $0x2] ss:$8 sm:$0x7] %vm16137_vm6, %v9420_v43 }
 0xd49   : > { %v14334_v43 = vld [vmem:[#allocation9] sm:$0xff]  }
 0xd4a   : > { %9395 = vst.msk [vmem:[#allocation2 + $0x1] ss:$8 sm:$0x7] %vm16137_vm6, %v9393_v8  ;;  %9426 = vst.msk [vmem:[#allocation2 + $0x3] ss:$8 sm:$0x7] %vm16137_vm6, %v9424_v54 }
 0xd4b   : > { %vm9436_vm6 = vcmask 388096   ;;  %v14335_v54 = vld [vmem:[#allocation9 + $0x98] sm:$0xff]  }
 0xd51   : > { %v9430_v4 = vld [vmem:[#allocation2 + $0x10] sm:$0xf]  ;;  %v9429_v56 = vld [vmem:[#allocation2 + $0x8] sm:$0xf]  ;;  %v9428_v5 = vld [vmem:[#allocation2] sm:$0xf] }
 0xd52   : > { %9456 = vrot.lane.b32.xlu1 %v9430_v4, %s14732_s1  ;;  %9481 = vst.msk [vmem:[#allocation2 + $0x10] sm:$0x3f] %vm9480_vm7, %v14725_v0  ;;  %9439 = vrot.lane.b32.xlu0 %v9429_v56, %s14732_s1  ;;  %9479 = vst [vmem:[#allocation2 + $0x8] sm:$0x3f] %v14725_v0  ;;  %vm10696_vm7 = vcmask 322784  }
 0xd53   : > { %9478 = vst [vmem:[#allocation2] sm:$0x3f] %v14725_v0 }
 0xd56   : > { %9432 = vrot.lane.b32.xlu0 %v9428_v5, %s14732_s1 }
 0xd59   : > { %v9500_v44 = vld [vmem:[#allocation2 + $0x10] sm:$0x3f] }
 0xd5a   : > { %v16428_v26 = vpack.c.bf16 %v9500_v44, %v9500_v44 }
 0xd5c   : > { %v9592_v37 = vshrl.u32 %v16428_v26, 16  ;;  %v9594_v39 = vshll.u32 %v16428_v26, 16  ;;  %v10023_v29 = vrot.slane %v16428_v26, 1 }
 0xd5e   : > { %v9596_v38 = vrot.slane %v9594_v39, 1 }
 0xd60   : > { %v9597_v57 = vor.u32 %v9596_v38, %v9592_v37  ;;  %v14355_v38 = vld [vmem:[#allocation9 + $0x1a0] sm:$0xff]  }
 0xd62   : > { %13226 = vmatmul.mubr.msk.bf16.vlgmr.msra.gmra.mxu0 %vm5910_vm3, %v9597_v57  ;;  %v14338_v57 = vld [vmem:[#allocation9 + $0x88] sm:$0xff]  }
 0xd63   : > { %13022 = vmatpush3.bf16.msra.mxu0 %v14307_v42 }
 0xd64   : > { %13023 = vmatprep.subr.bf16.mxu0 %v14308_v63 }
 0xd67   : > { %13024 = vmatpush3.bf16.msra.mxu0 %v14310_v61  ;;  %v14340_v61 = vld [vmem:[#allocation9 + $0x198] sm:$0xff]  }
 0xd68   : > { %13025 = vmatprep.subr.bf16.mxu0 %v14312_v25  ;;  %v14341_v25 = vld [vmem:[#allocation9 + $0x158] sm:$0xff]  }
 0xd6b   : > { %13026 = vmatpush3.bf16.msra.mxu0 %v14314_v62 }
 0xd6c   : > { %13027 = vmatprep.subr.bf16.mxu0 %v14316_v11  ;;  %v14343_v11 = vld [vmem:[#allocation9 + $0x150] sm:$0xff]  }
 0xd6f   : > { %13028 = vmatpush3.bf16.msra.mxu0 %v14318_v48  ;;  %v14344_v48 = vld [vmem:[#allocation9 + $0x188] sm:$0xff]  }
 0xd70   : > { %13029 = vmatprep.subr.bf16.mxu0 %v14320_v12  ;;  %v14345_v12 = vld [vmem:[#allocation9 + $0x148] sm:$0xff]  }
 0xd73   : > { %13030 = vmatpush3.bf16.msra.mxu0 %v14322_v32  ;;  %v14346_v32 = vld [vmem:[#allocation9 + $0x180] sm:$0xff]  }
 0xd74   : > { %13031 = vmatprep.subr.bf16.mxu0 %v14324_v17 }
 0xd77   : > { %13032 = vmatpush3.bf16.msra.mxu0 %v14326_v13 }
 0xd78   : > { %13033 = vmatprep.subr.bf16.mxu0 %v14328_v27 }
 0xd7b   : > { %13034 = vmatpush3.bf16.msra.mxu0 %v14330_v52 }
 0xd7c   : > { %13035 = vmatprep.subr.bf16.mxu0 %v14332_v35 }
 0xd7f   : > { %13036 = vmatpush3.bf16.msra.mxu0 %v14334_v43 }
 0xd80   : > { %13237 = vmatprep.subr.bf16.mxu0 %v14725_v0 }
 0xdc4   : > { %v9457_v10 = vpop.permute.xlu1 %9456  ;;  %v9440_v45 = vpop.permute.xlu0 %9439 }
 0xdc5   : > { %v9442_v2 = vmax.f32 %v9428_v5, %v9440_v45  ;;  %v9443_v16 = vmax.f32 %v9429_v56, %v9440_v45  ;;  %v9458_v20 = vsel %vm9450_vm2, %v9440_v45, %v9457_v10  ;;  %v9469_v1 = vmax.f32 %v9430_v4, %v9457_v10  ;;  %v14336_v10 = vld [vmem:[#allocation9 + $0xd0] sm:$0xff]  }
 0xdc6   : > { %v9460_v60 = vmax.f32 %v9429_v56, %v9458_v20  ;;  %v14337_v45 = vld [vmem:[#allocation9 + $0x90] sm:$0xff]  }
 0xdc7   : > { %9448 = vrot.lane.b32.xlu0 %v9443_v16, %s14732_s1  ;;  %9446 = vrot.lane.b32.xlu1 %v9442_v2, %s14732_s1  ;;  %s16799_s1 = sld [smem:[#allocation31_spill]] }
 0xdc8   : > { %v9433_v59 = vpop.permute.xlu0 %9432 }
 0xdc9   : > { %v9435_v6 = vmax.f32 %v9428_v5, %v9433_v59 }
 0xdcb   : > { %9437 = vst.msk [vmem:[#allocation3] sm:$0xf] %vm9436_vm6, %v9435_v6  ;;  %9471 = vrot.lane.b32.xlu0 %v9469_v1, %s16794_s7  ;;  %9462 = vrot.lane.b32.xlu1 %v9460_v60, %s16798_s23  ;;  %s16800_s7 = sld [smem:[#allocation32_spill]]  ;;  %vm10701_vm6 = vcmask 388416  }
 0xdcd   : > { %v12289_v23 = vld [vmem:[%s16799_s1] ss:$0 sm:$0xff]  ;;  %s16802_s1 = sld [smem:[#allocation41_spill]] }
 0xdce   : > { %v6860_v31 = vmul.f32 %v12289_v23, %v16118_v33  ;;  %v14329_v33 = vld [vmem:[#allocation9 + $0xe0] sm:$0xff]  }
 0xdcf   : > { %13006 = vmatprep.subr.bf16.mxu1 %v14329_v33  ;;  %v14347_v23 = vld [vmem:[#allocation9 + $0x140] sm:$0xff]  }
 0xdd0   : > { %13007 = vmatpush3.bf16.msra.mxu1 %v14331_v53 }
 0xdd1   : > { %v12290_v58 = vld [vmem:[%s16800_s7] ss:$0 sm:$0xff]  ;;  %13008 = vmatprep.subr.bf16.mxu1 %v14333_v40  ;;  %s16803_s7 = sld [smem:[#allocation39_spill]] }
 0xdd2   : > { %v6868_v51 = vadd.f32 %v12290_v58, %v6860_v31  ;;  %v14353_v31 = vld [vmem:[#allocation9 + $0x168] sm:$0xff]  }
 0xdd3   : > { %v14354_v58 = vld [vmem:[#allocation9 + $0x128] sm:$0xff]   ;;  %v14358_v3 = vld [vmem:[%s16802_s1 + $0x38] sm:$0xff]   ;;  %v14360_v13 = vld [vmem:[%s16802_s1 + $0x80] sm:$0xff]  }
 0xdd4   : > { %v16440_v19 = vmax.f32 %v6868_v51, 0.0  ;;  %13009 = vmatpush3.bf16.msra.mxu1 %v14335_v54  ;;  %v14359_v50 = vld [vmem:[%s16802_s1 + $0x30] sm:$0xff]   ;;  %v14362_v51 = vld [vmem:[%s16802_s1 + $0x78] sm:$0xff]   ;;  %v14361_v27 = vld [vmem:[%s16802_s1 + $0x28] sm:$0xff]  }
 0xdd5   : > { %13010 = vmatprep.subr.bf16.mxu1 %v14336_v10  ;;  %v14364_v33 = vld [vmem:[%s16802_s1 + $0x70] sm:$0xff]   ;;  %v14363_v52 = vld [vmem:[%s16802_s1 + $0x20] sm:$0xff]   ;;  %v14366_v53 = vld [vmem:[%s16802_s1 + $0x68] sm:$0xff]  }
 0xdd6   : > { %v14365_v35 = vld [vmem:[%s16802_s1 + $0x18] sm:$0xff]   ;;  %v14368_v40 = vld [vmem:[%s16802_s1 + $0x60] sm:$0xff]   ;;  %v14367_v43 = vld [vmem:[%s16802_s1 + $0x10] sm:$0xff]  }
 0xdd8   : > { %13011 = vmatpush3.bf16.msra.mxu1 %v14337_v45 }
 0xdd9   : > { %13229 = vmatprep.subr.bf16.mxu1 %v14725_v0 }
 0xe22   : > { %v16448_v2 = vpop.f32.mrf.mxu0 }
 0xe24   : > { %v13227_v16 = vpop.f32.mrf.mxu0 }
 0xe26   : > { %v9788_v20 = vpop.f32.mrf.mxu0 }
 0xe28   : > { %v13228_v59 = vpop.f32.mrf.mxu0 }
 0xe39   : > { %v9449_v46 = vpop.permute.xlu0 %9448  ;;  %v9447_v30 = vpop.permute.xlu1 %9446 }
 0xe3a   : > { %v9451_v15 = vsel %vm9450_vm2, %v9447_v30, %v9449_v46  ;;  %v14348_v46 = vld [vmem:[#allocation9 + $0x178] sm:$0xff]  }
 0xe3b   : > { %9454 = vst.msk [vmem:[#allocation3] sm:$0xf] %vm9453_vm4, %v9451_v15  ;;  %v14349_v30 = vld [vmem:[#allocation9 + $0x138] sm:$0xff]   ;;  %v14350_v15 = vld [vmem:[#allocation9 + $0x170] sm:$0xff]   ;;  %vm10706_vm4 = vcmask 486784  }
 0xe3d   : > { %v9472_v49 = vpop.permute.xlu0 %9471  ;;  %v9463_v18 = vpop.permute.xlu1 %9462 }
 0xe3e   : > { %9465 = vst.msk [vmem:[#allocation3] sm:$0xf] %vm4068_vm9, %v9463_v18  ;;  %vm9494_vm9 = vcmask 1044865  }
 0xe3f   : > { %9467 = vst.msk [vmem:[#allocation3 + $0x8] sm:$0xf] %vm9466_vm8, %v9463_v18  ;;  %v14357_v18 = vld [vmem:[#allocation9 + $0x120] sm:$0xff]  }
 0xe40   : > { %9475 = vst.msk [vmem:[#allocation3 + $0x8] sm:$0xf] %vm9474_vm10, %v9472_v49  ;;  %v14356_v49 = vld [vmem:[#allocation9 + $0x160] sm:$0xff]   ;;  %vm10716_vm10 = vcmask 650784  }
 0xe45   : > { %v9476_v8 = vld [vmem:[#allocation3] sm:$0xf] }
 0xe46   : > { %10680 = vst.msk [vmem:[#allocation3] sm:$0xf] %vm10664_vm13, %v16440_v19  ;;  %v9484_v4 = vrot.slane %v9476_v8, 7  ;;  %v14369_v8 = vld [vmem:[%s16802_s1 + $0x8] sm:$0xff]  }
 0xe47   : > { %v9477_v56 = vld [vmem:[#allocation3 + $0x8] sm:$0xf] }
 0xe48   : > { %v9485_v5 = vrot.slane %v9477_v56, 7  ;;  %9486 = vrot.lane.b32.xlu1 %v9484_v4, %s16801_s26 }
 0xe4a   : > { %9488 = vrot.lane.b32.xlu0 %v9485_v5, %s16801_s26 }
 0xeba   : > { %v9487_v1 = vpop.permute.xlu1 %9486 }
 0xebb   : > { %9495 = vst.msk [vmem:[#allocation2] sm:$0x1e] %vm9494_vm9, %v9487_v1  ;;  %vm10642_vm9 = vcmask 453952  }
 0xebc   : > { %v9489_v6 = vpop.permute.xlu0 %9488 }
 0xebd   : > { %v9491_v60 = vsel %vm9490_vm5, %v9487_v1, %v9489_v6  ;;  %vm10647_vm5 = vcmask 650688  }
 0xebe   : > { %9497 = vst.msk [vmem:[#allocation2 + $0x8] sm:$0x1e] %vm9496_vm11, %v9491_v60  ;;  %vm10652_vm11 = vcmask 781952  }
 0xec2   : > { %v9498_v7 = vld [vmem:[#allocation2] sm:$0x3f] }
 0xec3   : > { %10235 = vst [vmem:[#allocation2] sm:$0x3f] %v14725_v0  ;;  %v16451_v44 = vpack.c.bf16 %v9498_v7, %v9498_v7 }
 0xec5   : > { %v9499_v34 = vld [vmem:[#allocation2 + $0x8] sm:$0x3f]  ;;  %v9580_v24 = vshll.u32 %v16451_v44, 16  ;;  %v9578_v55 = vshrl.u32 %v16451_v44, 16  ;;  %v10021_v17 = vrot.slane %v16451_v44, 1 }
 0xec6   : > { %v9502_v21 = vpack.c.bf16 %v9499_v34, %v9499_v34  ;;  %10237 = vst.msk [vmem:[#allocation2 + $0x8] sm:$0x3f] %vm10236_vm12, %v14725_v0  ;;  %vm10657_vm12 = vcmask 978688  }
 0xec7   : > { %v9582_v37 = vrot.slane %v9580_v24, 1 }
 0xec8   : > { %9933 = vmatprep.mubr.bf16.mxu0 %v9502_v21  ;;  %v9587_v9 = vshll.u32 %v9502_v21, 16  ;;  %v9585_v39 = vshrl.u32 %v9502_v21, 16  ;;  %v10022_v62 = vrot.slane %v9502_v21, 1 }
 0xec9   : > { %9934 = vmatmul.mubr.bf16.vlgmr.msra.gmra.mxu0 %v16451_v44  ;;  %v9583_v63 = vor.u32 %v9582_v37, %v9578_v55 }
 0xeca   : > { %v9589_v22 = vrot.slane %v9587_v9, 1  ;;  %13238 = vmatpush3.bf16.msra.mxu0 %v14352_v28  ;;  %13241 = vmatprep.mubr.msk.bf16.mxu0 %vm14736_vm15, %v14725_v0 }
 0xecb   : > { %13239 = vmatprep.subr.bf16.mxu0 %v14725_v0 }
 0xecc   : > { %v9590_v42 = vor.u32 %v9589_v22, %v9585_v39 }
 0xece   : > { %9743 = vmatprep.mubr.bf16.mxu1 %v9590_v42  ;;  %13240 = vmatpush3.bf16.msra.mxu0 %v14355_v38  ;;  %v14370_v42 = vld [vmem:[%s16802_s1 + $0x58] sm:$0xff]  }
 0xecf   : > { %9744 = vmatmul.mubr.bf16.vlgmr.msra.gmra.mxu1 %v9583_v63  ;;  %10358 = vmatprep.subr.bf16.mxu0 %v14727_v14 }
 0xed0   : > { %13230 = vmatpush3.bf16.msra.mxu1 %v14338_v57  ;;  %13233 = vmatprep.mubr.msk.bf16.mxu1 %vm14736_vm15, %v14725_v0  ;;  %v14371_v57 = vld [vmem:[%s16802_s1] sm:$0xff]  }
 0xed1   : > { %13231 = vmatprep.subr.bf16.mxu1 %v14725_v0  ;;  %13242 = vmatmul.mubr.msk.bf16.vlgmr.msra.gmra.mxu0 %vm5910_vm3, %v10023_v29 }
 0xed2   : > { %10359 = vmatpush1.bf16.msra.mxu0 %v14360_v13 }
 0xed3   : > { %10360 = vmatprep.subr.bf16.mxu0 %v14727_v14 }
 0xed4   : > { %13232 = vmatpush3.bf16.msra.mxu1 %v14339_v47  ;;  %v12684_v47 = vld [vmem:[%s16803_s7] ss:$0 sm:$0xff]  ;;  %s16806_s7 = smov 12  }
 0xed5   : > { %13046 = vmatprep.subr.bf16.mxu1 %v14340_v61 }
 0xed6   : > { %10361 = vmatpush1.bf16.msra.mxu0 %v14362_v51 }
 0xed7   : > { %13234 = vmatmul.mubr.msk.bf16.vlgmr.msra.gmra.mxu1 %vm5910_vm3, %v16428_v26  ;;  %v14351_v26 = vld [vmem:[#allocation9 + $0x130] sm:$0xff]   ;;  %10362 = vmatprep.subr.bf16.mxu0 %v14727_v14  ;;  %vm10243_vm3 = vcmask 979137  }
 0xed8   : > { %13047 = vmatpush3.bf16.msra.mxu1 %v14341_v25  ;;  %10169 = vmatprep.mubr.bf16.mxu1 %v10022_v62  ;;  %v12685_v62 = vld [vmem:[%s16804_s3] ss:$0 sm:$0xff]  ;;  %s16805_s3 = smov 24  }
 0xed9   : > { %13048 = vmatprep.subr.bf16.mxu1 %v14342_v41  ;;  %v14373_v41 = vld [vmem:[%s16802_s1 + $0x40] sm:$0xff]  }
 0xeda   : > { %10363 = vmatpush1.bf16.msra.mxu0 %v14364_v33 }
 0xedb   : > { %10364 = vmatprep.subr.bf16.mxu0 %v14727_v14 }
 0xedc   : > { %13049 = vmatpush3.bf16.msra.mxu1 %v14343_v11 }
 0xedd   : > { %13050 = vmatprep.subr.bf16.mxu1 %v14344_v48 }
 0xede   : > { %10365 = vmatpush1.bf16.msra.mxu0 %v14366_v53 }
 0xedf   : > { %10366 = vmatprep.subr.bf16.mxu0 %v14727_v14 }
 0xee0   : > { %13051 = vmatpush3.bf16.msra.mxu1 %v14345_v12  ;;  %v14374_v12 = vld [vmem:[%s16802_s1 + $0x48] sm:$0xff]  }
 0xee1   : > { %13052 = vmatprep.subr.bf16.mxu1 %v14346_v32  ;;  %v10246_v32 = vld [vmem:[#allocation2 + $0x8] sm:$0x3f] }
 0xee2   : > { %10367 = vmatpush1.bf16.msra.mxu0 %v14368_v40 }
 0xee3   : > { %10368 = vmatprep.subr.bf16.mxu0 %v14727_v14 }
 0xee4   : > { %13053 = vmatpush3.bf16.msra.mxu1 %v14347_v23  ;;  %v10248_v23 = vpack.c.bf16 %v10246_v32, %v10246_v32 }
 0xee5   : > { %13054 = vmatprep.subr.bf16.mxu1 %v14348_v46 }
 0xee6   : > { %10369 = vmatpush1.bf16.msra.mxu0 %v14370_v42  ;;  %v10516_v53 = vrot.slane %v10248_v23, 1 }
 0xee7   : > { %10370 = vmatprep.subr.bf16.mxu0 %v14727_v14 }
 0xee8   : > { %13055 = vmatpush3.bf16.msra.mxu1 %v14349_v30 }
 0xee9   : > { %13056 = vmatprep.subr.bf16.mxu1 %v14350_v15  ;;  %v14375_v15 = vld [vmem:[%s16802_s1 + $0x88] sm:$0xff]  }
 0xeec   : > { %13057 = vmatpush3.bf16.msra.mxu1 %v14351_v26  ;;  %v10294_v26 = vshrl.u32 %v10248_v23, 16 }
 0xeed   : > { %13058 = vmatprep.subr.bf16.mxu1 %v14353_v31  ;;  %v10296_v31 = vshll.u32 %v10248_v23, 16 }
 0xef0   : > { %13059 = vmatpush3.bf16.msra.mxu1 %v14354_v58  ;;  %v10298_v58 = vrot.slane %v10296_v31, 1 }
 0xef1   : > { %13060 = vmatprep.subr.bf16.mxu1 %v14356_v49 }
 0xef2   : > { %v10299_v49 = vor.u32 %v10298_v58, %v10294_v26 }
 0xef4   : > { %13061 = vmatpush3.bf16.msra.mxu1 %v14357_v18  ;;  %12713 = vmatprep.mubr.msk.bf16.mxu0 %vm2340_vm14, %v10299_v49 }
 0xef5   : > { %10454 = vmatprep.subr.bf16.mxu1 %v14727_v14 }
 0xef7   : > { %10170 = vmatmul.mubr.bf16.vlgmr.msra.gmra.mxu1 %v10021_v17 }
 0xef8   : > { %10455 = vmatpush1.bf16.msra.mxu1 %v14358_v3  ;;  %12723 = vmatprep.mubr.msk.bf16.mxu1 %vm2340_vm14, %v10248_v23 }
 0xef9   : > { %10456 = vmatprep.subr.bf16.mxu1 %v14727_v14 }
 0xefc   : > { %10457 = vmatpush1.bf16.msra.mxu1 %v14359_v50 }
 0xefd   : > { %10458 = vmatprep.subr.bf16.mxu1 %v14727_v14 }
 0xf00   : > { %10459 = vmatpush1.bf16.msra.mxu1 %v14361_v27 }
 0xf01   : > { %10460 = vmatprep.subr.bf16.mxu1 %v14727_v14 }
 0xf04   : > { %10461 = vmatpush1.bf16.msra.mxu1 %v14363_v52  ;;  %v14376_v52 = vld [vmem:[%s16802_s1 + $0xc8] sm:$0xff]  }
 0xf05   : > { %10462 = vmatprep.subr.bf16.mxu1 %v14727_v14 }
 0xf08   : > { %10463 = vmatpush1.bf16.msra.mxu1 %v14365_v35 }
 0xf09   : > { %10464 = vmatprep.subr.bf16.mxu1 %v14727_v14 }
 0xf0c   : > { %10465 = vmatpush1.bf16.msra.mxu1 %v14367_v43  ;;  %v14377_v43 = vld [vmem:[%s16802_s1 + $0xc0] sm:$0xff]  }
 0xf0d   : > { %10466 = vmatprep.subr.bf16.mxu1 %v14727_v14 }
 0xf10   : > { %10467 = vmatpush1.bf16.msra.mxu1 %v14369_v8  ;;  %v14378_v8 = vld [vmem:[%s16802_s1 + $0xb8] sm:$0xff]  }
 0xf11   : > { %10468 = vmatprep.subr.bf16.mxu1 %v14727_v14 }
 0xf14   : > { %10469 = vmatpush1.bf16.msra.mxu1 %v14371_v57 }
 0xf15   : > { %10484 = vmatprep.subr.bf16.mxu1 %v14727_v14 }
 0xf18   : > { %10485 = vmatpush2.bf16.msra.mxu1 %v14373_v41 }
 0xf19   : > { %13245 = vmatprep.subr.bf16.mxu1 %v14725_v0 }
 0xf89   : > { %v13037_v54 = vpop.f32.mrf.mxu0 }
 0xf8b   : > { %v13038_v4 = vpop.f32.mrf.mxu0 }
 0xf8c   : > { %v13039_v9 = vadd.f32 %v13038_v4, %v13037_v54  ;;  %v14379_v54 = vld [vmem:[%s16802_s1 + $0xb0] sm:$0xff]   ;;  %v14380_v4 = vld [vmem:[%s16802_s1 + $0xa8] sm:$0xff]  }
 0xf8d   : > { %v13040_v56 = vpop.f32.mrf.mxu0 }
 0xf8e   : > { %v14381_v56 = vld [vmem:[%s16802_s1 + $0xa0] sm:$0xff]  }
 0xf8f   : > { %v13012_v5 = vpop.f32.mrf.mxu1  ;;  %v13041_v10 = vpop.f32.mrf.mxu0 }
 0xf90   : > { %v14383_v10 = vld [vmem:[%s16802_s1 + $0x90] sm:$0xff]  }
 0xf91   : > { %v13013_v45 = vpop.f32.mrf.mxu1  ;;  %v10211_v16 = vpop.f32.mrf.mxu0 }
 0xf92   : > { %v13014_v24 = vadd.f32 %v13013_v45, %v13012_v5  ;;  %v14382_v5 = vld [vmem:[%s16802_s1 + $0x98] sm:$0xff]   ;;  %v14384_v45 = vld [vmem:[%s16802_s1 + $0xd0] sm:$0xff]  }
 0xf93   : > { %v13015_v20 = vpop.f32.mrf.mxu1  ;;  %v13243_v59 = vpop.f32.mrf.mxu0 }
 0xf94   : > { %v9786_v28 = vadd.f32 %v13014_v24, %v16448_v2  ;;  %v14372_v2 = vld [vmem:[%s16802_s1 + $0x50] sm:$0xff]   ;;  %s16812_s1 = smov 8  }
 0xf95   : > { %v13016_v1 = vpop.f32.mrf.mxu1  ;;  %v10214_v6 = vpop.f32.mrf.mxu0  ;;  %10371 = vmatpush1.bf16.msra.mxu0 %v14372_v2 }
 0xf96   : > { %v9936_v39 = vadd.f32 %v13039_v9, %v9786_v28  ;;  %10372 = vmatprep.subr.bf16.mxu0 %v14727_v14 }
 0xf97   : > { %v9975_v60 = vpop.f32.mrf.mxu1  ;;  %v13244_v7 = vpop.f32.mrf.mxu0 }
 0xf98   : > { %v9976_v63 = vadd.f32 %v9975_v60, %v9936_v39 }
 0xf99   : > { %v13235_v44 = vpop.f32.mrf.mxu1  ;;  %10373 = vmatpush1.bf16.msra.mxu0 %v14374_v12 }
 0xf9a   : > { %10388 = vmatprep.subr.bf16.mxu0 %v14727_v14 }
 0xf9b   : > { %v9978_v34 = vpop.f32.mrf.mxu1 }
 0xf9d   : > { %v13236_v21 = vpop.f32.mrf.mxu1  ;;  %10389 = vmatpush2.bf16.msra.mxu0 %v14375_v15 }
 0xf9e   : > { %10575 = vmatprep.subr.bf16.mxu0 %v14727_v14 }
 0xfb7   : > { %v13062_v37 = vpop.f32.mrf.mxu1 }
 0xfb9   : > { %v13063_v22 = vpop.f32.mrf.mxu1 }
 0xfba   : > { %v13064_v38 = vadd.f32 %v13063_v22, %v13062_v37 }
 0xfbb   : > { %v13065_v55 = vpop.f32.mrf.mxu1 }
 0xfbc   : > { %v10212_v29 = vadd.f32 %v13064_v38, %v10211_v16 }
 0xfbd   : > { %v13066_v61 = vpop.f32.mrf.mxu1 }
 0xfbe   : > { %v10217_v25 = vadd.f32 %v10212_v29, %v9976_v63 }
 0xfc0   : > { %v10225_v11 = vmul.f32 %v12684_v47, %v10217_v25 }
 0xfc2   : > { %v10233_v48 = vadd.f32 %v12685_v62, %v10225_v11 }
 0xfc4   : > { %v10234_v46 = vmax.f32 %v10233_v48, 0.0 }
 0xfc6   : > { %v10239_v30 = vrot.slane %v10234_v46, 7 }
 0xfc8   : > { %10240 = vrot.lane.b32.xlu1 %v10239_v30, %s16805_s3 }
 0xfcc   : > { %10688 = vrot.lane.b32.xlu1 %v16440_v19, %s16806_s7  ;;  %s16811_s7 = sld [smem:[#allocation43_spill]] }
 0xfd0   : > { %10698 = vrot.lane.b32.xlu1 %v16440_v19, %s16805_s3 }
 0xfd2   : > { %v12753_v39 = vld [vmem:[%s16811_s7] ss:$0 sm:$0xff] }
 0xfd4   : > { %10708 = vrot.lane.b32.xlu1 %v16440_v19, %s14743_s5  ;;  %s16809_s5 = sld [smem:[#allocation44_spill]] }
 0xfd8   : > { %10634 = vrot.lane.b32.xlu1 %v10234_v46, %s16807_s6 }
 0xfda   : > { %v14385_v21 = vld [vmem:[%s16809_s5 + $0x20] sm:$0xff]   ;;  %v14386_v9 = vld [vmem:[%s16809_s5 + $0x18] sm:$0xff]   ;;  %v14387_v42 = vld [vmem:[%s16809_s5 + $0x10] sm:$0xff]  }
 0xfdb   : > { %v14388_v47 = vld [vmem:[%s16809_s5 + $0x8] sm:$0xff]   ;;  %v14389_v61 = vld [vmem:[%s16809_s5] sm:$0xff]  }
 0xfdc   : > { %10644 = vrot.lane.b32.xlu1 %v10234_v46, %s16798_s23 }
 0xfe0   : > { %10654 = vrot.lane.b32.xlu1 %v10234_v46, %s16801_s26 }
 0xfe4   : > { %10666 = vrot.lane.b32.xlu1 %v10234_v46, %s16808_s8  ;;  %s16810_s8 = sld [smem:[#allocation42_spill]] }
 0xfea   : > { %v12752_v28 = vld [vmem:[%s16810_s8] ss:$0 sm:$0xff]  ;;  %s14744_s8 = smov 72  }
0x103a   : > { %v10241_v18 = vpop.permute.xlu1 %10240 }
0x103b   : > { %10244 = vst.msk [vmem:[#allocation2] sm:$0x1e] %vm10243_vm3, %v10241_v18  ;;  %vm10662_vm3 = vcmask 1044416  }
0x103e   : > { %v16521_v17 = vpop.permute.xlu1 %10688 }
0x1042   : > { %v16523_v3 = vpop.permute.xlu1 %10698  ;;  %v10245_v13 = vld [vmem:[#allocation2] sm:$0x3f] }
0x1043   : > { %v10247_v50 = vpack.c.bf16 %v10245_v13, %v10245_v13  ;;  %10633 = vst.msk [vmem:[#allocation2] sm:$0xf] %vm9466_vm8, %v15878_v36  ;;  %vm10711_vm8 = vcmask 552416  }
0x1045   : > { %10487 = vmatmul.mubr.bf16.vlgmr.msra.gmra.mxu1 %v10247_v50  ;;  %v10289_v19 = vshll.u32 %v10247_v50, 16  ;;  %v10287_v27 = vshrl.u32 %v10247_v50, 16  ;;  %v10515_v16 = vrot.slane %v10247_v50, 1 }
0x1046   : > { %v16527_v51 = vpop.permute.xlu1 %10708  ;;  %13255 = vmatprep.mubr.msk.bf16.mxu1 %vm14736_vm15, %v14725_v0  ;;  %13246 = vmatpush3.bf16.msra.mxu1 %v14385_v21  ;;  %vm10691_vm15 = vcmask 224416  }
0x1047   : > { %v10291_v33 = vrot.slane %v10289_v19, 1  ;;  %13247 = vmatprep.subr.bf16.mxu1 %v14725_v0 }
0x1049   : > { %v10292_v35 = vor.u32 %v10291_v33, %v10287_v27 }
0x104a   : > { %v10635_v40 = vpop.permute.xlu1 %10634  ;;  %13248 = vmatpush3.bf16.msra.mxu1 %v14386_v9 }
0x104b   : > { %10638 = vst.msk [vmem:[#allocation2] sm:$0xf] %vm10637_vm0, %v10635_v40  ;;  %10391 = vmatmul.mubr.bf16.vlgmr.msra.gmra.mxu0 %v10292_v35  ;;  %13249 = vmatprep.subr.bf16.mxu1 %v14725_v0  ;;  %vm10669_vm0 = vcmask 257088  }
0x104c   : > { %10576 = vmatpush1.bf16.msra.mxu0 %v14376_v52  ;;  %12751 = vmatprep.mubr.msk.bf16.mxu0 %vm2340_vm14, %v10516_v53  ;;  %vm10685_vm14 = vcmask 158784  }
0x104d   : > { %10577 = vmatprep.subr.bf16.mxu0 %v14727_v14 }
0x104e   : > { %13250 = vmatpush3.bf16.msra.mxu1 %v14387_v42  ;;  %v10645_v41 = vpop.permute.xlu1 %10644 }
0x104f   : > { %13251 = vmatprep.subr.bf16.mxu1 %v14725_v0 }
0x1050   : > { %10578 = vmatpush1.bf16.msra.mxu0 %v14377_v43 }
0x1051   : > { %10579 = vmatprep.subr.bf16.mxu0 %v14727_v14 }
0x1052   : > { %13252 = vmatpush3.bf16.msra.mxu1 %v14388_v47  ;;  %v10655_v11 = vpop.permute.xlu1 %10654 }
0x1053   : > { %13253 = vmatprep.subr.bf16.mxu1 %v14725_v0 }
0x1054   : > { %10580 = vmatpush1.bf16.msra.mxu0 %v14378_v8 }
0x1055   : > { %10581 = vmatprep.subr.bf16.mxu0 %v14727_v14 }
0x1056   : > { %13254 = vmatpush3.bf16.msra.mxu1 %v14389_v61  ;;  %v10667_v46 = vpop.permute.xlu1 %10666 }
0x1058   : > { %10582 = vmatpush1.bf16.msra.mxu0 %v14379_v54 }
0x1059   : > { %10583 = vmatprep.subr.bf16.mxu0 %v14727_v14 }
0x105c   : > { %10584 = vmatpush1.bf16.msra.mxu0 %v14380_v4 }
0x105d   : > { %10585 = vmatprep.subr.bf16.mxu0 %v14727_v14 }
0x1060   : > { %10586 = vmatpush1.bf16.msra.mxu0 %v14381_v56 }
0x1061   : > { %10587 = vmatprep.subr.bf16.mxu0 %v14727_v14 }
0x1064   : > { %10588 = vmatpush1.bf16.msra.mxu0 %v14382_v5 }
0x1065   : > { %10589 = vmatprep.subr.bf16.mxu0 %v14727_v14 }
0x1068   : > { %10590 = vmatpush1.bf16.msra.mxu0 %v14383_v10 }
0x1069   : > { %10605 = vmatprep.subr.bf16.mxu0 %v14727_v14 }
0x106c   : > { %10606 = vmatpush2.bf16.msra.mxu0 %v14384_v45 }
0x106f   : > { %10608 = vmatmul.mubr.bf16.vlgmr.msra.gmra.mxu0 %v10515_v16 }
0x1105   : > { %v10488_v20 = vpop.f32.mrf.mxu1 }
0x1107   : > { %v10490_v59 = vpop.f32.mrf.mxu1 }
0x1109   : > { %v10491_v1 = vpop.f32.mrf.mxu1 }
0x110b   : > { %v10392_v6 = vpop.f32.mrf.mxu0  ;;  %v10492_v60 = vpop.f32.mrf.mxu1 }
0x110c   : > { %v10489_v24 = vadd.f32 %v10488_v20, %v10392_v6 }
0x110d   : > { %v10394_v7 = vpop.f32.mrf.mxu0 }
0x110f   : > { %v10395_v44 = vpop.f32.mrf.mxu0 }
0x1111   : > { %v10396_v34 = vpop.f32.mrf.mxu0 }
0x112f   : > { %v10609_v14 = vpop.f32.mrf.mxu0 }
0x1130   : > { %v10615_v37 = vadd.f32 %v10609_v14, %v10489_v24 }
0x1131   : > { %v10611_v22 = vpop.f32.mrf.mxu0 }
0x1132   : > { %v10623_v38 = vmul.f32 %v12752_v28, %v10615_v37 }
0x1133   : > { %v10612_v55 = vpop.f32.mrf.mxu0 }
0x1134   : > { %v10631_v57 = vadd.f32 %v12753_v39, %v10623_v38 }
0x1135   : > { %v10613_v63 = vpop.f32.mrf.mxu0 }
0x1136   : > { %v10632_v29 = vmax.f32 %v10631_v57, 0.0 }
0x1138   : > { %10682 = vrot.lane.b32.xlu0 %v10632_v29, %s16812_s1  ;;  %s10827_s1 = sand.u32 1, %s14947_s0  }
0x1139   : > { %s16584_s5 = scalar_lea.sflag [#allocation12], %s10827_s1 }
0x113c   : > { %10693 = vrot.lane.b32.xlu0 %v10632_v29, %s16807_s6  ;;  %s16813_s6 = sld [smem:[#allocation48_spill]] }
0x1140   : > { %10703 = vrot.lane.b32.xlu0 %v10632_v29, %s16805_s3 }
0x1144   : > { %10713 = vrot.lane.b32.xlu0 %v10632_v29, %s16798_s23  ;;  %s16814_s23 = sshll.u32 %s15311_s11, 3 }
0x1148   : > { %10639 = vrot.lane.b32.xlu0 %v15878_v36, %s16805_s3  ;;  %s16737_s3 = sshll.u32 %s14947_s0, 7 }
0x1149   : > { %s10873_s7 = scalar_lea.hbm %s16813_s6, %s16737_s3 }
0x114c   : > { %10649 = vrot.lane.b32.xlu0 %v15878_v36, %s16801_s26  ;;  %s1068_s26 = scalar_lea.vmem [#allocation11], %s16814_s23 }
0x1150   : > { %10659 = vrot.lane.b32.xlu0 %v15878_v36, %s14744_s8  ;;  %s10875_s8 = sshll.u32 %s1068_s26, 4  ;;  %s10876_s8 = int_to_ptr.vmem [resolvable:$true] %s10875_s8 }
0x1151   : > { %s14471_s9 = scalar_lea.vmem %s10876_s8, 128  ;;  %p14478_p4 = scmp.lt.s32.totalorder %s10876_s8, %s14476_s13 }
0x1152   : > { %p14472_p12 = scmp.ne.s32.totalorder %s10876_s8, %s14471_s9  ;;  %p14479_p7 = scmp.lt.s32.totalorder %s14477_s14, %s14471_s9 }
0x1154   : > { %p14473_p9 = pnand %p14472_p12, %p16815_p2  ;;  %p14480_p5 = por %p14479_p7, %p14478_p4 }
0x1156   : > { %p14474_p3 = pneg %p14473_p9 }
0x1158   : > { %p14481_p6 = pnand %p14480_p5, %p14474_p3 }
0x11aa   : > { %v10683_v0 = vpop.permute.xlu0 %10682 }
0x11ab   : > { %10686 = vst.msk [vmem:[#allocation3] sm:$0xf] %vm10685_vm14, %v10683_v0  ;;  %vm10677_vm14 = vcmask 261124  }
0x11ac   : > { %10692 = vst.msk [vmem:[#allocation3] sm:$0xf] %vm10691_vm15, %v16521_v17  ;;  %vm10678_vm15 = vmor %vm10677_vm14, %vm1111_vm1 }
0x11ae   : > { %v10694_v25 = vpop.permute.xlu0 %10693 }
0x11af   : > { %10697 = vst.msk [vmem:[#allocation3] sm:$0xf] %vm10696_vm7, %v10694_v25 }
0x11b0   : > { %10702 = vst.msk [vmem:[#allocation3] sm:$0xf] %vm10701_vm6, %v16523_v3 }
0x11b2   : > { %v10704_v2 = vpop.permute.xlu0 %10703 }
0x11b3   : > { %10707 = vst.msk [vmem:[#allocation3] sm:$0xf] %vm10706_vm4, %v10704_v2 }
0x11b4   : > { %10712 = vst.msk [vmem:[#allocation3] sm:$0xf] %vm10711_vm8, %v16527_v51 }
0x11b6   : > { %v10714_v36 = vpop.permute.xlu0 %10713 }
0x11b7   : > { %10717 = vst.msk [vmem:[#allocation3] sm:$0xf] %vm10716_vm10, %v10714_v36 }
0x11ba   : > { %v10640_v62 = vpop.permute.xlu0 %10639 }
0x11bb   : > { %10643 = vst.msk [vmem:[#allocation2] sm:$0xf] %vm10642_vm9, %v10640_v62 }
0x11bc   : > { %10648 = vst.msk [vmem:[#allocation2] sm:$0xf] %vm10647_vm5, %v10645_v41 }
0x11be   : > { %v10650_v48 = vpop.permute.xlu0 %10649  ;;  %v10718_v12 = vld [vmem:[#allocation3] sm:$0xf] }
0x11bf   : > { %10653 = vst.msk [vmem:[#allocation2] sm:$0xf] %vm10652_vm11, %v10650_v48  ;;  %v10719_v32 = vpack.c.bf16 %v10718_v12, %v10718_v12 }
0x11c0   : > { %10658 = vst.msk [vmem:[#allocation2] sm:$0xf] %vm10657_vm12, %v10655_v11 }
0x11c1   : > { %13256 = vmatmul.mubr.msk.bf16.vlgmr.msra.gmra.mxu1 %vm9450_vm2, %v10719_v32 }
0x11c2   : > { %v10660_v23 = vpop.permute.xlu0 %10659 }
0x11c3   : > { %10663 = vst.msk [vmem:[#allocation2] sm:$0xf] %vm10662_vm3, %v10660_v23 }
0x11c4   : > { %10665 = vst.msk [vmem:[#allocation2 + $0x8] sm:$0xf] %vm10664_vm13, %v10660_v23 }
0x11c5   : > { %10670 = vst.msk [vmem:[#allocation2 + $0x8] sm:$0xf] %vm10669_vm0, %v10667_v46 }
0x11cc   : > { %v14390_v30 = vld [vmem:[#allocation2] ss:$8 sps:$4 sm:$0xff]  }
0x11cd   : > { %10679 = vst.msk [vmem:[%s1068_s26] sm:$0xff] %vm10678_vm15, %v14390_v30 }
0x11ce   : > { %14484 = shalt.err (!%p14481_p6)
}
0x11cf   : > { %s14485_s23 = scalar_lea.hbm %s10873_s7, 128  ;;  %s14489_s26 = scalar_lea.hbm %s16813_s6, 256 }
0x11d0   : > { %p14486_p10 = scmp.ne.s32.totalorder %s10873_s7, %s14485_s23  ;;  %p14490_p11 = scmp.lt.s32.totalorder %s10873_s7, %s16813_s6 }
0x11d1   : > { %p14491_p0 = scmp.lt.s32.totalorder %s14489_s26, %s14485_s23 }
0x11d2   : > { %p14487_p8 = pnand %p14486_p10, %p16815_p2 }
0x11d3   : > { %p14492_p1 = por %p14491_p0, %p14490_p11 }
0x11d4   : > { %p14488_p13 = pneg %p14487_p8 }
0x11d6   : > { %p14493_p12 = pnand %p14492_p1, %p14488_p13 }
0x11d8   : > { %14496 = shalt.err (!%p14493_p12)
}
0x11d9   : > { %13274 = dma.vmem_to_hbm [thread:$0]  (%p16815_p2), %s10876_s8, 128, %s10873_s7, %s16584_s5  }
0x11da   : > { %s12780_s9 = sshll.u32 %s14947_s0, 8  ;;  %s10902_s13 = sshll.u32 %s16232_s15, 4  ;;  %s10903_s13 = int_to_ptr.vmem [resolvable:$true] %s10902_s13 }
0x11db   : > { %s10900_s14 = scalar_lea.hbm %s14914_s20, %s12780_s9  ;;  %s16602_s12 = scalar_lea.sflag [#allocation15], %s10827_s1 }
0x11dc   : > { %s14497_s23 = scalar_lea.vmem %s10903_s13, 256  ;;  %s14746_s26 = smov [#allocation14]  }
0x11dd   : > { %p14498_p9 = scmp.ne.s32.totalorder %s10903_s13, %s14497_s23  ;;  %s14501_s3 = sshll.u32 %s14746_s26, 4  ;;  %s14502_s3 = int_to_ptr.vmem [resolvable:$false] %s14501_s3 }
0x11de   : > { %s14503_s6 = scalar_lea.vmem %s14502_s3, 512  ;;  %p14504_p7 = scmp.lt.s32.totalorder %s10903_s13, %s14502_s3 }
0x11df   : > { %p14499_p3 = pnand %p14498_p9, %p16815_p2  ;;  %p14505_p5 = scmp.lt.s32.totalorder %s14503_s6, %s14497_s23 }
0x11e1   : > { %p14500_p4 = pneg %p14499_p3  ;;  %p14506_p6 = por %p14505_p5, %p14504_p7 }
0x11e3   : > { %p14507_p10 = pnand %p14506_p6, %p14500_p4 }
0x11e5   : > { %14510 = shalt.err (!%p14507_p10)
}
0x11e6   : > { %s14511_s15 = scalar_lea.hbm %s10900_s14, 256  ;;  %s14515_s1 = scalar_lea.hbm %s14914_s20, 512 }
0x11e7   : > { %p14512_p8 = scmp.ne.s32.totalorder %s10900_s14, %s14511_s15  ;;  %p14516_p0 = scmp.lt.s32.totalorder %s10900_s14, %s14914_s20 }
0x11e8   : > { %p14517_p1 = scmp.lt.s32.totalorder %s14515_s1, %s14511_s15 }
0x11e9   : > { %p14513_p13 = pnand %p14512_p8, %p16815_p2 }
0x11ea   : > { %p14518_p12 = por %p14517_p1, %p14516_p0 }
0x11eb   : > { %p14514_p11 = pneg %p14513_p13 }
0x11ed   : > { %p14519_p9 = pnand %p14518_p12, %p14514_p11 }
0x11ef   : > { %14522 = shalt.err (!%p14519_p9)
}
0x11f0   : > { %13276 = dma.vmem_to_hbm [thread:$0]  (%p16815_p2), %s10903_s13, 256, %s10900_s14, %s16602_s12  }
0x11f1   : > { %s16816_s6 = sshll.u32 %s14947_s0, 7  ;;  %s16621_s7 = scalar_lea.hbm %s14919_s27, %s12780_s9 }
0x11f2   : > { %s16616_s3 = scalar_lea.hbm %s14909_s30, %s16816_s6  ;;  %s10888_s8 = sshll.u32 %s15327_s2, 4  ;;  %s10889_s8 = int_to_ptr.vmem [resolvable:$true] %s10888_s8 }
0x11f3   : > { %s10916_s23 = sshll.u32 %s15527_s22, 4  ;;  %s14523_s26 = scalar_lea.vmem %s10889_s8, 128  ;;  %s10917_s23 = int_to_ptr.vmem [resolvable:$true] %s10916_s23 }
0x11f4   : > { %p14524_p3 = scmp.ne.s32.totalorder %s10889_s8, %s14523_s26  ;;  %s14747_s15 = smov [#allocation13]  }
0x11f5   : > { %s14527_s1 = sshll.u32 %s14747_s15, 4  ;;  %s14528_s1 = int_to_ptr.vmem [resolvable:$false] %s14527_s1 }
0x11f6   : > { %p14525_p4 = pnand %p14524_p3, %p16815_p2  ;;  %s14529_s16 = scalar_lea.vmem %s14528_s1, 256 }
0x11f7   : > { %p14530_p5 = scmp.lt.s32.totalorder %s10889_s8, %s14528_s1  ;;  %p14531_p6 = scmp.lt.s32.totalorder %s14529_s16, %s14523_s26 }
0x11f8   : > { %p14526_p7 = pneg %p14525_p4 }
0x11f9   : > { %p14532_p10 = por %p14531_p6, %p14530_p5 }
0x11fb   : > { %p14533_p8 = pnand %p14532_p10, %p14526_p7 }
0x11fd   : > { %14536 = shalt.err (!%p14533_p8)
}
0x11fe   : > { %s14537_s2 = scalar_lea.hbm %s16616_s3, 128  ;;  %s14541_s22 = scalar_lea.hbm %s14909_s30, 256 }
0x11ff   : > { %p14538_p13 = scmp.ne.s32.totalorder %s16616_s3, %s14537_s2  ;;  %p14542_p1 = scmp.lt.s32.totalorder %s16616_s3, %s14909_s30 }
0x1200   : > { %p14543_p12 = scmp.lt.s32.totalorder %s14541_s22, %s14537_s2 }
0x1201   : > { %p14539_p11 = pnand %p14538_p13, %p16815_p2 }
0x1202   : > { %p14544_p9 = por %p14543_p12, %p14542_p1 }
0x1203   : > { %p14540_p0 = pneg %p14539_p11 }
0x1205   : > { %p14545_p3 = pnand %p14544_p9, %p14540_p0 }
0x1207   : > { %14548 = shalt.err (!%p14545_p3)
}
0x1208   : > { %13275 = dma.vmem_to_hbm [thread:$0]  (%p16815_p2), %s10889_s8, 128, %s16616_s3, %s16584_s5  }
0x1209   : > { %s14549_s16 = scalar_lea.vmem %s10917_s23, 256  ;;  %s14748_s9 = smov [#allocation16]  }
0x120a   : > { %p14550_p4 = scmp.ne.s32.totalorder %s10917_s23, %s14549_s16  ;;  %s14553_s13 = sshll.u32 %s14748_s9, 4  ;;  %s14554_s13 = int_to_ptr.vmem [resolvable:$false] %s14553_s13 }
0x120b   : > { %s14555_s14 = scalar_lea.vmem %s14554_s13, 512  ;;  %p14556_p6 = scmp.lt.s32.totalorder %s10917_s23, %s14554_s13 }
0x120c   : > { %p14551_p7 = pnand %p14550_p4, %p16815_p2  ;;  %p14557_p10 = scmp.lt.s32.totalorder %s14555_s14, %s14549_s16 }
0x120e   : > { %p14552_p5 = pneg %p14551_p7  ;;  %p14558_p8 = por %p14557_p10, %p14556_p6 }
0x1210   : > { %p14559_p13 = pnand %p14558_p8, %p14552_p5 }
0x1212   : > { %14562 = shalt.err (!%p14559_p13)
}
0x1213   : > { %s14563_s5 = scalar_lea.hbm %s16621_s7, 256  ;;  %s14567_s6 = scalar_lea.hbm %s14919_s27, 512 }
0x1214   : > { %p14564_p11 = scmp.ne.s32.totalorder %s16621_s7, %s14563_s5  ;;  %p14568_p12 = scmp.lt.s32.totalorder %s16621_s7, %s14919_s27 }
0x1215   : > { %p14569_p9 = scmp.lt.s32.totalorder %s14567_s6, %s14563_s5 }
0x1216   : > { %p14565_p0 = pnand %p14564_p11, %p16815_p2 }
0x1217   : > { %p14570_p3 = por %p14569_p9, %p14568_p12 }
0x1218   : > { %p14566_p1 = pneg %p14565_p0 }
0x121a   : > { %p14571_p4 = pnand %p14570_p3, %p14566_p1 }
0x121c   : > { %14574 = shalt.err (!%p14571_p4)
}
0x121d   : > { %13277 = dma.vmem_to_hbm [thread:$0]  (%p16815_p2), %s10917_s23, 256, %s16621_s7, %s16602_s12  }
0x121e   : > { %s13260_s3 = smul.u32 384, %s14947_s0  ;;  %s10930_s8 = sshll.u32 %s16398_s18, 4  ;;  %s10931_s8 = int_to_ptr.vmem [resolvable:$true] %s10930_s8 }
0x121f   : > { %s10848_s15 = scalar_lea.sflag [#allocation18], %s15311_s11  ;;  %s14575_s1 = scalar_lea.vmem %s10931_s8, 384 }
0x1220   : > { %s10928_s26 = scalar_lea.hbm %s14924_s4, %s13260_s3  ;;  %p14576_p7 = scmp.ne.s32.totalorder %s10931_s8, %s14575_s1 }
0x1221   : > { %s14749_s2 = smov [#allocation17]  }
0x1222   : > { %p14577_p5 = pnand %p14576_p7, %p16815_p2  ;;  %s14579_s22 = sshll.u32 %s14749_s2, 4  ;;  %s14580_s22 = int_to_ptr.vmem [resolvable:$false] %s14579_s22 }
0x1223   : > { %s14581_s16 = scalar_lea.vmem %s14580_s22, 768  ;;  %p14582_p10 = scmp.lt.s32.totalorder %s10931_s8, %s14580_s22 }
0x1224   : > { %p14578_p6 = pneg %p14577_p5  ;;  %p14583_p8 = scmp.lt.s32.totalorder %s14581_s16, %s14575_s1 }
0x1226   : > { %p14584_p13 = por %p14583_p8, %p14582_p10 }
0x1228   : > { %p14585_p11 = pnand %p14584_p13, %p14578_p6 }
0x122a   : > { %14588 = shalt.err (!%p14585_p11)
}
0x122b   : > { %s14589_s12 = scalar_lea.hbm %s10928_s26, 384  ;;  %s14593_s18 = scalar_lea.hbm %s14924_s4, 768 }
0x122c   : > { %p14590_p0 = scmp.ne.s32.totalorder %s10928_s26, %s14589_s12  ;;  %p14594_p9 = scmp.lt.s32.totalorder %s10928_s26, %s14924_s4 }
0x122d   : > { %p14595_p3 = scmp.lt.s32.totalorder %s14593_s18, %s14589_s12 }
0x122e   : > { %p14591_p1 = pnand %p14590_p0, %p16815_p2 }
0x122f   : > { %p14596_p4 = por %p14595_p3, %p14594_p9 }
0x1230   : > { %p14592_p12 = pneg %p14591_p1 }
0x1232   : > { %p14597_p7 = pnand %p14596_p4, %p14592_p12 }
0x1234   : > { %14600 = shalt.err (!%p14597_p7)
}
0x1235   : > { %s16817_s7 = sld [smem:[#allocation45_spill]]  ;;  %s11217_s13 = sshll.u32 %s15311_s11, 2  ;;  %vm10820_vm1 = vcmask 27648  }
0x1236   : > { %s16818_s23 = sld [smem:[#allocation46_spill]]  ;;  %s12767_s14 = sshll.u32 %s14947_s0, 6 }
0x1237   : > { %s16819_s9 = sld [smem:[#allocation47_spill]]  ;;  %s1061_s5 = scalar_lea.vmem [#allocation10], %s11217_s13 }
0x1238   : > { %13278 = dma.vmem_to_hbm [thread:$0]  (%p16815_p2), %s10931_s8, 384, %s10928_s26, %s10848_s15  }
0x1239   : > { %s10861_s6 = sshll.u32 %s1061_s5, 4  ;;  %s10823_s8 = scalar_lea.sflag [#allocation6], %s15311_s11  ;;  %s10862_s6 = int_to_ptr.vmem [resolvable:$true] %s10861_s6 }
0x123a   : > { %s14601_s26 = scalar_lea.vmem %s10862_s6, 64  ;;  %s14750_s15 = smov [#allocation10]  }
0x123b   : > { %v12760_v15 = vld [vmem:[%s16817_s7] ss:$0 sm:$0xff]  ;;  %p14602_p5 = scmp.ne.s32.totalorder %s10862_s6, %s14601_s26  ;;  %s14605_s1 = sshll.u32 %s14750_s15, 4  ;;  %s14606_s1 = int_to_ptr.vmem [resolvable:$false] %s14605_s1 }
0x123c   : > { %v12761_v31 = vld [vmem:[%s16818_s23] ss:$0 sm:$0xff]  ;;  %s14607_s0 = scalar_lea.vmem %s14606_s1, 128  ;;  %p14608_p8 = scmp.lt.s32.totalorder %s10862_s6, %s14606_s1 }
0x123d   : > { %s16668_s3 = scalar_lea.hbm %s16819_s9, %s12767_s14  ;;  %p14603_p6 = pnand %p14602_p5, %p16815_p2 }
0x123e   : > { %p14609_p13 = scmp.lt.s32.totalorder %s14607_s0, %s14601_s26 }
0x123f   : > { %p14604_p10 = pneg %p14603_p6 }
0x1240   : > { %p14610_p11 = por %p14609_p13, %p14608_p8 }
0x1242   : > { %p14611_p0 = pnand %p14610_p11, %p14604_p10 }
0x1281   : > { %v10797_v26 = vpop.f32.mrf.mxu1 }
0x1282   : > { %v10810_v58 = vmul.f32 %v12760_v15, %v10797_v26 }
0x1283   : > { %v13257_v49 = vpop.f32.mrf.mxu1 }
0x1284   : > { %v10818_v18 = vadd.f32 %v12761_v31, %v10810_v58 }
0x1285   : > { %v10800_v17 = vpop.f32.mrf.mxu1 }
0x1286   : > { %v10819_v3 = vmax.f32 %v10818_v18, 0.0 }
0x1287   : > { %v13258_v13 = vpop.f32.mrf.mxu1 }
0x1288   : > { %10821 = vst.msk [vmem:[%s1061_s5] sm:$0xf] %vm10820_vm1, %v10819_v3 }
0x1289   : > { %14614 = shalt.err (!%p14611_p0)
}
0x128a   : > { %s14615_s11 = scalar_lea.hbm %s16668_s3, 64  ;;  %s14619_s2 = scalar_lea.hbm %s16819_s9, 128 }
0x128b   : > { %p14616_p1 = scmp.ne.s32.totalorder %s16668_s3, %s14615_s11  ;;  %p14620_p3 = scmp.lt.s32.totalorder %s16668_s3, %s16819_s9 }
0x128c   : > { %p14621_p4 = scmp.lt.s32.totalorder %s14619_s2, %s14615_s11 }
0x128d   : > { %p14617_p12 = pnand %p14616_p1, %p16815_p2 }
0x128e   : > { %p14622_p7 = por %p14621_p4, %p14620_p3 }
0x128f   : > { %p14618_p9 = pneg %p14617_p12 }
0x1291   : > { %p14623_p5 = pnand %p14622_p7, %p14618_p9 }
0x1293   : > { %14626 = shalt.err (!%p14623_p5)
}
0x1294   : > { %13273 = dma.vmem_to_hbm [thread:$0]  (%p16815_p2), %s10862_s6, 64, %s16668_s3, %s10823_s8  }
0x1295 PF: > { %s16820_s22 = sld [smem:[#allocation51_spill]] }
0x1296   : > { %s16821_s16 = sld [smem:[#allocation49_spill]] }
0x1297   : > { %s16822_s12 = sld [smem:[#allocation54_spill]] }
0x129b   : > { %p13320_p6 = scmp.ge.s32.totalorder %s16820_s22, 2 }
0x129c   : > { %s10942_s18 = sand.u32 1, %s16821_s16  }
0x129d   : > { %p16823_p10 = scmp.ne.s32.totalorder %s16822_s12, 0  ;;  %s10943_s7 = scalar_lea.sflag [#allocation6], %s10942_s18 }
0x129f   : > { %p13296_p8 = pnand %p13320_p6, %p16823_p10 }
0x12a1   : > { %p13297_p13 = pneg %p13296_p8 }
0x12a3   : > { %14652 = dma.done.wait (%p13297_p13), %s10943_s7, 64  }
0x12a4   : > { %14654 = vsyncadd (%p13297_p13), %s10943_s7, 4294967232  ;;  %s16824_s23 = sadd.s32 4294967294, %s16820_s22  }
0x12a5   : > { %s10951_s13 = sand.u32 1, %s16824_s23  }
0x12a6   : > { %s10952_s14 = scalar_lea.sflag [#allocation12], %s10951_s13 }
0x12a7   : > { %14656 = dma.done.wait (%p13297_p13), %s10952_s14, 256  }
0x12a8   : > { %14658 = vsyncadd (%p13297_p13), %s10952_s14, 4294967040  ;;  %s10970_s28 = scalar_lea.sflag [#allocation15], %s10951_s13 }
0x12a9   : > { %14660 = dma.done.wait (%p13297_p13), %s10970_s28, 512  }
0x12aa   : > { %14662 = vsyncadd (%p13297_p13), %s10970_s28, 4294966784  ;;  %s10988_s5 = scalar_lea.sflag [#allocation18], %s10942_s18 }
0x12ab   : > { %14664 = dma.done.wait (%p13297_p13), %s10988_s5, 384  }
0x12ac   : > { %14666 = vsyncadd (%p13297_p13), %s10988_s5, 4294966912  ;;  %s16825_s15 = sld [smem:[#allocation52_spill]]  ;;  %s16828_s7 = smov %s14673_s10 }
0x12ad   : > { %s16826_s6 = sld [smem:[#allocation50_spill]] }
0x12ae   : > { %s16827_s11 = sld [smem:[#allocation53_spill]] }
0x12b2   : > { %p89_p2 = scmp.ge.s32.totalorder %s16825_s15, 4  }
0x12b3   : > { %s16829_s10 = smov %s16826_s6 }
0x12b4   :  { %91 = sbr.rel (!%p89_p2) target bundleno = 76 (0x4c), region = 337 }
0x12b9   :  { %10993 = vsyncpa [#allocation5], 1 }
0x12ba   :  { %10995 = vsyncpa [#allocation5 + $0x1], 1 }
0x12bb   :  { %10996 = vsyncpa [#allocation8], 1 }
0x12bc   :  { %10997 = vsyncpa [#allocation6], 1 }
0x12bd   :  { %10999 = vsyncpa [#allocation6 + $0x1], 1 }
0x12be   :  { %11000 = vsyncpa [#allocation12], 1 }
0x12bf   :  { %11002 = vsyncpa [#allocation12 + $0x1], 1 }
0x12c0   :  { %11003 = vsyncpa [#allocation15], 1 }
0x12c1   :  { %11005 = vsyncpa [#allocation15 + $0x1], 1 }
0x12c2   :  { %11006 = vsyncpa [#allocation18], 1 }
0x12c3   :  { %11008 = vsyncpa [#allocation18 + $0x1], 1 }

</bundles_post_ra>
